<compile_context>
chip_gen: v5e
topology: v5e:2x2
jax: 0.10.0
libtpu: 0.0.40
codegen_flags: <defaults>
</compile_context>

<pallas_src>
import functools

import jax
import jax.numpy as jnp
from jax.experimental import pallas as pl
from jax.experimental.pallas import tpu as pltpu


BN_EPS = 1e-5


def _round_up(n, m):
    return ((n + m - 1) // m) * m


def _make_mlp_kernel(num_hidden_layers, hidden_out_pads, out_pad, out_real):
    """Kernel over (x, vec_pack, w_0..w_H, out)."""

    def kernel(*refs):
        x_ref, vec_ref = refs[0], refs[1]
        w_refs = refs[2:-1]
        out_ref = refs[-1]

        vecs = vec_ref[...]                       # (8, F_max) f32, packed b/gamma/beta/b_out
        h = x_ref[...]                            # (B, in_pad) f32

        for l in range(num_hidden_layers):
            f_out = hidden_out_pads[l]
            w = w_refs[l][...]                    # (in_pad, f_out) bf16
            b = vecs[3 * l:3 * l + 1, :f_out]
            g = vecs[3 * l + 1:3 * l + 2, :f_out]
            be = vecs[3 * l + 2:3 * l + 3, :f_out]

            # Linear: bf16 operands on the MXU, f32 accumulate.
            h = jnp.dot(h.astype(jnp.bfloat16), w,
                        preferred_element_type=jnp.float32) + b

            # BatchNorm1d (training-mode batch stats, biased var), fused affine.
            mean = jnp.mean(h, axis=0, keepdims=True)
            ex2 = jnp.mean(h * h, axis=0, keepdims=True)
            var = ex2 - mean * mean
            scale = g * jax.lax.rsqrt(var + BN_EPS)
            shift = be - mean * scale
            h = h * scale + shift

            # Sigmoid via tanh (single EUP op, no f32 divide).
            h = 0.5 * jnp.tanh(0.5 * h) + 0.5

        # Final Linear.
        w = w_refs[num_hidden_layers][...]
        b_out = vecs[3 * num_hidden_layers:3 * num_hidden_layers + 1, :out_pad]
        z = jnp.dot(h.astype(jnp.bfloat16), w,
                    preferred_element_type=jnp.float32) + b_out      # (B, out_pad)

        # Sparsemax along dim=1 over the REAL classes only (sort-free form):
        #   k_i = #{j : z_j >= z_i},  S_i = sum_{j : z_j >= z_i} z_j
        #   support_i iff 1 + k_i z_i > S_i ; tau = (sum_support z - 1)/|support|
        zr = z[:, :out_real]                                          # (B, Nr)
        ge = (zr[:, None, :] >= zr[:, :, None]).astype(jnp.float32)   # (B, Nr, Nr)
        k = jnp.sum(ge, axis=-1)
        s = jnp.sum(ge * zr[:, None, :], axis=-1)
        support = (1.0 + k * zr > s).astype(jnp.float32)
        k_sup = jnp.sum(support, axis=-1, keepdims=True)
        s_sup = jnp.sum(support * zr, axis=-1, keepdims=True)
        tau = (s_sup - 1.0) / k_sup                                   # (B, 1)

        # Lane-dense full-width store; padded columns forced to zero.
        col = jax.lax.broadcasted_iota(jnp.int32, z.shape, 1)
        out_ref[...] = jnp.where(col < out_real,
                                 jnp.maximum(z - tau, 0.0), 0.0)

    return kernel


def init_mlp_params(key, input_size, num_hidden_layers, output_size):
    """Deterministic params. Returns (padded bf16 weights, packed f32 vectors,
    unpadded f32 ref params, meta with layer dims / padded dims)."""
    # Layer widths exactly as the PyTorch module computes them.
    dims = []
    in_features = input_size
    step = (output_size - input_size) / (num_hidden_layers + 1)
    for _ in range(num_hidden_layers):
        out_features = int(in_features + step)
        dims.append((in_features, out_features))
        in_features = out_features
    dims.append((in_features, output_size))

    pads = [(_round_up(a, 128), _round_up(b, 128)) for a, b in dims]
    f_max = max(p[1] for p in pads)
    n_rows = 3 * num_hidden_layers + 1
    vec_pack = jnp.zeros((_round_up(n_rows, 8), f_max), jnp.float32)

    weights_pad = []
    ref_params = []
    for l, (fin, fout) in enumerate(dims):
        key, kw, kb = jax.random.split(key, 3)
        bound = 1.0 / (fin ** 0.5)
        w = jax.random.uniform(kw, (fin, fout), jnp.float32, -bound, bound)  # (in,out)=W.T
        b = jax.random.uniform(kb, (fout,), jnp.float32, -bound, bound)

        fin_p, fout_p = pads[l]
        w_p = jnp.zeros((fin_p, fout_p), jnp.float32).at[:fin, :fout].set(w)
        weights_pad.append(w_p.astype(jnp.bfloat16))

        if l < num_hidden_layers:
            gamma = jnp.ones((fout,), jnp.float32)
            beta = jnp.zeros((fout,), jnp.float32)
            vec_pack = vec_pack.at[3 * l, :fout].set(b)
            vec_pack = vec_pack.at[3 * l + 1, :fout].set(gamma)
            vec_pack = vec_pack.at[3 * l + 2, :fout].set(beta)
            ref_params.append((w, b, gamma, beta))
        else:
            vec_pack = vec_pack.at[3 * num_hidden_layers, :fout].set(b)
            ref_params.append((w, b))

    meta = {"dims": tuple(dims), "pads": tuple(pads)}
    return tuple(weights_pad), vec_pack, ref_params, meta


@functools.partial(
    jax.jit,
    static_argnames=("num_hidden_layers", "hidden_pads", "in_pad", "out_pad",
                     "output_size"))
def mlp_forward(x, vec_pack, weights, *, num_hidden_layers, hidden_pads,
                in_pad, out_pad, output_size):
    batch, in_real = x.shape
    # Zero-pad the input features to the lane-dense width.
    xp = jnp.zeros((batch, in_pad), jnp.float32).at[:, :in_real].set(x)

    kernel = _make_mlp_kernel(num_hidden_layers, hidden_pads, out_pad,
                              output_size)
    out_padded = pl.pallas_call(
        kernel,
        out_shape=jax.ShapeDtypeStruct((batch, out_pad), jnp.float32),
        in_specs=[pl.BlockSpec(memory_space=pltpu.MemorySpace.VMEM)]
        * (2 + len(weights)),
        out_specs=pl.BlockSpec(memory_space=pltpu.MemorySpace.VMEM),
    )(xp, vec_pack, *weights)
    return out_padded[:, :output_size]


def mlp_reference(x, ref_params, num_hidden_layers):
    """Pure-JAX reference: same math (bf16 matmul operands, f32 elsewhere)."""
    h = x.astype(jnp.float32)
    for l in range(num_hidden_layers):
        w, b, g, be = ref_params[l]
        h = jnp.dot(h.astype(jnp.bfloat16), w.astype(jnp.bfloat16),
                    preferred_element_type=jnp.float32) + b
        mean = jnp.mean(h, axis=0, keepdims=True)
        var = jnp.mean((h - mean) ** 2, axis=0, keepdims=True)
        h = g * (h - mean) / jnp.sqrt(var + BN_EPS) + be
        h = jax.nn.sigmoid(h)
    w, b = ref_params[num_hidden_layers]
    z = jnp.dot(h.astype(jnp.bfloat16), w.astype(jnp.bfloat16),
                preferred_element_type=jnp.float32) + b
    # Sparsemax via sort (textbook formulation).
    n = z.shape[1]
    z_sorted = jnp.sort(z, axis=1)[:, ::-1]
    kk = jnp.arange(1, n + 1, dtype=jnp.float32)[None, :]
    cumsum = jnp.cumsum(z_sorted, axis=1)
    cond = 1.0 + kk * z_sorted > cumsum
    k_sup = jnp.sum(cond, axis=1, keepdims=True)
    s_sup = jnp.take_along_axis(cumsum, k_sup.astype(jnp.int32) - 1, axis=1)
    tau = (s_sup - 1.0) / k_sup
    return jnp.maximum(z - tau, 0.0)


if __name__ == "__main__":
    INPUT_SIZE = 32
    NUM_HIDDEN_LAYERS = 2
    OUTPUT_SIZE = 8
    BATCH = 128  # >=128 rows/call amortizes launch & DMA overhead (v5e note)

    key = jax.random.PRNGKey(0)
    key, kx = jax.random.split(key)
    x = jax.random.normal(kx, (BATCH, INPUT_SIZE), jnp.float32)

    weights, vec_pack, ref_params, meta = init_mlp_params(
        key, INPUT_SIZE, NUM_HIDDEN_LAYERS, OUTPUT_SIZE)
    pads = meta["pads"]
    hidden_pads = tuple(p[1] for p in pads[:-1])
    in_pad = pads[0][0]
    out_pad = pads[-1][1]

    out = mlp_forward(x, vec_pack, weights,
                      num_hidden_layers=NUM_HIDDEN_LAYERS,
                      hidden_pads=hidden_pads,
                      in_pad=in_pad, out_pad=out_pad,
                      output_size=OUTPUT_SIZE)
    out = jax.block_until_ready(out)

    ref = mlp_reference(x, ref_params, NUM_HIDDEN_LAYERS)
    assert out.shape == (BATCH, OUTPUT_SIZE)
    # Sparsemax rows sum to 1.
    assert jnp.allclose(jnp.sum(out, axis=1), 1.0, atol=1e-3)
    assert jnp.allclose(out, ref, atol=1e-3), float(jnp.max(jnp.abs(out - ref)))

    print("KERNEL_OK")
</pallas_src>

<mosaic_0001>
module attributes {stable_mosaic.version = 11 : i64} {
  func.func @kernel(%arg0: memref<128x128xf32, #tpu.memory_space<vmem>>, %arg1: memref<8x128xf32, #tpu.memory_space<vmem>>, %arg2: memref<128x128xbf16, #tpu.memory_space<vmem>>, %arg3: memref<128x128xbf16, #tpu.memory_space<vmem>>, %arg4: memref<128x128xbf16, #tpu.memory_space<vmem>>, %arg5: memref<128x128xf32, #tpu.memory_space<vmem>>) attributes {dimension_semantics = [], scalar_prefetch = 0 : i64, scratch_operands = 0 : i64, tpu.core_type = #tpu.core_type<tc>} {
    %c0 = arith.constant 0 : index
    %c0_0 = arith.constant 0 : index
    %0 = vector.load %arg1[%c0, %c0_0] : memref<8x128xf32, #tpu.memory_space<vmem>>, vector<8x128xf32>
    %c0_1 = arith.constant 0 : index
    %c0_2 = arith.constant 0 : index
    %1 = vector.load %arg0[%c0_1, %c0_2] : memref<128x128xf32, #tpu.memory_space<vmem>>, vector<128x128xf32>
    %c0_3 = arith.constant 0 : index
    %c0_4 = arith.constant 0 : index
    %2 = vector.load %arg2[%c0_3, %c0_4] : memref<128x128xbf16, #tpu.memory_space<vmem>>, vector<128x128xbf16>
    %3 = vector.extract_strided_slice %0 {offsets = [0, 0], sizes = [1, 128], strides = [1, 1]} : vector<8x128xf32> to vector<1x128xf32>
    %4 = vector.extract_strided_slice %0 {offsets = [1, 0], sizes = [1, 128], strides = [1, 1]} : vector<8x128xf32> to vector<1x128xf32>
    %5 = vector.extract_strided_slice %0 {offsets = [2, 0], sizes = [1, 128], strides = [1, 1]} : vector<8x128xf32> to vector<1x128xf32>
    %6 = arith.truncf %1 : vector<128x128xf32> to vector<128x128xbf16>
    %cst = arith.constant dense<0.000000e+00> : vector<128x128xf32>
    %7 = tpu.matmul %6, %2, %cst {dimension_numbers = #tpu.dot_dimension_numbers<[1], [0], [0], [1], [0, 0, 1, 1], [], []>} : vector<128x128xbf16>, vector<128x128xbf16>, vector<128x128xf32> -> vector<128x128xf32>
    %8 = vector.broadcast %3 : vector<1x128xf32> to vector<128x128xf32>
    %9 = arith.addf %7, %8 : vector<128x128xf32>
    %cst_5 = arith.constant dense<0.000000e+00> : vector<128xf32>
    %10 = vector.multi_reduction <add>, %9, %cst_5 [0] : vector<128x128xf32> to vector<128xf32>
    %11 = vector.shape_cast %10 : vector<128xf32> to vector<1x128xf32>
    %cst_6 = arith.constant 1.280000e+02 : f32
    %12 = vector.broadcast %cst_6 : f32 to vector<1x128xf32>
    %13 = arith.divf %11, %12 : vector<1x128xf32>
    %14 = arith.mulf %9, %9 : vector<128x128xf32>
    %cst_7 = arith.constant dense<0.000000e+00> : vector<128xf32>
    %15 = vector.multi_reduction <add>, %14, %cst_7 [0] : vector<128x128xf32> to vector<128xf32>
    %16 = vector.shape_cast %15 : vector<128xf32> to vector<1x128xf32>
    %cst_8 = arith.constant 1.280000e+02 : f32
    %17 = vector.broadcast %cst_8 : f32 to vector<1x128xf32>
    %18 = arith.divf %16, %17 : vector<1x128xf32>
    %19 = arith.mulf %13, %13 : vector<1x128xf32>
    %20 = arith.subf %18, %19 : vector<1x128xf32>
    %cst_9 = arith.constant 9.99999974E-6 : f32
    %21 = vector.broadcast %cst_9 : f32 to vector<1x128xf32>
    %22 = arith.addf %20, %21 : vector<1x128xf32>
    %23 = math.rsqrt %22 : vector<1x128xf32>
    %24 = arith.mulf %4, %23 : vector<1x128xf32>
    %25 = arith.mulf %13, %24 : vector<1x128xf32>
    %26 = arith.subf %5, %25 : vector<1x128xf32>
    %27 = vector.broadcast %24 : vector<1x128xf32> to vector<128x128xf32>
    %28 = arith.mulf %9, %27 : vector<128x128xf32>
    %29 = vector.broadcast %26 : vector<1x128xf32> to vector<128x128xf32>
    %30 = arith.addf %28, %29 : vector<128x128xf32>
    %cst_10 = arith.constant 5.000000e-01 : f32
    %31 = vector.broadcast %cst_10 : f32 to vector<128x128xf32>
    %32 = arith.mulf %31, %30 : vector<128x128xf32>
    %33 = math.tanh %32 : vector<128x128xf32>
    %cst_11 = arith.constant 5.000000e-01 : f32
    %34 = vector.broadcast %cst_11 : f32 to vector<128x128xf32>
    %35 = arith.mulf %34, %33 : vector<128x128xf32>
    %cst_12 = arith.constant 5.000000e-01 : f32
    %36 = vector.broadcast %cst_12 : f32 to vector<128x128xf32>
    %37 = arith.addf %35, %36 : vector<128x128xf32>
    %c0_13 = arith.constant 0 : index
    %c0_14 = arith.constant 0 : index
    %38 = vector.load %arg3[%c0_13, %c0_14] : memref<128x128xbf16, #tpu.memory_space<vmem>>, vector<128x128xbf16>
    %39 = vector.extract_strided_slice %0 {offsets = [3, 0], sizes = [1, 128], strides = [1, 1]} : vector<8x128xf32> to vector<1x128xf32>
    %40 = vector.extract_strided_slice %0 {offsets = [4, 0], sizes = [1, 128], strides = [1, 1]} : vector<8x128xf32> to vector<1x128xf32>
    %41 = vector.extract_strided_slice %0 {offsets = [5, 0], sizes = [1, 128], strides = [1, 1]} : vector<8x128xf32> to vector<1x128xf32>
    %42 = arith.truncf %37 : vector<128x128xf32> to vector<128x128xbf16>
    %cst_15 = arith.constant dense<0.000000e+00> : vector<128x128xf32>
    %43 = tpu.matmul %42, %38, %cst_15 {dimension_numbers = #tpu.dot_dimension_numbers<[1], [0], [0], [1], [0, 0, 1, 1], [], []>} : vector<128x128xbf16>, vector<128x128xbf16>, vector<128x128xf32> -> vector<128x128xf32>
    %44 = vector.broadcast %39 : vector<1x128xf32> to vector<128x128xf32>
    %45 = arith.addf %43, %44 : vector<128x128xf32>
    %cst_16 = arith.constant dense<0.000000e+00> : vector<128xf32>
    %46 = vector.multi_reduction <add>, %45, %cst_16 [0] : vector<128x128xf32> to vector<128xf32>
    %47 = vector.shape_cast %46 : vector<128xf32> to vector<1x128xf32>
    %cst_17 = arith.constant 1.280000e+02 : f32
    %48 = vector.broadcast %cst_17 : f32 to vector<1x128xf32>
    %49 = arith.divf %47, %48 : vector<1x128xf32>
    %50 = arith.mulf %45, %45 : vector<128x128xf32>
    %cst_18 = arith.constant dense<0.000000e+00> : vector<128xf32>
    %51 = vector.multi_reduction <add>, %50, %cst_18 [0] : vector<128x128xf32> to vector<128xf32>
    %52 = vector.shape_cast %51 : vector<128xf32> to vector<1x128xf32>
    %cst_19 = arith.constant 1.280000e+02 : f32
    %53 = vector.broadcast %cst_19 : f32 to vector<1x128xf32>
    %54 = arith.divf %52, %53 : vector<1x128xf32>
    %55 = arith.mulf %49, %49 : vector<1x128xf32>
    %56 = arith.subf %54, %55 : vector<1x128xf32>
    %cst_20 = arith.constant 9.99999974E-6 : f32
    %57 = vector.broadcast %cst_20 : f32 to vector<1x128xf32>
    %58 = arith.addf %56, %57 : vector<1x128xf32>
    %59 = math.rsqrt %58 : vector<1x128xf32>
    %60 = arith.mulf %40, %59 : vector<1x128xf32>
    %61 = arith.mulf %49, %60 : vector<1x128xf32>
    %62 = arith.subf %41, %61 : vector<1x128xf32>
    %63 = vector.broadcast %60 : vector<1x128xf32> to vector<128x128xf32>
    %64 = arith.mulf %45, %63 : vector<128x128xf32>
    %65 = vector.broadcast %62 : vector<1x128xf32> to vector<128x128xf32>
    %66 = arith.addf %64, %65 : vector<128x128xf32>
    %cst_21 = arith.constant 5.000000e-01 : f32
    %67 = vector.broadcast %cst_21 : f32 to vector<128x128xf32>
    %68 = arith.mulf %67, %66 : vector<128x128xf32>
    %69 = math.tanh %68 : vector<128x128xf32>
    %cst_22 = arith.constant 5.000000e-01 : f32
    %70 = vector.broadcast %cst_22 : f32 to vector<128x128xf32>
    %71 = arith.mulf %70, %69 : vector<128x128xf32>
    %cst_23 = arith.constant 5.000000e-01 : f32
    %72 = vector.broadcast %cst_23 : f32 to vector<128x128xf32>
    %73 = arith.addf %71, %72 : vector<128x128xf32>
    %c0_24 = arith.constant 0 : index
    %c0_25 = arith.constant 0 : index
    %74 = vector.load %arg4[%c0_24, %c0_25] : memref<128x128xbf16, #tpu.memory_space<vmem>>, vector<128x128xbf16>
    %75 = vector.extract_strided_slice %0 {offsets = [6, 0], sizes = [1, 128], strides = [1, 1]} : vector<8x128xf32> to vector<1x128xf32>
    %76 = arith.truncf %73 : vector<128x128xf32> to vector<128x128xbf16>
    %cst_26 = arith.constant dense<0.000000e+00> : vector<128x128xf32>
    %77 = tpu.matmul %76, %74, %cst_26 {dimension_numbers = #tpu.dot_dimension_numbers<[1], [0], [0], [1], [0, 0, 1, 1], [], []>} : vector<128x128xbf16>, vector<128x128xbf16>, vector<128x128xf32> -> vector<128x128xf32>
    %78 = vector.broadcast %75 : vector<1x128xf32> to vector<128x128xf32>
    %79 = arith.addf %77, %78 : vector<128x128xf32>
    %80 = vector.extract_strided_slice %79 {offsets = [0, 0], sizes = [128, 8], strides = [1, 1]} : vector<128x128xf32> to vector<128x8xf32>
    %81 = vector.shape_cast %80 : vector<128x8xf32> to vector<128x1x8xf32>
    %82 = vector.shape_cast %80 : vector<128x8xf32> to vector<128x8x1xf32>
    %83 = vector.broadcast %81 : vector<128x1x8xf32> to vector<128x8x8xf32>
    %84 = vector.broadcast %82 : vector<128x8x1xf32> to vector<128x8x8xf32>
    %85 = arith.cmpf oge, %83, %84 : vector<128x8x8xf32>
    %86 = arith.extui %85 : vector<128x8x8xi1> to vector<128x8x8xi32>
    %87 = arith.sitofp %86 : vector<128x8x8xi32> to vector<128x8x8xf32>
    %cst_27 = arith.constant dense<0.000000e+00> : vector<128x8xf32>
    %88 = vector.multi_reduction <add>, %87, %cst_27 [2] : vector<128x8x8xf32> to vector<128x8xf32>
    %89 = vector.shape_cast %80 : vector<128x8xf32> to vector<128x1x8xf32>
    %90 = vector.broadcast %89 : vector<128x1x8xf32> to vector<128x8x8xf32>
    %91 = arith.mulf %87, %90 : vector<128x8x8xf32>
    %cst_28 = arith.constant dense<0.000000e+00> : vector<128x8xf32>
    %92 = vector.multi_reduction <add>, %91, %cst_28 [2] : vector<128x8x8xf32> to vector<128x8xf32>
    %93 = arith.mulf %88, %80 : vector<128x8xf32>
    %cst_29 = arith.constant 1.000000e+00 : f32
    %94 = vector.broadcast %cst_29 : f32 to vector<128x8xf32>
    %95 = arith.addf %94, %93 : vector<128x8xf32>
    %96 = arith.cmpf ogt, %95, %92 : vector<128x8xf32>
    %97 = arith.extui %96 : vector<128x8xi1> to vector<128x8xi32>
    %98 = arith.sitofp %97 : vector<128x8xi32> to vector<128x8xf32>
    %cst_30 = arith.constant dense<0.000000e+00> : vector<128xf32>
    %99 = vector.multi_reduction <add>, %98, %cst_30 [1] : vector<128x8xf32> to vector<128xf32>
    %100 = vector.shape_cast %99 : vector<128xf32> to vector<128x1xf32>
    %101 = arith.mulf %98, %80 : vector<128x8xf32>
    %cst_31 = arith.constant dense<0.000000e+00> : vector<128xf32>
    %102 = vector.multi_reduction <add>, %101, %cst_31 [1] : vector<128x8xf32> to vector<128xf32>
    %103 = vector.shape_cast %102 : vector<128xf32> to vector<128x1xf32>
    %cst_32 = arith.constant 1.000000e+00 : f32
    %104 = vector.broadcast %cst_32 : f32 to vector<128x1xf32>
    %105 = arith.subf %103, %104 : vector<128x1xf32>
    %106 = arith.divf %105, %100 : vector<128x1xf32>
    %107 = tpu.iota {dimensions = array<i32: 1>} : vector<128x128xi32>
    %c8_i32 = arith.constant 8 : i32
    %108 = vector.broadcast %c8_i32 : i32 to vector<128x128xi32>
    %109 = arith.cmpi slt, %107, %108 : vector<128x128xi32>
    %110 = vector.broadcast %106 : vector<128x1xf32> to vector<128x128xf32>
    %111 = arith.subf %79, %110 : vector<128x128xf32>
    %cst_33 = arith.constant 0.000000e+00 : f32
    %112 = vector.broadcast %cst_33 : f32 to vector<128x128xf32>
    %113 = arith.maximumf %111, %112 : vector<128x128xf32>
    %cst_34 = arith.constant 0.000000e+00 : f32
    %114 = vector.broadcast %cst_34 : f32 to vector<128x128xf32>
    %115 = arith.select %109, %113, %114 : vector<128x128xi1>, vector<128x128xf32>
    %c0_35 = arith.constant 0 : index
    %c0_36 = arith.constant 0 : index
    %116 = vector.load %arg5[%c0_35, %c0_36] : memref<128x128xf32, #tpu.memory_space<vmem>>, vector<128x128xf32>
    tpu.vector_store %arg5[%c0_35, %c0_36], %115 {strides = array<i32>} : memref<128x128xf32, #tpu.memory_space<vmem>>, vector<128x128xf32>,
    return
  }
}

</mosaic_0001>

<bundles_post_ra>
// kernel: mlp_forward.1
= control target key start
LH: loop header
LB: loop body
LE: loop exit
PB: predicated region body
PF: predicated region fallthrough
CT: control target
= control target key end

     0   :  { %s13404_s2 = inlined_call_operand.vmem [shape: bf16[128,128], index: 2, kind: input, shape index: {}]   ;;  %s13405_s0 = inlined_call_operand.vmem [shape: f32[128,128], index: 0, kind: input, shape index: {}]   ;;  %s13406_s1 = inlined_call_operand.vmem [shape: f32[8,128], index: 1, kind: input, shape index: {}]   ;;  %s13407_s3 = inlined_call_operand.vmem [shape: bf16[128,128], index: 3, kind: input, shape index: {}]   ;;  %s13408_s4 = inlined_call_operand.vmem [shape: bf16[128,128], index: 4, kind: input, shape index: {}]   ;;  %s13409_s5 = inlined_call_operand.vmem [shape: f32[128,128], index: 5, kind: output, shape index: {}]  }
   0x1   :  { %v7442_v0 = vld [vmem:[%s13404_s2 + $0x38] sm:$0xff]  ;;  %v7441_v1 = vld [vmem:[%s13404_s2 + $0x30] sm:$0xff]  ;;  %v7440_v2 = vld [vmem:[%s13404_s2 + $0x28] sm:$0xff] }
   0x2   :  { %110 = vmatpush.bf16.msra.mxu0 %v7442_v0  ;;  %7459 = vmatpush.bf16.msra.mxu3 %v7442_v0  ;;  %v7439_v3 = vld [vmem:[%s13404_s2 + $0x20] sm:$0xff]  ;;  %v7438_v4 = vld [vmem:[%s13404_s2 + $0x18] sm:$0xff]  ;;  %v7437_v5 = vld [vmem:[%s13404_s2 + $0x10] sm:$0xff] }
   0x3   :  { %v7436_v6 = vld [vmem:[%s13404_s2 + $0x8] sm:$0xff]  ;;  %v7435_v7 = vld [vmem:[%s13404_s2] sm:$0xff]  ;;  %v23_v11 = vld [vmem:[%s13405_s0 + $0x10] sm:$0xff] }
   0x4   :  { %v21_v8 = vld [vmem:[%s13405_s0] sm:$0xff]  ;;  %v22_v9 = vld [vmem:[%s13405_s0 + $0x8] sm:$0xff]  ;;  %v24_v12 = vld [vmem:[%s13405_s0 + $0x18] sm:$0xff] }
   0x5   :  { %v53_v10 = vpack.c.bf16 %v22_v9, %v21_v8  ;;  %v54_v13 = vpack.c.bf16 %v24_v12, %v23_v11  ;;  %v33_v14 = vld [vmem:[%s13405_s0 + $0x60] sm:$0xff]  ;;  %v34_v15 = vld [vmem:[%s13405_s0 + $0x68] sm:$0xff]  ;;  %v35_v20 = vld [vmem:[%s13405_s0 + $0x70] sm:$0xff] }
   0x6   :  { %111 = vmatpush.bf16.msra.mxu0 %v7441_v1  ;;  %7460 = vmatpush.bf16.msra.mxu3 %v7441_v1  ;;  %v59_v16 = vpack.c.bf16 %v34_v15, %v33_v14  ;;  %v25_v17 = vld [vmem:[%s13405_s0 + $0x20] sm:$0xff]  ;;  %v26_v18 = vld [vmem:[%s13405_s0 + $0x28] sm:$0xff]  ;;  %v36_v21 = vld [vmem:[%s13405_s0 + $0x78] sm:$0xff] }
   0x7   :  { %v55_v19 = vpack.c.bf16 %v26_v18, %v25_v17  ;;  %v60_v22 = vpack.c.bf16 %v36_v21, %v35_v20  ;;  %v27_v23 = vld [vmem:[%s13405_s0 + $0x30] sm:$0xff]  ;;  %v28_v24 = vld [vmem:[%s13405_s0 + $0x38] sm:$0xff]  ;;  %v29_v26 = vld [vmem:[%s13405_s0 + $0x40] sm:$0xff]  ;;  %v7915_v20 = vmov 128.0  }
   0x8   :  { %v56_v25 = vpack.c.bf16 %v28_v24, %v27_v23  ;;  %v30_v27 = vld [vmem:[%s13405_s0 + $0x48] sm:$0xff]  ;;  %v31_v29 = vld [vmem:[%s13405_s0 + $0x50] sm:$0xff]  ;;  %v32_v30 = vld [vmem:[%s13405_s0 + $0x58] sm:$0xff]  ;;  %7812 = vrcp.f32 %v7915_v20 }
   0x9   :  { %v57_v28 = vpack.c.bf16 %v30_v27, %v29_v26  ;;  %v58_v31 = vpack.c.bf16 %v32_v30, %v31_v29  ;;  %v8023_v40 = vld [vmem:[%s13406_s1] sm:$0xff] }
   0xa   :  { %112 = vmatpush.bf16.msra.mxu0 %v7440_v2  ;;  %7461 = vmatpush.bf16.msra.mxu3 %v7440_v2  ;;  %v8026_v42 = vperm.slane %v8023_v40, 0 }
   0xe   :  { %113 = vmatpush.bf16.msra.mxu0 %v7439_v3  ;;  %7462 = vmatpush.bf16.msra.mxu3 %v7439_v3  ;;  %v7813_v29 = vpop.eup %7812 }
   0xf   :  { %vm185_vm0 = vweird.f32 %v7813_v29 }
  0x12   :  { %114 = vmatpush.bf16.msra.mxu0 %v7438_v4  ;;  %7463 = vmatpush.bf16.msra.mxu3 %v7438_v4 }
  0x16   :  { %115 = vmatpush.bf16.msra.mxu0 %v7437_v5  ;;  %7464 = vmatpush.bf16.msra.mxu3 %v7437_v5 }
  0x1a   :  { %116 = vmatpush.bf16.msra.mxu0 %v7436_v6  ;;  %7465 = vmatpush.bf16.msra.mxu3 %v7436_v6 }
  0x1e   :  { %117 = vmatpush.bf16.msra.mxu0 %v7435_v7  ;;  %7466 = vmatpush.bf16.msra.mxu3 %v7435_v7 }
  0x21   :  { %118 = vmatmul.bf16.vlgmr.msra.gmra.mxu0 %v53_v10  ;;  %148 = vmatmul.bf16.vlgmr.msra.gmra.mxu3 %v59_v16 }
  0x31   :  { %123 = vmatmul.bf16.gmra.mxu0 %v54_v13  ;;  %153 = vmatmul.bf16.gmra.mxu3 %v60_v22 }
  0x41   :  { %128 = vmatmul.bf16.gmra.mxu0 %v55_v19 }
  0x51   :  { %133 = vmatmul.bf16.gmra.mxu0 %v56_v25 }
  0x61   :  { %138 = vmatmul.bf16.gmra.mxu0 %v57_v28 }
  0x71   :  { %143 = vmatmul.bf16.gmra.mxu0 %v58_v31 }
  0x9e   :  { %v119_v32 = vpop.f32.mrf.mxu0 }
  0x9f   :  { %v8032_v45 = vadd.f32 %v119_v32, %v8026_v42 }
  0xa1   :  { %v188_v49 = vmul.f32 %v8032_v45, %v8032_v45 }
  0xa4   :  { %v149_v41 = vpop.f32.mrf.mxu3 }
  0xa5   :  { %v8094_v25 = vadd.f32 %v149_v41, %v8026_v42 }
  0xa6   :  { %v121_v33 = vpop.f32.mrf.mxu0 }
  0xa7   :  { %v8029_v44 = vadd.f32 %v121_v33, %v8026_v42 }
  0xa9   :  { %v189_v47 = vmul.f32 %v8029_v44, %v8029_v44  ;;  %v159_v50 = vadd.f32 %v8029_v44, %v8032_v45 }
  0xab   :  { %v204_v55 = vadd.f32 %v189_v47, %v188_v49 }
  0xac   :  { %v151_v54 = vpop.f32.mrf.mxu3 }
  0xad   :  { %v8101_v30 = vadd.f32 %v151_v54, %v8026_v42 }
  0xae   :  { %v124_v34 = vpop.f32.mrf.mxu0 }
  0xaf   :  { %v8035_v46 = vadd.f32 %v124_v34, %v8026_v42  ;;  %v201_v41 = vmul.f32 %v8101_v30, %v8101_v30 }
  0xb1   :  { %v190_v51 = vmul.f32 %v8035_v46, %v8035_v46  ;;  %v160_v56 = vadd.f32 %v159_v50, %v8035_v46 }
  0xb3   :  { %v205_v59 = vadd.f32 %v204_v55, %v190_v51 }
  0xb4   :  { %v154_v12 = vpop.f32.mrf.mxu3 }
  0xb6   :  { %v126_v35 = vpop.f32.mrf.mxu0 }
  0xb7   :  { %v8040_v48 = vadd.f32 %v126_v35, %v8026_v42  ;;  %v200_v35 = vmul.f32 %v8094_v25, %v8094_v25 }
  0xb9   :  { %v191_v57 = vmul.f32 %v8040_v48, %v8040_v48  ;;  %v161_v60 = vadd.f32 %v160_v56, %v8040_v48 }
  0xbb   :  { %v206_v63 = vadd.f32 %v205_v59, %v191_v57 }
  0xbc   :  { %v156_v34 = vpop.f32.mrf.mxu3 }
  0xbd   :  { %v8115_v47 = vadd.f32 %v156_v34, %v8026_v42 }
  0xbe   :  { %v129_v36 = vpop.f32.mrf.mxu0 }
  0xbf   :  { %v8049_v52 = vadd.f32 %v129_v36, %v8026_v42  ;;  %v8109_v36 = vadd.f32 %v154_v12, %v8026_v42  ;;  %v203_v56 = vmul.f32 %v8115_v47, %v8115_v47  ;;  %v7448_v12 = vld [vmem:[%s13407_s3 + $0x28] sm:$0xff] }
  0xc1   :  { %v192_v61 = vmul.f32 %v8049_v52, %v8049_v52  ;;  %v162_v0 = vadd.f32 %v161_v60, %v8049_v52  ;;  %v202_v50 = vmul.f32 %v8109_v36, %v8109_v36 }
  0xc3   :  { %v207_v3 = vadd.f32 %v206_v63, %v192_v61 }
  0xc6   :  { %v131_v37 = vpop.f32.mrf.mxu0 }
  0xc7   :  { %v8055_v58 = vadd.f32 %v131_v37, %v8026_v42 }
  0xc9   :  { %v193_v1 = vmul.f32 %v8055_v58, %v8055_v58  ;;  %v163_v4 = vadd.f32 %v162_v0, %v8055_v58 }
  0xcb   :  { %v208_v8 = vadd.f32 %v207_v3, %v193_v1 }
  0xce   :  { %v134_v38 = vpop.f32.mrf.mxu0 }
  0xcf   :  { %v8061_v62 = vadd.f32 %v134_v38, %v8026_v42 }
  0xd1   :  { %v194_v5 = vmul.f32 %v8061_v62, %v8061_v62  ;;  %v164_v9 = vadd.f32 %v163_v4, %v8061_v62  ;;  %v7449_v4 = vld [vmem:[%s13407_s3 + $0x30] sm:$0xff] }
  0xd3   :  { %v209_v13 = vadd.f32 %v208_v8, %v194_v5 }
  0xd6   :  { %v136_v39 = vpop.f32.mrf.mxu0 }
  0xd7   :  { %v8067_v2 = vadd.f32 %v136_v39, %v8026_v42  ;;  %v181_v39 = vmul.f32 128.0, %v7813_v29 }
  0xd9   :  { %v195_v10 = vmul.f32 %v8067_v2, %v8067_v2  ;;  %v165_v14 = vadd.f32 %v164_v9, %v8067_v2  ;;  %v182_v54 = vsub.f32 1.0, %v181_v39 }
  0xdb   :  { %v210_v17 = vadd.f32 %v209_v13, %v195_v10  ;;  %v183_v61 = vmul.f32 %v7813_v29, %v182_v54 }
  0xdd   :  { %v184_v5 = vadd.f32 %v7813_v29, %v183_v61 }
  0xde   :  { %v139_v43 = vpop.f32.mrf.mxu0 }
  0xdf   :  { %v8073_v6 = vadd.f32 %v139_v43, %v8026_v42  ;;  %v8133_v13 = vsel %vm185_vm0, %v7813_v29, %v184_v5 }
  0xe1   :  { %v196_v15 = vmul.f32 %v8073_v6, %v8073_v6  ;;  %v166_v18 = vadd.f32 %v165_v14, %v8073_v6 }
  0xe3   :  { %v211_v21 = vadd.f32 %v210_v17, %v196_v15 }
  0xe6   :  { %v141_v53 = vpop.f32.mrf.mxu0 }
  0xe7   :  { %v8079_v11 = vadd.f32 %v141_v53, %v8026_v42 }
  0xe9   :  { %v197_v19 = vmul.f32 %v8079_v11, %v8079_v11  ;;  %v167_v22 = vadd.f32 %v166_v18, %v8079_v11 }
  0xeb   :  { %v212_v26 = vadd.f32 %v211_v21, %v197_v19  ;;  %v7447_v19 = vld [vmem:[%s13407_s3 + $0x20] sm:$0xff] }
  0xee   :  { %v144_v7 = vpop.f32.mrf.mxu0 }
  0xef   :  { %v8085_v16 = vadd.f32 %v144_v7, %v8026_v42 }
  0xf1   :  { %v198_v23 = vmul.f32 %v8085_v16, %v8085_v16  ;;  %v168_v27 = vadd.f32 %v167_v22, %v8085_v16  ;;  %v7446_v22 = vld [vmem:[%s13407_s3 + $0x18] sm:$0xff] }
  0xf3   :  { %v213_v31 = vadd.f32 %v212_v26, %v198_v23  ;;  %v7445_v26 = vld [vmem:[%s13407_s3 + $0x10] sm:$0xff] }
  0xf6   :  { %v146_v24 = vpop.f32.mrf.mxu0 }
  0xf7   :  { %v8098_v28 = vadd.f32 %v146_v24, %v8026_v42  ;;  %v7450_v42 = vld [vmem:[%s13407_s3 + $0x38] sm:$0xff] }
  0xf8   :  { %416 = vmatpush.bf16.msra.mxu1 %v7450_v42  ;;  %7467 = vmatpush.bf16.msrb.mxu3 %v7450_v42 }
  0xf9   :  { %v169_v32 = vadd.f32 %v168_v27, %v8098_v28  ;;  %v199_v33 = vmul.f32 %v8098_v28, %v8098_v28  ;;  %v7444_v27 = vld [vmem:[%s13407_s3 + $0x8] sm:$0xff] }
  0xfb   :  { %v170_v37 = vadd.f32 %v169_v32, %v8094_v25  ;;  %v214_v38 = vadd.f32 %v213_v31, %v199_v33  ;;  %v7443_v31 = vld [vmem:[%s13407_s3] sm:$0xff] }
  0xfc   :  { %417 = vmatpush.bf16.msra.mxu1 %v7449_v4  ;;  %7468 = vmatpush.bf16.msrb.mxu3 %v7449_v4 }
  0xfd   :  { %v215_v43 = vadd.f32 %v214_v38, %v200_v35  ;;  %v171_v49 = vadd.f32 %v170_v37, %v8101_v30 }
  0xff   :  { %v172_v51 = vadd.f32 %v171_v49, %v8109_v36  ;;  %v216_v53 = vadd.f32 %v215_v43, %v201_v41 }
 0x100   :  { %418 = vmatpush.bf16.msra.mxu1 %v7448_v12  ;;  %7469 = vmatpush.bf16.msrb.mxu3 %v7448_v12 }
 0x101   :  { %v173_v55 = vadd.f32 %v172_v51, %v8115_v47  ;;  %v217_v57 = vadd.f32 %v216_v53, %v202_v50 }
 0x103   :  { %v174_v59 = vrot.slane %v173_v55, 4  ;;  %v218_v60 = vadd.f32 %v217_v57, %v203_v56 }
 0x104   :  { %419 = vmatpush.bf16.msra.mxu1 %v7447_v19  ;;  %7470 = vmatpush.bf16.msrb.mxu3 %v7447_v19 }
 0x105   :  { %v175_v63 = vadd.f32 %v174_v59, %v173_v55  ;;  %v219_v0 = vrot.slane %v218_v60, 4 }
 0x107   :  { %v176_v1 = vrot.slane %v175_v63, 2  ;;  %v220_v3 = vadd.f32 %v219_v0, %v218_v60 }
 0x108   :  { %420 = vmatpush.bf16.msra.mxu1 %v7446_v22  ;;  %7471 = vmatpush.bf16.msrb.mxu3 %v7446_v22 }
 0x109   :  { %v177_v7 = vadd.f32 %v176_v1, %v175_v63  ;;  %v221_v8 = vrot.slane %v220_v3, 2 }
 0x10b   :  { %v178_v9 = vrot.slane %v177_v7, 1  ;;  %v222_v10 = vadd.f32 %v221_v8, %v220_v3 }
 0x10c   :  { %421 = vmatpush.bf16.msra.mxu1 %v7445_v26  ;;  %7472 = vmatpush.bf16.msrb.mxu3 %v7445_v26 }
 0x10d   :  { %v179_v14 = vadd.f32 %v178_v9, %v177_v7  ;;  %v223_v15 = vrot.slane %v222_v10, 1 }
 0x10f   :  { %v187_v17 = vmul.f32 %v8133_v13, %v179_v14  ;;  %v224_v18 = vadd.f32 %v223_v15, %v222_v10 }
 0x110   :  { %422 = vmatpush.bf16.msra.mxu1 %v7444_v27  ;;  %7473 = vmatpush.bf16.msrb.mxu3 %v7444_v27 }
 0x111   :  { %v225_v20 = vmul.f32 %v224_v18, %v8133_v13  ;;  %v226_v21 = vmul.f32 %v187_v17, %v187_v17 }
 0x113   :  { %v227_v23 = vsub.f32 %v225_v20, %v226_v21 }
 0x114   :  { %423 = vmatpush.bf16.msra.mxu1 %v7443_v31  ;;  %7474 = vmatpush.bf16.msrb.mxu3 %v7443_v31 }
 0x115   :  { %v228_v24 = vadd.f32 1e-05, %v227_v23 }
 0x117   :  { %7814 = vrsqrt.f32 %v228_v24  ;;  %vm235_vm2 = vweird.f32 %v228_v24 }
 0x11d   :  { %v7815_v29 = vpop.eup %7814 }
 0x11e   :  { %v230_v32 = vmul.f32 %v7815_v29, %v228_v24  ;;  %vm236_vm1 = vweird.f32 %v7815_v29 }
 0x11f   :  { %vm237_vm3 = vmor %vm235_vm2, %vm236_vm1 }
 0x120   :  { %v231_v33 = vmul.f32 %v7815_v29, %v230_v32 }
 0x122   :  { %v232_v34 = vmul.f32 0.5, %v231_v33 }
 0x124   :  { %v233_v35 = vsub.f32 1.5, %v232_v34 }
 0x126   :  { %v234_v37 = vmul.f32 %v7815_v29, %v233_v35 }
 0x128   :  { %v238_v38 = vsel %vm237_vm3, %v7815_v29, %v234_v37 }
 0x129   :  { %v239_v39 = vmul.f32 %v238_v38, %v8023_v40 }
 0x12b   :  { %v240_v41 = vmul.f32 %v239_v39, %v187_v17  ;;  %v8153_v43 = vperm.slane %v239_v39, 1 }
 0x12d   :  { %v242_v49 = vrot.slane %v240_v41, 7  ;;  %v246_v51 = vmul.f32 %v8153_v43, %v8032_v45  ;;  %v247_v53 = vmul.f32 %v8153_v43, %v8029_v44  ;;  %v258_v54 = vmul.f32 %v8153_v43, %v8094_v25 }
 0x12e   :  { %v259_v56 = vmul.f32 %v8153_v43, %v8101_v30  ;;  %v256_v57 = vmul.f32 %v8153_v43, %v8085_v16  ;;  %v257_v59 = vmul.f32 %v8153_v43, %v8098_v28  ;;  %v248_v30 = vmul.f32 %v8153_v43, %v8035_v46 }
 0x12f   :  { %v244_v50 = vsub.f32 %v8023_v40, %v242_v49  ;;  %v249_v16 = vmul.f32 %v8153_v43, %v8040_v48  ;;  %v254_v28 = vmul.f32 %v8153_v43, %v8073_v6  ;;  %v255_v1 = vmul.f32 %v8153_v43, %v8079_v11 }
 0x130   :  { %v261_v3 = vmul.f32 %v8153_v43, %v8115_v47  ;;  %v260_v5 = vmul.f32 %v8153_v43, %v8109_v36  ;;  %v250_v39 = vmul.f32 %v8153_v43, %v8049_v52 }
 0x131   :  { %v8162_v55 = vperm.slane %v244_v50, 2  ;;  %v251_v50 = vmul.f32 %v8153_v43, %v8055_v58 }
 0x133   :  { %v263_v60 = vadd.f32 %v8162_v55, %v246_v51  ;;  %v264_v45 = vadd.f32 %v8162_v55, %v247_v53  ;;  %v275_v44 = vadd.f32 %v8162_v55, %v258_v54  ;;  %v276_v42 = vadd.f32 %v8162_v55, %v259_v56 }
 0x134   :  { %v265_v4 = vadd.f32 %v8162_v55, %v248_v30  ;;  %v266_v46 = vadd.f32 %v8162_v55, %v249_v16  ;;  %v271_v48 = vadd.f32 %v8162_v55, %v254_v28  ;;  %v272_v7 = vadd.f32 %v8162_v55, %v255_v1 }
 0x135   :  { %v279_v25 = vmul.f32 0.5, %v263_v60  ;;  %v280_v61 = vmul.f32 0.5, %v264_v45  ;;  %v291_v63 = vmul.f32 0.5, %v275_v44  ;;  %v292_v0 = vmul.f32 0.5, %v276_v42 }
 0x136   :  { %v277_v6 = vadd.f32 %v8162_v55, %v260_v5  ;;  %v278_v11 = vadd.f32 %v8162_v55, %v261_v3  ;;  %v281_v47 = vmul.f32 0.5, %v265_v4  ;;  %v273_v8 = vadd.f32 %v8162_v55, %v256_v57 }
 0x137   :  { %7816 = vtanh.f32 %v279_v25  ;;  %v274_v9 = vadd.f32 %v8162_v55, %v257_v59  ;;  %v282_v10 = vmul.f32 0.5, %v266_v46  ;;  %v287_v20 = vmul.f32 0.5, %v271_v48 }
 0x138   :  { %7818 = vtanh.f32 %v280_v61  ;;  %v293_v12 = vmul.f32 0.5, %v277_v6  ;;  %v294_v17 = vmul.f32 0.5, %v278_v11  ;;  %v288_v24 = vmul.f32 0.5, %v272_v7 }
 0x139   :  { %7820 = vtanh.f32 %v291_v63  ;;  %v289_v29 = vmul.f32 0.5, %v273_v8  ;;  %v290_v32 = vmul.f32 0.5, %v274_v9  ;;  %v267_v51 = vadd.f32 %v8162_v55, %v250_v39 }
 0x13a   :  { %7822 = vtanh.f32 %v292_v0  ;;  %v268_v56 = vadd.f32 %v8162_v55, %v251_v50  ;;  %v252_v8 = vmul.f32 %v8153_v43, %v8061_v62 }
 0x13b   :  { %7824 = vtanh.f32 %v281_v47  ;;  %v283_v52 = vmul.f32 0.5, %v267_v51 }
 0x13c   :  { %7826 = vtanh.f32 %v282_v10  ;;  %v284_v58 = vmul.f32 0.5, %v268_v56  ;;  %v253_v10 = vmul.f32 %v8153_v43, %v8067_v2 }
 0x13d   :  { %v7817_v36 = vpop.eup %7816  ;;  %7828 = vtanh.f32 %v293_v12 }
 0x13e   :  { %v7819_v14 = vpop.eup %7818  ;;  %v311_v15 = vmul.f32 0.5, %v7817_v36  ;;  %7830 = vtanh.f32 %v294_v17  ;;  %v269_v36 = vadd.f32 %v8162_v55, %v252_v8  ;;  %v270_v12 = vadd.f32 %v8162_v55, %v253_v10 }
 0x13f   :  { %v7821_v18 = vpop.eup %7820  ;;  %v312_v19 = vmul.f32 0.5, %v7819_v14  ;;  %7832 = vtanh.f32 %v287_v20 }
 0x140   :  { %v7823_v21 = vpop.eup %7822  ;;  %v327_v22 = vadd.f32 0.5, %v311_v15  ;;  %v323_v23 = vmul.f32 0.5, %v7821_v18  ;;  %7834 = vtanh.f32 %v288_v24  ;;  %v285_v17 = vmul.f32 0.5, %v269_v36 }
 0x141   :  { %v328_v26 = vadd.f32 0.5, %v312_v19  ;;  %v324_v27 = vmul.f32 0.5, %v7823_v21  ;;  %v7825_v35 = vpop.eup %7824  ;;  %7836 = vtanh.f32 %v289_v29  ;;  %v286_v18 = vmul.f32 0.5, %v270_v12 }
 0x142   :  { %v339_v31 = vadd.f32 0.5, %v323_v23  ;;  %v7827_v38 = vpop.eup %7826  ;;  %7838 = vtanh.f32 %v290_v32  ;;  %v313_v60 = vmul.f32 0.5, %v7825_v35 }
 0x143   :  { %v359_v33 = vpack.c.bf16 %v328_v26, %v327_v22  ;;  %v340_v34 = vadd.f32 0.5, %v324_v27  ;;  %v7829_v41 = vpop.eup %7828  ;;  %v314_v45 = vmul.f32 0.5, %v7827_v38  ;;  %7840 = vtanh.f32 %v283_v52 }
 0x144   :  { %v7831_v49 = vpop.eup %7830  ;;  %v325_v63 = vmul.f32 0.5, %v7829_v41  ;;  %v329_v1 = vadd.f32 0.5, %v313_v60  ;;  %7842 = vtanh.f32 %v284_v58  ;;  %v367_v38 = vperm.slane %v8023_v40, 3 }
 0x145   :  { %424 = vmatmul.bf16.vlgmr.msra.gmra.mxu1 %v359_v33  ;;  %v365_v37 = vpack.c.bf16 %v340_v34, %v339_v31  ;;  %v7833_v53 = vpop.eup %7832  ;;  %v326_v30 = vmul.f32 0.5, %v7831_v49  ;;  %v330_v3 = vadd.f32 0.5, %v314_v45  ;;  %7844 = vtanh.f32 %v285_v17 }
 0x146   :  { %v7835_v54 = vpop.eup %7834  ;;  %v319_v57 = vmul.f32 0.5, %v7833_v53  ;;  %v341_v46 = vadd.f32 0.5, %v325_v63  ;;  %7846 = vtanh.f32 %v286_v18 }
 0x147   :  { %454 = vmatmul.bf16.vlgmr.msrb.gmra.mxu3 %v365_v37  ;;  %v7837_v59 = vpop.eup %7836  ;;  %v320_v44 = vmul.f32 0.5, %v7835_v54  ;;  %v342_v48 = vadd.f32 0.5, %v326_v30  ;;  %v360_v6 = vpack.c.bf16 %v330_v3, %v329_v1 }
 0x148   :  { %v7839_v42 = vpop.eup %7838  ;;  %v335_v25 = vadd.f32 0.5, %v319_v57  ;;  %v321_v61 = vmul.f32 0.5, %v7837_v59 }
 0x149   :  { %v336_v0 = vadd.f32 0.5, %v320_v44  ;;  %v322_v16 = vmul.f32 0.5, %v7839_v42  ;;  %v366_v11 = vpack.c.bf16 %v342_v48, %v341_v46  ;;  %v7841_v47 = vpop.eup %7840 }
 0x14a   :  { %v337_v28 = vadd.f32 0.5, %v321_v61  ;;  %v7843_v9 = vpop.eup %7842  ;;  %v315_v14 = vmul.f32 0.5, %v7841_v47 }
 0x14b   :  { %v363_v4 = vpack.c.bf16 %v336_v0, %v335_v25  ;;  %v338_v5 = vadd.f32 0.5, %v322_v16  ;;  %v316_v15 = vmul.f32 0.5, %v7843_v9  ;;  %v7845_v22 = vpop.eup %7844 }
 0x14c   :  { %v331_v19 = vadd.f32 0.5, %v315_v14  ;;  %v7847_v62 = vpop.eup %7846  ;;  %v317_v23 = vmul.f32 0.5, %v7845_v22 }
 0x14d   :  { %v364_v7 = vpack.c.bf16 %v338_v5, %v337_v28  ;;  %v332_v20 = vadd.f32 0.5, %v316_v15  ;;  %v318_v24 = vmul.f32 0.5, %v7847_v62 }
 0x14e   :  { %v333_v26 = vadd.f32 0.5, %v317_v23 }
 0x14f   :  { %v361_v21 = vpack.c.bf16 %v332_v20, %v331_v19  ;;  %v334_v2 = vadd.f32 0.5, %v318_v24 }
 0x151   :  { %v362_v43 = vpack.c.bf16 %v334_v2, %v333_v26 }
 0x155   :  { %429 = vmatmul.bf16.gmra.mxu1 %v360_v6 }
 0x157   :  { %459 = vmatmul.bf16.gmra.mxu3 %v366_v11 }
 0x165   :  { %434 = vmatmul.bf16.gmra.mxu1 %v361_v21 }
 0x175   :  { %439 = vmatmul.bf16.gmra.mxu1 %v362_v43 }
 0x185   :  { %444 = vmatmul.bf16.gmra.mxu1 %v363_v4 }
 0x195   :  { %449 = vmatmul.bf16.gmra.mxu1 %v364_v7 }
 0x1c2   :  { %v425_v55 = vpop.f32.mrf.mxu1 }
 0x1c3   :  { %v8209_v49 = vadd.f32 %v425_v55, %v367_v38 }
 0x1c5   :  { %v487_v54 = vmul.f32 %v8209_v49, %v8209_v49 }
 0x1ca   :  { %v427_v27 = vpop.f32.mrf.mxu1  ;;  %v455_v37 = vpop.f32.mrf.mxu3 }
 0x1cb   :  { %v8207_v41 = vadd.f32 %v427_v27, %v367_v38  ;;  %v8261_v22 = vadd.f32 %v455_v37, %v367_v38 }
 0x1cd   :  { %v488_v51 = vmul.f32 %v8207_v41, %v8207_v41  ;;  %v465_v56 = vadd.f32 %v8207_v41, %v8209_v49 }
 0x1cf   :  { %v503_v44 = vadd.f32 %v488_v51, %v487_v54 }
 0x1d2   :  { %v430_v29 = vpop.f32.mrf.mxu1  ;;  %v457_v60 = vpop.f32.mrf.mxu3 }
 0x1d3   :  { %v8211_v50 = vadd.f32 %v430_v29, %v367_v38  ;;  %v8266_v26 = vadd.f32 %v457_v60, %v367_v38  ;;  %v499_v29 = vmul.f32 %v8261_v22, %v8261_v22 }
 0x1d5   :  { %v489_v57 = vmul.f32 %v8211_v50, %v8211_v50  ;;  %v466_v42 = vadd.f32 %v465_v56, %v8211_v50 }
 0x1d7   :  { %v504_v61 = vadd.f32 %v503_v44, %v489_v57 }
 0x1da   :  { %v432_v31 = vpop.f32.mrf.mxu1  ;;  %v460_v8 = vpop.f32.mrf.mxu3 }
 0x1db   :  { %v8215_v53 = vadd.f32 %v432_v31, %v367_v38  ;;  %v8273_v31 = vadd.f32 %v460_v8, %v367_v38 }
 0x1dd   :  { %v490_v52 = vmul.f32 %v8215_v53, %v8215_v53  ;;  %v467_v63 = vadd.f32 %v466_v42, %v8215_v53  ;;  %v501_v51 = vmul.f32 %v8273_v31, %v8273_v31 }
 0x1df   :  { %v505_v16 = vadd.f32 %v504_v61, %v490_v52 }
 0x1e2   :  { %v435_v32 = vpop.f32.mrf.mxu1  ;;  %v462_v27 = vpop.f32.mrf.mxu3 }
 0x1e3   :  { %v8223_v59 = vadd.f32 %v435_v32, %v367_v38 }
 0x1e5   :  { %v491_v30 = vmul.f32 %v8223_v59, %v8223_v59  ;;  %v468_v58 = vadd.f32 %v467_v63, %v8223_v59 }
 0x1e7   :  { %v506_v3 = vadd.f32 %v505_v16, %v491_v30 }
 0x1ea   :  { %v437_v33 = vpop.f32.mrf.mxu1 }
 0x1eb   :  { %v8228_v25 = vadd.f32 %v437_v33, %v367_v38 }
 0x1ed   :  { %v492_v28 = vmul.f32 %v8228_v25, %v8228_v25  ;;  %v469_v4 = vadd.f32 %v468_v58, %v8228_v25 }
 0x1ef   :  { %v507_v7 = vadd.f32 %v506_v3, %v492_v28 }
 0x1f2   :  { %v440_v34 = vpop.f32.mrf.mxu1 }
 0x1f3   :  { %v8233_v0 = vadd.f32 %v440_v34, %v367_v38  ;;  %v500_v34 = vmul.f32 %v8266_v26, %v8266_v26 }
 0x1f5   :  { %v493_v5 = vmul.f32 %v8233_v0, %v8233_v0  ;;  %v470_v6 = vadd.f32 %v469_v4, %v8233_v0 }
 0x1f7   :  { %v508_v9 = vadd.f32 %v507_v7, %v493_v5 }
 0x1fa   :  { %v442_v35 = vpop.f32.mrf.mxu1 }
 0x1fb   :  { %v8238_v1 = vadd.f32 %v442_v35, %v367_v38  ;;  %v8278_v35 = vadd.f32 %v462_v27, %v367_v38 }
 0x1fd   :  { %v494_v11 = vmul.f32 %v8238_v1, %v8238_v1  ;;  %v471_v10 = vadd.f32 %v470_v6, %v8238_v1  ;;  %v502_v57 = vmul.f32 %v8278_v35, %v8278_v35 }
 0x1ff   :  { %v509_v14 = vadd.f32 %v508_v9, %v494_v11  ;;  %v7458_v11 = vld [vmem:[%s13408_s4 + $0x38] sm:$0xff]  ;;  %v7457_v9 = vld [vmem:[%s13408_s4 + $0x30] sm:$0xff] }
 0x200   :  { %715 = vmatpush.bf16.msra.mxu2 %v7458_v11  ;;  %7475 = vmatpush.bf16.msra.mxu3 %v7458_v11 }
 0x202   :  { %v445_v39 = vpop.f32.mrf.mxu1 }
 0x203   :  { %v8243_v46 = vadd.f32 %v445_v39, %v367_v38 }
 0x204   :  { %716 = vmatpush.bf16.msra.mxu2 %v7457_v9  ;;  %7476 = vmatpush.bf16.msra.mxu3 %v7457_v9 }
 0x205   :  { %v495_v36 = vmul.f32 %v8243_v46, %v8243_v46  ;;  %v472_v15 = vadd.f32 %v471_v10, %v8243_v46 }
 0x207   :  { %v510_v18 = vadd.f32 %v509_v14, %v495_v36  ;;  %v7455_v36 = vld [vmem:[%s13408_s4 + $0x20] sm:$0xff] }
 0x20a   :  { %v447_v45 = vpop.f32.mrf.mxu1 }
 0x20b   :  { %v8248_v47 = vadd.f32 %v447_v45, %v367_v38 }
 0x20d   :  { %v496_v17 = vmul.f32 %v8248_v47, %v8248_v47  ;;  %v473_v19 = vadd.f32 %v472_v15, %v8248_v47 }
 0x20f   :  { %v511_v62 = vadd.f32 %v510_v18, %v496_v17  ;;  %v7454_v17 = vld [vmem:[%s13408_s4 + $0x18] sm:$0xff] }
 0x212   :  { %v450_v48 = vpop.f32.mrf.mxu1 }
 0x213   :  { %v8253_v12 = vadd.f32 %v450_v48, %v367_v38 }
 0x215   :  { %v497_v20 = vmul.f32 %v8253_v12, %v8253_v12  ;;  %v474_v23 = vadd.f32 %v473_v19, %v8253_v12 }
 0x217   :  { %v512_v2 = vadd.f32 %v511_v62, %v497_v20  ;;  %v7453_v20 = vld [vmem:[%s13408_s4 + $0x10] sm:$0xff] }
 0x21a   :  { %v452_v21 = vpop.f32.mrf.mxu1 }
 0x21b   :  { %v8264_v24 = vadd.f32 %v452_v21, %v367_v38 }
 0x21d   :  { %v475_v43 = vadd.f32 %v474_v23, %v8264_v24  ;;  %v498_v55 = vmul.f32 %v8264_v24, %v8264_v24  ;;  %v7452_v23 = vld [vmem:[%s13408_s4 + $0x8] sm:$0xff] }
 0x21f   :  { %v476_v32 = vadd.f32 %v475_v43, %v8261_v22  ;;  %v513_v33 = vadd.f32 %v512_v2, %v498_v55 }
 0x221   :  { %v477_v37 = vadd.f32 %v476_v32, %v8266_v26  ;;  %v514_v39 = vadd.f32 %v513_v33, %v499_v29  ;;  %v7451_v29 = vld [vmem:[%s13408_s4] sm:$0xff] }
 0x223   :  { %v478_v54 = vadd.f32 %v477_v37, %v8273_v31  ;;  %v515_v56 = vadd.f32 %v514_v39, %v500_v34 }
 0x225   :  { %v479_v60 = vadd.f32 %v478_v54, %v8278_v35  ;;  %v516_v45 = vadd.f32 %v515_v56, %v501_v51 }
 0x227   :  { %v480_v44 = vrot.slane %v479_v60, 4  ;;  %v517_v42 = vadd.f32 %v516_v45, %v502_v57 }
 0x229   :  { %v481_v52 = vadd.f32 %v480_v44, %v479_v60  ;;  %v518_v38 = vrot.slane %v517_v42, 4 }
 0x22b   :  { %v482_v61 = vrot.slane %v481_v52, 2  ;;  %v519_v63 = vadd.f32 %v518_v38, %v517_v42 }
 0x22d   :  { %v483_v30 = vadd.f32 %v482_v61, %v481_v52  ;;  %v520_v16 = vrot.slane %v519_v63, 2 }
 0x22f   :  { %v484_v58 = vrot.slane %v483_v30, 1  ;;  %v521_v28 = vadd.f32 %v520_v16, %v519_v63 }
 0x231   :  { %v485_v3 = vadd.f32 %v484_v58, %v483_v30  ;;  %v522_v4 = vrot.slane %v521_v28, 1 }
 0x233   :  { %v486_v5 = vmul.f32 %v485_v3, %v8133_v13  ;;  %v523_v48 = vadd.f32 %v522_v4, %v521_v28 }
 0x235   :  { %v524_v7 = vmul.f32 %v523_v48, %v8133_v13  ;;  %v525_v6 = vmul.f32 %v486_v5, %v486_v5  ;;  %v7456_v13 = vld [vmem:[%s13408_s4 + $0x28] sm:$0xff] }
 0x236   :  { %717 = vmatpush.bf16.msra.mxu2 %v7456_v13  ;;  %7477 = vmatpush.bf16.msra.mxu3 %v7456_v13 }
 0x237   :  { %v526_v8 = vsub.f32 %v524_v7, %v525_v6 }
 0x239   :  { %v527_v10 = vadd.f32 1e-05, %v526_v8 }
 0x23a   :  { %718 = vmatpush.bf16.msra.mxu2 %v7455_v36  ;;  %7478 = vmatpush.bf16.msra.mxu3 %v7455_v36 }
 0x23b   :  { %7848 = vrsqrt.f32 %v527_v10  ;;  %vm534_vm5 = vweird.f32 %v527_v10 }
 0x23e   :  { %719 = vmatpush.bf16.msra.mxu2 %v7454_v17  ;;  %7479 = vmatpush.bf16.msra.mxu3 %v7454_v17 }
 0x241   :  { %v7849_v14 = vpop.eup %7848 }
 0x242   :  { %v529_v15 = vmul.f32 %v7849_v14, %v527_v10  ;;  %vm535_vm4 = vweird.f32 %v7849_v14  ;;  %720 = vmatpush.bf16.msra.mxu2 %v7453_v20  ;;  %7480 = vmatpush.bf16.msra.mxu3 %v7453_v20 }
 0x243   :  { %vm536_vm6 = vmor %vm534_vm5, %vm535_vm4 }
 0x244   :  { %v530_v18 = vmul.f32 %v7849_v14, %v529_v15 }
 0x246   :  { %v531_v19 = vmul.f32 0.5, %v530_v18  ;;  %721 = vmatpush.bf16.msra.mxu2 %v7452_v23  ;;  %7481 = vmatpush.bf16.msra.mxu3 %v7452_v23 }
 0x248   :  { %v532_v21 = vsub.f32 1.5, %v531_v19 }
 0x24a   :  { %v533_v62 = vmul.f32 %v7849_v14, %v532_v21  ;;  %722 = vmatpush.bf16.msra.mxu2 %v7451_v29  ;;  %7482 = vmatpush.bf16.msra.mxu3 %v7451_v29 }
 0x24c   :  { %v537_v2 = vsel %vm536_vm6, %v7849_v14, %v533_v62 }
 0x24d   :  { %v538_v43 = vmul.f32 %v537_v2, %v8023_v40 }
 0x24f   :  { %v539_v55 = vmul.f32 %v538_v43, %v486_v5  ;;  %v8311_v27 = vperm.slane %v538_v43, 4 }
 0x251   :  { %v541_v32 = vrot.slane %v539_v55, 7  ;;  %v556_v33 = vmul.f32 %v8311_v27, %v8264_v24  ;;  %v545_v37 = vmul.f32 %v8311_v27, %v8209_v49  ;;  %v546_v39 = vmul.f32 %v8311_v27, %v8207_v41 }
 0x252   :  { %v557_v54 = vmul.f32 %v8311_v27, %v8261_v22  ;;  %v558_v56 = vmul.f32 %v8311_v27, %v8266_v26  ;;  %v555_v24 = vmul.f32 %v8311_v27, %v8253_v12  ;;  %v547_v22 = vmul.f32 %v8311_v27, %v8211_v50 }
 0x253   :  { %v543_v34 = vsub.f32 %v8023_v40, %v541_v32  ;;  %v548_v26 = vmul.f32 %v8311_v27, %v8215_v53  ;;  %v553_v12 = vmul.f32 %v8311_v27, %v8243_v46  ;;  %v554_v52 = vmul.f32 %v8311_v27, %v8248_v47 }
 0x254   :  { %v559_v61 = vmul.f32 %v8311_v27, %v8273_v31  ;;  %v560_v63 = vmul.f32 %v8311_v27, %v8278_v35  ;;  %v549_v2 = vmul.f32 %v8311_v27, %v8223_v59  ;;  %v550_v29 = vmul.f32 %v8311_v27, %v8228_v25 }
 0x255   :  { %v8323_v51 = vperm.slane %v543_v34, 5 }
 0x257   :  { %v562_v40 = vadd.f32 %v8323_v51, %v545_v37  ;;  %v563_v57 = vadd.f32 %v8323_v51, %v546_v39  ;;  %v574_v49 = vadd.f32 %v8323_v51, %v557_v54  ;;  %v575_v60 = vadd.f32 %v8323_v51, %v558_v56 }
 0x258   :  { %v564_v38 = vadd.f32 %v8323_v51, %v547_v22  ;;  %v565_v50 = vadd.f32 %v8323_v51, %v548_v26  ;;  %v570_v53 = vadd.f32 %v8323_v51, %v553_v12  ;;  %v571_v30 = vadd.f32 %v8323_v51, %v554_v52 }
 0x259   :  { %v578_v41 = vmul.f32 0.5, %v562_v40  ;;  %v579_v45 = vmul.f32 0.5, %v563_v57  ;;  %v590_v44 = vmul.f32 0.5, %v574_v49  ;;  %v591_v42 = vmul.f32 0.5, %v575_v60 }
 0x25a   :  { %v576_v46 = vadd.f32 %v8323_v51, %v559_v61  ;;  %v577_v47 = vadd.f32 %v8323_v51, %v560_v63  ;;  %v580_v16 = vmul.f32 0.5, %v564_v38  ;;  %v572_v58 = vadd.f32 %v8323_v51, %v555_v24 }
 0x25b   :  { %7850 = vtanh.f32 %v578_v41  ;;  %v573_v31 = vadd.f32 %v8323_v51, %v556_v33  ;;  %v581_v28 = vmul.f32 0.5, %v565_v50  ;;  %v586_v11 = vmul.f32 0.5, %v570_v53 }
 0x25c   :  { %7852 = vtanh.f32 %v579_v45  ;;  %v592_v3 = vmul.f32 0.5, %v576_v46  ;;  %v593_v48 = vmul.f32 0.5, %v577_v47  ;;  %v587_v13 = vmul.f32 0.5, %v571_v30 }
 0x25d   :  { %7854 = vtanh.f32 %v590_v44  ;;  %v588_v15 = vmul.f32 0.5, %v572_v58  ;;  %v589_v18 = vmul.f32 0.5, %v573_v31  ;;  %v566_v32 = vadd.f32 %v8323_v51, %v549_v2 }
 0x25e   :  { %7856 = vtanh.f32 %v591_v42  ;;  %v567_v37 = vadd.f32 %v8323_v51, %v550_v29  ;;  %v551_v47 = vmul.f32 %v8311_v27, %v8233_v0  ;;  %v552_v58 = vmul.f32 %v8311_v27, %v8238_v1 }
 0x25f   :  { %7858 = vtanh.f32 %v580_v16  ;;  %v582_v59 = vmul.f32 0.5, %v566_v32 }
 0x260   :  { %7860 = vtanh.f32 %v581_v28  ;;  %v583_v25 = vmul.f32 0.5, %v567_v37  ;;  %v568_v31 = vadd.f32 %v8323_v51, %v551_v47  ;;  %v569_v28 = vadd.f32 %v8323_v51, %v552_v58 }
 0x261   :  { %v7851_v35 = vpop.eup %7850  ;;  %7862 = vtanh.f32 %v592_v3 }
 0x262   :  { %v7853_v4 = vpop.eup %7852  ;;  %v610_v5 = vmul.f32 0.5, %v7851_v35  ;;  %7864 = vtanh.f32 %v593_v48 }
 0x263   :  { %v7855_v7 = vpop.eup %7854  ;;  %v611_v6 = vmul.f32 0.5, %v7853_v4  ;;  %7866 = vtanh.f32 %v586_v11  ;;  %v584_v4 = vmul.f32 0.5, %v568_v31 }
 0x264   :  { %v7857_v8 = vpop.eup %7856  ;;  %v626_v9 = vadd.f32 0.5, %v610_v5  ;;  %v622_v10 = vmul.f32 0.5, %v7855_v7  ;;  %7868 = vtanh.f32 %v587_v13  ;;  %v585_v5 = vmul.f32 0.5, %v569_v28 }
 0x265   :  { %v627_v36 = vadd.f32 0.5, %v611_v6  ;;  %v623_v14 = vmul.f32 0.5, %v7857_v8  ;;  %v7859_v21 = vpop.eup %7858  ;;  %7870 = vtanh.f32 %v588_v15  ;;  %v13410_v13 = vlaneseq }
 0x266   :  { %v638_v17 = vadd.f32 0.5, %v622_v10  ;;  %v7861_v23 = vpop.eup %7860  ;;  %7872 = vtanh.f32 %v589_v18  ;;  %v612_v56 = vmul.f32 0.5, %v7859_v21 }
 0x267   :  { %v658_v19 = vpack.c.bf16 %v627_v36, %v626_v9  ;;  %v639_v20 = vadd.f32 0.5, %v623_v14  ;;  %v7863_v43 = vpop.eup %7862  ;;  %v613_v24 = vmul.f32 0.5, %v7861_v23  ;;  %7874 = vtanh.f32 %v582_v59  ;;  %v7914_v36 = vld [vmem:[%s13406_s1] sm:$0xff] }
 0x268   :  { %v7865_v55 = vpop.eup %7864  ;;  %v624_v41 = vmul.f32 0.5, %v7863_v43  ;;  %v628_v26 = vadd.f32 0.5, %v612_v56  ;;  %7876 = vtanh.f32 %v583_v25  ;;  %v894_v51 = vshrl.u32 %v13410_v13, 7 }
 0x269   :  { %723 = vmatmul.bf16.vlgmr.msra.gmra.mxu2 %v658_v19  ;;  %v664_v62 = vpack.c.bf16 %v639_v20, %v638_v17  ;;  %v7867_v33 = vpop.eup %7866  ;;  %v625_v45 = vmul.f32 0.5, %v7865_v55  ;;  %v629_v12 = vadd.f32 0.5, %v613_v24  ;;  %7878 = vtanh.f32 %v584_v4 }
 0x26a   :  { %v7869_v34 = vpop.eup %7868  ;;  %v618_v39 = vmul.f32 0.5, %v7867_v33  ;;  %v640_v61 = vadd.f32 0.5, %v624_v41  ;;  %7880 = vtanh.f32 %v585_v5  ;;  %7488 = vset.pattern.permute.xlu2 %v894_v51  ;;  %7487 = vset.pattern.permute.xlu1 %v894_v51  ;;  %v8371_v14 = vperm.slane %v7914_v36, 6 }
 0x26b   :  { %753 = vmatmul.bf16.vlgmr.msra.gmra.mxu3 %v664_v62  ;;  %v7871_v54 = vpop.eup %7870  ;;  %v619_v40 = vmul.f32 0.5, %v7869_v34  ;;  %v641_v63 = vadd.f32 0.5, %v625_v45  ;;  %v659_v53 = vpack.c.bf16 %v629_v12, %v628_v26  ;;  %7486 = vset.pattern.permute.xlu0 %v894_v51 }
 0x26c   :  { %v7873_v57 = vpop.eup %7872  ;;  %v634_v49 = vadd.f32 0.5, %v618_v39  ;;  %v620_v60 = vmul.f32 0.5, %v7871_v54 }
 0x26d   :  { %v635_v44 = vadd.f32 0.5, %v619_v40  ;;  %v621_v22 = vmul.f32 0.5, %v7873_v57  ;;  %v665_v30 = vpack.c.bf16 %v641_v63, %v640_v61  ;;  %v7875_v46 = vpop.eup %7874 }
 0x26e   :  { %v636_v42 = vadd.f32 0.5, %v620_v60  ;;  %v7877_v16 = vpop.eup %7876  ;;  %v614_v35 = vmul.f32 0.5, %v7875_v46 }
 0x26f   :  { %v662_v52 = vpack.c.bf16 %v635_v44, %v634_v49  ;;  %v637_v38 = vadd.f32 0.5, %v621_v22  ;;  %v615_v3 = vmul.f32 0.5, %v7877_v16  ;;  %v7879_v11 = vpop.eup %7878 }
 0x270   :  { %v630_v48 = vadd.f32 0.5, %v614_v35  ;;  %v7881_v0 = vpop.eup %7880  ;;  %v616_v8 = vmul.f32 0.5, %v7879_v11 }
 0x271   :  { %v663_v50 = vpack.c.bf16 %v637_v38, %v636_v42  ;;  %v631_v7 = vadd.f32 0.5, %v615_v3  ;;  %v617_v9 = vmul.f32 0.5, %v7881_v0 }
 0x272   :  { %v632_v10 = vadd.f32 0.5, %v616_v8 }
 0x273   :  { %v660_v6 = vpack.c.bf16 %v631_v7, %v630_v48  ;;  %v633_v1 = vadd.f32 0.5, %v617_v9 }
 0x275   :  { %v661_v27 = vpack.c.bf16 %v633_v1, %v632_v10 }
 0x279   :  { %728 = vmatmul.bf16.gmra.mxu2 %v659_v53 }
 0x27b   :  { %758 = vmatmul.bf16.gmra.mxu3 %v665_v30 }
 0x289   :  { %733 = vmatmul.bf16.gmra.mxu2 %v660_v6 }
 0x299   :  { %738 = vmatmul.bf16.gmra.mxu2 %v661_v27  ;;  %v13468_v27 = vmov 0.0  }
 0x2a9   :  { %743 = vmatmul.bf16.gmra.mxu2 %v662_v52 }
 0x2b9   :  { %748 = vmatmul.bf16.gmra.mxu2 %v663_v50 }
 0x2ec   :  { %v724_v15 = vpop.f32.mrf.mxu2 }
 0x2ed   :  { %v8374_v17 = vadd.f32 %v724_v15, %v8371_v14 }
 0x2ee   :  { %v754_v23 = vpop.f32.mrf.mxu3 }
 0x2ef   :  { %13860 = vst [vmem:[#allocation2_spill] sm:$0xff] %v8374_v17  ;;  %v13461_v18 = vperm.slane %v8374_v17, 4  ;;  %v13463_v19 = vperm.slane %v8374_v17, 2  ;;  %v8379_v20 = vperm.slane %v8374_v17, 0  ;;  %v13458_v21 = vperm.slane %v8374_v17, 5 }
 0x2f0   :  { %v13462_v62 = vperm.slane %v8374_v17, 3  ;;  %v13467_v2 = vperm.slane %v8374_v17, 1  ;;  %v8396_v43 = vadd.f32 %v754_v23, %v8371_v14  ;;  %v13456_v29 = vperm.slane %v8374_v17, 7 }
 0x2f1   :  { %13861 = vst [vmem:[#allocation3_spill] sm:$0xff] %v8379_v20  ;;  %925 = vperm.xlu2 %7488, %v13461_v18   ;;  %911 = vperm.xlu1 %7487, %v13463_v19   ;;  %v13457_v32 = vperm.slane %v8374_v17, 6 }
 0x2f2   :  { %897 = vperm.xlu0 %7486, %v8379_v20   ;;  %13862 = vst [vmem:[#allocation4_spill] sm:$0xff] %v8396_v43  ;;  %v13430_v55 = vperm.slane %v8396_v43, 2  ;;  %v13427_v33 = vperm.slane %v8396_v43, 5  ;;  %v13431_v34 = vperm.slane %v8396_v43, 1  ;;  %v8410_v39 = vperm.slane %v8396_v43, 0 }
 0x2f3   :  { %v13428_v24 = vperm.slane %v8396_v43, 4  ;;  %v13429_v40 = vperm.slane %v8396_v43, 3  ;;  %v13425_v59 = vperm.slane %v8396_v43, 7  ;;  %v13426_v49 = vperm.slane %v8396_v43, 6 }
 0x2f4   :  { %v726_v37 = vpop.f32.mrf.mxu2  ;;  %13863 = vst [vmem:[#allocation5_spill] sm:$0xff] %v8410_v39  ;;  %v865_v11 = vrot.slane %v8396_v43, 2  ;;  %v868_v36 = vrot.slane %v8396_v43, 5 }
 0x2f5   :  { %v8418_v54 = vadd.f32 %v726_v37, %v8371_v14 }
 0x2f6   :  { %v756_v45 = vpop.f32.mrf.mxu3  ;;  %v1886_v10 = vperm.slane %v865_v11, 0 }
 0x2f7   :  { %13864 = vst [vmem:[#allocation6_spill] sm:$0xff] %v8418_v54  ;;  %v8421_v56 = vperm.slane %v8418_v54, 0  ;;  %v13451_v57 = vperm.slane %v8418_v54, 3  ;;  %v13448_v60 = vperm.slane %v8418_v54, 6  ;;  %v13454_v41 = vperm.slane %v8418_v54, 2 }
 0x2f8   :  { %v13455_v44 = vperm.slane %v8418_v54, 1  ;;  %v8449_v22 = vadd.f32 %v756_v45, %v8371_v14  ;;  %v13449_v42 = vperm.slane %v8418_v54, 5  ;;  %v13450_v26 = vperm.slane %v8418_v54, 4 }
 0x2f9   :  { %932 = vperm.xlu2 %7488, %v13458_v21   ;;  %918 = vperm.xlu1 %7487, %v13462_v62   ;;  %v13447_v38 = vperm.slane %v8418_v54, 7 }
 0x2fa   :  { %904 = vperm.xlu0 %7486, %v13467_v2   ;;  %13865 = vst [vmem:[#allocation7_spill] sm:$0xff] %v8449_v22  ;;  %v8452_v25 = vperm.slane %v8449_v22, 0  ;;  %v13422_v12 = vperm.slane %v8449_v22, 3  ;;  %v13423_v52 = vperm.slane %v8449_v22, 2  ;;  %v13416_v61 = vperm.slane %v8449_v22, 6 }
 0x2fb   :  { %v13417_v63 = vperm.slane %v8449_v22, 5  ;;  %v13424_v53 = vperm.slane %v8449_v22, 1  ;;  %v13421_v16 = vperm.slane %v8449_v22, 4  ;;  %v13415_v28 = vperm.slane %v8449_v22, 7 }
 0x2fc   :  { %13866 = vst [vmem:[#allocation8_spill] sm:$0xff] %v8452_v25  ;;  %v729_v50 = vpop.f32.mrf.mxu2 }
 0x2fd   :  { %v8480_v30 = vadd.f32 %v729_v50, %v8371_v14  ;;  %v1889_v50 = vperm.slane %v868_v36, 0 }
 0x2fe   :  { %v759_v5 = vpop.f32.mrf.mxu3 }
 0x2ff   :  { %13867 = vst [vmem:[#allocation9_spill] sm:$0xff] %v8480_v30  ;;  %v13446_v46 = vperm.slane %v8480_v30, 1  ;;  %v8484_v47 = vperm.slane %v8480_v30, 0  ;;  %v13440_v58 = vperm.slane %v8480_v30, 4  ;;  %v13444_v31 = vperm.slane %v8480_v30, 3 }
 0x300   :  { %v13437_v3 = vperm.slane %v8480_v30, 7  ;;  %v13438_v4 = vperm.slane %v8480_v30, 6  ;;  %v13445_v48 = vperm.slane %v8480_v30, 2  ;;  %v8513_v7 = vadd.f32 %v759_v5, %v8371_v14 }
 0x301   :  { %1583 = vperm.xlu2 %7488, %v13430_v55   ;;  %946 = vperm.xlu1 %7487, %v13456_v29   ;;  %13868 = vst [vmem:[#allocation10_spill] sm:$0xff] %v8484_v47  ;;  %v13439_v9 = vperm.slane %v8480_v30, 5 }
 0x302   :  { %939 = vperm.xlu0 %7486, %v13457_v32   ;;  %13869 = vst [vmem:[#allocation11_spill] sm:$0xff] %v8513_v7  ;;  %v13412_v0 = vperm.slane %v8513_v7, 1  ;;  %v8520_v8 = vperm.slane %v8513_v7, 0  ;;  %v13411_v23 = vperm.slane %v8513_v7, 4  ;;  %v13413_v37 = vperm.slane %v8513_v7, 3 }
 0x303   :  { %v13414_v45 = vperm.slane %v8513_v7, 2  ;;  %v13418_v13 = vperm.slane %v8513_v7, 7 }
 0x304   :  { %13870 = vst [vmem:[#allocation12_spill] sm:$0xff] %v8520_v8 }
 0x309   :  { %1604 = vperm.xlu2 %7488, %v13427_v33   ;;  %1576 = vperm.xlu1 %7487, %v13431_v34  }
 0x30a   :  { %1569 = vperm.xlu0 %7486, %v8410_v39  }
 0x311   :  { %953 = vperm.xlu2 %7488, %v8421_v56   ;;  %1597 = vperm.xlu1 %7487, %v13428_v24  }
 0x312   :  { %1590 = vperm.xlu0 %7486, %v13429_v40  }
 0x319   :  { %974 = vperm.xlu2 %7488, %v13451_v57   ;;  %1618 = vperm.xlu1 %7487, %v13425_v59  }
 0x31a   :  { %1611 = vperm.xlu0 %7486, %v13426_v49  }
 0x321   :  { %995 = vperm.xlu2 %7488, %v13448_v60   ;;  %967 = vperm.xlu1 %7487, %v13454_v41  }
 0x322   :  { %960 = vperm.xlu0 %7486, %v13455_v44  }
 0x329   :  { %1625 = vperm.xlu2 %7488, %v8452_v25   ;;  %988 = vperm.xlu1 %7487, %v13449_v42  }
 0x32a   :  { %981 = vperm.xlu0 %7486, %v13450_v26  }
 0x331   :  { %1646 = vperm.xlu2 %7488, %v13422_v12   ;;  %1639 = vperm.xlu1 %7487, %v13423_v52  }
 0x332   :  { %1002 = vperm.xlu0 %7486, %v13447_v38  }
 0x339   :  { %1667 = vperm.xlu2 %7488, %v13416_v61   ;;  %1660 = vperm.xlu1 %7487, %v13417_v63  }
 0x33a   :  { %1632 = vperm.xlu0 %7486, %v13424_v53   ;;  %v761_v53 = vpop.f32.mrf.mxu3 }
 0x33b   :  { %v8599_v33 = vadd.f32 %v761_v53, %v8371_v14  ;;  %v866_v53 = vrot.slane %v8396_v43, 3 }
 0x33d   :  { %13875 = vst [vmem:[#allocation17_spill] sm:$0xff] %v8599_v33  ;;  %v13465_v32 = vperm.slane %v8599_v33, 7 }
 0x341   :  { %1016 = vperm.xlu2 %7488, %v13446_v46   ;;  %1009 = vperm.xlu1 %7487, %v8484_v47  }
 0x342   :  { %1653 = vperm.xlu0 %7486, %v13421_v16   ;;  %v864_v16 = vrot.slane %v8396_v43, 1 }
 0x344   :  { %v1885_v49 = vperm.slane %v864_v16, 0 }
 0x349   :  { %1037 = vperm.xlu2 %7488, %v13440_v58   ;;  %1030 = vperm.xlu1 %7487, %v13444_v31   ;;  %v873_v58 = vrot.slane %v8449_v22, 3 }
 0x34a   :  { %1674 = vperm.xlu0 %7486, %v13415_v28  }
 0x34b   :  { %v8501_v35 = vpop.permute.xlu2 %925 }
 0x351   :  { %1058 = vperm.xlu2 %7488, %v13437_v3   ;;  %1051 = vperm.xlu1 %7487, %v13438_v4   ;;  %v1887_v3 = vperm.slane %v866_v53, 0  ;;  %v13453_v53 = vperm.slane %v8599_v33, 1 }
 0x352   :  { %1023 = vperm.xlu0 %7486, %v13445_v48   ;;  %v8642_v48 = vperm.slane %v8599_v33, 0 }
 0x353   :  { %v8515_v6 = vpop.permute.xlu2 %932 }
 0x354   :  { %13879 = vst [vmem:[#allocation21_spill] sm:$0xff] %v8642_v48 }
 0x359   :  { %1688 = vperm.xlu2 %7488, %v13412_v0   ;;  %1681 = vperm.xlu1 %7487, %v8520_v8  }
 0x35a   :  { %1044 = vperm.xlu0 %7486, %v13439_v9  }
 0x35b   :  { %v1584_v1 = vpop.permute.xlu2 %1583 }
 0x35c   :  { %vm2142_vm7 = vcmp.ge.f32.partialorder %v1886_v10, %v1584_v1 }
 0x35d   :  { %v8529_v51 = vsel %vm2142_vm7, 1.0, %v13468_v27 }
 0x35e   :  { %v8533_v15 = vmul.f32 %v8529_v51, %v1886_v10 }
 0x360   :  { %13871 = vst [vmem:[#allocation13_spill] sm:$0xff] %v8533_v15 }
 0x361   :  { %1709 = vperm.xlu2 %7488, %v13411_v23   ;;  %1702 = vperm.xlu1 %7487, %v13413_v37   ;;  %v13419_v23 = vperm.slane %v8513_v7, 6  ;;  %v731_v37 = vpop.f32.mrf.mxu2 }
 0x362   :  { %1695 = vperm.xlu0 %7486, %v13414_v45   ;;  %v13420_v45 = vperm.slane %v8513_v7, 5  ;;  %v8564_v36 = vadd.f32 %v731_v37, %v8371_v14 }
 0x363   :  { %v1605_v5 = vpop.permute.xlu2 %1604  ;;  %v8544_v11 = vpop.permute.xlu1 %911 }
 0x364   :  { %vm2145_vm8 = vcmp.ge.f32.partialorder %v1889_v50, %v1605_v5  ;;  %v8546_v10 = vpop.permute.xlu0 %897  ;;  %13873 = vst [vmem:[#allocation15_spill] sm:$0xff] %v8564_v36  ;;  %v13435_v61 = vperm.slane %v8564_v36, 2  ;;  %v13436_v63 = vperm.slane %v8564_v36, 1  ;;  %v13432_v12 = vperm.slane %v8564_v36, 5 }
 0x365   :  { %v8549_v1 = vsel %vm2145_vm8, 1.0, %v13468_v27  ;;  %v13433_v52 = vperm.slane %v8564_v36, 4  ;;  %v13434_v59 = vperm.slane %v8564_v36, 3  ;;  %v13442_v16 = vperm.slane %v8564_v36, 7 }
 0x366   :  { %v8554_v0 = vmul.f32 %v8549_v1, %v1889_v50 }
 0x368   :  { %13872 = vst [vmem:[#allocation14_spill] sm:$0xff] %v8554_v0 }
 0x369   :  { %1730 = vperm.xlu2 %7488, %v13418_v13   ;;  %1723 = vperm.xlu1 %7487, %v13419_v23   ;;  %v8575_v13 = vperm.slane %v8564_v36, 0  ;;  %v734_v31 = vpop.f32.mrf.mxu2 }
 0x36a   :  { %1716 = vperm.xlu0 %7486, %v13420_v45   ;;  %v8650_v38 = vadd.f32 %v734_v31, %v8371_v14 }
 0x36b   :  { %v8566_v5 = vpop.permute.xlu2 %953  ;;  %v8568_v28 = vpop.permute.xlu1 %918  ;;  %13874 = vst [vmem:[#allocation16_spill] sm:$0xff] %v8575_v13 }
 0x36c   :  { %v8570_v50 = vpop.permute.xlu0 %904  ;;  %13880 = vst [vmem:[#allocation22_spill] sm:$0xff] %v8650_v38  ;;  %v8666_v31 = vperm.slane %v8650_v38, 0  ;;  %v13464_v29 = vperm.slane %v8650_v38, 3  ;;  %v13472_v18 = vperm.slane %v8650_v38, 6  ;;  %v13473_v62 = vperm.slane %v8650_v38, 2 }
 0x36e   :  { %13882 = vst [vmem:[#allocation24_spill] sm:$0xff] %v8666_v31 }
 0x371   :  { %1079 = vperm.xlu2 %7488, %v13435_v61   ;;  %1072 = vperm.xlu1 %7487, %v13436_v63   ;;  %v13443_v61 = vperm.slane %v8564_v36, 6  ;;  %v736_v19 = vpop.f32.mrf.mxu2 }
 0x372   :  { %1065 = vperm.xlu0 %7486, %v8575_v13  }
 0x373   :  { %v8582_v37 = vpop.permute.xlu2 %974  ;;  %v8584_v23 = vpop.permute.xlu1 %946 }
 0x374   :  { %v8586_v45 = vpop.permute.xlu0 %939 }
 0x379   :  { %1100 = vperm.xlu2 %7488, %v13432_v12   ;;  %1093 = vperm.xlu1 %7487, %v13433_v52   ;;  %v867_v12 = vrot.slane %v8396_v43, 4 }
 0x37a   :  { %1086 = vperm.xlu0 %7486, %v13434_v59   ;;  %v13441_v59 = vperm.slane %v8599_v33, 2 }
 0x37b   :  { %v8601_v24 = vpop.permute.xlu2 %995  ;;  %v1577_v40 = vpop.permute.xlu1 %1576 }
 0x37c   :  { %vm2141_vm9 = vcmp.ge.f32.partialorder %v1885_v49, %v1577_v40  ;;  %v8603_v55 = vpop.permute.xlu0 %1569  ;;  %v1888_v40 = vperm.slane %v867_v12, 0  ;;  %v13452_v12 = vperm.slane %v8599_v33, 5 }
 0x37d   :  { %v8606_v34 = vsel %vm2141_vm9, 1.0, %v13468_v27 }
 0x37e   :  { %v8610_v52 = vmul.f32 %v8606_v34, %v1885_v49 }
 0x380   :  { %13876 = vst [vmem:[#allocation18_spill] sm:$0xff] %v8610_v52 }
 0x381   :  { %1751 = vperm.xlu2 %7488, %v13441_v59   ;;  %1114 = vperm.xlu1 %7487, %v13442_v16   ;;  %v870_v59 = vrot.slane %v8396_v43, 7 }
 0x382   :  { %1107 = vperm.xlu0 %7486, %v13443_v61  }
 0x383   :  { %v8622_v49 = vpop.permute.xlu2 %1625  ;;  %v1598_v63 = vpop.permute.xlu1 %1597  ;;  %v1891_v46 = vperm.slane %v870_v59, 0 }
 0x384   :  { %vm2144_vm10 = vcmp.ge.f32.partialorder %v1888_v40, %v1598_v63  ;;  %v1591_v4 = vpop.permute.xlu0 %1590  ;;  %v869_v63 = vrot.slane %v8396_v43, 6 }
 0x385   :  { %vm2143_vm11 = vcmp.ge.f32.partialorder %v1887_v3, %v1591_v4  ;;  %v8625_v9 = vsel %vm2144_vm10, 1.0, %v13468_v27 }
 0x386   :  { %v8630_v16 = vsel %vm2143_vm11, 1.0, %v13468_v27  ;;  %v8633_v61 = vmul.f32 %v8625_v9, %v1888_v40  ;;  %v1895_v40 = vperm.slane %v873_v58, 0  ;;  %v1890_v42 = vperm.slane %v869_v63, 0 }
 0x387   :  { %v8639_v4 = vmul.f32 %v8630_v16, %v1887_v3 }
 0x388   :  { %13877 = vst [vmem:[#allocation19_spill] sm:$0xff] %v8633_v61 }
 0x389   :  { %13878 = vst [vmem:[#allocation20_spill] sm:$0xff] %v8639_v4  ;;  %1772 = vperm.xlu2 %7488, %v13452_v12   ;;  %1744 = vperm.xlu1 %7487, %v13453_v53   ;;  %v876_v53 = vrot.slane %v8449_v22, 6 }
 0x38a   :  { %1737 = vperm.xlu0 %7486, %v8642_v48  }
 0x38b   :  { %v1647_v60 = vpop.permute.xlu2 %1646  ;;  %v1619_v3 = vpop.permute.xlu1 %1618 }
 0x38c   :  { %vm2151_vm12 = vcmp.ge.f32.partialorder %v1895_v40, %v1647_v60  ;;  %vm2147_vm13 = vcmp.ge.f32.partialorder %v1891_v46, %v1619_v3  ;;  %v1612_v26 = vpop.permute.xlu0 %1611  ;;  %v13459_v60 = vperm.slane %v8599_v33, 4  ;;  %v13460_v3 = vperm.slane %v8599_v33, 3 }
 0x38d   :  { %vm2146_vm14 = vcmp.ge.f32.partialorder %v1890_v42, %v1612_v26  ;;  %v8653_v57 = vsel %vm2147_vm13, 1.0, %v13468_v27  ;;  %v8656_v12 = vsel %vm2151_vm12, 1.0, %v13468_v27 }
 0x38e   :  { %v8660_v59 = vsel %vm2146_vm14, 1.0, %v13468_v27  ;;  %v8663_v58 = vmul.f32 %v8653_v57, %v1891_v46  ;;  %v8673_v63 = vmul.f32 %v8656_v12, %v1895_v40  ;;  %v1898_v46 = vperm.slane %v876_v53, 0 }
 0x38f   :  { %v8670_v26 = vmul.f32 %v8660_v59, %v1890_v42 }
 0x390   :  { %13881 = vst [vmem:[#allocation23_spill] sm:$0xff] %v8663_v58 }
 0x391   :  { %13883 = vst [vmem:[#allocation25_spill] sm:$0xff] %v8670_v26  ;;  %1121 = vperm.xlu2 %7488, %v8666_v31   ;;  %1765 = vperm.xlu1 %7487, %v13459_v60   ;;  %v13466_v60 = vperm.slane %v8599_v33, 6  ;;  %v13476_v26 = vperm.slane %v8650_v38, 5 }
 0x392   :  { %13884 = vst [vmem:[#allocation26_spill] sm:$0xff] %v8673_v63  ;;  %1758 = vperm.xlu0 %7486, %v13460_v3  }
 0x393   :  { %v1668_v41 = vpop.permute.xlu2 %1667  ;;  %v8681_v44 = vpop.permute.xlu1 %967 }
 0x394   :  { %vm2154_vm15 = vcmp.ge.f32.partialorder %v1898_v46, %v1668_v41  ;;  %v8683_v42 = vpop.permute.xlu0 %960 }
 0x395   :  { %v8686_v40 = vsel %vm2154_vm15, 1.0, %v13468_v27 }
 0x396   :  { %v8691_v21 = vmul.f32 %v8686_v40, %v1898_v46  ;;  %v872_v46 = vrot.slane %v8449_v22, 2 }
 0x398   :  { %13885 = vst [vmem:[#allocation27_spill] sm:$0xff] %v8691_v21  ;;  %v13889_v21 = vmov 0.0  }
 0x399   :  { %1142 = vperm.xlu2 %7488, %v13464_v29   ;;  %1786 = vperm.xlu1 %7487, %v13465_v32   ;;  %v13474_v29 = vperm.slane %v8650_v38, 1  ;;  %v1894_v32 = vperm.slane %v872_v46, 0  ;;  %v871_v46 = vrot.slane %v8449_v22, 1 }
 0x39a   :  { %1779 = vperm.xlu0 %7486, %v13466_v60   ;;  %v8717_v60 = vadd.f32 %v736_v19, %v8371_v14 }
 0x39b   :  { %v8700_v41 = vpop.permute.xlu2 %1016  ;;  %v8702_v53 = vpop.permute.xlu1 %988  ;;  %v1893_v4 = vperm.slane %v871_v46, 0 }
 0x39c   :  { %13886 = vst [vmem:[#allocation28_spill] sm:$0xff] %v8700_v41  ;;  %v8704_v3 = vpop.permute.xlu0 %981 }
 0x39d   :  { %13887 = vst [vmem:[#allocation29_spill] sm:$0xff] %v8717_v60 }
 0x3a1   :  { %1163 = vperm.xlu2 %7488, %v13472_v18   ;;  %1135 = vperm.xlu1 %7487, %v13473_v62   ;;  %v875_v18 = vrot.slane %v8449_v22, 5  ;;  %v13475_v62 = vperm.slane %v8717_v60, 1 }
 0x3a2   :  { %1128 = vperm.xlu0 %7486, %v13474_v29   ;;  %v13477_v29 = vperm.slane %v8650_v38, 4 }
 0x3a3   :  { %v8719_v2 = vpop.permute.xlu2 %1037  ;;  %v1640_v27 = vpop.permute.xlu1 %1639 }
 0x3a4   :  { %13888 = vst [vmem:[#allocation30_spill] sm:$0xff] %v8719_v2  ;;  %vm2150_vm0 = vcmp.ge.f32.partialorder %v1894_v32, %v1640_v27  ;;  %v8721_v43 = vpop.permute.xlu0 %1002  ;;  %v1897_v27 = vperm.slane %v875_v18, 0  ;;  %v8752_v18 = vperm.slane %v8717_v60, 0  ;;  %v886_v2 = vrot.slane %v8599_v33, 2 }
 0x3a5   :  { %v8724_v63 = vsel %vm2150_vm0, 1.0, %v13889_v21 }
 0x3a6   :  { %v8731_v19 = vmul.f32 %v8724_v63, %v1894_v32  ;;  %13892 = vst [vmem:[#allocation33_spill] sm:$0xff] %v8752_v18 }
 0x3a8   :  { %13890 = vst [vmem:[#allocation31_spill] sm:$0xff] %v8731_v19  ;;  %v878_v19 = vrot.slane %v8513_v7, 1 }
 0x3a9   :  { %1184 = vperm.xlu2 %7488, %v13475_v62   ;;  %1156 = vperm.xlu1 %7487, %v13476_v26   ;;  %v874_v62 = vrot.slane %v8449_v22, 4 }
 0x3aa   :  { %1149 = vperm.xlu0 %7486, %v13477_v29   ;;  %v13482_v29 = vperm.slane %v8717_v60, 4  ;;  %v1901_v15 = vperm.slane %v878_v19, 0  ;;  %v13493_v19 = vperm.slane %v8717_v60, 3 }
 0x3ab   :  { %v8740_v58 = vpop.permute.xlu2 %1058  ;;  %v1661_v0 = vpop.permute.xlu1 %1660  ;;  %v1896_v48 = vperm.slane %v874_v62, 0 }
 0x3ac   :  { %13891 = vst [vmem:[#allocation32_spill] sm:$0xff] %v8740_v58  ;;  %vm2153_vm1 = vcmp.ge.f32.partialorder %v1897_v27, %v1661_v0  ;;  %v1633_v61 = vpop.permute.xlu0 %1632  ;;  %v13483_v0 = vperm.slane %v8650_v38, 7 }
 0x3ad   :  { %vm2149_vm2 = vcmp.ge.f32.partialorder %v1893_v4, %v1633_v61  ;;  %v8743_v32 = vsel %vm2153_vm1, 1.0, %v13889_v21 }
 0x3ae   :  { %v8748_v26 = vsel %vm2149_vm2, 1.0, %v13889_v21  ;;  %v8758_v61 = vmul.f32 %v8743_v32, %v1897_v27 }
 0x3af   :  { %v8755_v46 = vmul.f32 %v8748_v26, %v1893_v4 }
 0x3b0   :  { %13894 = vst [vmem:[#allocation35_spill] sm:$0xff] %v8758_v61  ;;  %v881_v61 = vrot.slane %v8513_v7, 4 }
 0x3b1   :  { %13893 = vst [vmem:[#allocation34_spill] sm:$0xff] %v8755_v46  ;;  %1205 = vperm.xlu2 %7488, %v13482_v29   ;;  %1177 = vperm.xlu1 %7487, %v8752_v18   ;;  %v877_v29 = vrot.slane %v8449_v22, 7 }
 0x3b2   :  { %1170 = vperm.xlu0 %7486, %v13483_v0   ;;  %v13492_v0 = vperm.slane %v8717_v60, 7  ;;  %v1904_v22 = vperm.slane %v881_v61, 0 }
 0x3b3   :  { %v1689_v52 = vpop.permute.xlu2 %1688  ;;  %v8766_v31 = vpop.permute.xlu1 %1009 }
 0x3b4   :  { %vm2157_vm3 = vcmp.ge.f32.partialorder %v1901_v15, %v1689_v52  ;;  %v1654_v4 = vpop.permute.xlu0 %1653  ;;  %v739_v52 = vpop.f32.mrf.mxu2 }
 0x3b5   :  { %vm2152_vm4 = vcmp.ge.f32.partialorder %v1896_v48, %v1654_v4  ;;  %v8769_v27 = vsel %vm2157_vm3, 1.0, %v13889_v21  ;;  %v13494_v4 = vperm.slane %v8717_v60, 2  ;;  %v8792_v38 = vadd.f32 %v739_v52, %v8371_v14 }
 0x3b6   :  { %13895 = vst [vmem:[#allocation36_spill] sm:$0xff] %v8769_v27  ;;  %v8774_v46 = vsel %vm2152_vm4, 1.0, %v13889_v21  ;;  %v8782_v62 = vmul.f32 %v8769_v27, %v1901_v15  ;;  %v1899_v15 = vperm.slane %v877_v29, 0  ;;  %v13499_v52 = vperm.slane %v8717_v60, 6 }
 0x3b7   :  { %v8779_v18 = vmul.f32 %v8774_v46, %v1896_v48  ;;  %13898 = vst [vmem:[#allocation39_spill] sm:$0xff] %v8792_v38  ;;  %v13498_v61 = vperm.slane %v8792_v38, 2  ;;  %vm2044_vm3 = vcmp.ge.f32.partialorder %v8379_v20, %v8546_v10  ;;  %vm2428_vm4 = vcmask 64512  }
 0x3b8   :  { %13897 = vst [vmem:[#allocation38_spill] sm:$0xff] %v8782_v62 }
 0x3b9   :  { %13896 = vst [vmem:[#allocation37_spill] sm:$0xff] %v8779_v18  ;;  %1226 = vperm.xlu2 %7488, %v13492_v0   ;;  %1198 = vperm.xlu1 %7487, %v13493_v19   ;;  %v884_v0 = vrot.slane %v8513_v7, 7 }
 0x3ba   :  { %1191 = vperm.xlu0 %7486, %v13494_v4  }
 0x3bb   :  { %v1710_v48 = vpop.permute.xlu2 %1709  ;;  %v8794_v18 = vpop.permute.xlu1 %1030 }
 0x3bc   :  { %vm2160_vm5 = vcmp.ge.f32.partialorder %v1904_v22, %v1710_v48  ;;  %v1675_v62 = vpop.permute.xlu0 %1674  ;;  %v1907_v48 = vperm.slane %v884_v0, 0 }
 0x3bd   :  { %vm2155_vm6 = vcmp.ge.f32.partialorder %v1899_v15, %v1675_v62  ;;  %v8797_v36 = vsel %vm2160_vm5, 1.0, %v13889_v21  ;;  %v13500_v62 = vperm.slane %v8717_v60, 5 }
 0x3be   :  { %13899 = vst [vmem:[#allocation40_spill] sm:$0xff] %v8797_v36  ;;  %v8801_v19 = vsel %vm2155_vm6, 1.0, %v13889_v21  ;;  %v8809_v29 = vmul.f32 %v8797_v36, %v1904_v22 }
 0x3bf   :  { %v8806_v4 = vmul.f32 %v8801_v19, %v1899_v15 }
 0x3c0   :  { %13901 = vst [vmem:[#allocation42_spill] sm:$0xff] %v8809_v29  ;;  %v13504_v29 = vperm.slane %v8792_v38, 5 }
 0x3c1   :  { %13900 = vst [vmem:[#allocation41_spill] sm:$0xff] %v8806_v4  ;;  %1247 = vperm.xlu2 %7488, %v13498_v61   ;;  %1219 = vperm.xlu1 %7487, %v13499_v52   ;;  %v13505_v61 = vperm.slane %v8792_v38, 1  ;;  %v741_v52 = vpop.f32.mrf.mxu2 }
 0x3c2   :  { %1212 = vperm.xlu0 %7486, %v13500_v62   ;;  %v8831_v62 = vperm.slane %v8792_v38, 0 }
 0x3c3   :  { %v1731_v13 = vpop.permute.xlu2 %1730  ;;  %v8818_v27 = vpop.permute.xlu1 %1051 }
 0x3c4   :  { %13902 = vst [vmem:[#allocation43_spill] sm:$0xff] %v8818_v27  ;;  %vm2163_vm7 = vcmp.ge.f32.partialorder %v1907_v48, %v1731_v13  ;;  %v8820_v15 = vpop.permute.xlu0 %1023  ;;  %v8839_v13 = vadd.f32 %v741_v52, %v8371_v14 }
 0x3c5   :  { %v8823_v22 = vsel %vm2163_vm7, 1.0, %v13889_v21  ;;  %13905 = vst [vmem:[#allocation46_spill] sm:$0xff] %v8831_v62 }
 0x3c6   :  { %13903 = vst [vmem:[#allocation44_spill] sm:$0xff] %v8823_v22  ;;  %v8828_v4 = vmul.f32 %v8823_v22, %v1907_v48  ;;  %v8849_v22 = vperm.slane %v8839_v13, 0 }
 0x3c7   :  { %13906 = vst [vmem:[#allocation47_spill] sm:$0xff] %v8839_v13 }
 0x3c8   :  { %13904 = vst [vmem:[#allocation45_spill] sm:$0xff] %v8828_v4  ;;  %v880_v4 = vrot.slane %v8513_v7, 3 }
 0x3c9   :  { %1268 = vperm.xlu2 %7488, %v13504_v29   ;;  %1240 = vperm.xlu1 %7487, %v13505_v61   ;;  %13910 = vst [vmem:[#allocation51_spill] sm:$0xff] %v8849_v22  ;;  %v13513_v29 = vperm.slane %v8792_v38, 4  ;;  %v879_v61 = vrot.slane %v8513_v7, 2 }
 0x3ca   :  { %1233 = vperm.xlu0 %7486, %v8831_v62   ;;  %v13514_v62 = vperm.slane %v8792_v38, 3  ;;  %v1903_v52 = vperm.slane %v880_v4, 0  ;;  %v13517_v4 = vperm.slane %v8839_v13, 3 }
 0x3cb   :  { %v8841_v0 = vpop.permute.xlu2 %1079  ;;  %v8843_v60 = vpop.permute.xlu1 %1681  ;;  %v1902_v58 = vperm.slane %v879_v61, 0  ;;  %v13519_v61 = vperm.slane %v8792_v38, 6 }
 0x3cc   :  { %13907 = vst [vmem:[#allocation48_spill] sm:$0xff] %v8841_v0  ;;  %v8845_v48 = vpop.permute.xlu0 %1044 }
 0x3cd   :  { %13908 = vst [vmem:[#allocation49_spill] sm:$0xff] %v8843_v60 }
 0x3ce   :  { %13909 = vst [vmem:[#allocation50_spill] sm:$0xff] %v8845_v48 }
 0x3d1   :  { %1289 = vperm.xlu2 %7488, %v8849_v22   ;;  %1261 = vperm.xlu1 %7487, %v13513_v29   ;;  %v883_v22 = vrot.slane %v8513_v7, 6  ;;  %v882_v29 = vrot.slane %v8513_v7, 5  ;;  %v1910_v7 = vperm.slane %v886_v2, 0 }
 0x3d2   :  { %1254 = vperm.xlu0 %7486, %v13514_v62   ;;  %v13518_v62 = vperm.slane %v8792_v38, 7 }
 0x3d3   :  { %v8859_v0 = vpop.permute.xlu2 %1100  ;;  %v1703_v36 = vpop.permute.xlu1 %1702 }
 0x3d4   :  { %13911 = vst [vmem:[#allocation52_spill] sm:$0xff] %v8859_v0  ;;  %vm2159_vm8 = vcmp.ge.f32.partialorder %v1903_v52, %v1703_v36  ;;  %v1696_v8 = vpop.permute.xlu0 %1695  ;;  %v1906_v0 = vperm.slane %v883_v22, 0 }
 0x3d5   :  { %vm2158_vm9 = vcmp.ge.f32.partialorder %v1902_v58, %v1696_v8  ;;  %v8862_v60 = vsel %vm2159_vm8, 1.0, %v13889_v21 }
 0x3d6   :  { %v8868_v48 = vsel %vm2158_vm9, 1.0, %v13889_v21  ;;  %v8873_v36 = vmul.f32 %v8862_v60, %v1903_v52  ;;  %v1905_v52 = vperm.slane %v882_v29, 0  ;;  %v13520_v29 = vperm.slane %v8839_v13, 6 }
 0x3d7   :  { %v8876_v8 = vmul.f32 %v8868_v48, %v1902_v58 }
 0x3d8   :  { %13912 = vst [vmem:[#allocation53_spill] sm:$0xff] %v8873_v36 }
 0x3d9   :  { %13913 = vst [vmem:[#allocation54_spill] sm:$0xff] %v8876_v8  ;;  %1310 = vperm.xlu2 %7488, %v13517_v4   ;;  %1282 = vperm.xlu1 %7487, %v13518_v62   ;;  %v889_v62 = vrot.slane %v8599_v33, 5 }
 0x3da   :  { %1275 = vperm.xlu0 %7486, %v13519_v61   ;;  %v13524_v61 = vperm.slane %v8839_v13, 1 }
 0x3db   :  { %v1752_v27 = vpop.permute.xlu2 %1751  ;;  %v1724_v41 = vpop.permute.xlu1 %1723 }
 0x3dc   :  { %vm2166_vm10 = vcmp.ge.f32.partialorder %v1910_v7, %v1752_v27  ;;  %vm2162_vm11 = vcmp.ge.f32.partialorder %v1906_v0, %v1724_v41  ;;  %v1717_v58 = vpop.permute.xlu0 %1716  ;;  %v13521_v41 = vperm.slane %v8839_v13, 2 }
 0x3dd   :  { %vm2161_vm12 = vcmp.ge.f32.partialorder %v1905_v52, %v1717_v58  ;;  %v8886_v8 = vsel %vm2162_vm11, 1.0, %v13889_v21  ;;  %v8889_v4 = vsel %vm2166_vm10, 1.0, %v13889_v21  ;;  %v744_v58 = vpop.f32.mrf.mxu2 }
 0x3de   :  { %13914 = vst [vmem:[#allocation55_spill] sm:$0xff] %v8886_v8  ;;  %v8893_v36 = vsel %vm2161_vm12, 1.0, %v13889_v21  ;;  %v8896_v2 = vmul.f32 %v8886_v8, %v1906_v0  ;;  %v8904_v22 = vmul.f32 %v8889_v4, %v1910_v7  ;;  %v1913_v0 = vperm.slane %v889_v62, 0 }
 0x3df   :  { %13915 = vst [vmem:[#allocation56_spill] sm:$0xff] %v8889_v4  ;;  %v8901_v27 = vmul.f32 %v8893_v36, %v1905_v52  ;;  %v13527_v62 = vperm.slane %v8839_v13, 4  ;;  %vm2140_vm12 = vcmp.ge.f32.partialorder %v8410_v39, %v8603_v55  ;;  %v2720_v39 = vsel %vm2428_vm4, %v8606_v34, 0.0 }
 0x3e0   :  { %13916 = vst [vmem:[#allocation57_spill] sm:$0xff] %v8896_v2  ;;  %v8914_v2 = vadd.f32 %v744_v58, %v8371_v14  ;;  %v2729_v34 = vsel %vm2428_vm4, %v8625_v9, 0.0  ;;  %v2738_v9 = vsel %vm2428_vm4, %v8653_v57, 0.0 }
 0x3e1   :  { %13917 = vst [vmem:[#allocation58_spill] sm:$0xff] %v8901_v27  ;;  %1331 = vperm.xlu2 %7488, %v13520_v29   ;;  %1303 = vperm.xlu1 %7487, %v13521_v41   ;;  %v13526_v41 = vperm.slane %v8839_v13, 5 }
 0x3e2   :  { %13918 = vst [vmem:[#allocation59_spill] sm:$0xff] %v8904_v22  ;;  %1296 = vperm.xlu0 %7486, %v13524_v61   ;;  %v13525_v29 = vperm.slane %v8914_v2, 1  ;;  %v13530_v61 = vperm.slane %v8914_v2, 4  ;;  %v13537_v4 = vperm.slane %v8914_v2, 3 }
 0x3e3   :  { %13919 = vst [vmem:[#allocation60_spill] sm:$0xff] %v8914_v2  ;;  %v1773_v52 = vpop.permute.xlu2 %1772  ;;  %v8916_v27 = vpop.permute.xlu1 %1072 }
 0x3e4   :  { %13920 = vst [vmem:[#allocation61_spill] sm:$0xff] %v8916_v27  ;;  %vm2169_vm13 = vcmp.ge.f32.partialorder %v1913_v0, %v1773_v52  ;;  %v8918_v7 = vpop.permute.xlu0 %1065  ;;  %v13541_v27 = vperm.slane %v8914_v2, 6 }
 0x3e5   :  { %13921 = vst [vmem:[#allocation62_spill] sm:$0xff] %v8918_v7  ;;  %v8921_v22 = vsel %vm2169_vm13, 1.0, %v13889_v21  ;;  %vm2052_vm13 = vcmp.ge.f32.partialorder %v8421_v56, %v8566_v5 }
 0x3e6   :  { %13922 = vst [vmem:[#allocation63_spill] sm:$0xff] %v8921_v22  ;;  %v8926_v38 = vmul.f32 %v8921_v22, %v1913_v0  ;;  %v8941_v0 = vperm.slane %v8914_v2, 0  ;;  %v13536_v22 = vperm.slane %v8914_v2, 7 }
 0x3e8   :  { %13923 = vst [vmem:[#allocation64_spill] sm:$0xff] %v8926_v38  ;;  %v13531_v38 = vperm.slane %v8839_v13, 7 }
 0x3e9   :  { %1352 = vperm.xlu2 %7488, %v13525_v29   ;;  %1324 = vperm.xlu1 %7487, %v13526_v41   ;;  %13926 = vst [vmem:[#allocation67_spill] sm:$0xff] %v8941_v0 }
 0x3ea   :  { %1317 = vperm.xlu0 %7486, %v13527_v62   ;;  %v885_v62 = vrot.slane %v8599_v33, 1 }
 0x3eb   :  { %v8935_v58 = vpop.permute.xlu1 %1093 }
 0x3ec   :  { %13924 = vst [vmem:[#allocation65_spill] sm:$0xff] %v8935_v58  ;;  %v8937_v52 = vpop.permute.xlu0 %1086  ;;  %v746_v58 = vpop.f32.mrf.mxu2 }
 0x3ed   :  { %13925 = vst [vmem:[#allocation66_spill] sm:$0xff] %v8937_v52  ;;  %v13538_v52 = vperm.slane %v8914_v2, 2 }
 0x3f1   :  { %1373 = vperm.xlu2 %7488, %v13530_v61   ;;  %1345 = vperm.xlu1 %7487, %v8941_v0   ;;  %v1909_v61 = vperm.slane %v885_v62, 0  ;;  %v8966_v0 = vpop.permute.xlu2 %1121  ;;  %v887_v62 = vrot.slane %v8599_v33, 3 }
 0x3f2   :  { %1338 = vperm.xlu0 %7486, %v13531_v38   ;;  %v8964_v38 = vadd.f32 %v746_v58, %v8371_v14  ;;  %13930 = vst [vmem:[#allocation71_spill] sm:$0xff] %v8966_v0 }
 0x3f3   :  { %v8949_v29 = vpop.permute.xlu1 %1114 }
 0x3f4   :  { %13927 = vst [vmem:[#allocation68_spill] sm:$0xff] %v8949_v29  ;;  %v8951_v41 = vpop.permute.xlu0 %1107 }
 0x3f5   :  { %13928 = vst [vmem:[#allocation69_spill] sm:$0xff] %v8951_v41 }
 0x3f6   :  { %13929 = vst [vmem:[#allocation70_spill] sm:$0xff] %v8964_v38 }
 0x3f9   :  { %1394 = vperm.xlu2 %7488, %v13536_v22   ;;  %1366 = vperm.xlu1 %7487, %v13537_v4   ;;  %v888_v22 = vrot.slane %v8599_v33, 4  ;;  %v13540_v4 = vperm.slane %v8964_v38, 2  ;;  %v8987_v8 = vpop.permute.xlu2 %1142 }
 0x3fa   :  { %1359 = vperm.xlu0 %7486, %v13538_v52   ;;  %v13542_v52 = vperm.slane %v8914_v2, 5  ;;  %13933 = vst [vmem:[#allocation74_spill] sm:$0xff] %v8987_v8  ;;  %v9006_v2 = vperm.slane %v8964_v38, 0 }
 0x3fb   :  { %v1745_v13 = vpop.permute.xlu1 %1744 }
 0x3fc   :  { %vm2165_vm14 = vcmp.ge.f32.partialorder %v1909_v61, %v1745_v13  ;;  %v8968_v29 = vpop.permute.xlu0 %1737  ;;  %v1912_v13 = vperm.slane %v888_v22, 0  ;;  %v13549_v22 = vperm.slane %v8964_v38, 1  ;;  %13937 = vst [vmem:[#allocation78_spill] sm:$0xff] %v9006_v2 }
 0x3fd   :  { %13931 = vst [vmem:[#allocation72_spill] sm:$0xff] %v8968_v29  ;;  %v8971_v41 = vsel %vm2165_vm14, 1.0, %v13889_v21  ;;  %v1911_v29 = vperm.slane %v887_v62, 0 }
 0x3fe   :  { %v8978_v58 = vmul.f32 %v8971_v41, %v1909_v61 }
 0x400   :  { %13932 = vst [vmem:[#allocation73_spill] sm:$0xff] %v8978_v58  ;;  %v891_v58 = vrot.slane %v8599_v33, 7 }
 0x401   :  { %1415 = vperm.xlu2 %7488, %v13540_v4   ;;  %1387 = vperm.xlu1 %7487, %v13541_v27   ;;  %v890_v4 = vrot.slane %v8599_v33, 6 }
 0x402   :  { %1380 = vperm.xlu0 %7486, %v13542_v52   ;;  %v13548_v52 = vperm.slane %v8964_v38, 5  ;;  %v1915_v33 = vperm.slane %v891_v58, 0  ;;  %v13552_v58 = vperm.slane %v8964_v38, 4 }
 0x403   :  { %v1766_v0 = vpop.permute.xlu1 %1765 }
 0x404   :  { %vm2168_vm15 = vcmp.ge.f32.partialorder %v1912_v13, %v1766_v0  ;;  %v1759_v7 = vpop.permute.xlu0 %1758 }
 0x405   :  { %vm2167_vm0 = vcmp.ge.f32.partialorder %v1911_v29, %v1759_v7  ;;  %v8990_v61 = vsel %vm2168_vm15, 1.0, %v13889_v21  ;;  %v749_v7 = vpop.f32.mrf.mxu2 }
 0x406   :  { %13934 = vst [vmem:[#allocation75_spill] sm:$0xff] %v8990_v61  ;;  %v8995_v27 = vsel %vm2167_vm0, 1.0, %v13889_v21  ;;  %v9000_v0 = vmul.f32 %v8990_v61, %v1912_v13  ;;  %v9014_v8 = vadd.f32 %v749_v7, %v8371_v14 }
 0x407   :  { %v9003_v62 = vmul.f32 %v8995_v27, %v1911_v29 }
 0x408   :  { %13935 = vst [vmem:[#allocation76_spill] sm:$0xff] %v9000_v0  ;;  %v1914_v0 = vperm.slane %v890_v4, 0 }
 0x409   :  { %13936 = vst [vmem:[#allocation77_spill] sm:$0xff] %v9003_v62  ;;  %1436 = vperm.xlu2 %7488, %v13548_v52   ;;  %1408 = vperm.xlu1 %7487, %v13549_v22   ;;  %v9022_v52 = vpop.permute.xlu2 %1163  ;;  %v9025_v22 = vperm.slane %v9014_v8, 0 }
 0x40a   :  { %1401 = vperm.xlu0 %7486, %v9006_v2   ;;  %13938 = vst [vmem:[#allocation79_spill] sm:$0xff] %v9014_v8 }
 0x40b   :  { %v1787_v13 = vpop.permute.xlu1 %1786  ;;  %13939 = vst [vmem:[#allocation80_spill] sm:$0xff] %v9022_v52  ;;  %v13562_v52 = vperm.slane %v9014_v8, 2 }
 0x40c   :  { %vm2171_vm1 = vcmp.ge.f32.partialorder %v1915_v33, %v1787_v13  ;;  %v1780_v29 = vpop.permute.xlu0 %1779  ;;  %13940 = vst [vmem:[#allocation81_spill] sm:$0xff] %v9025_v22  ;;  %v13553_v13 = vperm.slane %v8964_v38, 3 }
 0x40d   :  { %vm2170_vm2 = vcmp.ge.f32.partialorder %v1914_v0, %v1780_v29  ;;  %v9017_v62 = vsel %vm2171_vm1, 1.0, %v13889_v21 }
 0x40e   :  { %v9020_v61 = vsel %vm2170_vm2, 1.0, %v13889_v21  ;;  %v9029_v7 = vmul.f32 %v9017_v62, %v1915_v33  ;;  %v13556_v33 = vperm.slane %v9014_v8, 3 }
 0x40f   :  { %v9032_v4 = vmul.f32 %v9020_v61, %v1914_v0  ;;  %v13558_v0 = vperm.slane %v8964_v38, 6 }
 0x410   :  { %13941 = vst [vmem:[#allocation82_spill] sm:$0xff] %v9029_v7  ;;  %v13557_v7 = vperm.slane %v8964_v38, 7 }
 0x411   :  { %13942 = vst [vmem:[#allocation83_spill] sm:$0xff] %v9032_v4  ;;  %1457 = vperm.xlu2 %7488, %v9025_v22   ;;  %1429 = vperm.xlu1 %7487, %v13552_v58   ;;  %v9047_v4 = vpop.permute.xlu2 %1184  ;;  %v13561_v22 = vperm.slane %v9014_v8, 6 }
 0x412   :  { %1422 = vperm.xlu0 %7486, %v13553_v13   ;;  %13945 = vst [vmem:[#allocation86_spill] sm:$0xff] %v9047_v4  ;;  %v13563_v4 = vperm.slane %v9014_v8, 1 }
 0x413   :  { %v9040_v29 = vpop.permute.xlu1 %1135 }
 0x414   :  { %13943 = vst [vmem:[#allocation84_spill] sm:$0xff] %v9040_v29  ;;  %v9042_v2 = vpop.permute.xlu0 %1128 }
 0x415   :  { %13944 = vst [vmem:[#allocation85_spill] sm:$0xff] %v9042_v2  ;;  %v751_v2 = vpop.f32.mrf.mxu2 }
 0x419   :  { %1478 = vperm.xlu2 %7488, %v13556_v33   ;;  %1450 = vperm.xlu1 %7487, %v13557_v7   ;;  %v9069_v33 = vadd.f32 %v751_v2, %v8371_v14  ;;  %v9071_v7 = vpop.permute.xlu2 %1205 }
 0x41a   :  { %1443 = vperm.xlu0 %7486, %v13558_v0   ;;  %13949 = vst [vmem:[#allocation90_spill] sm:$0xff] %v9071_v7 }
 0x41b   :  { %v9055_v58 = vpop.permute.xlu1 %1156  ;;  %13948 = vst [vmem:[#allocation89_spill] sm:$0xff] %v9069_v33  ;;  %v9094_v7 = vperm.slane %v9069_v33, 0 }
 0x41c   :  { %13946 = vst [vmem:[#allocation87_spill] sm:$0xff] %v9055_v58  ;;  %v9057_v13 = vpop.permute.xlu0 %1149  ;;  %v13565_v58 = vperm.slane %v9014_v8, 5 }
 0x41d   :  { %13947 = vst [vmem:[#allocation88_spill] sm:$0xff] %v9057_v13  ;;  %v13564_v13 = vperm.slane %v9069_v33, 1 }
 0x41e   :  { %13955 = vst [vmem:[#allocation96_spill] sm:$0xff] %v9094_v7 }
 0x421   :  { %1499 = vperm.xlu2 %7488, %v13561_v22   ;;  %1471 = vperm.xlu1 %7487, %v13562_v52   ;;  %v13566_v22 = vperm.slane %v9014_v8, 4  ;;  %v9088_v2 = vpop.permute.xlu2 %1226 }
 0x422   :  { %1464 = vperm.xlu0 %7486, %v13563_v4   ;;  %13953 = vst [vmem:[#allocation94_spill] sm:$0xff] %v9088_v2  ;;  %v13567_v4 = vperm.slane %v9069_v33, 4  ;;  %v13573_v2 = vperm.slane %v9069_v33, 7 }
 0x423   :  { %v9073_v0 = vpop.permute.xlu1 %1177 }
 0x424   :  { %13950 = vst [vmem:[#allocation91_spill] sm:$0xff] %v9073_v0  ;;  %v9075_v38 = vpop.permute.xlu0 %1170  ;;  %v13568_v0 = vperm.slane %v9014_v8, 7 }
 0x425   :  { %13951 = vst [vmem:[#allocation92_spill] sm:$0xff] %v9075_v38 }
 0x429   :  { %1520 = vperm.xlu2 %7488, %v13564_v13   ;;  %1492 = vperm.xlu1 %7487, %v13565_v58   ;;  %v9104_v58 = vpop.permute.xlu2 %1247 }
 0x42a   :  { %1485 = vperm.xlu0 %7486, %v13566_v22   ;;  %13957 = vst [vmem:[#allocation98_spill] sm:$0xff] %v9104_v58 }
 0x42b   :  { %v9086_v14 = vpop.permute.xlu1 %1198 }
 0x42c   :  { %13952 = vst [vmem:[#allocation93_spill] sm:$0xff] %v9086_v14  ;;  %v9090_v52 = vpop.permute.xlu0 %1191  ;;  %v13574_v14 = vperm.slane %v9069_v33, 3 }
 0x42d   :  { %13954 = vst [vmem:[#allocation95_spill] sm:$0xff] %v9090_v52  ;;  %v13575_v52 = vperm.slane %v9069_v33, 2 }
 0x431   :  { %1541 = vperm.xlu2 %7488, %v13567_v4   ;;  %1513 = vperm.xlu1 %7487, %v9094_v7   ;;  %v13576_v4 = vperm.slane %v9069_v33, 6  ;;  %v13579_v7 = vperm.slane %v9069_v33, 5  ;;  %v9121_v8 = vpop.permute.xlu2 %1268  ;;  %v781_v33 = vrot.slane %v8374_v17, 2 }
 0x432   :  { %1506 = vperm.xlu0 %7486, %v13568_v0   ;;  %13960 = vst [vmem:[#allocation101_spill] sm:$0xff] %v9121_v8 }
 0x433   :  { %v9102_v13 = vpop.permute.xlu1 %1219 }
 0x434   :  { %13956 = vst [vmem:[#allocation97_spill] sm:$0xff] %v9102_v13  ;;  %v9106_v22 = vpop.permute.xlu0 %1212 }
 0x435   :  { %13958 = vst [vmem:[#allocation99_spill] sm:$0xff] %v9106_v22 }
 0x439   :  { %1562 = vperm.xlu2 %7488, %v13573_v2   ;;  %1534 = vperm.xlu1 %7487, %v13574_v14   ;;  %v9131_v14 = vpop.permute.xlu2 %1289 }
 0x43a   :  { %1527 = vperm.xlu0 %7486, %v13575_v52   ;;  %13963 = vst [vmem:[#allocation104_spill] sm:$0xff] %v9131_v14  ;;  %v780_v14 = vrot.slane %v8374_v17, 1 }
 0x43b   :  { %v9118_v0 = vpop.permute.xlu1 %1240 }
 0x43c   :  { %13959 = vst [vmem:[#allocation100_spill] sm:$0xff] %v9118_v0  ;;  %v9123_v58 = vpop.permute.xlu0 %1233 }
 0x43d   :  { %13961 = vst [vmem:[#allocation102_spill] sm:$0xff] %v9123_v58 }
 0x441   :  { %1555 = vperm.xlu1 %7487, %v13576_v4   ;;  %v9137_v0 = vpop.permute.xlu2 %1310  ;;  %v782_v4 = vrot.slane %v8374_v17, 3 }
 0x442   :  { %1548 = vperm.xlu0 %7486, %v13579_v7   ;;  %13966 = vst [vmem:[#allocation107_spill] sm:$0xff] %v9137_v0 }
 0x443   :  { %v9129_v2 = vpop.permute.xlu1 %1261  ;;  %v9155_v0 = vperm.slane %v782_v4, 0  ;;  %v785_v4 = vrot.slane %v8374_v17, 6 }
 0x444   :  { %13962 = vst [vmem:[#allocation103_spill] sm:$0xff] %v9129_v2  ;;  %v9133_v52 = vpop.permute.xlu0 %1254  ;;  %v9148_v2 = vsel %vm2044_vm3, 1.0, %v13889_v21 }
 0x445   :  { %13964 = vst [vmem:[#allocation105_spill] sm:$0xff] %v9133_v52  ;;  %v2429_v10 = vsel %vm2428_vm4, %v9148_v2, 0.0  ;;  %vm2047_vm5 = vcmp.ge.f32.partialorder %v9155_v0, %v8568_v28  ;;  %v9189_v38 = vperm.slane %v785_v4, 0  ;;  %v786_v4 = vrot.slane %v8374_v17, 7 }
 0x447   :  { %vm2050_vm9 = vcmp.ge.f32.partialorder %v9189_v38, %v8586_v45 }
 0x449   :  { %v9151_v8 = vpop.permute.xlu2 %1331 }
 0x44a   :  { %13969 = vst [vmem:[#allocation110_spill] sm:$0xff] %v9151_v8  ;;  %v783_v8 = vrot.slane %v8374_v17, 4 }
 0x44b   :  { %v9135_v13 = vpop.permute.xlu1 %1282 }
 0x44c   :  { %13965 = vst [vmem:[#allocation106_spill] sm:$0xff] %v9135_v13  ;;  %v9139_v22 = vpop.permute.xlu0 %1275 }
 0x44d   :  { %13967 = vst [vmem:[#allocation108_spill] sm:$0xff] %v9139_v22  ;;  %v9159_v22 = vperm.slane %v781_v33, 0  ;;  %v784_v33 = vrot.slane %v8374_v17, 5 }
 0x44f   :  { %vm2046_vm6 = vcmp.ge.f32.partialorder %v9159_v22, %v8544_v11  ;;  %v9181_v11 = vperm.slane %v783_v8, 0 }
 0x451   :  { %v9183_v52 = vpop.permute.xlu2 %1352  ;;  %vm2048_vm8 = vcmp.ge.f32.partialorder %v9181_v11, %v8501_v35 }
 0x452   :  { %13972 = vst [vmem:[#allocation113_spill] sm:$0xff] %v9183_v52  ;;  %v7169_v52 = vsel %vm2050_vm9, 1.0, %v13889_v21 }
 0x453   :  { %v9145_v7 = vpop.permute.xlu1 %1303  ;;  %v2447_v45 = vsel %vm2428_vm4, %v7169_v52, 0.0 }
 0x454   :  { %13968 = vst [vmem:[#allocation109_spill] sm:$0xff] %v9145_v7  ;;  %v9153_v13 = vpop.permute.xlu0 %1296  ;;  %v9163_v7 = vperm.slane %v780_v14, 0 }
 0x455   :  { %13970 = vst [vmem:[#allocation111_spill] sm:$0xff] %v9153_v13  ;;  %v9172_v13 = vsel %vm2047_vm5, 1.0, %v13889_v21 }
 0x456   :  { %vm2045_vm7 = vcmp.ge.f32.partialorder %v9163_v7, %v8570_v50  ;;  %v2438_v50 = vsel %vm2428_vm4, %v9172_v13, 0.0 }
 0x457   :  { %v7164_v14 = vsel %vm2045_vm7, 1.0, %v13889_v21  ;;  %vm2060_vm7 = vcmp.ge.f32.partialorder %v8484_v47, %v8766_v31  ;;  %v794_v31 = vrot.slane %v8480_v30, 1 }
 0x458   :  { %v2432_v8 = vsel %vm2428_vm4, %v7164_v14, 0.0 }
 0x45b   :  { %v9178_v28 = vpop.permute.xlu1 %1324 }
 0x45c   :  { %13971 = vst [vmem:[#allocation112_spill] sm:$0xff] %v9178_v28  ;;  %v9185_v58 = vpop.permute.xlu0 %1317  ;;  %v9195_v28 = vperm.slane %v784_v33, 0  ;;  %v9208_v33 = vperm.slane %v786_v4, 0 }
 0x45d   :  { %13973 = vst [vmem:[#allocation114_spill] sm:$0xff] %v9185_v58 }
 0x45e   :  { %vm2049_vm10 = vcmp.ge.f32.partialorder %v9195_v28, %v8515_v6  ;;  %vm2051_vm11 = vcmp.ge.f32.partialorder %v9208_v33, %v8584_v23  ;;  %v9216_v6 = vpop.permute.xlu2 %1373 }
 0x45f   :  { %v9206_v35 = vsel %vm2049_vm10, 1.0, %v13889_v21  ;;  %13975 = vst [vmem:[#allocation116_spill] sm:$0xff] %v9216_v6  ;;  %v7170_v4 = vsel %vm2051_vm11, 1.0, %v13889_v21 }
 0x460   :  { %v2444_v17 = vsel %vm2428_vm4, %v9206_v35, 0.0 }
 0x462   :  { %2430 = vadd.xlane.f32.xlu2 %v2429_v10  ;;  %v9176_v10 = vsel %vm2046_vm6, 1.0, %v13889_v21  ;;  %vm2148_vm6 = vcmp.ge.f32.partialorder %v8452_v25, %v8622_v49 }
 0x463   :  { %v2435_v29 = vsel %vm2428_vm4, %v9176_v10, 0.0  ;;  %v9211_v58 = vpop.permute.xlu1 %1345 }
 0x464   :  { %13974 = vst [vmem:[#allocation115_spill] sm:$0xff] %v9211_v58  ;;  %v2450_v58 = vsel %vm2428_vm4, %v7170_v4, 0.0 }
 0x466   :  { %v9235_v55 = vpop.permute.xlu2 %1394 }
 0x467   :  { %13977 = vst [vmem:[#allocation118_spill] sm:$0xff] %v9235_v55  ;;  %v2813_v55 = vmul.f32 %v9148_v2, %v8379_v20  ;;  %v2744_v20 = vsel %vm2428_vm4, %v8748_v26, 0.0  ;;  %v2759_v26 = vsel %vm2428_vm4, %v8686_v40, 0.0 }
 0x46a   :  { %2439 = vadd.xlane.f32.xlu2 %v2438_v50  ;;  %v7167_v50 = vsel %vm2048_vm8, 1.0, %v13889_v21 }
 0x46b   :  { %2436 = vadd.xlane.f32.xlu1 %v2435_v29  ;;  %v2441_v29 = vsel %vm2428_vm4, %v7167_v50, 0.0  ;;  %v9233_v6 = vpop.permute.xlu1 %1366 }
 0x46c   :  { %2433 = vadd.xlane.f32.xlu0 %v2432_v8  ;;  %v9218_v8 = vpop.permute.xlu0 %1338 }
 0x472   :  { %2442 = vadd.xlane.f32.xlu2 %v2441_v29  ;;  %v9226_v29 = vsel %vm2140_vm12, 1.0, %v13889_v21 }
 0x473   :  { %2448 = vadd.xlane.f32.xlu1 %v2447_v45  ;;  %13976 = vst [vmem:[#allocation117_spill] sm:$0xff] %v9226_v29  ;;  %v2717_v23 = vsel %vm2428_vm4, %v9226_v29, 0.0  ;;  %v2723_v45 = vsel %vm2428_vm4, %v8529_v51, 0.0  ;;  %v9245_v51 = vpop.permute.xlu1 %1387  ;;  %v9247_v29 = vpop.permute.xlu2 %1415 }
 0x474   :  { %2445 = vadd.xlane.f32.xlu0 %v2444_v17  ;;  %v9237_v17 = vpop.permute.xlu0 %1359  ;;  %13978 = vst [vmem:[#allocation119_spill] sm:$0xff] %v9247_v29 }
 0x47a   :  { %2451 = vadd.xlane.f32.xlu2 %v2450_v58  ;;  %v2726_v58 = vsel %vm2428_vm4, %v8630_v16, 0.0  ;;  %v2814_v16 = vmul.f32 %v7164_v14, %v9163_v7  ;;  %v2815_v7 = vmul.f32 %v9176_v10, %v9159_v22  ;;  %v787_v22 = vrot.slane %v8418_v54, 1 }
 0x47b   :  { %2718 = vadd.xlane.f32.xlu1 %v2717_v23  ;;  %v2732_v23 = vsel %vm2428_vm4, %v8549_v1, 0.0  ;;  %v2941_v1 = vsel %vm2428_vm4, %v2813_v55, 0.0  ;;  %v9263_v29 = vpop.permute.xlu2 %1436  ;;  %v2820_v10 = vmul.f32 %v7170_v4, %v9208_v33  ;;  %v791_v33 = vrot.slane %v8418_v54, 5 }
 0x47c   :  { %2724 = vadd.xlane.f32.xlu0 %v2723_v45  ;;  %v9249_v45 = vpop.permute.xlu0 %1380  ;;  %v2947_v14 = vsel %vm2428_vm4, %v2815_v7, 0.0 }
 0x47d   :  { %v2962_v5 = vsel %vm2428_vm4, %v2820_v10, 0.0  ;;  %v793_v10 = vrot.slane %v8418_v54, 7 }
 0x482   :  { %2721 = vadd.xlane.f32.xlu2 %v2720_v39  ;;  %v2735_v39 = vsel %vm2428_vm4, %v8660_v59, 0.0  ;;  %v2944_v59 = vsel %vm2428_vm4, %v2814_v16, 0.0 }
 0x483   :  { %2727 = vadd.xlane.f32.xlu1 %v2726_v58  ;;  %v2816_v58 = vmul.f32 %v9172_v13, %v9155_v0  ;;  %v2817_v13 = vmul.f32 %v7167_v50, %v9181_v11  ;;  %v2819_v0 = vmul.f32 %v7169_v52, %v9189_v38  ;;  %v788_v38 = vrot.slane %v8418_v54, 2 }
 0x484   :  { %2733 = vadd.xlane.f32.xlu0 %v2732_v23  ;;  %v9261_v23 = vpop.permute.xlu1 %1408  ;;  %v9265_v2 = vpop.permute.xlu0 %1401  ;;  %v2818_v52 = vmul.f32 %v9206_v35, %v9195_v28  ;;  %v789_v11 = vrot.slane %v8418_v54, 3  ;;  %v9293_v50 = vsel %vm2052_vm13, 1.0, %v13889_v21 }
 0x485   :  { %v2950_v55 = vsel %vm2428_vm4, %v2816_v58, 0.0  ;;  %v2953_v57 = vsel %vm2428_vm4, %v2817_v13, 0.0  ;;  %v2959_v16 = vsel %vm2428_vm4, %v2819_v0, 0.0  ;;  %v9295_v58 = vperm.slane %v788_v38, 0 }
 0x486   :  { %v2453_v28 = vsel %vm2428_vm4, %v9293_v50, 0.0  ;;  %v792_v0 = vrot.slane %v8418_v54, 6 }
 0x487   :  { %vm2054_vm14 = vcmp.ge.f32.partialorder %v9295_v58, %v8681_v44  ;;  %v790_v44 = vrot.slane %v8418_v54, 4 }
 0x488   :  { %v9320_v13 = vsel %vm2054_vm14, 1.0, %v13889_v21 }
 0x48a   :  { %2730 = vadd.xlane.f32.xlu2 %v2729_v34 }
 0x48b   :  { %2736 = vadd.xlane.f32.xlu1 %v2735_v39  ;;  %v9279_v39 = vpop.permute.xlu2 %1457 }
 0x48c   :  { %2942 = vadd.xlane.f32.xlu0 %v2941_v1  ;;  %v9276_v34 = vpop.permute.xlu1 %1429  ;;  %v9281_v1 = vpop.permute.xlu0 %1422 }
 0x492   :  { %2739 = vadd.xlane.f32.xlu2 %v2738_v9  ;;  %v2956_v9 = vsel %vm2428_vm4, %v2818_v52, 0.0  ;;  %v1802_v52 = vperm.slane %v792_v0, 0 }
 0x493   :  { %2945 = vadd.xlane.f32.xlu1 %v2944_v59  ;;  %v9298_v59 = vperm.slane %v787_v22, 0  ;;  %v9314_v4 = vpop.permute.xlu2 %1478 }
 0x494   :  { %2951 = vadd.xlane.f32.xlu0 %v2950_v55  ;;  %v9301_v55 = vperm.slane %v789_v11, 0  ;;  %v9309_v35 = vpop.permute.xlu1 %1450  ;;  %v9316_v7 = vpop.permute.xlu0 %1443  ;;  %vm2058_vm3 = vcmp.ge.f32.partialorder %v1802_v52, %v8601_v24 }
 0x495   :  { %vm2053_vm15 = vcmp.ge.f32.partialorder %v9298_v59, %v8683_v42 }
 0x496   :  { %vm2055_vm0 = vcmp.ge.f32.partialorder %v9301_v55, %v8582_v37  ;;  %v7172_v42 = vsel %vm2053_vm15, 1.0, %v13889_v21  ;;  %v2459_v37 = vsel %vm2428_vm4, %v9320_v13, 0.0 }
 0x497   :  { %v2456_v38 = vsel %vm2428_vm4, %v7172_v42, 0.0 }
 0x49a   :  { %2948 = vadd.xlane.f32.xlu2 %v2947_v14  ;;  %v7174_v14 = vsel %vm2055_vm0, 1.0, %v13889_v21 }
 0x49b   :  { %2954 = vadd.xlane.f32.xlu1 %v2953_v57  ;;  %v9325_v57 = vperm.slane %v791_v33, 0  ;;  %v2462_v22 = vsel %vm2428_vm4, %v7174_v14, 0.0  ;;  %v7177_v33 = vsel %vm2058_vm3, 1.0, %v13889_v21 }
 0x49c   :  { %2960 = vadd.xlane.f32.xlu0 %v2959_v16  ;;  %v9329_v16 = vperm.slane %v790_v44, 0  ;;  %v9339_v11 = vpop.permute.xlu1 %1471  ;;  %v9352_v44 = vperm.slane %v793_v10, 0  ;;  %v2471_v0 = vsel %vm2428_vm4, %v7177_v33, 0.0 }
 0x49d   :  { %vm2057_vm1 = vcmp.ge.f32.partialorder %v9325_v57, %v8702_v53 }
 0x49e   :  { %vm2056_vm2 = vcmp.ge.f32.partialorder %v9329_v16, %v8704_v3  ;;  %vm2059_vm5 = vcmp.ge.f32.partialorder %v9352_v44, %v8721_v43 }
 0x49f   :  { %v7175_v53 = vsel %vm2056_vm2, 1.0, %v13889_v21 }
 0x4a0   :  { %v2465_v24 = vsel %vm2428_vm4, %v7175_v53, 0.0 }
 0x4a2   :  { %2957 = vadd.xlane.f32.xlu2 %v2956_v9  ;;  %v9342_v9 = vsel %vm2057_vm1, 1.0, %v13889_v21 }
 0x4a3   :  { %2963 = vadd.xlane.f32.xlu1 %v2962_v5  ;;  %v9344_v5 = vpop.permute.xlu2 %1499  ;;  %v2468_v3 = vsel %vm2428_vm4, %v9342_v9, 0.0 }
 0x4a4   :  { %2454 = vadd.xlane.f32.xlu0 %v2453_v28  ;;  %v9346_v28 = vpop.permute.xlu0 %1464 }
 0x4aa   :  { %2460 = vadd.xlane.f32.xlu2 %v2459_v37  ;;  %v7178_v37 = vsel %vm2059_vm5, 1.0, %v13889_v21 }
 0x4ab   :  { %2457 = vadd.xlane.f32.xlu1 %v2456_v38  ;;  %v9361_v38 = vpop.permute.xlu1 %1492  ;;  %v9366_v10 = vpop.permute.xlu2 %1520  ;;  %v2474_v43 = vsel %vm2428_vm4, %v7178_v37, 0.0 }
 0x4ac   :  { %2463 = vadd.xlane.f32.xlu0 %v2462_v22  ;;  %v9364_v22 = vsel %vm2148_vm6, 1.0, %v13889_v21 }
 0x4ad   :  { %v2741_v49 = vsel %vm2428_vm4, %v9364_v22, 0.0 }
 0x4b2   :  { %2469 = vadd.xlane.f32.xlu2 %v2468_v3  ;;  %v9368_v3 = vpop.permute.xlu0 %1485 }
 0x4b3   :  { %2466 = vadd.xlane.f32.xlu1 %v2465_v24  ;;  %v2747_v24 = vsel %vm2428_vm4, %v8724_v63, 0.0  ;;  %v9377_v54 = vpop.permute.xlu1 %1513  ;;  %v9381_v25 = vpop.permute.xlu2 %1541 }
 0x4b4   :  { %2472 = vadd.xlane.f32.xlu0 %v2471_v0  ;;  %v2756_v0 = vsel %vm2428_vm4, %v8743_v32, 0.0 }
 0x4ba   :  { %2748 = vadd.xlane.f32.xlu2 %v2747_v24  ;;  %v9383_v63 = vpop.permute.xlu0 %1506  ;;  %v2750_v24 = vsel %vm2428_vm4, %v8656_v12, 0.0 }
 0x4bb   :  { %2475 = vadd.xlane.f32.xlu1 %v2474_v43  ;;  %v2821_v43 = vmul.f32 %v9293_v50, %v8421_v56  ;;  %v2822_v50 = vmul.f32 %v7172_v42, %v9298_v59  ;;  %v2825_v59 = vmul.f32 %v7175_v53, %v9329_v16  ;;  %v9427_v16 = vsel %vm2060_vm7, 1.0, %v13889_v21 }
 0x4bc   :  { %2742 = vadd.xlane.f32.xlu0 %v2741_v49  ;;  %v2753_v49 = vsel %vm2428_vm4, %v8774_v46, 0.0  ;;  %v2762_v46 = vsel %vm2428_vm4, %v8801_v19, 0.0  ;;  %v2826_v53 = vmul.f32 %v9342_v9, %v9325_v57  ;;  %v13983_v9 = vld [vmem:[#allocation28_spill] sm:$0xff] }
 0x4bd   :  { %v2965_v32 = vsel %vm2428_vm4, %v2821_v43, 0.0  ;;  %v2968_v40 = vsel %vm2428_vm4, %v2822_v50, 0.0 }
 0x4c2   :  { %2757 = vadd.xlane.f32.xlu2 %v2756_v0  ;;  %v9394_v0 = vpop.permute.xlu1 %1534  ;;  %v9398_v12 = vpop.permute.xlu0 %1527 }
 0x4c3   :  { %2745 = vadd.xlane.f32.xlu1 %v2744_v20  ;;  %v9396_v20 = vpop.permute.xlu2 %1562 }
 0x4c4   :  { %2751 = vadd.xlane.f32.xlu0 %v2750_v24  ;;  %v2824_v24 = vmul.f32 %v7174_v14, %v9301_v55  ;;  %v2823_v55 = vmul.f32 %v9320_v13, %v9295_v58  ;;  %v795_v58 = vrot.slane %v8480_v30, 2 }
 0x4c6   :  { %v2974_v43 = vsel %vm2428_vm4, %v2824_v24, 0.0  ;;  %v2971_v19 = vsel %vm2428_vm4, %v2823_v55, 0.0  ;;  %v2980_v55 = vsel %vm2428_vm4, %v2826_v53, 0.0 }
 0x4ca   :  { %2966 = vadd.xlane.f32.xlu2 %v2965_v32  ;;  %v9412_v14 = vpop.permute.xlu0 %1548 }
 0x4cb   :  { %2754 = vadd.xlane.f32.xlu1 %v2753_v49  ;;  %v2827_v49 = vmul.f32 %v7177_v33, %v1802_v52  ;;  %v2977_v52 = vsel %vm2428_vm4, %v2825_v59, 0.0  ;;  %v796_v33 = vrot.slane %v8480_v30, 3  ;;  %v9442_v59 = vperm.slane %v794_v31, 0 }
 0x4cc   :  { %2760 = vadd.xlane.f32.xlu0 %v2759_v26  ;;  %v9408_v26 = vpop.permute.xlu1 %1555 }
 0x4cd   :  { %v2983_v42 = vsel %vm2428_vm4, %v2827_v49, 0.0  ;;  %v9439_v49 = vperm.slane %v795_v58, 0  ;;  %vm2061_vm10 = vcmp.ge.f32.partialorder %v9442_v59, %v13983_v9 }
 0x4ce   :  { %v7180_v58 = vsel %vm2061_vm10, 1.0, %v13889_v21 }
 0x4cf   :  { %vm2062_vm9 = vcmp.ge.f32.partialorder %v9439_v49, %v8820_v15  ;;  %v2480_v9 = vsel %vm2428_vm4, %v7180_v58, 0.0 }
 0x4d0   :  { %v9464_v15 = vsel %vm2062_vm9, 1.0, %v13889_v21 }
 0x4d2   :  { %2975 = vadd.xlane.f32.xlu2 %v2974_v43  ;;  %v2828_v43 = vmul.f32 %v7178_v37, %v9352_v44  ;;  %v799_v44 = vrot.slane %v8480_v30, 6 }
 0x4d3   :  { %2763 = vadd.xlane.f32.xlu1 %v2762_v46  ;;  %v9435_v46 = vperm.slane %v796_v33, 0 }
 0x4d4   :  { %2969 = vadd.xlane.f32.xlu0 %v2968_v40  ;;  %v2477_v40 = vsel %vm2428_vm4, %v9427_v16, 0.0  ;;  %v2986_v57 = vsel %vm2428_vm4, %v2828_v43, 0.0  ;;  %v9467_v53 = vperm.slane %v799_v44, 0  ;;  %v13989_v44 = vld [vmem:[#allocation30_spill] sm:$0xff] }
 0x4d5   :  { %v9406_v32 = vpop.xlane.xlu2 %2430  ;;  %vm2063_vm8 = vcmp.ge.f32.partialorder %v9435_v46, %v8794_v18 }
 0x4d6   :  { %13979 = vst [vmem:[#allocation120_spill] sm:$0xff] %v9406_v32  ;;  %v9458_v18 = vsel %vm2063_vm8, 1.0, %v13889_v21 }
 0x4d7   :  { %v2486_v31 = vsel %vm2428_vm4, %v9458_v18, 0.0 }
 0x4da   :  { %2984 = vadd.xlane.f32.xlu2 %v2983_v42  ;;  %v798_v42 = vrot.slane %v8480_v30, 5 }
 0x4db   :  { %2972 = vadd.xlane.f32.xlu1 %v2971_v19 }
 0x4dc   :  { %2978 = vadd.xlane.f32.xlu0 %v2977_v52  ;;  %v797_v52 = vrot.slane %v8480_v30, 4  ;;  %v9471_v43 = vperm.slane %v798_v42, 0 }
 0x4dd   :  { %v9421_v24 = vpop.xlane.xlu2 %2439 }
 0x4de   :  { %13980 = vst [vmem:[#allocation121_spill] sm:$0xff] %v9421_v24  ;;  %v9424_v13 = vpop.xlane.xlu1 %2436 }
 0x4df   :  { %13981 = vst [vmem:[#allocation122_spill] sm:$0xff] %v9424_v13  ;;  %v9432_v50 = vpop.xlane.xlu0 %2433 }
 0x4e0   :  { %13982 = vst [vmem:[#allocation123_spill] sm:$0xff] %v9432_v50 }
 0x4e2   :  { %2478 = vadd.xlane.f32.xlu2 %v2477_v40  ;;  %v2483_v40 = vsel %vm2428_vm4, %v9464_v15, 0.0 }
 0x4e3   :  { %2981 = vadd.xlane.f32.xlu1 %v2980_v55  ;;  %v9475_v55 = vperm.slane %v797_v52, 0 }
 0x4e4   :  { %2987 = vadd.xlane.f32.xlu0 %v2986_v57  ;;  %v13987_v57 = vld [vmem:[#allocation43_spill] sm:$0xff] }
 0x4e5   :  { %v9452_v37 = vpop.xlane.xlu2 %2442  ;;  %vm2066_vm11 = vcmp.ge.f32.partialorder %v9467_v53, %v13987_v57  ;;  %vm2064_vm13 = vcmp.ge.f32.partialorder %v9475_v55, %v13989_v44 }
 0x4e6   :  { %13984 = vst [vmem:[#allocation28_spill] sm:$0xff] %v9452_v37  ;;  %v9455_v19 = vpop.xlane.xlu1 %2448  ;;  %v7185_v52 = vsel %vm2066_vm11, 1.0, %v13889_v21  ;;  %v800_v37 = vrot.slane %v8480_v30, 7  ;;  %v7183_v57 = vsel %vm2064_vm13, 1.0, %v13889_v21  ;;  %v14002_v30 = vld [vmem:[#allocation36_spill] sm:$0xff] }
 0x4e7   :  { %13985 = vst [vmem:[#allocation124_spill] sm:$0xff] %v9455_v19  ;;  %v9461_v33 = vpop.xlane.xlu0 %2445  ;;  %v13988_v19 = vld [vmem:[#allocation50_spill] sm:$0xff]  ;;  %v2489_v13 = vsel %vm2428_vm4, %v7183_v57, 0.0 }
 0x4e8   :  { %13986 = vst [vmem:[#allocation125_spill] sm:$0xff] %v9461_v33  ;;  %vm2065_vm12 = vcmp.ge.f32.partialorder %v9471_v43, %v13988_v19  ;;  %v2495_v19 = vsel %vm2428_vm4, %v7185_v52, 0.0  ;;  %v1811_v44 = vperm.slane %v800_v37, 0 }
 0x4ea   :  { %2487 = vadd.xlane.f32.xlu2 %v2486_v31 }
 0x4eb   :  { %2484 = vadd.xlane.f32.xlu1 %v2483_v40  ;;  %v9493_v40 = vsel %vm2065_vm12, 1.0, %v13889_v21 }
 0x4ec   :  { %2481 = vadd.xlane.f32.xlu0 %v2480_v9  ;;  %v2492_v9 = vsel %vm2428_vm4, %v9493_v40, 0.0 }
 0x4ed   :  { %v9484_v42 = vpop.xlane.xlu2 %2451 }
 0x4ee   :  { %13990 = vst [vmem:[#allocation43_spill] sm:$0xff] %v9484_v42  ;;  %v9486_v31 = vpop.xlane.xlu1 %2718  ;;  %v13993_v42 = vld [vmem:[#allocation49_spill] sm:$0xff] }
 0x4ef   :  { %13991 = vst [vmem:[#allocation50_spill] sm:$0xff] %v9486_v31  ;;  %v9490_v33 = vpop.xlane.xlu0 %2724  ;;  %v13994_v31 = vld [vmem:[#allocation12_spill] sm:$0xff] }
 0x4f0   :  { %13992 = vst [vmem:[#allocation30_spill] sm:$0xff] %v9490_v33  ;;  %vm2156_vm14 = vcmp.ge.f32.partialorder %v13994_v31, %v13993_v42  ;;  %v13995_v33 = vld [vmem:[#allocation32_spill] sm:$0xff] }
 0x4f1   :  { %vm2067_vm15 = vcmp.ge.f32.partialorder %v1811_v44, %v13995_v33  ;;  %v9508_v50 = vsel %vm2156_vm14, 1.0, %v13889_v21 }
 0x4f2   :  { %2496 = vadd.xlane.f32.xlu2 %v2495_v19  ;;  %v7186_v37 = vsel %vm2067_vm15, 1.0, %v13889_v21  ;;  %v2765_v42 = vsel %vm2428_vm4, %v9508_v50, 0.0 }
 0x4f3   :  { %2493 = vadd.xlane.f32.xlu1 %v2492_v9  ;;  %v2498_v33 = vsel %vm2428_vm4, %v7186_v37, 0.0 }
 0x4f4   :  { %2490 = vadd.xlane.f32.xlu0 %v2489_v13  ;;  %v2771_v13 = vsel %vm2428_vm4, %v8868_v48, 0.0  ;;  %v2768_v48 = vsel %vm2428_vm4, %v14002_v30, 0.0 }
 0x4f5   :  { %v9503_v24 = vpop.xlane.xlu2 %2721 }
 0x4f6   :  { %13996 = vst [vmem:[#allocation49_spill] sm:$0xff] %v9503_v24  ;;  %v9505_v32 = vpop.xlane.xlu1 %2727 }
 0x4f7   :  { %13997 = vst [vmem:[#allocation12_spill] sm:$0xff] %v9505_v32  ;;  %v9510_v19 = vpop.xlane.xlu0 %2733 }
 0x4f8   :  { %13998 = vst [vmem:[#allocation32_spill] sm:$0xff] %v9510_v19  ;;  %v2774_v19 = vsel %vm2428_vm4, %v8862_v60, 0.0 }
 0x4fa   :  { %2766 = vadd.xlane.f32.xlu2 %v2765_v42  ;;  %v2780_v42 = vsel %vm2428_vm4, %v8893_v36, 0.0 }
 0x4fb   :  { %2772 = vadd.xlane.f32.xlu1 %v2771_v13 }
 0x4fc   :  { %2499 = vadd.xlane.f32.xlu0 %v2498_v33 }
 0x4fd   :  { %v9518_v9 = vpop.xlane.xlu2 %2730 }
 0x4fe   :  { %13999 = vst [vmem:[#allocation126_spill] sm:$0xff] %v9518_v9  ;;  %v9520_v32 = vpop.xlane.xlu1 %2736  ;;  %v2829_v9 = vmul.f32 %v9427_v16, %v8484_v47  ;;  %v2832_v16 = vmul.f32 %v9458_v18, %v9435_v46  ;;  %v2835_v46 = vmul.f32 %v7185_v52, %v9467_v53  ;;  %v2836_v52 = vmul.f32 %v7186_v37, %v1811_v44  ;;  %v14043_v47 = vld [vmem:[#allocation63_spill] sm:$0xff] }
 0x4ff   :  { %14000 = vst [vmem:[#allocation127_spill] sm:$0xff] %v9520_v32  ;;  %v9522_v24 = vpop.xlane.xlu0 %2942 }
 0x500   :  { %14001 = vst [vmem:[#allocation128_spill] sm:$0xff] %v9522_v24  ;;  %v14006_v24 = vld [vmem:[#allocation55_spill] sm:$0xff]  ;;  %v2989_v36 = vsel %vm2428_vm4, %v2829_v9, 0.0  ;;  %v2998_v9 = vsel %vm2428_vm4, %v2832_v16, 0.0  ;;  %v3007_v16 = vsel %vm2428_vm4, %v2835_v46, 0.0 }
 0x501   :  { %v2783_v60 = vsel %vm2428_vm4, %v14006_v24, 0.0 }
 0x502   :  { %2775 = vadd.xlane.f32.xlu2 %v2774_v19  ;;  %v14007_v19 = vld [vmem:[#allocation40_spill] sm:$0xff] }
 0x503   :  { %2781 = vadd.xlane.f32.xlu1 %v2780_v42  ;;  %v2777_v30 = vsel %vm2428_vm4, %v14007_v19, 0.0 }
 0x504   :  { %2769 = vadd.xlane.f32.xlu0 %v2768_v48  ;;  %v2830_v48 = vmul.f32 %v7180_v58, %v9442_v59  ;;  %v2833_v59 = vmul.f32 %v7183_v57, %v9475_v55  ;;  %v14017_v55 = vld [vmem:[#allocation15_spill] sm:$0xff] }
 0x505   :  { %v9530_v13 = vpop.xlane.xlu2 %2739  ;;  %v801_v57 = vrot.slane %v14017_v55, 1 }
 0x506   :  { %14003 = vst [vmem:[#allocation36_spill] sm:$0xff] %v9530_v13  ;;  %v9532_v33 = vpop.xlane.xlu1 %2945  ;;  %v2992_v24 = vsel %vm2428_vm4, %v2830_v48, 0.0  ;;  %v3001_v48 = vsel %vm2428_vm4, %v2833_v59, 0.0 }
 0x507   :  { %14004 = vst [vmem:[#allocation129_spill] sm:$0xff] %v9532_v33  ;;  %v9536_v32 = vpop.xlane.xlu0 %2951 }
 0x508   :  { %14005 = vst [vmem:[#allocation130_spill] sm:$0xff] %v9536_v32 }
 0x50a   :  { %2784 = vadd.xlane.f32.xlu2 %v2783_v60  ;;  %v14011_v60 = vld [vmem:[#allocation44_spill] sm:$0xff] }
 0x50b   :  { %2990 = vadd.xlane.f32.xlu1 %v2989_v36  ;;  %v2786_v36 = vsel %vm2428_vm4, %v14011_v60, 0.0  ;;  %v14016_v60 = vld [vmem:[#allocation16_spill] sm:$0xff] }
 0x50c   :  { %2778 = vadd.xlane.f32.xlu0 %v2777_v30  ;;  %v2831_v30 = vmul.f32 %v9464_v15, %v9439_v49  ;;  %v802_v15 = vrot.slane %v14017_v55, 2 }
 0x50d   :  { %v9543_v42 = vpop.xlane.xlu2 %2948 }
 0x50e   :  { %14008 = vst [vmem:[#allocation55_spill] sm:$0xff] %v9543_v42  ;;  %v9546_v13 = vpop.xlane.xlu1 %2954  ;;  %v9592_v37 = vperm.slane %v802_v15, 0 }
 0x50f   :  { %14009 = vst [vmem:[#allocation40_spill] sm:$0xff] %v9546_v13  ;;  %v9550_v32 = vpop.xlane.xlu0 %2960 }
 0x510   :  { %14010 = vst [vmem:[#allocation131_spill] sm:$0xff] %v9550_v32 }
 0x512   :  { %2993 = vadd.xlane.f32.xlu2 %v2992_v24  ;;  %v2995_v24 = vsel %vm2428_vm4, %v2831_v30, 0.0  ;;  %v2834_v30 = vmul.f32 %v9493_v40, %v9471_v43  ;;  %v14023_v43 = vld [vmem:[#allocation48_spill] sm:$0xff]  ;;  %v804_v40 = vrot.slane %v14017_v55, 4 }
 0x513   :  { %2999 = vadd.xlane.f32.xlu1 %v2998_v9  ;;  %v14015_v9 = vld [vmem:[#allocation62_spill] sm:$0xff]  ;;  %vm2070_vm3 = vcmp.ge.f32.partialorder %v9592_v37, %v14023_v43 }
 0x514   :  { %2787 = vadd.xlane.f32.xlu0 %v2786_v36  ;;  %vm2068_vm0 = vcmp.ge.f32.partialorder %v14016_v60, %v14015_v9  ;;  %v803_v36 = vrot.slane %v14017_v55, 3  ;;  %v14021_v9 = vld [vmem:[#allocation61_spill] sm:$0xff] }
 0x515   :  { %v9556_v19 = vpop.xlane.xlu2 %2957  ;;  %v9581_v46 = vsel %vm2068_vm0, 1.0, %v13889_v21 }
 0x516   :  { %14012 = vst [vmem:[#allocation44_spill] sm:$0xff] %v9556_v19  ;;  %v9559_v58 = vpop.xlane.xlu1 %2963  ;;  %v2501_v44 = vsel %vm2428_vm4, %v9581_v46, 0.0  ;;  %v14033_v19 = vld [vmem:[#allocation68_spill] sm:$0xff] }
 0x517   :  { %14013 = vst [vmem:[#allocation132_spill] sm:$0xff] %v9559_v58  ;;  %v9562_v18 = vpop.xlane.xlu0 %2454  ;;  %v14022_v58 = vld [vmem:[#allocation66_spill] sm:$0xff] }
 0x518   :  { %14014 = vst [vmem:[#allocation133_spill] sm:$0xff] %v9562_v18  ;;  %v3004_v18 = vsel %vm2428_vm4, %v2834_v30, 0.0  ;;  %v805_v30 = vrot.slane %v14017_v55, 5 }
 0x51a   :  { %3002 = vadd.xlane.f32.xlu2 %v3001_v48  ;;  %v9585_v48 = vperm.slane %v801_v57, 0 }
 0x51b   :  { %3008 = vadd.xlane.f32.xlu1 %v3007_v16  ;;  %v3010_v16 = vsel %vm2428_vm4, %v2836_v52, 0.0  ;;  %v806_v52 = vrot.slane %v14017_v55, 6 }
 0x51c   :  { %2996 = vadd.xlane.f32.xlu0 %v2995_v24  ;;  %v9588_v24 = vperm.slane %v803_v36, 0  ;;  %vm2069_vm1 = vcmp.ge.f32.partialorder %v9585_v48, %v14021_v9 }
 0x51d   :  { %v9572_v53 = vpop.xlane.xlu2 %2460  ;;  %v9608_v15 = vsel %vm2069_vm1, 1.0, %v13889_v21  ;;  %v9623_v43 = vperm.slane %v806_v52, 0  ;;  %v807_v52 = vrot.slane %v14017_v55, 7 }
 0x51e   :  { %14018 = vst [vmem:[#allocation62_spill] sm:$0xff] %v9572_v53  ;;  %v9575_v49 = vpop.xlane.xlu1 %2457  ;;  %vm2071_vm2 = vcmp.ge.f32.partialorder %v9588_v24, %v14022_v58  ;;  %v2504_v9 = vsel %vm2428_vm4, %v9608_v15, 0.0  ;;  %v14029_v53 = vld [vmem:[#allocation52_spill] sm:$0xff] }
 0x51f   :  { %14019 = vst [vmem:[#allocation16_spill] sm:$0xff] %v9575_v49  ;;  %v9578_v59 = vpop.xlane.xlu0 %2463  ;;  %v9614_v58 = vsel %vm2071_vm2, 1.0, %v13889_v21 }
 0x520   :  { %14020 = vst [vmem:[#allocation134_spill] sm:$0xff] %v9578_v59  ;;  %v2510_v13 = vsel %vm2428_vm4, %v9614_v58, 0.0  ;;  %v9627_v59 = vperm.slane %v805_v30, 0 }
 0x522   :  { %3011 = vadd.xlane.f32.xlu2 %v3010_v16  ;;  %vm2073_vm7 = vcmp.ge.f32.partialorder %v9627_v59, %v14029_v53 }
 0x523   :  { %2502 = vadd.xlane.f32.xlu1 %v2501_v44  ;;  %v9619_v44 = vperm.slane %v804_v40, 0  ;;  %v14028_v40 = vld [vmem:[#allocation69_spill] sm:$0xff] }
 0x524   :  { %3005 = vadd.xlane.f32.xlu0 %v3004_v18  ;;  %v9617_v18 = vsel %vm2070_vm3, 1.0, %v13889_v21  ;;  %vm2074_vm6 = vcmp.ge.f32.partialorder %v9623_v43, %v14028_v40  ;;  %v9649_v40 = vperm.slane %v807_v52, 0 }
 0x525   :  { %v9602_v57 = vpop.xlane.xlu2 %2469  ;;  %v2507_v32 = vsel %vm2428_vm4, %v9617_v18, 0.0 }
 0x526   :  { %14024 = vst [vmem:[#allocation61_spill] sm:$0xff] %v9602_v57  ;;  %v9605_v36 = vpop.xlane.xlu1 %2466  ;;  %v9647_v57 = vsel %vm2073_vm7, 1.0, %v13889_v21  ;;  %vm2075_vm8 = vcmp.ge.f32.partialorder %v9649_v40, %v14033_v19 }
 0x527   :  { %14025 = vst [vmem:[#allocation66_spill] sm:$0xff] %v9605_v36  ;;  %v9611_v16 = vpop.xlane.xlu0 %2472  ;;  %v7194_v36 = vsel %vm2075_vm8, 1.0, %v13889_v21 }
 0x528   :  { %14026 = vst [vmem:[#allocation48_spill] sm:$0xff] %v9611_v16  ;;  %v14027_v16 = vld [vmem:[#allocation65_spill] sm:$0xff]  ;;  %v2522_v19 = vsel %vm2428_vm4, %v7194_v36, 0.0 }
 0x529   :  { %vm2072_vm5 = vcmp.ge.f32.partialorder %v9619_v44, %v14027_v16 }
 0x52a   :  { %2505 = vadd.xlane.f32.xlu2 %v2504_v9  ;;  %v7191_v49 = vsel %vm2072_vm5, 1.0, %v13889_v21 }
 0x52b   :  { %2511 = vadd.xlane.f32.xlu1 %v2510_v13  ;;  %v7193_v13 = vsel %vm2074_vm6, 1.0, %v13889_v21 }
 0x52c   :  { %2508 = vadd.xlane.f32.xlu0 %v2507_v32  ;;  %v2513_v32 = vsel %vm2428_vm4, %v7191_v49, 0.0  ;;  %v2519_v53 = vsel %vm2428_vm4, %v7193_v13, 0.0 }
 0x52d   :  { %v9638_v9 = vpop.xlane.xlu2 %2748 }
 0x52e   :  { %14030 = vst [vmem:[#allocation65_spill] sm:$0xff] %v9638_v9  ;;  %v9640_v30 = vpop.xlane.xlu1 %2475  ;;  %v2516_v9 = vsel %vm2428_vm4, %v9647_v57, 0.0 }
 0x52f   :  { %14031 = vst [vmem:[#allocation69_spill] sm:$0xff] %v9640_v30  ;;  %v9643_v16 = vpop.xlane.xlu0 %2742  ;;  %v14035_v30 = vld [vmem:[#allocation21_spill] sm:$0xff] }
 0x530   :  { %14032 = vst [vmem:[#allocation52_spill] sm:$0xff] %v9643_v16  ;;  %v14034_v16 = vld [vmem:[#allocation72_spill] sm:$0xff] }
 0x531   :  { %vm2164_vm9 = vcmp.ge.f32.partialorder %v14035_v30, %v14034_v16  ;;  %v14039_v16 = vld [vmem:[#allocation56_spill] sm:$0xff] }
 0x532   :  { %2514 = vadd.xlane.f32.xlu2 %v2513_v32  ;;  %v9667_v33 = vsel %vm2164_vm9, 1.0, %v13889_v21 }
 0x533   :  { %2520 = vadd.xlane.f32.xlu1 %v2519_v53  ;;  %v2789_v53 = vsel %vm2428_vm4, %v9667_v33, 0.0 }
 0x534   :  { %2517 = vadd.xlane.f32.xlu0 %v2516_v9  ;;  %v2795_v9 = vsel %vm2428_vm4, %v14039_v16, 0.0 }
 0x535   :  { %v9659_v42 = vpop.xlane.xlu2 %2757 }
 0x536   :  { %14036 = vst [vmem:[#allocation68_spill] sm:$0xff] %v9659_v42  ;;  %v9661_v52 = vpop.xlane.xlu1 %2745 }
 0x537   :  { %14037 = vst [vmem:[#allocation72_spill] sm:$0xff] %v9661_v52  ;;  %v9664_v32 = vpop.xlane.xlu0 %2751 }
 0x538   :  { %14038 = vst [vmem:[#allocation21_spill] sm:$0xff] %v9664_v32  ;;  %v2792_v32 = vsel %vm2428_vm4, %v8971_v41, 0.0 }
 0x53a   :  { %2523 = vadd.xlane.f32.xlu2 %v2522_v19  ;;  %v2798_v19 = vsel %vm2428_vm4, %v8995_v27, 0.0  ;;  %v2807_v27 = vsel %vm2428_vm4, %v9020_v61, 0.0 }
 0x53b   :  { %2790 = vadd.xlane.f32.xlu1 %v2789_v53  ;;  %v2804_v53 = vsel %vm2428_vm4, %v14043_v47, 0.0 }
 0x53c   :  { %2796 = vadd.xlane.f32.xlu0 %v2795_v9 }
 0x53d   :  { %v9674_v42 = vpop.xlane.xlu2 %2966 }
 0x53e   :  { %14040 = vst [vmem:[#allocation56_spill] sm:$0xff] %v9674_v42  ;;  %v9676_v52 = vpop.xlane.xlu1 %2754 }
 0x53f   :  { %14041 = vst [vmem:[#allocation135_spill] sm:$0xff] %v9676_v52  ;;  %v9678_v55 = vpop.xlane.xlu0 %2760  ;;  %v14047_v52 = vld [vmem:[#allocation75_spill] sm:$0xff] }
 0x540   :  { %14042 = vst [vmem:[#allocation136_spill] sm:$0xff] %v9678_v55  ;;  %v2837_v55 = vmul.f32 %v9581_v46, %v14016_v60  ;;  %v2801_v41 = vsel %vm2428_vm4, %v14047_v52, 0.0  ;;  %v2840_v46 = vmul.f32 %v9614_v58, %v9588_v24  ;;  %v2810_v52 = vsel %vm2428_vm4, %v9017_v62, 0.0 }
 0x541   :  { %v2843_v62 = vmul.f32 %v7193_v13, %v9623_v43  ;;  %v2844_v13 = vmul.f32 %v7194_v36, %v9649_v40  ;;  %v14061_v40 = vld [vmem:[#allocation85_spill] sm:$0xff] }
 0x542   :  { %2793 = vadd.xlane.f32.xlu2 %v2792_v32  ;;  %v3013_v47 = vsel %vm2428_vm4, %v2837_v55, 0.0  ;;  %v3022_v55 = vsel %vm2428_vm4, %v2840_v46, 0.0  ;;  %v14054_v46 = vld [vmem:[#allocation71_spill] sm:$0xff] }
 0x543   :  { %2799 = vadd.xlane.f32.xlu1 %v2798_v19 }
 0x544   :  { %2805 = vadd.xlane.f32.xlu0 %v2804_v53  ;;  %v2838_v53 = vmul.f32 %v9608_v15, %v9585_v48  ;;  %v2839_v48 = vmul.f32 %v9617_v18, %v9592_v37  ;;  %v14056_v37 = vld [vmem:[#allocation22_spill] sm:$0xff] }
 0x545   :  { %v9686_v16 = vpop.xlane.xlu2 %2975  ;;  %v809_v18 = vrot.slane %v14056_v37, 2 }
 0x546   :  { %14044 = vst [vmem:[#allocation63_spill] sm:$0xff] %v9686_v16  ;;  %v9688_v9 = vpop.xlane.xlu1 %2763  ;;  %v3016_v61 = vsel %vm2428_vm4, %v2838_v53, 0.0  ;;  %v3019_v58 = vsel %vm2428_vm4, %v2839_v48, 0.0  ;;  %v3031_v53 = vsel %vm2428_vm4, %v2843_v62, 0.0 }
 0x547   :  { %14045 = vst [vmem:[#allocation137_spill] sm:$0xff] %v9688_v9  ;;  %v9690_v42 = vpop.xlane.xlu0 %2969  ;;  %v9741_v62 = vperm.slane %v809_v18, 0  ;;  %v812_v18 = vrot.slane %v14056_v37, 5 }
 0x548   :  { %14046 = vst [vmem:[#allocation138_spill] sm:$0xff] %v9690_v42 }
 0x54a   :  { %2802 = vadd.xlane.f32.xlu2 %v2801_v41 }
 0x54b   :  { %2808 = vadd.xlane.f32.xlu1 %v2807_v27  ;;  %v2841_v27 = vmul.f32 %v7191_v49, %v9619_v44  ;;  %v2842_v49 = vmul.f32 %v9647_v57, %v9627_v59  ;;  %v808_v44 = vrot.slane %v14056_v37, 1  ;;  %v3034_v59 = vsel %vm2428_vm4, %v2844_v13, 0.0 }
 0x54c   :  { %3014 = vadd.xlane.f32.xlu0 %v3013_v47 }
 0x54d   :  { %v9699_v32 = vpop.xlane.xlu2 %2984  ;;  %v3025_v47 = vsel %vm2428_vm4, %v2841_v27, 0.0 }
 0x54e   :  { %14048 = vst [vmem:[#allocation75_spill] sm:$0xff] %v9699_v32  ;;  %v9701_v19 = vpop.xlane.xlu1 %2972 }
 0x54f   :  { %14049 = vst [vmem:[#allocation139_spill] sm:$0xff] %v9701_v19  ;;  %v9705_v9 = vpop.xlane.xlu0 %2978  ;;  %v14066_v19 = vld [vmem:[#allocation87_spill] sm:$0xff] }
 0x550   :  { %14050 = vst [vmem:[#allocation140_spill] sm:$0xff] %v9705_v9 }
 0x552   :  { %2811 = vadd.xlane.f32.xlu2 %v2810_v52  ;;  %v14055_v52 = vld [vmem:[#allocation24_spill] sm:$0xff] }
 0x553   :  { %3017 = vadd.xlane.f32.xlu1 %v3016_v61  ;;  %vm2076_vm10 = vcmp.ge.f32.partialorder %v14055_v52, %v14054_v46  ;;  %v14062_v46 = vld [vmem:[#allocation74_spill] sm:$0xff] }
 0x554   :  { %3023 = vadd.xlane.f32.xlu0 %v3022_v55  ;;  %v810_v55 = vrot.slane %v14056_v37, 3  ;;  %v7195_v27 = vsel %vm2076_vm10, 1.0, %v13889_v21 }
 0x555   :  { %v9713_v41 = vpop.xlane.xlu2 %2478  ;;  %v2525_v36 = vsel %vm2428_vm4, %v7195_v27, 0.0 }
 0x556   :  { %14051 = vst [vmem:[#allocation141_spill] sm:$0xff] %v9713_v41  ;;  %v9717_v15 = vpop.xlane.xlu1 %2981  ;;  %v1823_v57 = vperm.slane %v810_v55, 0  ;;  %v813_v55 = vrot.slane %v14056_v37, 6 }
 0x557   :  { %14052 = vst [vmem:[#allocation142_spill] sm:$0xff] %v9717_v15  ;;  %v9720_v24 = vpop.xlane.xlu0 %2987 }
 0x558   :  { %14053 = vst [vmem:[#allocation143_spill] sm:$0xff] %v9720_v24  ;;  %vm2079_vm13 = vcmp.ge.f32.partialorder %v1823_v57, %v14062_v46  ;;  %v1826_v24 = vperm.slane %v813_v55, 0 }
 0x55a   :  { %3020 = vadd.xlane.f32.xlu2 %v3019_v58  ;;  %v3028_v58 = vsel %vm2428_vm4, %v2842_v49, 0.0  ;;  %v811_v49 = vrot.slane %v14056_v37, 4 }
 0x55b   :  { %3026 = vadd.xlane.f32.xlu1 %v3025_v47  ;;  %v1821_v47 = vperm.slane %v808_v44, 0 }
 0x55c   :  { %3032 = vadd.xlane.f32.xlu0 %v3031_v53  ;;  %v14060_v53 = vld [vmem:[#allocation84_spill] sm:$0xff]  ;;  %v1824_v46 = vperm.slane %v811_v49, 0 }
 0x55d   :  { %v9729_v61 = vpop.xlane.xlu2 %2487  ;;  %vm2078_vm11 = vcmp.ge.f32.partialorder %v9741_v62, %v14060_v53  ;;  %vm2077_vm12 = vcmp.ge.f32.partialorder %v1821_v47, %v14061_v40  ;;  %v7198_v53 = vsel %vm2079_vm13, 1.0, %v13889_v21 }
 0x55e   :  { %14057 = vst [vmem:[#allocation71_spill] sm:$0xff] %v9729_v61  ;;  %v9734_v43 = vpop.xlane.xlu1 %2484  ;;  %v7197_v13 = vsel %vm2078_vm11, 1.0, %v13889_v21 }
 0x55f   :  { %14058 = vst [vmem:[#allocation24_spill] sm:$0xff] %v9734_v43  ;;  %v9738_v48 = vpop.xlane.xlu0 %2481  ;;  %v2531_v40 = vsel %vm2428_vm4, %v7197_v13, 0.0 }
 0x560   :  { %14059 = vst [vmem:[#allocation144_spill] sm:$0xff] %v9738_v48  ;;  %v14067_v48 = vld [vmem:[#allocation88_spill] sm:$0xff] }
 0x561   :  { %vm2080_vm15 = vcmp.ge.f32.partialorder %v1824_v46, %v14067_v48 }
 0x562   :  { %3029 = vadd.xlane.f32.xlu2 %v3028_v58 }
 0x563   :  { %3035 = vadd.xlane.f32.xlu1 %v3034_v59  ;;  %v7196_v59 = vsel %vm2077_vm12, 1.0, %v13889_v21 }
 0x564   :  { %2526 = vadd.xlane.f32.xlu0 %v2525_v36  ;;  %v1825_v36 = vperm.slane %v812_v18, 0  ;;  %v814_v18 = vrot.slane %v14056_v37, 7 }
 0x565   :  { %v9751_v32 = vpop.xlane.xlu2 %2496 }
 0x566   :  { %14063 = vst [vmem:[#allocation84_spill] sm:$0xff] %v9751_v32  ;;  %v9754_v44 = vpop.xlane.xlu1 %2493  ;;  %v2528_v32 = vsel %vm2428_vm4, %v7196_v59, 0.0  ;;  %vm2081_vm14 = vcmp.ge.f32.partialorder %v1825_v36, %v14066_v19  ;;  %v7199_v19 = vsel %vm2080_vm15, 1.0, %v13889_v21  ;;  %v1827_v48 = vperm.slane %v814_v18, 0 }
 0x567   :  { %14064 = vst [vmem:[#allocation85_spill] sm:$0xff] %v9754_v44  ;;  %v9758_v58 = vpop.xlane.xlu0 %2490  ;;  %v2534_v44 = vsel %vm2428_vm4, %v7198_v53, 0.0  ;;  %v7200_v49 = vsel %vm2081_vm14, 1.0, %v13889_v21  ;;  %v2846_v18 = vmul.f32 %v7196_v59, %v1821_v47  ;;  %v2849_v43 = vmul.f32 %v7199_v19, %v1824_v46 }
 0x568   :  { %14065 = vst [vmem:[#allocation74_spill] sm:$0xff] %v9758_v58  ;;  %v14068_v58 = vld [vmem:[#allocation80_spill] sm:$0xff]  ;;  %v2540_v55 = vsel %vm2428_vm4, %v7200_v49, 0.0 }
 0x569   :  { %vm2082_vm0 = vcmp.ge.f32.partialorder %v1826_v24, %v14068_v58 }
 0x56a   :  { %2532 = vadd.xlane.f32.xlu2 %v2531_v40 }
 0x56b   :  { %2529 = vadd.xlane.f32.xlu1 %v2528_v32  ;;  %v7201_v32 = vsel %vm2082_vm0, 1.0, %v13889_v21 }
 0x56c   :  { %2535 = vadd.xlane.f32.xlu0 %v2534_v44  ;;  %v2537_v44 = vsel %vm2428_vm4, %v7199_v19, 0.0  ;;  %v2543_v58 = vsel %vm2428_vm4, %v7201_v32, 0.0 }
 0x56d   :  { %v9768_v16 = vpop.xlane.xlu2 %2766 }
 0x56e   :  { %14069 = vst [vmem:[#allocation87_spill] sm:$0xff] %v9768_v16  ;;  %v9771_v41 = vpop.xlane.xlu1 %2772  ;;  %v14072_v16 = vld [vmem:[#allocation92_spill] sm:$0xff] }
 0x56f   :  { %14070 = vst [vmem:[#allocation88_spill] sm:$0xff] %v9771_v41  ;;  %v9774_v40 = vpop.xlane.xlu0 %2499  ;;  %vm2083_vm1 = vcmp.ge.f32.partialorder %v1827_v48, %v14072_v16  ;;  %v3040_v16 = vsel %vm2428_vm4, %v2846_v18, 0.0 }
 0x570   :  { %14071 = vst [vmem:[#allocation80_spill] sm:$0xff] %v9774_v40  ;;  %v2845_v40 = vmul.f32 %v7195_v27, %v14055_v52  ;;  %v7202_v15 = vsel %vm2083_vm1, 1.0, %v13889_v21 }
 0x572   :  { %2541 = vadd.xlane.f32.xlu2 %v2540_v55  ;;  %v3037_v55 = vsel %vm2428_vm4, %v2845_v40, 0.0  ;;  %v3049_v40 = vsel %vm2428_vm4, %v2849_v43, 0.0 }
 0x573   :  { %2538 = vadd.xlane.f32.xlu1 %v2537_v44  ;;  %v2546_v44 = vsel %vm2428_vm4, %v7202_v15, 0.0 }
 0x574   :  { %2544 = vadd.xlane.f32.xlu0 %v2543_v58 }
 0x575   :  { %v9782_v41 = vpop.xlane.xlu2 %2775 }
 0x576   :  { %14073 = vst [vmem:[#allocation92_spill] sm:$0xff] %v9782_v41  ;;  %v9785_v61 = vpop.xlane.xlu1 %2781  ;;  %v2848_v41 = vmul.f32 %v7198_v53, %v1823_v57  ;;  %v14080_v57 = vld [vmem:[#allocation29_spill] sm:$0xff] }
 0x577   :  { %14074 = vst [vmem:[#allocation145_spill] sm:$0xff] %v9785_v61  ;;  %v9787_v42 = vpop.xlane.xlu0 %2769  ;;  %v2847_v61 = vmul.f32 %v7197_v13, %v9741_v62  ;;  %v816_v53 = vrot.slane %v14080_v57, 2  ;;  %v2850_v62 = vmul.f32 %v7200_v49, %v1825_v36  ;;  %v815_v13 = vrot.slane %v14080_v57, 1  ;;  %v14085_v36 = vld [vmem:[#allocation95_spill] sm:$0xff]  ;;  %v14086_v49 = vld [vmem:[#allocation86_spill] sm:$0xff] }
 0x578   :  { %14075 = vst [vmem:[#allocation146_spill] sm:$0xff] %v9787_v42  ;;  %v3046_v47 = vsel %vm2428_vm4, %v2848_v41, 0.0  ;;  %v2852_v41 = vmul.f32 %v7202_v15, %v1827_v48  ;;  %v817_v15 = vrot.slane %v14080_v57, 3 }
 0x579   :  { %v3043_v59 = vsel %vm2428_vm4, %v2847_v61, 0.0  ;;  %v9812_v61 = vperm.slane %v816_v53, 0  ;;  %v3052_v43 = vsel %vm2428_vm4, %v2850_v62, 0.0  ;;  %v818_v53 = vrot.slane %v14080_v57, 4 }
 0x57a   :  { %3038 = vadd.xlane.f32.xlu2 %v3037_v55  ;;  %v2851_v55 = vmul.f32 %v7201_v32, %v1826_v24  ;;  %v14084_v24 = vld [vmem:[#allocation33_spill] sm:$0xff]  ;;  %v3058_v32 = vsel %vm2428_vm4, %v2852_v41, 0.0 }
 0x57b   :  { %2547 = vadd.xlane.f32.xlu1 %v2546_v44  ;;  %vm2086_vm3 = vcmp.ge.f32.partialorder %v9812_v61, %v14085_v36  ;;  %v1832_v36 = vperm.slane %v818_v53, 0  ;;  %v821_v53 = vrot.slane %v14080_v57, 7 }
 0x57c   :  { %3041 = vadd.xlane.f32.xlu0 %v3040_v16  ;;  %v3055_v19 = vsel %vm2428_vm4, %v2851_v55, 0.0  ;;  %v1829_v16 = vperm.slane %v815_v13, 0  ;;  %v7205_v13 = vsel %vm2086_vm3, 1.0, %v13889_v21 }
 0x57d   :  { %v9793_v58 = vpop.xlane.xlu2 %2784 }
 0x57e   :  { %14076 = vst [vmem:[#allocation147_spill] sm:$0xff] %v9793_v58  ;;  %v9795_v27 = vpop.xlane.xlu1 %2990  ;;  %vm2085_vm5 = vcmp.ge.f32.partialorder %v1829_v16, %v14086_v49  ;;  %v14090_v49 = vld [vmem:[#allocation93_spill] sm:$0xff] }
 0x57f   :  { %14077 = vst [vmem:[#allocation148_spill] sm:$0xff] %v9795_v27  ;;  %v9798_v42 = vpop.xlane.xlu0 %2778  ;;  %v7204_v41 = vsel %vm2085_vm5, 1.0, %v13889_v21  ;;  %v1835_v27 = vperm.slane %v821_v53, 0 }
 0x580   :  { %14078 = vst [vmem:[#allocation149_spill] sm:$0xff] %v9798_v42  ;;  %v2552_v58 = vsel %vm2428_vm4, %v7204_v41, 0.0  ;;  %v14092_v42 = vld [vmem:[#allocation90_spill] sm:$0xff] }
 0x581   :  { %vm2088_vm8 = vcmp.ge.f32.partialorder %v1832_v36, %v14092_v42 }
 0x582   :  { %3047 = vadd.xlane.f32.xlu2 %v3046_v47  ;;  %v14083_v47 = vld [vmem:[#allocation91_spill] sm:$0xff] }
 0x583   :  { %3044 = vadd.xlane.f32.xlu1 %v3043_v59  ;;  %vm2084_vm2 = vcmp.ge.f32.partialorder %v14084_v24, %v14083_v47  ;;  %v819_v59 = vrot.slane %v14080_v57, 5 }
 0x584   :  { %3050 = vadd.xlane.f32.xlu0 %v3049_v40  ;;  %v7203_v55 = vsel %vm2084_vm2, 1.0, %v13889_v21 }
 0x585   :  { %v9803_v18 = vpop.xlane.xlu2 %2993  ;;  %v1833_v47 = vperm.slane %v819_v59, 0 }
 0x586   :  { %14079 = vst [vmem:[#allocation150_spill] sm:$0xff] %v9803_v18  ;;  %v9806_v44 = vpop.xlane.xlu1 %2999 }
 0x587   :  { %14081 = vst [vmem:[#allocation151_spill] sm:$0xff] %v9806_v44  ;;  %v9809_v46 = vpop.xlane.xlu0 %2787  ;;  %v14097_v44 = vld [vmem:[#allocation94_spill] sm:$0xff] }
 0x588   :  { %14082 = vst [vmem:[#allocation152_spill] sm:$0xff] %v9809_v46  ;;  %v14091_v46 = vld [vmem:[#allocation99_spill] sm:$0xff]  ;;  %vm2091_vm10 = vcmp.ge.f32.partialorder %v1835_v27, %v14097_v44 }
 0x589   :  { %vm2089_vm7 = vcmp.ge.f32.partialorder %v1833_v47, %v14091_v46  ;;  %v7210_v53 = vsel %vm2091_vm10, 1.0, %v13889_v21 }
 0x58a   :  { %3056 = vadd.xlane.f32.xlu2 %v3055_v19  ;;  %v1831_v19 = vperm.slane %v817_v15, 0 }
 0x58b   :  { %3053 = vadd.xlane.f32.xlu1 %v3052_v43  ;;  %v2549_v43 = vsel %vm2428_vm4, %v7203_v55, 0.0 }
 0x58c   :  { %3059 = vadd.xlane.f32.xlu0 %v3058_v32  ;;  %v2555_v32 = vsel %vm2428_vm4, %v7205_v13, 0.0  ;;  %vm2087_vm6 = vcmp.ge.f32.partialorder %v1831_v19, %v14090_v49  ;;  %v7207_v49 = vsel %vm2088_vm8, 1.0, %v13889_v21 }
 0x58d   :  { %v9822_v48 = vpop.xlane.xlu2 %3002  ;;  %v7206_v59 = vsel %vm2087_vm6, 1.0, %v13889_v21  ;;  %v2561_v18 = vsel %vm2428_vm4, %v7207_v49, 0.0 }
 0x58e   :  { %14087 = vst [vmem:[#allocation91_spill] sm:$0xff] %v9822_v48  ;;  %v9825_v40 = vpop.xlane.xlu1 %3008  ;;  %v820_v48 = vrot.slane %v14080_v57, 6  ;;  %v2856_v9 = vmul.f32 %v7206_v59, %v1831_v19  ;;  %v14106_v19 = vld [vmem:[#allocation39_spill] sm:$0xff] }
 0x58f   :  { %14088 = vst [vmem:[#allocation33_spill] sm:$0xff] %v9825_v40  ;;  %v9829_v62 = vpop.xlane.xlu0 %2996 }
 0x590   :  { %14089 = vst [vmem:[#allocation95_spill] sm:$0xff] %v9829_v62  ;;  %v1834_v46 = vperm.slane %v820_v48, 0  ;;  %v2853_v62 = vmul.f32 %v7203_v55, %v14084_v24 }
 0x592   :  { %2550 = vadd.xlane.f32.xlu2 %v2549_v43 }
 0x593   :  { %2556 = vadd.xlane.f32.xlu1 %v2555_v32  ;;  %v7208_v32 = vsel %vm2089_vm7, 1.0, %v13889_v21 }
 0x594   :  { %2553 = vadd.xlane.f32.xlu0 %v2552_v58  ;;  %v2558_v58 = vsel %vm2428_vm4, %v7206_v59, 0.0  ;;  %v2564_v42 = vsel %vm2428_vm4, %v7208_v32, 0.0  ;;  %v823_v59 = vrot.slane %v14106_v19, 2 }
 0x595   :  { %v9840_v15 = vpop.xlane.xlu2 %3011 }
 0x596   :  { %14093 = vst [vmem:[#allocation86_spill] sm:$0xff] %v9840_v15  ;;  %v9842_v40 = vpop.xlane.xlu1 %2502  ;;  %v14096_v15 = vld [vmem:[#allocation97_spill] sm:$0xff] }
 0x597   :  { %14094 = vst [vmem:[#allocation93_spill] sm:$0xff] %v9842_v40  ;;  %v9846_v43 = vpop.xlane.xlu0 %3005  ;;  %vm2090_vm9 = vcmp.ge.f32.partialorder %v1834_v46, %v14096_v15 }
 0x598   :  { %14095 = vst [vmem:[#allocation99_spill] sm:$0xff] %v9846_v43  ;;  %v7209_v48 = vsel %vm2090_vm9, 1.0, %v13889_v21 }
 0x599   :  { %v2567_v15 = vsel %vm2428_vm4, %v7209_v48, 0.0 }
 0x59a   :  { %2559 = vadd.xlane.f32.xlu2 %v2558_v58 }
 0x59b   :  { %2565 = vadd.xlane.f32.xlu1 %v2564_v42  ;;  %v3061_v42 = vsel %vm2428_vm4, %v2853_v62, 0.0 }
 0x59c   :  { %2562 = vadd.xlane.f32.xlu0 %v2561_v18  ;;  %v2570_v18 = vsel %vm2428_vm4, %v7210_v53, 0.0 }
 0x59d   :  { %v9855_v43 = vpop.xlane.xlu2 %2505 }
 0x59e   :  { %14098 = vst [vmem:[#allocation90_spill] sm:$0xff] %v9855_v43  ;;  %v9857_v40 = vpop.xlane.xlu1 %2511 }
 0x59f   :  { %14099 = vst [vmem:[#allocation97_spill] sm:$0xff] %v9857_v40  ;;  %v9861_v58 = vpop.xlane.xlu0 %2508  ;;  %v2854_v40 = vmul.f32 %v7204_v41, %v1829_v16  ;;  %v2859_v41 = vmul.f32 %v7209_v48, %v1834_v46  ;;  %v822_v46 = vrot.slane %v14106_v19, 1  ;;  %v824_v48 = vrot.slane %v14106_v19, 3 }
 0x5a0   :  { %14100 = vst [vmem:[#allocation94_spill] sm:$0xff] %v9861_v58  ;;  %v2855_v58 = vmul.f32 %v7205_v13, %v9812_v61  ;;  %v2858_v61 = vmul.f32 %v7208_v32, %v1833_v47  ;;  %v2860_v32 = vmul.f32 %v7210_v53, %v1835_v27  ;;  %v14114_v53 = vld [vmem:[#allocation100_spill] sm:$0xff] }
 0x5a1   :  { %v3064_v57 = vsel %vm2428_vm4, %v2854_v40, 0.0 }
 0x5a2   :  { %2568 = vadd.xlane.f32.xlu2 %v2567_v15  ;;  %v3070_v15 = vsel %vm2428_vm4, %v2856_v9, 0.0  ;;  %v3067_v62 = vsel %vm2428_vm4, %v2855_v58, 0.0  ;;  %v3079_v9 = vsel %vm2428_vm4, %v2859_v41, 0.0  ;;  %v3076_v13 = vsel %vm2428_vm4, %v2858_v61, 0.0  ;;  %v14108_v58 = vld [vmem:[#allocation102_spill] sm:$0xff] }
 0x5a3   :  { %3062 = vadd.xlane.f32.xlu1 %v3061_v42  ;;  %v1837_v61 = vperm.slane %v822_v46, 0  ;;  %v825_v46 = vrot.slane %v14106_v19, 4 }
 0x5a4   :  { %2571 = vadd.xlane.f32.xlu0 %v2570_v18  ;;  %v2857_v18 = vmul.f32 %v7207_v49, %v1832_v36  ;;  %v14109_v36 = vld [vmem:[#allocation46_spill] sm:$0xff] }
 0x5a5   :  { %v9867_v44 = vpop.xlane.xlu2 %2514  ;;  %vm2092_vm11 = vcmp.ge.f32.partialorder %v14109_v36, %v14108_v58  ;;  %v14110_v49 = vld [vmem:[#allocation98_spill] sm:$0xff]  ;;  %vm2093_vm13 = vcmp.ge.f32.partialorder %v1837_v61, %v14114_v53 }
 0x5a6   :  { %14101 = vst [vmem:[#allocation153_spill] sm:$0xff] %v9867_v44  ;;  %v9869_v43 = vpop.xlane.xlu1 %2520  ;;  %v3073_v40 = vsel %vm2428_vm4, %v2857_v18, 0.0  ;;  %v7211_v41 = vsel %vm2092_vm11, 1.0, %v13889_v21 }
 0x5a7   :  { %14102 = vst [vmem:[#allocation154_spill] sm:$0xff] %v9869_v43  ;;  %v9871_v55 = vpop.xlane.xlu0 %2517 }
 0x5a8   :  { %14103 = vst [vmem:[#allocation155_spill] sm:$0xff] %v9871_v55 }
 0x5aa   :  { %3065 = vadd.xlane.f32.xlu2 %v3064_v57  ;;  %v9886_v57 = vperm.slane %v823_v59, 0 }
 0x5ab   :  { %3071 = vadd.xlane.f32.xlu1 %v3070_v15 }
 0x5ac   :  { %3068 = vadd.xlane.f32.xlu0 %v3067_v62  ;;  %vm2094_vm12 = vcmp.ge.f32.partialorder %v9886_v57, %v14110_v49  ;;  %v826_v62 = vrot.slane %v14106_v19, 5  ;;  %v14115_v49 = vld [vmem:[#allocation105_spill] sm:$0xff] }
 0x5ad   :  { %v9877_v42 = vpop.xlane.xlu2 %2523  ;;  %v7213_v59 = vsel %vm2094_vm12, 1.0, %v13889_v21 }
 0x5ae   :  { %14104 = vst [vmem:[#allocation156_spill] sm:$0xff] %v9877_v42  ;;  %v9879_v16 = vpop.xlane.xlu1 %2790  ;;  %v9906_v27 = vperm.slane %v826_v62, 0  ;;  %v2579_v58 = vsel %vm2428_vm4, %v7213_v59, 0.0  ;;  %v7212_v62 = vsel %vm2093_vm13, 1.0, %v13889_v21 }
 0x5af   :  { %14105 = vst [vmem:[#allocation157_spill] sm:$0xff] %v9879_v16  ;;  %v9882_v55 = vpop.xlane.xlu0 %2796  ;;  %v2576_v16 = vsel %vm2428_vm4, %v7212_v62, 0.0 }
 0x5b0   :  { %14107 = vst [vmem:[#allocation158_spill] sm:$0xff] %v9882_v55  ;;  %v828_v55 = vrot.slane %v14106_v19, 7 }
 0x5b2   :  { %3074 = vadd.xlane.f32.xlu2 %v3073_v40  ;;  %v3082_v40 = vsel %vm2428_vm4, %v2860_v32, 0.0 }
 0x5b3   :  { %3080 = vadd.xlane.f32.xlu1 %v3079_v9  ;;  %v1839_v9 = vperm.slane %v824_v48, 0  ;;  %v827_v48 = vrot.slane %v14106_v19, 6  ;;  %v2862_v19 = vmul.f32 %v7212_v62, %v1837_v61 }
 0x5b4   :  { %3077 = vadd.xlane.f32.xlu0 %v3076_v13  ;;  %v2573_v13 = vsel %vm2428_vm4, %v7211_v41, 0.0 }
 0x5b5   :  { %v9894_v47 = vpop.xlane.xlu2 %2793  ;;  %vm2095_vm14 = vcmp.ge.f32.partialorder %v1839_v9, %v14115_v49 }
 0x5b6   :  { %14111 = vst [vmem:[#allocation102_spill] sm:$0xff] %v9894_v47  ;;  %v9897_v15 = vpop.xlane.xlu1 %2799  ;;  %v14116_v47 = vld [vmem:[#allocation101_spill] sm:$0xff] }
 0x5b7   :  { %14112 = vst [vmem:[#allocation98_spill] sm:$0xff] %v9897_v15  ;;  %v9900_v18 = vpop.xlane.xlu0 %2805  ;;  %vm2097_vm15 = vcmp.ge.f32.partialorder %v9906_v27, %v14116_v47  ;;  %v1842_v47 = vperm.slane %v827_v48, 0  ;;  %v14121_v15 = vld [vmem:[#allocation108_spill] sm:$0xff] }
 0x5b8   :  { %14113 = vst [vmem:[#allocation159_spill] sm:$0xff] %v9900_v18  ;;  %v7216_v49 = vsel %vm2097_vm15, 1.0, %v13889_v21 }
 0x5b9   :  { %vm2098_vm1 = vcmp.ge.f32.partialorder %v1842_v47, %v14121_v15 }
 0x5ba   :  { %3083 = vadd.xlane.f32.xlu2 %v3082_v40 }
 0x5bb   :  { %2574 = vadd.xlane.f32.xlu1 %v2573_v13  ;;  %v7214_v13 = vsel %vm2095_vm14, 1.0, %v13889_v21 }
 0x5bc   :  { %2580 = vadd.xlane.f32.xlu0 %v2579_v58  ;;  %v1840_v58 = vperm.slane %v825_v46, 0  ;;  %v2582_v18 = vsel %vm2428_vm4, %v7214_v13, 0.0 }
 0x5bd   :  { %v9914_v32 = vpop.xlane.xlu2 %2802 }
 0x5be   :  { %14117 = vst [vmem:[#allocation100_spill] sm:$0xff] %v9914_v32  ;;  %v9917_v40 = vpop.xlane.xlu1 %2808  ;;  %v14120_v32 = vld [vmem:[#allocation103_spill] sm:$0xff] }
 0x5bf   :  { %14118 = vst [vmem:[#allocation105_spill] sm:$0xff] %v9917_v40  ;;  %v9920_v53 = vpop.xlane.xlu0 %3014  ;;  %vm2096_vm0 = vcmp.ge.f32.partialorder %v1840_v58, %v14120_v32  ;;  %v2588_v40 = vsel %vm2428_vm4, %v7216_v49, 0.0  ;;  %v2861_v32 = vmul.f32 %v7211_v41, %v14109_v36  ;;  %v3088_v36 = vsel %vm2428_vm4, %v2862_v19, 0.0 }
 0x5c0   :  { %14119 = vst [vmem:[#allocation101_spill] sm:$0xff] %v9920_v53  ;;  %v7215_v46 = vsel %vm2096_vm0, 1.0, %v13889_v21 }
 0x5c1   :  { %v2585_v43 = vsel %vm2428_vm4, %v7215_v46, 0.0 }
 0x5c2   :  { %2577 = vadd.xlane.f32.xlu2 %v2576_v16  ;;  %v7217_v16 = vsel %vm2098_vm1, 1.0, %v13889_v21 }
 0x5c3   :  { %2583 = vadd.xlane.f32.xlu1 %v2582_v18  ;;  %v1843_v18 = vperm.slane %v828_v55, 0  ;;  %v2591_v15 = vsel %vm2428_vm4, %v7217_v16, 0.0  ;;  %v2864_v55 = vmul.f32 %v7214_v13, %v1839_v9  ;;  %v2867_v62 = vmul.f32 %v7217_v16, %v1842_v47 }
 0x5c4   :  { %2589 = vadd.xlane.f32.xlu0 %v2588_v40  ;;  %v14125_v40 = vld [vmem:[#allocation106_spill] sm:$0xff] }
 0x5c5   :  { %v9930_v44 = vpop.xlane.xlu2 %2811  ;;  %vm2099_vm2 = vcmp.ge.f32.partialorder %v1843_v18, %v14125_v40  ;;  %v3103_v19 = vsel %vm2428_vm4, %v2867_v62, 0.0 }
 0x5c6   :  { %14122 = vst [vmem:[#allocation103_spill] sm:$0xff] %v9930_v44  ;;  %v9932_v42 = vpop.xlane.xlu1 %3017  ;;  %v3085_v44 = vsel %vm2428_vm4, %v2861_v32, 0.0  ;;  %v2863_v32 = vmul.f32 %v7213_v59, %v9886_v57 }
 0x5c7   :  { %14123 = vst [vmem:[#allocation108_spill] sm:$0xff] %v9932_v42  ;;  %v9935_v48 = vpop.xlane.xlu0 %3023 }
 0x5c8   :  { %14124 = vst [vmem:[#allocation160_spill] sm:$0xff] %v9935_v48  ;;  %v7218_v48 = vsel %vm2099_vm2, 1.0, %v13889_v21  ;;  %v3091_v9 = vsel %vm2428_vm4, %v2863_v32, 0.0 }
 0x5c9   :  { %v2868_v16 = vmul.f32 %v7218_v48, %v1843_v18  ;;  %v14139_v18 = vld [vmem:[#allocation111_spill] sm:$0xff] }
 0x5ca   :  { %2586 = vadd.xlane.f32.xlu2 %v2585_v43  ;;  %v2594_v43 = vsel %vm2428_vm4, %v7218_v48, 0.0 }
 0x5cb   :  { %2592 = vadd.xlane.f32.xlu1 %v2591_v15  ;;  %v3094_v15 = vsel %vm2428_vm4, %v2864_v55, 0.0  ;;  %v14133_v55 = vld [vmem:[#allocation51_spill] sm:$0xff] }
 0x5cc   :  { %3086 = vadd.xlane.f32.xlu0 %v3085_v44 }
 0x5cd   :  { %v9943_v42 = vpop.xlane.xlu2 %3020 }
 0x5ce   :  { %14126 = vst [vmem:[#allocation106_spill] sm:$0xff] %v9943_v42  ;;  %v9945_v53 = vpop.xlane.xlu1 %3026  ;;  %v2865_v42 = vmul.f32 %v7215_v46, %v1840_v58  ;;  %v2866_v58 = vmul.f32 %v7216_v49, %v9906_v27  ;;  %v14138_v49 = vld [vmem:[#allocation109_spill] sm:$0xff] }
 0x5cf   :  { %14127 = vst [vmem:[#allocation161_spill] sm:$0xff] %v9945_v53  ;;  %v9948_v41 = vpop.xlane.xlu0 %3032 }
 0x5d0   :  { %14128 = vst [vmem:[#allocation162_spill] sm:$0xff] %v9948_v41  ;;  %v3097_v13 = vsel %vm2428_vm4, %v2865_v42, 0.0 }
 0x5d2   :  { %2595 = vadd.xlane.f32.xlu2 %v2594_v43  ;;  %v14134_v43 = vld [vmem:[#allocation47_spill] sm:$0xff] }
 0x5d3   :  { %3089 = vadd.xlane.f32.xlu1 %v3088_v36  ;;  %v14132_v36 = vld [vmem:[#allocation104_spill] sm:$0xff]  ;;  %v830_v57 = vrot.slane %v14134_v43, 2  ;;  %v829_v47 = vrot.slane %v14134_v43, 1  ;;  %v831_v42 = vrot.slane %v14134_v43, 3 }
 0x5d4   :  { %3095 = vadd.xlane.f32.xlu0 %v3094_v15  ;;  %vm2100_vm3 = vcmp.ge.f32.partialorder %v14133_v55, %v14132_v36  ;;  %v14140_v36 = vld [vmem:[#allocation107_spill] sm:$0xff] }
 0x5d5   :  { %v9953_v44 = vpop.xlane.xlu2 %3029  ;;  %v7219_v32 = vsel %vm2100_vm3, 1.0, %v13889_v21  ;;  %v9976_v62 = vperm.slane %v830_v57, 0  ;;  %v1847_v27 = vperm.slane %v831_v42, 0  ;;  %v833_v57 = vrot.slane %v14134_v43, 5 }
 0x5d6   :  { %14129 = vst [vmem:[#allocation163_spill] sm:$0xff] %v9953_v44  ;;  %v9956_v40 = vpop.xlane.xlu1 %3035  ;;  %v2597_v48 = vsel %vm2428_vm4, %v7219_v32, 0.0  ;;  %v834_v42 = vrot.slane %v14134_v43, 6  ;;  %v14144_v44 = vld [vmem:[#allocation112_spill] sm:$0xff] }
 0x5d7   :  { %14130 = vst [vmem:[#allocation164_spill] sm:$0xff] %v9956_v40  ;;  %v9958_v61 = vpop.xlane.xlu0 %2526  ;;  %vm2102_vm5 = vcmp.ge.f32.partialorder %v9976_v62, %v14138_v49  ;;  %vm2103_vm7 = vcmp.ge.f32.partialorder %v1847_v27, %v14140_v36 }
 0x5d8   :  { %14131 = vst [vmem:[#allocation165_spill] sm:$0xff] %v9958_v61  ;;  %v7222_v49 = vsel %vm2103_vm7, 1.0, %v13889_v21 }
 0x5da   :  { %3092 = vadd.xlane.f32.xlu2 %v3091_v9  ;;  %v3100_v9 = vsel %vm2428_vm4, %v2866_v58, 0.0  ;;  %v832_v58 = vrot.slane %v14134_v43, 4 }
 0x5db   :  { %3098 = vadd.xlane.f32.xlu1 %v3097_v13  ;;  %v1845_v13 = vperm.slane %v829_v47, 0 }
 0x5dc   :  { %3104 = vadd.xlane.f32.xlu0 %v3103_v19  ;;  %v3106_v19 = vsel %vm2428_vm4, %v2868_v16, 0.0  ;;  %v7221_v16 = vsel %vm2102_vm5, 1.0, %v13889_v21  ;;  %v1848_v36 = vperm.slane %v832_v58, 0 }
 0x5dd   :  { %v9966_v59 = vpop.xlane.xlu2 %2532  ;;  %vm2101_vm6 = vcmp.ge.f32.partialorder %v1845_v13, %v14139_v18  ;;  %v2603_v18 = vsel %vm2428_vm4, %v7221_v16, 0.0 }
 0x5de   :  { %14135 = vst [vmem:[#allocation104_spill] sm:$0xff] %v9966_v59  ;;  %v9970_v46 = vpop.xlane.xlu1 %2529  ;;  %v2606_v59 = vsel %vm2428_vm4, %v7222_v49, 0.0 }
 0x5df   :  { %14136 = vst [vmem:[#allocation51_spill] sm:$0xff] %v9970_v46  ;;  %v9973_v15 = vpop.xlane.xlu0 %2535  ;;  %v14145_v46 = vld [vmem:[#allocation114_spill] sm:$0xff] }
 0x5e0   :  { %14137 = vst [vmem:[#allocation166_spill] sm:$0xff] %v9973_v15  ;;  %v1850_v15 = vperm.slane %v834_v42, 0  ;;  %vm2104_vm9 = vcmp.ge.f32.partialorder %v1848_v36, %v14145_v46 }
 0x5e2   :  { %3101 = vadd.xlane.f32.xlu2 %v3100_v9 }
 0x5e3   :  { %3107 = vadd.xlane.f32.xlu1 %v3106_v19  ;;  %v7220_v19 = vsel %vm2101_vm6, 1.0, %v13889_v21 }
 0x5e4   :  { %2598 = vadd.xlane.f32.xlu0 %v2597_v48  ;;  %v1849_v48 = vperm.slane %v833_v57, 0  ;;  %v2600_v53 = vsel %vm2428_vm4, %v7220_v19, 0.0  ;;  %v835_v57 = vrot.slane %v14134_v43, 7 }
 0x5e5   :  { %v9986_v61 = vpop.xlane.xlu2 %2541 }
 0x5e6   :  { %14141 = vst [vmem:[#allocation109_spill] sm:$0xff] %v9986_v61  ;;  %v9989_v47 = vpop.xlane.xlu1 %2538  ;;  %vm2105_vm8 = vcmp.ge.f32.partialorder %v1849_v48, %v14144_v44  ;;  %v7223_v44 = vsel %vm2104_vm9, 1.0, %v13889_v21  ;;  %v1851_v46 = vperm.slane %v835_v57, 0  ;;  %v2870_v57 = vmul.f32 %v7220_v19, %v1845_v13 }
 0x5e7   :  { %14142 = vst [vmem:[#allocation111_spill] sm:$0xff] %v9989_v47  ;;  %v9993_v9 = vpop.xlane.xlu0 %2544  ;;  %v7224_v58 = vsel %vm2105_vm8, 1.0, %v13889_v21  ;;  %v2873_v43 = vmul.f32 %v7223_v44, %v1848_v36 }
 0x5e8   :  { %14143 = vst [vmem:[#allocation107_spill] sm:$0xff] %v9993_v9  ;;  %v14146_v9 = vld [vmem:[#allocation110_spill] sm:$0xff]  ;;  %v2612_v42 = vsel %vm2428_vm4, %v7224_v58, 0.0  ;;  %vm2107_vm11 = vcmp.ge.f32.partialorder %v1851_v46, %v9218_v8  ;;  %v3112_v8 = vsel %vm2428_vm4, %v2870_v57, 0.0 }
 0x5e9   :  { %vm2106_vm10 = vcmp.ge.f32.partialorder %v1850_v15, %v14146_v9  ;;  %v7226_v41 = vsel %vm2107_vm11, 1.0, %v13889_v21  ;;  %v3121_v19 = vsel %vm2428_vm4, %v2873_v43, 0.0 }
 0x5ea   :  { %2604 = vadd.xlane.f32.xlu2 %v2603_v18 }
 0x5eb   :  { %2601 = vadd.xlane.f32.xlu1 %v2600_v53  ;;  %v7225_v53 = vsel %vm2106_vm10, 1.0, %v13889_v21 }
 0x5ec   :  { %2607 = vadd.xlane.f32.xlu0 %v2606_v59  ;;  %v2609_v59 = vsel %vm2428_vm4, %v7223_v44, 0.0  ;;  %v2615_v9 = vsel %vm2428_vm4, %v7225_v53, 0.0 }
 0x5ed   :  { %v10003_v61 = vpop.xlane.xlu2 %3038 }
 0x5ee   :  { %14147 = vst [vmem:[#allocation112_spill] sm:$0xff] %v10003_v61  ;;  %v10006_v40 = vpop.xlane.xlu1 %2547 }
 0x5ef   :  { %14148 = vst [vmem:[#allocation114_spill] sm:$0xff] %v10006_v40  ;;  %v10009_v18 = vpop.xlane.xlu0 %3041  ;;  %v2869_v40 = vmul.f32 %v7219_v32, %v14133_v55 }
 0x5f0   :  { %14149 = vst [vmem:[#allocation110_spill] sm:$0xff] %v10009_v18 }
 0x5f2   :  { %2613 = vadd.xlane.f32.xlu2 %v2612_v42  ;;  %v3109_v42 = vsel %vm2428_vm4, %v2869_v40, 0.0 }
 0x5f3   :  { %2610 = vadd.xlane.f32.xlu1 %v2609_v59  ;;  %v2618_v59 = vsel %vm2428_vm4, %v7226_v41, 0.0 }
 0x5f4   :  { %2616 = vadd.xlane.f32.xlu0 %v2615_v9 }
 0x5f5   :  { %v10017_v61 = vpop.xlane.xlu2 %3047 }
 0x5f6   :  { %14150 = vst [vmem:[#allocation167_spill] sm:$0xff] %v10017_v61  ;;  %v10020_v18 = vpop.xlane.xlu1 %3044  ;;  %v2872_v61 = vmul.f32 %v7222_v49, %v1847_v27  ;;  %v14156_v27 = vld [vmem:[#allocation60_spill] sm:$0xff] }
 0x5f7   :  { %14151 = vst [vmem:[#allocation168_spill] sm:$0xff] %v10020_v18  ;;  %v10022_v47 = vpop.xlane.xlu0 %3050  ;;  %v2871_v18 = vmul.f32 %v7221_v16, %v9976_v62  ;;  %v837_v49 = vrot.slane %v14156_v27, 2  ;;  %v2874_v62 = vmul.f32 %v7224_v58, %v1849_v48  ;;  %v836_v16 = vrot.slane %v14156_v27, 1  ;;  %v14160_v48 = vld [vmem:[#allocation113_spill] sm:$0xff] }
 0x5f8   :  { %14152 = vst [vmem:[#allocation169_spill] sm:$0xff] %v10022_v47  ;;  %v3118_v13 = vsel %vm2428_vm4, %v2872_v61, 0.0  ;;  %v2876_v61 = vmul.f32 %v7226_v41, %v1851_v46  ;;  %v838_v41 = vrot.slane %v14156_v27, 3  ;;  %v840_v46 = vrot.slane %v14156_v27, 5 }
 0x5f9   :  { %v3115_v40 = vsel %vm2428_vm4, %v2871_v18, 0.0  ;;  %v10047_v18 = vperm.slane %v837_v49, 0  ;;  %v3124_v43 = vsel %vm2428_vm4, %v2874_v62, 0.0 }
 0x5fa   :  { %3110 = vadd.xlane.f32.xlu2 %v3109_v42  ;;  %v2875_v42 = vmul.f32 %v7225_v53, %v1850_v15  ;;  %v14159_v15 = vld [vmem:[#allocation67_spill] sm:$0xff]  ;;  %v3130_v53 = vsel %vm2428_vm4, %v2876_v61, 0.0 }
 0x5fb   :  { %2619 = vadd.xlane.f32.xlu1 %v2618_v59  ;;  %vm2110_vm13 = vcmp.ge.f32.partialorder %v10047_v18, %v9237_v17 }
 0x5fc   :  { %3113 = vadd.xlane.f32.xlu0 %v3112_v8  ;;  %v3127_v44 = vsel %vm2428_vm4, %v2875_v42, 0.0  ;;  %v1853_v8 = vperm.slane %v836_v16, 0  ;;  %v839_v42 = vrot.slane %v14156_v27, 4  ;;  %v7229_v62 = vsel %vm2110_vm13, 1.0, %v13889_v21 }
 0x5fd   :  { %v10028_v9 = vpop.xlane.xlu2 %3056  ;;  %v1855_v16 = vperm.slane %v838_v41, 0 }
 0x5fe   :  { %14153 = vst [vmem:[#allocation170_spill] sm:$0xff] %v10028_v9  ;;  %v10030_v32 = vpop.xlane.xlu1 %3053  ;;  %vm2109_vm14 = vcmp.ge.f32.partialorder %v1853_v8, %v14160_v48  ;;  %v14164_v48 = vld [vmem:[#allocation116_spill] sm:$0xff] }
 0x5ff   :  { %v10033_v47 = vpop.xlane.xlu0 %3059  ;;  %v7228_v17 = vsel %vm2109_vm14, 1.0, %v13889_v21  ;;  %vm2111_vm15 = vcmp.ge.f32.partialorder %v1855_v16, %v9233_v6 }
 0x600   :  { %14154 = vst [vmem:[#allocation171_spill] sm:$0xff] %v10033_v47 }
 0x602   :  { %3119 = vadd.xlane.f32.xlu2 %v3118_v13  ;;  %v14158_v13 = vld [vmem:[#allocation115_spill] sm:$0xff] }
 0x603   :  { %3116 = vadd.xlane.f32.xlu1 %v3115_v40  ;;  %vm2108_vm12 = vcmp.ge.f32.partialorder %v14159_v15, %v14158_v13  ;;  %v1856_v13 = vperm.slane %v839_v42, 0  ;;  %v842_v42 = vrot.slane %v14156_v27, 7 }
 0x604   :  { %3122 = vadd.xlane.f32.xlu0 %v3121_v19  ;;  %v7227_v19 = vsel %vm2108_vm12, 1.0, %v13889_v21 }
 0x605   :  { %v10038_v57 = vpop.xlane.xlu2 %2550  ;;  %v2621_v61 = vsel %vm2428_vm4, %v7227_v19, 0.0  ;;  %vm2112_vm1 = vcmp.ge.f32.partialorder %v1856_v13, %v14164_v48 }
 0x606   :  { %14155 = vst [vmem:[#allocation172_spill] sm:$0xff] %v10038_v57  ;;  %v10041_v59 = vpop.xlane.xlu1 %2556 }
 0x607   :  { %v10044_v36 = vpop.xlane.xlu0 %2553 }
 0x608   :  { %14157 = vst [vmem:[#allocation173_spill] sm:$0xff] %v10044_v36  ;;  %v2877_v36 = vmul.f32 %v7227_v19, %v14159_v15 }
 0x60a   :  { %3128 = vadd.xlane.f32.xlu2 %v3127_v44  ;;  %v1857_v44 = vperm.slane %v840_v46, 0  ;;  %v7230_v46 = vsel %vm2111_vm15, 1.0, %v13889_v21 }
 0x60b   :  { %3125 = vadd.xlane.f32.xlu1 %v3124_v43  ;;  %v2627_v43 = vsel %vm2428_vm4, %v7229_v62, 0.0  ;;  %v2880_v57 = vmul.f32 %v7230_v46, %v1855_v16  ;;  %v14176_v16 = vld [vmem:[#allocation70_spill] sm:$0xff] }
 0x60c   :  { %3131 = vadd.xlane.f32.xlu0 %v3130_v53  ;;  %v2624_v53 = vsel %vm2428_vm4, %v7228_v17, 0.0  ;;  %vm2113_vm0 = vcmp.ge.f32.partialorder %v1857_v44, %v9249_v45 }
 0x60d   :  { %v10057_v58 = vpop.xlane.xlu2 %2559  ;;  %v7232_v6 = vsel %vm2113_vm0, 1.0, %v13889_v21 }
 0x60e   :  { %14161 = vst [vmem:[#allocation115_spill] sm:$0xff] %v10057_v58  ;;  %v10060_v40 = vpop.xlane.xlu1 %2565  ;;  %v2636_v48 = vsel %vm2428_vm4, %v7232_v6, 0.0 }
 0x60f   :  { %14162 = vst [vmem:[#allocation67_spill] sm:$0xff] %v10060_v40  ;;  %v10064_v49 = vpop.xlane.xlu0 %2562  ;;  %v1859_v40 = vperm.slane %v842_v42, 0 }
 0x610   :  { %14163 = vst [vmem:[#allocation113_spill] sm:$0xff] %v10064_v49  ;;  %v841_v49 = vrot.slane %v14156_v27, 6 }
 0x612   :  { %2622 = vadd.xlane.f32.xlu2 %v2621_v61  ;;  %v1858_v45 = vperm.slane %v841_v49, 0 }
 0x613   :  { %2628 = vadd.xlane.f32.xlu1 %v2627_v43  ;;  %v7231_v43 = vsel %vm2112_vm1, 1.0, %v13889_v21 }
 0x614   :  { %2625 = vadd.xlane.f32.xlu0 %v2624_v53  ;;  %v2630_v53 = vsel %vm2428_vm4, %v7230_v46, 0.0  ;;  %vm2114_vm2 = vcmp.ge.f32.partialorder %v1858_v45, %v9245_v51  ;;  %v844_v46 = vrot.slane %v14176_v16, 2 }
 0x615   :  { %v10075_v41 = vpop.xlane.xlu2 %2568  ;;  %v7233_v49 = vsel %vm2114_vm2, 1.0, %v13889_v21 }
 0x616   :  { %14165 = vst [vmem:[#allocation116_spill] sm:$0xff] %v10075_v41  ;;  %v10077_v9 = vpop.xlane.xlu1 %3062  ;;  %v14168_v41 = vld [vmem:[#allocation118_spill] sm:$0xff]  ;;  %v2639_v51 = vsel %vm2428_vm4, %v7233_v49, 0.0 }
 0x617   :  { %14166 = vst [vmem:[#allocation174_spill] sm:$0xff] %v10077_v9  ;;  %v10081_v61 = vpop.xlane.xlu0 %2571  ;;  %v2633_v9 = vsel %vm2428_vm4, %v7231_v43, 0.0  ;;  %vm2115_vm3 = vcmp.ge.f32.partialorder %v1859_v40, %v14168_v41 }
 0x618   :  { %14167 = vst [vmem:[#allocation175_spill] sm:$0xff] %v10081_v61  ;;  %v7234_v42 = vsel %vm2115_vm3, 1.0, %v13889_v21 }
 0x61a   :  { %2631 = vadd.xlane.f32.xlu2 %v2630_v53 }
 0x61b   :  { %2637 = vadd.xlane.f32.xlu1 %v2636_v48  ;;  %v3133_v48 = vsel %vm2428_vm4, %v2877_v36, 0.0 }
 0x61c   :  { %2634 = vadd.xlane.f32.xlu0 %v2633_v9  ;;  %v2642_v9 = vsel %vm2428_vm4, %v7234_v42, 0.0 }
 0x61d   :  { %v10090_v61 = vpop.xlane.xlu2 %3065 }
 0x61e   :  { %14169 = vst [vmem:[#allocation118_spill] sm:$0xff] %v10090_v61  ;;  %v10092_v47 = vpop.xlane.xlu1 %3071  ;;  %v2878_v61 = vmul.f32 %v7228_v17, %v1853_v8  ;;  %v2883_v17 = vmul.f32 %v7233_v49, %v1858_v45  ;;  %v843_v45 = vrot.slane %v14176_v16, 1  ;;  %v845_v49 = vrot.slane %v14176_v16, 3 }
 0x61f   :  { %14170 = vst [vmem:[#allocation176_spill] sm:$0xff] %v10092_v47  ;;  %v10096_v53 = vpop.xlane.xlu0 %3068 }
 0x620   :  { %14171 = vst [vmem:[#allocation177_spill] sm:$0xff] %v10096_v53  ;;  %v2879_v53 = vmul.f32 %v7229_v62, %v10047_v18  ;;  %v3136_v58 = vsel %vm2428_vm4, %v2878_v61, 0.0  ;;  %v2882_v18 = vmul.f32 %v7232_v6, %v1857_v44  ;;  %v2884_v6 = vmul.f32 %v7234_v42, %v1859_v40 }
 0x622   :  { %2640 = vadd.xlane.f32.xlu2 %v2639_v51  ;;  %v3142_v51 = vsel %vm2428_vm4, %v2880_v57, 0.0  ;;  %v3139_v36 = vsel %vm2428_vm4, %v2879_v53, 0.0  ;;  %v3151_v57 = vsel %vm2428_vm4, %v2883_v17, 0.0  ;;  %v3148_v61 = vsel %vm2428_vm4, %v2882_v18, 0.0 }
 0x623   :  { %3134 = vadd.xlane.f32.xlu1 %v3133_v48  ;;  %v1861_v17 = vperm.slane %v843_v45, 0  ;;  %v1863_v18 = vperm.slane %v845_v49, 0 }
 0x624   :  { %2643 = vadd.xlane.f32.xlu0 %v2642_v9  ;;  %v2881_v9 = vmul.f32 %v7231_v43, %v1856_v13  ;;  %v14178_v13 = vld [vmem:[#allocation78_spill] sm:$0xff]  ;;  %v14179_v43 = vld [vmem:[#allocation119_spill] sm:$0xff] }
 0x625   :  { %v10102_v41 = vpop.xlane.xlu2 %3074  ;;  %vm2116_vm5 = vcmp.ge.f32.partialorder %v14178_v13, %v9265_v2  ;;  %vm2117_vm7 = vcmp.ge.f32.partialorder %v1861_v17, %v9261_v23  ;;  %vm2119_vm8 = vcmp.ge.f32.partialorder %v1863_v18, %v9281_v1 }
 0x626   :  { %14172 = vst [vmem:[#allocation178_spill] sm:$0xff] %v10102_v41  ;;  %v10104_v47 = vpop.xlane.xlu1 %3080  ;;  %v3145_v62 = vsel %vm2428_vm4, %v2881_v9, 0.0  ;;  %v7235_v9 = vsel %vm2116_vm5, 1.0, %v13889_v21  ;;  %v7238_v49 = vsel %vm2119_vm8, 1.0, %v13889_v21 }
 0x627   :  { %14173 = vst [vmem:[#allocation179_spill] sm:$0xff] %v10104_v47  ;;  %v10106_v19 = vpop.xlane.xlu0 %3077 }
 0x628   :  { %14174 = vst [vmem:[#allocation180_spill] sm:$0xff] %v10106_v19 }
 0x62a   :  { %3137 = vadd.xlane.f32.xlu2 %v3136_v58  ;;  %v10121_v58 = vperm.slane %v844_v46, 0  ;;  %v3154_v46 = vsel %vm2428_vm4, %v2884_v6, 0.0  ;;  %v7236_v6 = vsel %vm2117_vm7, 1.0, %v13889_v21 }
 0x62b   :  { %3143 = vadd.xlane.f32.xlu1 %v3142_v51  ;;  %v847_v51 = vrot.slane %v14176_v16, 5 }
 0x62c   :  { %3140 = vadd.xlane.f32.xlu0 %v3139_v36  ;;  %vm2118_vm6 = vcmp.ge.f32.partialorder %v10121_v58, %v14179_v43  ;;  %v848_v43 = vrot.slane %v14176_v16, 6 }
 0x62d   :  { %v10112_v48 = vpop.xlane.xlu2 %3083  ;;  %v7237_v2 = vsel %vm2118_vm6, 1.0, %v13889_v21  ;;  %v10141_v40 = vperm.slane %v847_v51, 0 }
 0x62e   :  { %14175 = vst [vmem:[#allocation181_spill] sm:$0xff] %v10112_v48  ;;  %v10114_v8 = vpop.xlane.xlu1 %2574  ;;  %v2651_v42 = vsel %vm2428_vm4, %v7237_v2, 0.0 }
 0x62f   :  { %v10117_v41 = vpop.xlane.xlu0 %2580  ;;  %vm2121_vm9 = vcmp.ge.f32.partialorder %v10141_v40, %v9263_v29  ;;  %v1866_v29 = vperm.slane %v848_v43, 0 }
 0x630   :  { %14177 = vst [vmem:[#allocation182_spill] sm:$0xff] %v10117_v41  ;;  %v7240_v1 = vsel %vm2121_vm9, 1.0, %v13889_v21  ;;  %v849_v41 = vrot.slane %v14176_v16, 7 }
 0x631   :  { %vm2122_vm11 = vcmp.ge.f32.partialorder %v1866_v29, %v9316_v7 }
 0x632   :  { %3146 = vadd.xlane.f32.xlu2 %v3145_v62  ;;  %v2645_v62 = vsel %vm2428_vm4, %v7235_v9, 0.0 }
 0x633   :  { %3152 = vadd.xlane.f32.xlu1 %v3151_v57  ;;  %v846_v57 = vrot.slane %v14176_v16, 4 }
 0x634   :  { %3149 = vadd.xlane.f32.xlu0 %v3148_v61 }
 0x635   :  { %v10129_v44 = vpop.xlane.xlu2 %2577  ;;  %v1864_v51 = vperm.slane %v846_v57, 0 }
 0x636   :  { %v10132_v53 = vpop.xlane.xlu1 %2583 }
 0x637   :  { %14180 = vst [vmem:[#allocation78_spill] sm:$0xff] %v10132_v53  ;;  %v10135_v36 = vpop.xlane.xlu0 %2589  ;;  %vm2120_vm10 = vcmp.ge.f32.partialorder %v1864_v51, %v9276_v34  ;;  %v2885_v34 = vmul.f32 %v7235_v9, %v14178_v13 }
 0x638   :  { %14181 = vst [vmem:[#allocation119_spill] sm:$0xff] %v10135_v36  ;;  %v7239_v57 = vsel %vm2120_vm10, 1.0, %v13889_v21 }
 0x639   :  { %v2657_v48 = vsel %vm2428_vm4, %v7239_v57, 0.0 }
 0x63a   :  { %3155 = vadd.xlane.f32.xlu2 %v3154_v46  ;;  %v2648_v46 = vsel %vm2428_vm4, %v7236_v6, 0.0 }
 0x63b   :  { %2646 = vadd.xlane.f32.xlu1 %v2645_v62  ;;  %v2654_v62 = vsel %vm2428_vm4, %v7238_v49, 0.0 }
 0x63c   :  { %2652 = vadd.xlane.f32.xlu0 %v2651_v42  ;;  %v2660_v42 = vsel %vm2428_vm4, %v7240_v1, 0.0 }
 0x63d   :  { %v10149_v61 = vpop.xlane.xlu2 %2586 }
 0x63e   :  { %14182 = vst [vmem:[#allocation183_spill] sm:$0xff] %v10149_v61  ;;  %v10152_v45 = vpop.xlane.xlu1 %2592 }
 0x63f   :  { %14183 = vst [vmem:[#allocation184_spill] sm:$0xff] %v10152_v45  ;;  %v10155_v23 = vpop.xlane.xlu0 %3086 }
 0x640   :  { %14184 = vst [vmem:[#allocation185_spill] sm:$0xff] %v10155_v23 }
 0x642   :  { %2649 = vadd.xlane.f32.xlu2 %v2648_v46  ;;  %v7241_v46 = vsel %vm2122_vm11, 1.0, %v13889_v21 }
 0x643   :  { %2655 = vadd.xlane.f32.xlu1 %v2654_v62  ;;  %v1867_v62 = vperm.slane %v849_v41, 0  ;;  %v2663_v7 = vsel %vm2428_vm4, %v7241_v46, 0.0  ;;  %v2888_v41 = vmul.f32 %v7238_v49, %v1863_v18 }
 0x644   :  { %2661 = vadd.xlane.f32.xlu0 %v2660_v42  ;;  %v3157_v42 = vsel %vm2428_vm4, %v2885_v34, 0.0 }
 0x645   :  { %v10165_v47 = vpop.xlane.xlu2 %2595  ;;  %vm2123_vm12 = vcmp.ge.f32.partialorder %v1867_v62, %v9309_v35  ;;  %v3166_v35 = vsel %vm2428_vm4, %v2888_v41, 0.0  ;;  %v14195_v41 = vld [vmem:[#allocation79_spill] sm:$0xff] }
 0x646   :  { %14185 = vst [vmem:[#allocation186_spill] sm:$0xff] %v10165_v47  ;;  %v10167_v36 = vpop.xlane.xlu1 %3089  ;;  %v2886_v47 = vmul.f32 %v7236_v6, %v1861_v17  ;;  %v2891_v6 = vmul.f32 %v7241_v46, %v1866_v29  ;;  %v850_v29 = vrot.slane %v14195_v41, 1 }
 0x647   :  { %14186 = vst [vmem:[#allocation187_spill] sm:$0xff] %v10167_v36  ;;  %v10170_v43 = vpop.xlane.xlu0 %3095  ;;  %v14468_v36 = vperm.slane %v14195_v41, 5 }
 0x648   :  { %14187 = vst [vmem:[#allocation188_spill] sm:$0xff] %v10170_v43  ;;  %v7242_v43 = vsel %vm2123_vm12, 1.0, %v13889_v21  ;;  %v3160_v19 = vsel %vm2428_vm4, %v2886_v47, 0.0  ;;  %v3175_v47 = vsel %vm2428_vm4, %v2891_v6, 0.0  ;;  %v1869_v6 = vperm.slane %v850_v29, 0 }
 0x649   :  { %v2892_v46 = vmul.f32 %v7242_v43, %v1867_v62 }
 0x64a   :  { %2658 = vadd.xlane.f32.xlu2 %v2657_v48  ;;  %v2666_v48 = vsel %vm2428_vm4, %v7242_v43, 0.0  ;;  %vm2125_vm15 = vcmp.ge.f32.partialorder %v1869_v6, %v9346_v28  ;;  %v854_v43 = vrot.slane %v14195_v41, 5 }
 0x64b   :  { %2664 = vadd.xlane.f32.xlu1 %v2663_v7  ;;  %v2887_v7 = vmul.f32 %v7237_v2, %v10121_v58  ;;  %v851_v58 = vrot.slane %v14195_v41, 2  ;;  %v7244_v29 = vsel %vm2125_vm15, 1.0, %v13889_v21 }
 0x64c   :  { %3158 = vadd.xlane.f32.xlu0 %v3157_v42 }
 0x64d   :  { %v10178_v61 = vpop.xlane.xlu2 %3092  ;;  %v3163_v18 = vsel %vm2428_vm4, %v2887_v7, 0.0  ;;  %v10211_v7 = vperm.slane %v851_v58, 0 }
 0x64e   :  { %14188 = vst [vmem:[#allocation189_spill] sm:$0xff] %v10178_v61  ;;  %v10180_v53 = vpop.xlane.xlu1 %3098  ;;  %v2889_v61 = vmul.f32 %v7239_v57, %v1864_v51  ;;  %v2890_v51 = vmul.f32 %v7240_v1, %v10141_v40 }
 0x64f   :  { %14189 = vst [vmem:[#allocation190_spill] sm:$0xff] %v10180_v53  ;;  %v10183_v9 = vpop.xlane.xlu0 %3104  ;;  %vm2126_vm14 = vcmp.ge.f32.partialorder %v10211_v7, %v9339_v11  ;;  %v855_v11 = vrot.slane %v14195_v41, 6 }
 0x650   :  { %14190 = vst [vmem:[#allocation191_spill] sm:$0xff] %v10183_v9  ;;  %v3169_v49 = vsel %vm2428_vm4, %v2889_v61, 0.0  ;;  %v852_v61 = vrot.slane %v14195_v41, 3  ;;  %v7245_v58 = vsel %vm2126_vm14, 1.0, %v13889_v21 }
 0x652   :  { %2667 = vadd.xlane.f32.xlu2 %v2666_v48  ;;  %v1871_v40 = vperm.slane %v852_v61, 0 }
 0x653   :  { %3161 = vadd.xlane.f32.xlu1 %v3160_v19  ;;  %v14194_v19 = vld [vmem:[#allocation81_spill] sm:$0xff] }
 0x654   :  { %3167 = vadd.xlane.f32.xlu0 %v3166_v35  ;;  %vm2124_vm13 = vcmp.ge.f32.partialorder %v14194_v19, %v9279_v39  ;;  %v3172_v39 = vsel %vm2428_vm4, %v2890_v51, 0.0  ;;  %vm2127_vm0 = vcmp.ge.f32.partialorder %v1871_v40, %v9314_v4  ;;  %v2675_v4 = vsel %vm2428_vm4, %v7245_v58, 0.0 }
 0x655   :  { %v10188_v34 = vpop.xlane.xlu2 %3101  ;;  %v7243_v35 = vsel %vm2124_vm13, 1.0, %v13889_v21  ;;  %v7246_v28 = vsel %vm2127_vm0, 1.0, %v13889_v21 }
 0x656   :  { %14191 = vst [vmem:[#allocation192_spill] sm:$0xff] %v10188_v34  ;;  %v10191_v42 = vpop.xlane.xlu1 %3107  ;;  %v2669_v1 = vsel %vm2428_vm4, %v7243_v35, 0.0 }
 0x657   :  { %14192 = vst [vmem:[#allocation193_spill] sm:$0xff] %v10191_v42  ;;  %v10193_v17 = vpop.xlane.xlu0 %2598 }
 0x658   :  { %14193 = vst [vmem:[#allocation194_spill] sm:$0xff] %v10193_v17 }
 0x65a   :  { %3164 = vadd.xlane.f32.xlu2 %v3163_v18  ;;  %v3178_v18 = vsel %vm2428_vm4, %v2892_v46, 0.0  ;;  %v1873_v46 = vperm.slane %v854_v43, 0  ;;  %v856_v43 = vrot.slane %v14195_v41, 7 }
 0x65b   :  { %3170 = vadd.xlane.f32.xlu1 %v3169_v49  ;;  %v853_v49 = vrot.slane %v14195_v41, 4 }
 0x65c   :  { %3176 = vadd.xlane.f32.xlu0 %v3175_v47  ;;  %vm2129_vm1 = vcmp.ge.f32.partialorder %v1873_v46, %v9361_v38 }
 0x65d   :  { %v10201_v2 = vpop.xlane.xlu2 %2604  ;;  %v1872_v61 = vperm.slane %v853_v49, 0  ;;  %v7248_v49 = vsel %vm2129_vm1, 1.0, %v13889_v21 }
 0x65e   :  { %14196 = vst [vmem:[#allocation81_spill] sm:$0xff] %v10201_v2  ;;  %v10205_v57 = vpop.xlane.xlu1 %2601 }
 0x65f   :  { %14197 = vst [vmem:[#allocation195_spill] sm:$0xff] %v10205_v57  ;;  %v10208_v48 = vpop.xlane.xlu0 %2607  ;;  %vm2128_vm2 = vcmp.ge.f32.partialorder %v1872_v61, %v9368_v3  ;;  %v1875_v3 = vperm.slane %v856_v43, 0  ;;  %v2894_v43 = vmul.f32 %v7244_v29, %v1869_v6 }
 0x660   :  { %14198 = vst [vmem:[#allocation196_spill] sm:$0xff] %v10208_v48  ;;  %v7247_v38 = vsel %vm2128_vm2, 1.0, %v13889_v21 }
 0x661   :  { %vm2131_vm5 = vcmp.ge.f32.partialorder %v1875_v3, %v9383_v63  ;;  %v3184_v63 = vsel %vm2428_vm4, %v2894_v43, 0.0  ;;  %v2897_v34 = vmul.f32 %v7247_v38, %v1872_v61 }
 0x662   :  { %3173 = vadd.xlane.f32.xlu2 %v3172_v39  ;;  %v2672_v39 = vsel %vm2428_vm4, %v7244_v29, 0.0  ;;  %v7250_v48 = vsel %vm2131_vm5, 1.0, %v13889_v21 }
 0x663   :  { %3179 = vadd.xlane.f32.xlu1 %v3178_v18  ;;  %v1874_v18 = vperm.slane %v855_v11, 0  ;;  %v3193_v29 = vsel %vm2428_vm4, %v2897_v34, 0.0 }
 0x664   :  { %2670 = vadd.xlane.f32.xlu0 %v2669_v1  ;;  %v2678_v1 = vsel %vm2428_vm4, %v7246_v28, 0.0 }
 0x665   :  { %v10221_v62 = vpop.xlane.xlu2 %2613  ;;  %vm2130_vm3 = vcmp.ge.f32.partialorder %v1874_v18, %v9344_v5  ;;  %v2681_v5 = vsel %vm2428_vm4, %v7247_v38, 0.0 }
 0x666   :  { %14199 = vst [vmem:[#allocation197_spill] sm:$0xff] %v10221_v62  ;;  %v10224_v47 = vpop.xlane.xlu1 %2610  ;;  %v7249_v11 = vsel %vm2130_vm3, 1.0, %v13889_v21  ;;  %v14457_v62 = vperm.slane %v14176_v16, 7 }
 0x667   :  { %14200 = vst [vmem:[#allocation198_spill] sm:$0xff] %v10224_v47  ;;  %v10228_v51 = vpop.xlane.xlu0 %2616  ;;  %v14462_v47 = vperm.slane %v14195_v41, 2 }
 0x668   :  { %14201 = vst [vmem:[#allocation199_spill] sm:$0xff] %v10228_v51 }
 0x66a   :  { %2676 = vadd.xlane.f32.xlu2 %v2675_v4 }
 0x66b   :  { %2673 = vadd.xlane.f32.xlu1 %v2672_v39  ;;  %v2684_v39 = vsel %vm2428_vm4, %v7248_v49, 0.0 }
 0x66c   :  { %2679 = vadd.xlane.f32.xlu0 %v2678_v1  ;;  %v2687_v1 = vsel %vm2428_vm4, %v7249_v11, 0.0 }
 0x66d   :  { %v10238_v51 = vpop.xlane.xlu2 %3110 }
 0x66e   :  { %14202 = vst [vmem:[#allocation200_spill] sm:$0xff] %v10238_v51  ;;  %v10241_v17 = vpop.xlane.xlu1 %2619 }
 0x66f   :  { %14203 = vst [vmem:[#allocation201_spill] sm:$0xff] %v10241_v17  ;;  %v10244_v4 = vpop.xlane.xlu0 %3113  ;;  %v2893_v17 = vmul.f32 %v7243_v35, %v14194_v19 }
 0x670   :  { %14204 = vst [vmem:[#allocation202_spill] sm:$0xff] %v10244_v4 }
 0x672   :  { %2685 = vadd.xlane.f32.xlu2 %v2684_v39  ;;  %v3181_v39 = vsel %vm2428_vm4, %v2893_v17, 0.0 }
 0x673   :  { %2682 = vadd.xlane.f32.xlu1 %v2681_v5  ;;  %v2690_v5 = vsel %vm2428_vm4, %v7250_v48, 0.0 }
 0x674   :  { %2688 = vadd.xlane.f32.xlu0 %v2687_v1 }
 0x675   :  { %v10252_v51 = vpop.xlane.xlu2 %3119 }
 0x676   :  { %14205 = vst [vmem:[#allocation203_spill] sm:$0xff] %v10252_v51  ;;  %v10255_v4 = vpop.xlane.xlu1 %3116  ;;  %v2896_v51 = vmul.f32 %v7246_v28, %v1871_v40  ;;  %v14212_v40 = vld [vmem:[#allocation89_spill] sm:$0xff] }
 0x677   :  { %14206 = vst [vmem:[#allocation204_spill] sm:$0xff] %v10255_v4  ;;  %v10257_v53 = vpop.xlane.xlu0 %3122  ;;  %v2895_v4 = vmul.f32 %v7245_v58, %v10211_v7  ;;  %v858_v28 = vrot.slane %v14212_v40, 2  ;;  %v2898_v7 = vmul.f32 %v7248_v49, %v1873_v46  ;;  %v857_v58 = vrot.slane %v14212_v40, 1 }
 0x678   :  { %14207 = vst [vmem:[#allocation205_spill] sm:$0xff] %v10257_v53  ;;  %v3190_v6 = vsel %vm2428_vm4, %v2896_v51, 0.0  ;;  %v2900_v51 = vmul.f32 %v7250_v48, %v1875_v3  ;;  %v859_v48 = vrot.slane %v14212_v40, 3  ;;  %v861_v49 = vrot.slane %v14212_v40, 5 }
 0x679   :  { %v3187_v17 = vsel %vm2428_vm4, %v2895_v4, 0.0  ;;  %v10282_v4 = vperm.slane %v858_v28, 0  ;;  %v3196_v34 = vsel %vm2428_vm4, %v2898_v7, 0.0 }
 0x67a   :  { %3182 = vadd.xlane.f32.xlu2 %v3181_v39  ;;  %v2899_v39 = vmul.f32 %v7249_v11, %v1874_v18  ;;  %v14215_v18 = vld [vmem:[#allocation96_spill] sm:$0xff]  ;;  %v3202_v11 = vsel %vm2428_vm4, %v2900_v51, 0.0  ;;  %v1881_v28 = vperm.slane %v861_v49, 0  ;;  %v863_v49 = vrot.slane %v14212_v40, 7 }
 0x67b   :  { %2691 = vadd.xlane.f32.xlu1 %v2690_v5  ;;  %vm2132_vm6 = vcmp.ge.f32.partialorder %v14215_v18, %v9377_v54  ;;  %vm2134_vm7 = vcmp.ge.f32.partialorder %v10282_v4, %v9398_v12  ;;  %v860_v54 = vrot.slane %v14212_v40, 4 }
 0x67c   :  { %3185 = vadd.xlane.f32.xlu0 %v3184_v63  ;;  %v3199_v38 = vsel %vm2428_vm4, %v2899_v39, 0.0  ;;  %v1877_v63 = vperm.slane %v857_v58, 0  ;;  %v1879_v39 = vperm.slane %v859_v48, 0  ;;  %vm2137_vm10 = vcmp.ge.f32.partialorder %v1881_v28, %v9412_v14 }
 0x67d   :  { %v10263_v1 = vpop.xlane.xlu2 %3128  ;;  %v1880_v58 = vperm.slane %v860_v54, 0 }
 0x67e   :  { %14208 = vst [vmem:[#allocation206_spill] sm:$0xff] %v10263_v1  ;;  %v10265_v35 = vpop.xlane.xlu1 %3125  ;;  %vm2133_vm8 = vcmp.ge.f32.partialorder %v1877_v63, %v9366_v10  ;;  %vm2135_vm9 = vcmp.ge.f32.partialorder %v1879_v39, %v9394_v0  ;;  %v7256_v0 = vsel %vm2137_vm10, 1.0, %v13889_v21 }
 0x67f   :  { %14209 = vst [vmem:[#allocation207_spill] sm:$0xff] %v10265_v35  ;;  %v10268_v53 = vpop.xlane.xlu0 %3131  ;;  %v7252_v12 = vsel %vm2133_vm8, 1.0, %v13889_v21  ;;  %vm2136_vm11 = vcmp.ge.f32.partialorder %v1880_v58, %v9381_v25  ;;  %v7254_v48 = vsel %vm2135_vm9, 1.0, %v13889_v21  ;;  %v2708_v25 = vsel %vm2428_vm4, %v7256_v0, 0.0 }
 0x680   :  { %14210 = vst [vmem:[#allocation208_spill] sm:$0xff] %v10268_v53  ;;  %v2696_v51 = vsel %vm2428_vm4, %v7252_v12, 0.0 }
 0x682   :  { %3191 = vadd.xlane.f32.xlu2 %v3190_v6  ;;  %v7251_v6 = vsel %vm2132_vm6, 1.0, %v13889_v21 }
 0x683   :  { %3188 = vadd.xlane.f32.xlu1 %v3187_v17  ;;  %v2693_v10 = vsel %vm2428_vm4, %v7251_v6, 0.0 }
 0x684   :  { %3194 = vadd.xlane.f32.xlu0 %v3193_v29  ;;  %v7253_v29 = vsel %vm2134_vm7, 1.0, %v13889_v21 }
 0x685   :  { %v10273_v43 = vpop.xlane.xlu2 %2622  ;;  %v2699_v7 = vsel %vm2428_vm4, %v7253_v29, 0.0  ;;  %v2903_v53 = vmul.f32 %v7253_v29, %v10282_v4 }
 0x686   :  { %14211 = vst [vmem:[#allocation209_spill] sm:$0xff] %v10273_v43  ;;  %v10276_v5 = vpop.xlane.xlu1 %2628 }
 0x687   :  { %14213 = vst [vmem:[#allocation210_spill] sm:$0xff] %v10276_v5  ;;  %v10279_v61 = vpop.xlane.xlu0 %2625  ;;  %v14451_v5 = vperm.slane %v14176_v16, 4 }
 0x688   :  { %14214 = vst [vmem:[#allocation211_spill] sm:$0xff] %v10279_v61  ;;  %v14440_v61 = vperm.slane %v14156_v27, 6 }
 0x68a   :  { %3200 = vadd.xlane.f32.xlu2 %v3199_v38  ;;  %v862_v38 = vrot.slane %v14212_v40, 6 }
 0x68b   :  { %3197 = vadd.xlane.f32.xlu1 %v3196_v34 }
 0x68c   :  { %3203 = vadd.xlane.f32.xlu0 %v3202_v11  ;;  %v1882_v14 = vperm.slane %v862_v38, 0 }
 0x68d   :  { %v10292_v46 = vpop.xlane.xlu2 %2631 }
 0x68e   :  { %14216 = vst [vmem:[#allocation96_spill] sm:$0xff] %v10292_v46  ;;  %v10295_v3 = vpop.xlane.xlu1 %2637  ;;  %vm2138_vm12 = vcmp.ge.f32.partialorder %v1882_v14, %v9408_v26  ;;  %v14445_v46 = vperm.slane %v14176_v16, 1 }
 0x68f   :  { %14217 = vst [vmem:[#allocation212_spill] sm:$0xff] %v10295_v3  ;;  %v10299_v17 = vpop.xlane.xlu0 %2634  ;;  %v7257_v38 = vsel %vm2138_vm12, 1.0, %v13889_v21  ;;  %v2904_v3 = vmul.f32 %v7254_v48, %v1879_v39 }
 0x690   :  { %14218 = vst [vmem:[#allocation213_spill] sm:$0xff] %v10299_v17  ;;  %v2711_v26 = vsel %vm2428_vm4, %v7257_v38, 0.0 }
 0x692   :  { %2694 = vadd.xlane.f32.xlu2 %v2693_v10  ;;  %v7255_v10 = vsel %vm2136_vm11, 1.0, %v13889_v21 }
 0x693   :  { %2700 = vadd.xlane.f32.xlu1 %v2699_v7  ;;  %v2702_v7 = vsel %vm2428_vm4, %v7254_v48, 0.0  ;;  %v2705_v17 = vsel %vm2428_vm4, %v7255_v10, 0.0  ;;  %v2906_v48 = vmul.f32 %v7256_v0, %v1881_v28  ;;  %v14236_v0 = vld [vmem:[#allocation18_spill] sm:$0xff] }
 0x694   :  { %2697 = vadd.xlane.f32.xlu0 %v2696_v51  ;;  %v1883_v51 = vperm.slane %v863_v49, 0 }
 0x695   :  { %v10310_v34 = vpop.xlane.xlu2 %2640 }
 0x696   :  { %14219 = vst [vmem:[#allocation214_spill] sm:$0xff] %v10310_v34  ;;  %v10312_v11 = vpop.xlane.xlu1 %3134  ;;  %vm2139_vm13 = vcmp.ge.f32.partialorder %v1883_v51, %v9396_v20 }
 0x697   :  { %14220 = vst [vmem:[#allocation215_spill] sm:$0xff] %v10312_v11  ;;  %v10316_v54 = vpop.xlane.xlu0 %2643  ;;  %v7258_v49 = vsel %vm2139_vm13, 1.0, %v13889_v21 }
 0x698   :  { %14221 = vst [vmem:[#allocation216_spill] sm:$0xff] %v10316_v54  ;;  %v2901_v54 = vmul.f32 %v7251_v6, %v14215_v18  ;;  %v2714_v20 = vsel %vm2428_vm4, %v7258_v49, 0.0  ;;  %v2908_v29 = vmul.f32 %v7258_v49, %v1883_v51 }
 0x69a   :  { %2703 = vadd.xlane.f32.xlu2 %v2702_v7  ;;  %v3226_v28 = vsel %vm2428_vm4, %v2908_v29, 0.0 }
 0x69b   :  { %2709 = vadd.xlane.f32.xlu1 %v2708_v25  ;;  %v3205_v25 = vsel %vm2428_vm4, %v2901_v54, 0.0  ;;  %v3211_v54 = vsel %vm2428_vm4, %v2903_v53, 0.0 }
 0x69c   :  { %2706 = vadd.xlane.f32.xlu0 %v2705_v17 }
 0x69d   :  { %v10325_v1 = vpop.xlane.xlu2 %3137 }
 0x69e   :  { %14222 = vst [vmem:[#allocation217_spill] sm:$0xff] %v10325_v1  ;;  %v10327_v11 = vpop.xlane.xlu1 %3143  ;;  %v2902_v1 = vmul.f32 %v7252_v12, %v1877_v63  ;;  %v2907_v12 = vmul.f32 %v7257_v38, %v1882_v14 }
 0x69f   :  { %14223 = vst [vmem:[#allocation218_spill] sm:$0xff] %v10327_v11  ;;  %v10331_v7 = vpop.xlane.xlu0 %3140 }
 0x6a0   :  { %14224 = vst [vmem:[#allocation219_spill] sm:$0xff] %v10331_v7  ;;  %v3208_v11 = vsel %vm2428_vm4, %v2902_v1, 0.0  ;;  %v3223_v1 = vsel %vm2428_vm4, %v2907_v12, 0.0  ;;  %v14240_v12 = vld [vmem:[#allocation13_spill] sm:$0xff] }
 0x6a2   :  { %2712 = vadd.xlane.f32.xlu2 %v2711_v26  ;;  %v3214_v26 = vsel %vm2428_vm4, %v2904_v3, 0.0  ;;  %v3220_v3 = vsel %vm2428_vm4, %v2906_v48, 0.0  ;;  %v3235_v48 = vsel %vm2428_vm4, %v14240_v12, 0.0 }
 0x6a3   :  { %3206 = vadd.xlane.f32.xlu1 %v3205_v25 }
 0x6a4   :  { %2715 = vadd.xlane.f32.xlu0 %v2714_v20  ;;  %v2905_v20 = vmul.f32 %v7255_v10, %v1880_v58  ;;  %v14233_v58 = vld [vmem:[#allocation5_spill] sm:$0xff] }
 0x6a5   :  { %v10337_v17 = vpop.xlane.xlu2 %3146  ;;  %v14234_v10 = vld [vmem:[#allocation117_spill] sm:$0xff] }
 0x6a6   :  { %14225 = vst [vmem:[#allocation220_spill] sm:$0xff] %v10337_v17  ;;  %v10339_v34 = vpop.xlane.xlu1 %3152  ;;  %v3217_v4 = vsel %vm2428_vm4, %v2905_v20, 0.0  ;;  %v2909_v14 = vmul.f32 %v14234_v10, %v14233_v58 }
 0x6a7   :  { %14226 = vst [vmem:[#allocation221_spill] sm:$0xff] %v10339_v34  ;;  %v10341_v6 = vpop.xlane.xlu0 %3149 }
 0x6a8   :  { %14227 = vst [vmem:[#allocation222_spill] sm:$0xff] %v10341_v6 }
 0x6aa   :  { %3209 = vadd.xlane.f32.xlu2 %v3208_v11 }
 0x6ab   :  { %3215 = vadd.xlane.f32.xlu1 %v3214_v26  ;;  %v3232_v26 = vsel %vm2428_vm4, %v14236_v0, 0.0  ;;  %v14246_v0 = vld [vmem:[#allocation14_spill] sm:$0xff] }
 0x6ac   :  { %3212 = vadd.xlane.f32.xlu0 %v3211_v54  ;;  %v3229_v54 = vsel %vm2428_vm4, %v2909_v14, 0.0 }
 0x6ad   :  { %v10347_v25 = vpop.xlane.xlu2 %3155 }
 0x6ae   :  { %14228 = vst [vmem:[#allocation223_spill] sm:$0xff] %v10347_v25  ;;  %v10349_v63 = vpop.xlane.xlu1 %2646  ;;  %v14414_v25 = vld [vmem:[#allocation47_spill] sm:$0xff] }
 0x6af   :  { %14229 = vst [vmem:[#allocation224_spill] sm:$0xff] %v10349_v63  ;;  %v10351_v39 = vpop.xlane.xlu0 %2652  ;;  %v14423_v6 = vperm.slane %v14414_v25, 5  ;;  %v14434_v63 = vperm.slane %v14156_v27, 3 }
 0x6b0   :  { %14230 = vst [vmem:[#allocation225_spill] sm:$0xff] %v10351_v39 }
 0x6b2   :  { %3218 = vadd.xlane.f32.xlu2 %v3217_v4  ;;  %v14241_v4 = vld [vmem:[#allocation19_spill] sm:$0xff] }
 0x6b3   :  { %3224 = vadd.xlane.f32.xlu1 %v3223_v1  ;;  %v3241_v1 = vsel %vm2428_vm4, %v14241_v4, 0.0 }
 0x6b4   :  { %3221 = vadd.xlane.f32.xlu0 %v3220_v3  ;;  %v14242_v3 = vld [vmem:[#allocation20_spill] sm:$0xff] }
 0x6b5   :  { %v10356_v53 = vpop.xlane.xlu2 %2649  ;;  %v3238_v29 = vsel %vm2428_vm4, %v14242_v3, 0.0  ;;  %v14250_v3 = vld [vmem:[#allocation8_spill] sm:$0xff] }
 0x6b6   :  { %14231 = vst [vmem:[#allocation226_spill] sm:$0xff] %v10356_v53  ;;  %v10358_v11 = vpop.xlane.xlu1 %2655 }
 0x6b7   :  { %14232 = vst [vmem:[#allocation227_spill] sm:$0xff] %v10358_v11  ;;  %v10362_v38 = vpop.xlane.xlu0 %2661  ;;  %v14417_v11 = vperm.slane %v14414_v25, 2 }
 0x6b8   :  { %14235 = vst [vmem:[#allocation5_spill] sm:$0xff] %v10362_v38 }
 0x6ba   :  { %3227 = vadd.xlane.f32.xlu2 %v3226_v28 }
 0x6bb   :  { %3233 = vadd.xlane.f32.xlu1 %v3232_v26  ;;  %v3244_v26 = vsel %vm2428_vm4, %v14246_v0, 0.0 }
 0x6bc   :  { %3230 = vadd.xlane.f32.xlu0 %v3229_v54  ;;  %v14247_v54 = vld [vmem:[#allocation23_spill] sm:$0xff] }
 0x6bd   :  { %v10368_v20 = vpop.xlane.xlu2 %2658  ;;  %v3250_v12 = vsel %vm2428_vm4, %v14247_v54, 0.0 }
 0x6be   :  { %14237 = vst [vmem:[#allocation117_spill] sm:$0xff] %v10368_v20  ;;  %v10370_v51 = vpop.xlane.xlu1 %2664 }
 0x6bf   :  { %14238 = vst [vmem:[#allocation18_spill] sm:$0xff] %v10370_v51  ;;  %v10372_v49 = vpop.xlane.xlu0 %3158 }
 0x6c0   :  { %14239 = vst [vmem:[#allocation228_spill] sm:$0xff] %v10372_v49 }
 0x6c2   :  { %3236 = vadd.xlane.f32.xlu2 %v3235_v48  ;;  %v14248_v48 = vld [vmem:[#allocation25_spill] sm:$0xff] }
 0x6c3   :  { %3242 = vadd.xlane.f32.xlu1 %v3241_v1  ;;  %v3247_v4 = vsel %vm2428_vm4, %v14248_v48, 0.0 }
 0x6c4   :  { %3239 = vadd.xlane.f32.xlu0 %v3238_v29  ;;  %v2917_v29 = vmul.f32 %v9364_v22, %v14250_v3 }
 0x6c5   :  { %v10380_v10 = vpop.xlane.xlu2 %2667 }
 0x6c6   :  { %14243 = vst [vmem:[#allocation13_spill] sm:$0xff] %v10380_v10  ;;  %v10382_v14 = vpop.xlane.xlu1 %3161  ;;  %v3253_v0 = vsel %vm2428_vm4, %v2917_v29, 0.0  ;;  %v14259_v29 = vld [vmem:[#allocation35_spill] sm:$0xff] }
 0x6c7   :  { %14244 = vst [vmem:[#allocation19_spill] sm:$0xff] %v10382_v14  ;;  %v10384_v28 = vpop.xlane.xlu0 %3167 }
 0x6c8   :  { %14245 = vst [vmem:[#allocation20_spill] sm:$0xff] %v10384_v28 }
 0x6ca   :  { %3245 = vadd.xlane.f32.xlu2 %v3244_v26  ;;  %v14253_v26 = vld [vmem:[#allocation31_spill] sm:$0xff] }
 0x6cb   :  { %3251 = vadd.xlane.f32.xlu1 %v3250_v12  ;;  %v3259_v54 = vsel %vm2428_vm4, %v14253_v26, 0.0  ;;  %v14254_v12 = vld [vmem:[#allocation34_spill] sm:$0xff]  ;;  %v14260_v26 = vld [vmem:[#allocation37_spill] sm:$0xff] }
 0x6cc   :  { %3248 = vadd.xlane.f32.xlu0 %v3247_v4  ;;  %v3256_v48 = vsel %vm2428_vm4, %v14254_v12, 0.0 }
 0x6cd   :  { %v10392_v1 = vpop.xlane.xlu2 %3164 }
 0x6ce   :  { %14249 = vst [vmem:[#allocation14_spill] sm:$0xff] %v10392_v1  ;;  %v10396_v39 = vpop.xlane.xlu1 %3170 }
 0x6cf   :  { %14251 = vst [vmem:[#allocation23_spill] sm:$0xff] %v10396_v39  ;;  %v10398_v28 = vpop.xlane.xlu0 %3176  ;;  %v14258_v39 = vld [vmem:[#allocation26_spill] sm:$0xff] }
 0x6d0   :  { %14252 = vst [vmem:[#allocation25_spill] sm:$0xff] %v10398_v28  ;;  %v3262_v28 = vsel %vm2428_vm4, %v14258_v39, 0.0 }
 0x6d2   :  { %3254 = vadd.xlane.f32.xlu2 %v3253_v0  ;;  %v3268_v0 = vsel %vm2428_vm4, %v14259_v29, 0.0  ;;  %v14265_v29 = vld [vmem:[#allocation41_spill] sm:$0xff] }
 0x6d3   :  { %3260 = vadd.xlane.f32.xlu1 %v3259_v54  ;;  %v3265_v54 = vsel %vm2428_vm4, %v14260_v26, 0.0 }
 0x6d4   :  { %3257 = vadd.xlane.f32.xlu0 %v3256_v48 }
 0x6d5   :  { %v10405_v4 = vpop.xlane.xlu2 %3173 }
 0x6d6   :  { %14255 = vst [vmem:[#allocation8_spill] sm:$0xff] %v10405_v4  ;;  %v10407_v1 = vpop.xlane.xlu1 %3179  ;;  %v2925_v4 = vmul.f32 %v9508_v50, %v13994_v31  ;;  %v14269_v50 = vld [vmem:[#allocation38_spill] sm:$0xff] }
 0x6d7   :  { %14256 = vst [vmem:[#allocation31_spill] sm:$0xff] %v10407_v1  ;;  %v10409_v22 = vpop.xlane.xlu0 %2670  ;;  %v14264_v1 = vld [vmem:[#allocation27_spill] sm:$0xff] }
 0x6d8   :  { %14257 = vst [vmem:[#allocation34_spill] sm:$0xff] %v10409_v22  ;;  %v3271_v39 = vsel %vm2428_vm4, %v14264_v1, 0.0 }
 0x6da   :  { %3263 = vadd.xlane.f32.xlu2 %v3262_v28  ;;  %v3277_v28 = vsel %vm2428_vm4, %v2925_v4, 0.0  ;;  %v14271_v4 = vld [vmem:[#allocation54_spill] sm:$0xff] }
 0x6db   :  { %3269 = vadd.xlane.f32.xlu1 %v3268_v0  ;;  %v3274_v0 = vsel %vm2428_vm4, %v14265_v29, 0.0 }
 0x6dc   :  { %3266 = vadd.xlane.f32.xlu0 %v3265_v54 }
 0x6dd   :  { %v10417_v12 = vpop.xlane.xlu2 %2676 }
 0x6de   :  { %14261 = vst [vmem:[#allocation26_spill] sm:$0xff] %v10417_v12  ;;  %v10419_v48 = vpop.xlane.xlu1 %2673 }
 0x6df   :  { %14262 = vst [vmem:[#allocation35_spill] sm:$0xff] %v10419_v48  ;;  %v10423_v22 = vpop.xlane.xlu0 %2679  ;;  %v14270_v48 = vld [vmem:[#allocation53_spill] sm:$0xff] }
 0x6e0   :  { %14263 = vst [vmem:[#allocation37_spill] sm:$0xff] %v10423_v22  ;;  %v3280_v22 = vsel %vm2428_vm4, %v14269_v50, 0.0  ;;  %v3286_v1 = vsel %vm2428_vm4, %v14270_v48, 0.0  ;;  %v14276_v50 = vld [vmem:[#allocation57_spill] sm:$0xff]  ;;  %v14277_v48 = vld [vmem:[#allocation58_spill] sm:$0xff] }
 0x6e2   :  { %3272 = vadd.xlane.f32.xlu2 %v3271_v39  ;;  %v3283_v39 = vsel %vm2428_vm4, %v14271_v4, 0.0 }
 0x6e3   :  { %3278 = vadd.xlane.f32.xlu1 %v3277_v28 }
 0x6e4   :  { %3275 = vadd.xlane.f32.xlu0 %v3274_v0 }
 0x6e5   :  { %v10430_v26 = vpop.xlane.xlu2 %2685 }
 0x6e6   :  { %14266 = vst [vmem:[#allocation27_spill] sm:$0xff] %v10430_v26  ;;  %v10432_v54 = vpop.xlane.xlu1 %2682  ;;  %v14275_v26 = vld [vmem:[#allocation42_spill] sm:$0xff] }
 0x6e7   :  { %14267 = vst [vmem:[#allocation41_spill] sm:$0xff] %v10432_v54  ;;  %v10434_v12 = vpop.xlane.xlu0 %2688 }
 0x6e8   :  { %14268 = vst [vmem:[#allocation229_spill] sm:$0xff] %v10434_v12  ;;  %v3289_v12 = vsel %vm2428_vm4, %v14275_v26, 0.0  ;;  %v14282_v26 = vld [vmem:[#allocation73_spill] sm:$0xff] }
 0x6ea   :  { %3281 = vadd.xlane.f32.xlu2 %v3280_v22  ;;  %v3295_v22 = vsel %vm2428_vm4, %v14276_v50, 0.0  ;;  %v3304_v50 = vsel %vm2428_vm4, %v14282_v26, 0.0 }
 0x6eb   :  { %3287 = vadd.xlane.f32.xlu1 %v3286_v1  ;;  %v3292_v1 = vsel %vm2428_vm4, %v14277_v48, 0.0 }
 0x6ec   :  { %3284 = vadd.xlane.f32.xlu0 %v3283_v39 }
 0x6ed   :  { %v10442_v28 = vpop.xlane.xlu2 %3182 }
 0x6ee   :  { %14272 = vst [vmem:[#allocation38_spill] sm:$0xff] %v10442_v28  ;;  %v10444_v29 = vpop.xlane.xlu1 %2691 }
 0x6ef   :  { %14273 = vst [vmem:[#allocation53_spill] sm:$0xff] %v10444_v29  ;;  %v10446_v0 = vpop.xlane.xlu0 %3185  ;;  %v2933_v29 = vmul.f32 %v9667_v33, %v14035_v30 }
 0x6f0   :  { %14274 = vst [vmem:[#allocation54_spill] sm:$0xff] %v10446_v0  ;;  %v14281_v0 = vld [vmem:[#allocation45_spill] sm:$0xff] }
 0x6f2   :  { %3290 = vadd.xlane.f32.xlu2 %v3289_v12  ;;  %v3298_v12 = vsel %vm2428_vm4, %v14281_v0, 0.0 }
 0x6f3   :  { %3296 = vadd.xlane.f32.xlu1 %v3295_v22  ;;  %v3301_v22 = vsel %vm2428_vm4, %v2933_v29, 0.0 }
 0x6f4   :  { %3293 = vadd.xlane.f32.xlu0 %v3292_v1 }
 0x6f5   :  { %v10454_v4 = vpop.xlane.xlu2 %3191 }
 0x6f6   :  { %14278 = vst [vmem:[#allocation42_spill] sm:$0xff] %v10454_v4  ;;  %v10456_v39 = vpop.xlane.xlu1 %3188  ;;  %v14286_v4 = vld [vmem:[#allocation59_spill] sm:$0xff] }
 0x6f7   :  { %14279 = vst [vmem:[#allocation57_spill] sm:$0xff] %v10456_v39  ;;  %v10458_v28 = vpop.xlane.xlu0 %3194  ;;  %v3307_v33 = vsel %vm2428_vm4, %v14286_v4, 0.0  ;;  %v14293_v4 = vld [vmem:[#allocation82_spill] sm:$0xff] }
 0x6f8   :  { %14280 = vst [vmem:[#allocation58_spill] sm:$0xff] %v10458_v28  ;;  %v14287_v28 = vld [vmem:[#allocation76_spill] sm:$0xff] }
 0x6f9   :  { %v3313_v0 = vsel %vm2428_vm4, %v14287_v28, 0.0  ;;  %v14294_v28 = vld [vmem:[#allocation83_spill] sm:$0xff] }
 0x6fa   :  { %3299 = vadd.xlane.f32.xlu2 %v3298_v12  ;;  %v14288_v12 = vld [vmem:[#allocation77_spill] sm:$0xff] }
 0x6fb   :  { %3305 = vadd.xlane.f32.xlu1 %v3304_v50  ;;  %v3310_v26 = vsel %vm2428_vm4, %v14288_v12, 0.0 }
 0x6fc   :  { %3302 = vadd.xlane.f32.xlu0 %v3301_v22 }
 0x6fd   :  { %v10467_v48 = vpop.xlane.xlu2 %3200 }
 0x6fe   :  { %14283 = vst [vmem:[#allocation45_spill] sm:$0xff] %v10467_v48  ;;  %v10469_v1 = vpop.xlane.xlu1 %3197  ;;  %v14292_v48 = vld [vmem:[#allocation64_spill] sm:$0xff] }
 0x6ff   :  { %14284 = vst [vmem:[#allocation73_spill] sm:$0xff] %v10469_v1  ;;  %v10471_v39 = vpop.xlane.xlu0 %3203 }
 0x700   :  { %14285 = vst [vmem:[#allocation230_spill] sm:$0xff] %v10471_v39  ;;  %v3316_v39 = vsel %vm2428_vm4, %v14292_v48, 0.0 }
 0x702   :  { %3308 = vadd.xlane.f32.xlu2 %v3307_v33  ;;  %v3322_v33 = vsel %vm2428_vm4, %v14293_v4, 0.0 }
 0x703   :  { %3314 = vadd.xlane.f32.xlu1 %v3313_v0  ;;  %v3319_v0 = vsel %vm2428_vm4, %v14294_v28, 0.0  ;;  %v14304_v28 = vld [vmem:[#allocation2_spill] sm:$0xff] }
 0x704   :  { %3311 = vadd.xlane.f32.xlu0 %v3310_v26 }
 0x705   :  { %v10479_v29 = vpop.xlane.xlu2 %2694 }
 0x706   :  { %14289 = vst [vmem:[#allocation59_spill] sm:$0xff] %v10479_v29  ;;  %v10481_v50 = vpop.xlane.xlu1 %2700 }
 0x707   :  { %14290 = vst [vmem:[#allocation76_spill] sm:$0xff] %v10481_v50  ;;  %v10483_v22 = vpop.xlane.xlu0 %2697 }
 0x708   :  { %14291 = vst [vmem:[#allocation77_spill] sm:$0xff] %v10483_v22 }
 0x70a   :  { %3317 = vadd.xlane.f32.xlu2 %v3316_v39 }
 0x70b   :  { %3323 = vadd.xlane.f32.xlu1 %v3322_v33 }
 0x70c   :  { %3320 = vadd.xlane.f32.xlu0 %v3319_v0  ;;  %v14305_v0 = vperm.slane %v14304_v28, 1 }
 0x70d   :  { %v10491_v12 = vpop.xlane.xlu2 %2703 }
 0x70e   :  { %14295 = vst [vmem:[#allocation64_spill] sm:$0xff] %v10491_v12  ;;  %v10493_v26 = vpop.xlane.xlu1 %2709  ;;  %v14306_v12 = vld [vmem:[#allocation3_spill] sm:$0xff] }
 0x70f   :  { %14296 = vst [vmem:[#allocation82_spill] sm:$0xff] %v10493_v26  ;;  %v10495_v29 = vpop.xlane.xlu0 %2706  ;;  %v14307_v26 = vperm.slane %v14304_v28, 2 }
 0x710   :  { %14297 = vst [vmem:[#allocation83_spill] sm:$0xff] %v10495_v29 }
 0x715   :  { %v10497_v1 = vpop.xlane.xlu2 %2712 }
 0x716   :  { %14298 = vst [vmem:[#allocation231_spill] sm:$0xff] %v10497_v1  ;;  %v10499_v22 = vpop.xlane.xlu1 %3206 }
 0x717   :  { %14299 = vst [vmem:[#allocation232_spill] sm:$0xff] %v10499_v22  ;;  %v10501_v48 = vpop.xlane.xlu0 %2715 }
 0x718   :  { %14300 = vst [vmem:[#allocation233_spill] sm:$0xff] %v10501_v48  ;;  %v14311_v48 = vperm.slane %v14304_v28, 3 }
 0x71d   :  { %v10503_v39 = vpop.xlane.xlu2 %3209 }
 0x71e   :  { %14301 = vst [vmem:[#allocation234_spill] sm:$0xff] %v10503_v39  ;;  %v10505_v4 = vpop.xlane.xlu1 %3215  ;;  %v14312_v39 = vperm.slane %v14304_v28, 4 }
 0x71f   :  { %14302 = vst [vmem:[#allocation235_spill] sm:$0xff] %v10505_v4  ;;  %v10507_v33 = vpop.xlane.xlu0 %3212  ;;  %v14313_v4 = vperm.slane %v14304_v28, 5 }
 0x720   :  { %14303 = vst [vmem:[#allocation236_spill] sm:$0xff] %v10507_v33  ;;  %3336 = vperm.xlu0 %7486, %v14305_v0  }
 0x722   :  { %3329 = vperm.xlu2 %7488, %v14306_v12  }
 0x724   :  { %3343 = vperm.xlu1 %7487, %v14307_v26  }
 0x725   :  { %v10514_v29 = vpop.xlane.xlu2 %3218 }
 0x726   :  { %14308 = vst [vmem:[#allocation3_spill] sm:$0xff] %v10514_v29  ;;  %v10516_v1 = vpop.xlane.xlu1 %3224  ;;  %v14317_v29 = vperm.slane %v14304_v28, 6 }
 0x727   :  { %14309 = vst [vmem:[#allocation237_spill] sm:$0xff] %v10516_v1  ;;  %v10518_v22 = vpop.xlane.xlu0 %3221  ;;  %v14318_v1 = vperm.slane %v14304_v28, 7 }
 0x728   :  { %14310 = vst [vmem:[#allocation238_spill] sm:$0xff] %v10518_v22  ;;  %3350 = vperm.xlu0 %7486, %v14311_v48  }
 0x72a   :  { %3357 = vperm.xlu2 %7488, %v14312_v39  }
 0x72c   :  { %3364 = vperm.xlu1 %7487, %v14313_v4   ;;  %v14322_v4 = vld [vmem:[#allocation6_spill] sm:$0xff] }
 0x72d   :  { %v10526_v0 = vpop.xlane.xlu2 %3227  ;;  %v14329_v28 = vperm.slane %v14322_v4, 4 }
 0x72e   :  { %14314 = vst [vmem:[#allocation239_spill] sm:$0xff] %v10526_v0  ;;  %v10528_v12 = vpop.xlane.xlu1 %3233  ;;  %v14323_v0 = vperm.slane %v14322_v4, 1 }
 0x72f   :  { %14315 = vst [vmem:[#allocation240_spill] sm:$0xff] %v10528_v12  ;;  %v10530_v26 = vpop.xlane.xlu0 %3230  ;;  %v14324_v12 = vperm.slane %v14322_v4, 2 }
 0x730   :  { %14316 = vst [vmem:[#allocation241_spill] sm:$0xff] %v10530_v26  ;;  %3371 = vperm.xlu0 %7486, %v14317_v29   ;;  %v14325_v26 = vperm.slane %v14322_v4, 3 }
 0x732   :  { %3378 = vperm.xlu2 %7488, %v14318_v1  }
 0x734   :  { %3384 = vperm.xlu1 %7487, %v8421_v56  }
 0x735   :  { %v10537_v48 = vpop.xlane.xlu2 %3236 }
 0x736   :  { %14319 = vst [vmem:[#allocation242_spill] sm:$0xff] %v10537_v48  ;;  %v10539_v39 = vpop.xlane.xlu1 %3242 }
 0x737   :  { %14320 = vst [vmem:[#allocation243_spill] sm:$0xff] %v10539_v39  ;;  %v10541_v22 = vpop.xlane.xlu0 %3239  ;;  %v14330_v39 = vperm.slane %v14322_v4, 5 }
 0x738   :  { %14321 = vst [vmem:[#allocation244_spill] sm:$0xff] %v10541_v22  ;;  %3391 = vperm.xlu0 %7486, %v14323_v0   ;;  %v14331_v0 = vperm.slane %v14322_v4, 6  ;;  %v14337_v22 = vld [vmem:[#allocation9_spill] sm:$0xff] }
 0x73a   :  { %3398 = vperm.xlu2 %7488, %v14324_v12  }
 0x73c   :  { %3405 = vperm.xlu1 %7487, %v14325_v26  }
 0x73d   :  { %v10549_v29 = vpop.xlane.xlu2 %3245 }
 0x73e   :  { %14326 = vst [vmem:[#allocation245_spill] sm:$0xff] %v10549_v29  ;;  %v10551_v1 = vpop.xlane.xlu1 %3251  ;;  %v14335_v29 = vperm.slane %v14322_v4, 7  ;;  %v14344_v4 = vperm.slane %v14337_v22, 4 }
 0x73f   :  { %14327 = vst [vmem:[#allocation246_spill] sm:$0xff] %v10551_v1  ;;  %v10553_v56 = vpop.xlane.xlu0 %3248  ;;  %v14336_v1 = vld [vmem:[#allocation10_spill] sm:$0xff] }
 0x740   :  { %14328 = vst [vmem:[#allocation247_spill] sm:$0xff] %v10553_v56  ;;  %3412 = vperm.xlu0 %7486, %v14329_v28   ;;  %v14338_v56 = vperm.slane %v14337_v22, 1 }
 0x742   :  { %3419 = vperm.xlu2 %7488, %v14330_v39  }
 0x744   :  { %3426 = vperm.xlu1 %7487, %v14331_v0   ;;  %v14341_v0 = vperm.slane %v14337_v22, 2 }
 0x745   :  { %v10561_v48 = vpop.xlane.xlu2 %3254 }
 0x746   :  { %14332 = vst [vmem:[#allocation248_spill] sm:$0xff] %v10561_v48  ;;  %v10565_v26 = vpop.xlane.xlu1 %3260 }
 0x747   :  { %v10563_v12 = vpop.xlane.xlu0 %3257  ;;  %14334 = vst [vmem:[#allocation250_spill] sm:$0xff] %v10565_v26  ;;  %v14348_v26 = vperm.slane %v14337_v22, 6 }
 0x748   :  { %14333 = vst [vmem:[#allocation249_spill] sm:$0xff] %v10563_v12  ;;  %3433 = vperm.xlu0 %7486, %v14335_v29   ;;  %v14343_v12 = vperm.slane %v14337_v22, 3 }
 0x74a   :  { %3439 = vperm.xlu2 %7488, %v14336_v1  }
 0x74c   :  { %3446 = vperm.xlu1 %7487, %v14338_v56   ;;  %v14347_v56 = vperm.slane %v14337_v22, 5 }
 0x74d   :  { %v10572_v28 = vpop.xlane.xlu2 %3263 }
 0x74e   :  { %14339 = vst [vmem:[#allocation10_spill] sm:$0xff] %v10572_v28  ;;  %v10578_v48 = vpop.xlane.xlu1 %3269 }
 0x74f   :  { %v10574_v39 = vpop.xlane.xlu0 %3266  ;;  %14342 = vst [vmem:[#allocation252_spill] sm:$0xff] %v10578_v48 }
 0x750   :  { %14340 = vst [vmem:[#allocation251_spill] sm:$0xff] %v10574_v39  ;;  %3453 = vperm.xlu0 %7486, %v14341_v0   ;;  %v14350_v0 = vperm.slane %v14337_v22, 7  ;;  %v14398_v39 = vld [vmem:[#allocation39_spill] sm:$0xff] }
 0x751   :  { %v14399_v33 = vperm.slane %v14398_v39, 1  ;;  %v14405_v54 = vperm.slane %v14398_v39, 4  ;;  %v14411_v38 = vperm.slane %v14398_v39, 7 }
 0x752   :  { %3460 = vperm.xlu2 %7488, %v14343_v12   ;;  %v14353_v12 = vld [vmem:[#allocation15_spill] sm:$0xff] }
 0x754   :  { %3467 = vperm.xlu1 %7487, %v14344_v4  }
 0x755   :  { %v10584_v29 = vpop.xlane.xlu2 %3272 }
 0x756   :  { %14345 = vst [vmem:[#allocation253_spill] sm:$0xff] %v10584_v29  ;;  %v10592_v28 = vpop.xlane.xlu1 %3278  ;;  %v14354_v29 = vperm.slane %v14353_v12, 1 }
 0x757   :  { %v10586_v1 = vpop.xlane.xlu0 %3275  ;;  %14349 = vst [vmem:[#allocation255_spill] sm:$0xff] %v10592_v28  ;;  %v14358_v28 = vperm.slane %v14353_v12, 3 }
 0x758   :  { %14346 = vst [vmem:[#allocation254_spill] sm:$0xff] %v10586_v1  ;;  %3474 = vperm.xlu0 %7486, %v14347_v56   ;;  %v14355_v1 = vperm.slane %v14353_v12, 2 }
 0x75a   :  { %3481 = vperm.xlu2 %7488, %v14348_v26  }
 0x75c   :  { %3488 = vperm.xlu1 %7487, %v14350_v0   ;;  %v14359_v0 = vperm.slane %v14353_v12, 4 }
 0x75d   :  { %v10596_v48 = vpop.xlane.xlu2 %3281 }
 0x75e   :  { %14351 = vst [vmem:[#allocation256_spill] sm:$0xff] %v10596_v48  ;;  %v10607_v26 = vpop.xlane.xlu1 %3287 }
 0x75f   :  { %v10599_v4 = vpop.xlane.xlu0 %3284  ;;  %14357 = vst [vmem:[#allocation259_spill] sm:$0xff] %v10607_v26 }
 0x760   :  { %3494 = vperm.xlu0 %7486, %v14016_v60   ;;  %14352 = vst [vmem:[#allocation257_spill] sm:$0xff] %v10599_v4  ;;  %v14361_v60 = vperm.slane %v14353_v12, 5 }
 0x762   :  { %3501 = vperm.xlu2 %7488, %v14354_v29  }
 0x764   :  { %3508 = vperm.xlu1 %7487, %v14355_v1   ;;  %v14364_v1 = vperm.slane %v14353_v12, 6 }
 0x765   :  { %v10605_v56 = vpop.xlane.xlu2 %3290 }
 0x766   :  { %14356 = vst [vmem:[#allocation258_spill] sm:$0xff] %v10605_v56  ;;  %v10619_v29 = vpop.xlane.xlu1 %3296  ;;  %v14365_v56 = vperm.slane %v14353_v12, 7  ;;  %v14375_v12 = vperm.slane %v14056_v37, 5 }
 0x767   :  { %v10613_v22 = vpop.xlane.xlu0 %3293  ;;  %14363 = vst [vmem:[#allocation262_spill] sm:$0xff] %v10619_v29  ;;  %v14371_v29 = vperm.slane %v14056_v37, 3 }
 0x768   :  { %3515 = vperm.xlu0 %7486, %v14358_v28   ;;  %14360 = vst [vmem:[#allocation260_spill] sm:$0xff] %v10613_v22  ;;  %v14368_v22 = vperm.slane %v14056_v37, 1 }
 0x76a   :  { %3522 = vperm.xlu2 %7488, %v14359_v0  }
 0x76c   :  { %3529 = vperm.xlu1 %7487, %v14361_v60  }
 0x76d   :  { %v10617_v48 = vpop.xlane.xlu2 %3299 }
 0x76e   :  { %14362 = vst [vmem:[#allocation261_spill] sm:$0xff] %v10617_v48  ;;  %v10632_v60 = vpop.xlane.xlu1 %3305  ;;  %v14370_v48 = vperm.slane %v14056_v37, 2 }
 0x76f   :  { %v10628_v0 = vpop.xlane.xlu0 %3302  ;;  %14369 = vst [vmem:[#allocation265_spill] sm:$0xff] %v10632_v60 }
 0x770   :  { %3536 = vperm.xlu0 %7486, %v14364_v1   ;;  %14367 = vst [vmem:[#allocation264_spill] sm:$0xff] %v10628_v0 }
 0x772   :  { %3543 = vperm.xlu2 %7488, %v14365_v56  }
 0x774   :  { %3549 = vperm.xlu1 %7487, %v14055_v52   ;;  %v14374_v52 = vperm.slane %v14056_v37, 4 }
 0x775   :  { %v10626_v28 = vpop.xlane.xlu2 %3308 }
 0x776   :  { %14366 = vst [vmem:[#allocation263_spill] sm:$0xff] %v10626_v28  ;;  %v10646_v0 = vpop.xlane.xlu1 %3314 }
 0x777   :  { %v10640_v56 = vpop.xlane.xlu0 %3311  ;;  %14376 = vst [vmem:[#allocation268_spill] sm:$0xff] %v10646_v0 }
 0x778   :  { %3556 = vperm.xlu0 %7486, %v14368_v22   ;;  %14373 = vst [vmem:[#allocation267_spill] sm:$0xff] %v10640_v56  ;;  %v14377_v22 = vperm.slane %v14056_v37, 6 }
 0x77a   :  { %3563 = vperm.xlu2 %7488, %v14370_v48   ;;  %v14379_v48 = vperm.slane %v14056_v37, 7 }
 0x77c   :  { %3570 = vperm.xlu1 %7487, %v14371_v29  }
 0x77d   :  { %v10638_v1 = vpop.xlane.xlu2 %3317 }
 0x77e   :  { %14372 = vst [vmem:[#allocation266_spill] sm:$0xff] %v10638_v1  ;;  %v14381_v1 = vld [vmem:[#allocation29_spill] sm:$0xff] }
 0x77f   :  { %v10654_v29 = vpop.xlane.xlu0 %3320  ;;  %v14382_v56 = vperm.slane %v14381_v1, 1  ;;  %v14385_v0 = vperm.slane %v14381_v1, 2  ;;  %v14387_v28 = vperm.slane %v14381_v1, 3 }
 0x780   :  { %3577 = vperm.xlu0 %7486, %v14374_v52   ;;  %14380 = vst [vmem:[#allocation270_spill] sm:$0xff] %v10654_v29 }
 0x782   :  { %3584 = vperm.xlu2 %7488, %v14375_v12   ;;  %v10661_v12 = vpop.xlane.xlu1 %3323 }
 0x783   :  { %14384 = vst [vmem:[#allocation272_spill] sm:$0xff] %v10661_v12  ;;  %v14393_v12 = vperm.slane %v14381_v1, 6 }
 0x784   :  { %3591 = vperm.xlu1 %7487, %v14377_v22  }
 0x785   :  { %v10650_v60 = vpop.permute.xlu2 %3329 }
 0x786   :  { %14378 = vst [vmem:[#allocation269_spill] sm:$0xff] %v10650_v60 }
 0x788   :  { %3598 = vperm.xlu0 %7486, %v14379_v48   ;;  %v14388_v48 = vperm.slane %v14381_v1, 4 }
 0x78a   :  { %3604 = vperm.xlu2 %7488, %v14084_v24  }
 0x78c   :  { %3611 = vperm.xlu1 %7487, %v14382_v56   ;;  %v14391_v56 = vperm.slane %v14381_v1, 5 }
 0x78d   :  { %v10659_v52 = vpop.permute.xlu2 %3357 }
 0x78e   :  { %14383 = vst [vmem:[#allocation271_spill] sm:$0xff] %v10659_v52 }
 0x790   :  { %3618 = vperm.xlu0 %7486, %v14385_v0   ;;  %v14394_v0 = vperm.slane %v14381_v1, 7 }
 0x792   :  { %v10665_v22 = vpop.permute.xlu0 %3336  ;;  %3625 = vperm.xlu2 %7488, %v14387_v28  }
 0x793   :  { %14386 = vst [vmem:[#allocation273_spill] sm:$0xff] %v10665_v22 }
 0x794   :  { %3632 = vperm.xlu1 %7487, %v14388_v48   ;;  %v14396_v48 = vld [vmem:[#allocation46_spill] sm:$0xff] }
 0x795   :  { %v10671_v37 = vpop.permute.xlu2 %3378 }
 0x796   :  { %14389 = vst [vmem:[#allocation274_spill] sm:$0xff] %v10671_v37  ;;  %v10673_v24 = vpop.permute.xlu1 %3343 }
 0x797   :  { %14390 = vst [vmem:[#allocation275_spill] sm:$0xff] %v10673_v24 }
 0x798   :  { %3639 = vperm.xlu0 %7486, %v14391_v56   ;;  %v14400_v56 = vperm.slane %v14398_v39, 2 }
 0x79a   :  { %v10677_v29 = vpop.permute.xlu0 %3350  ;;  %3646 = vperm.xlu2 %7488, %v14393_v12  }
 0x79b   :  { %14392 = vst [vmem:[#allocation276_spill] sm:$0xff] %v10677_v29 }
 0x79c   :  { %3653 = vperm.xlu1 %7487, %v14394_v0   ;;  %v14403_v0 = vperm.slane %v14398_v39, 3 }
 0x79d   :  { %v10683_v26 = vpop.permute.xlu2 %3398 }
 0x79e   :  { %v10685_v28 = vpop.permute.xlu1 %3364 }
 0x79f   :  { %14395 = vst [vmem:[#allocation277_spill] sm:$0xff] %v10685_v28 }
 0x7a0   :  { %3659 = vperm.xlu0 %7486, %v14396_v48   ;;  %v14406_v48 = vperm.slane %v14398_v39, 5 }
 0x7a2   :  { %v10688_v4 = vpop.permute.xlu0 %3371  ;;  %3666 = vperm.xlu2 %7488, %v14399_v33  }
 0x7a3   :  { %14397 = vst [vmem:[#allocation46_spill] sm:$0xff] %v10688_v4 }
 0x7a4   :  { %3673 = vperm.xlu1 %7487, %v14400_v56   ;;  %v14409_v56 = vperm.slane %v14398_v39, 6 }
 0x7a5   :  { %v10694_v50 = vpop.permute.xlu2 %3419 }
 0x7a6   :  { %14401 = vst [vmem:[#allocation278_spill] sm:$0xff] %v10694_v50  ;;  %v10696_v12 = vpop.permute.xlu1 %3384 }
 0x7a7   :  { %14402 = vst [vmem:[#allocation279_spill] sm:$0xff] %v10696_v12 }
 0x7a8   :  { %3680 = vperm.xlu0 %7486, %v14403_v0  }
 0x7aa   :  { %v10700_v1 = vpop.permute.xlu0 %3391  ;;  %3687 = vperm.xlu2 %7488, %v14405_v54  }
 0x7ab   :  { %14404 = vst [vmem:[#allocation280_spill] sm:$0xff] %v10700_v1 }
 0x7ac   :  { %3694 = vperm.xlu1 %7487, %v14406_v48   ;;  %v14415_v48 = vperm.slane %v14414_v25, 1 }
 0x7ad   :  { %v10706_v17 = vpop.permute.xlu2 %3439 }
 0x7ae   :  { %14407 = vst [vmem:[#allocation281_spill] sm:$0xff] %v10706_v17  ;;  %v10708_v33 = vpop.permute.xlu1 %3405 }
 0x7af   :  { %14408 = vst [vmem:[#allocation282_spill] sm:$0xff] %v10708_v33 }
 0x7b0   :  { %3701 = vperm.xlu0 %7486, %v14409_v56   ;;  %v14418_v56 = vperm.slane %v14414_v25, 3 }
 0x7b2   :  { %v10712_v34 = vpop.permute.xlu0 %3412  ;;  %3708 = vperm.xlu2 %7488, %v14411_v38  }
 0x7b3   :  { %14410 = vst [vmem:[#allocation283_spill] sm:$0xff] %v10712_v34 }
 0x7b4   :  { %3714 = vperm.xlu1 %7487, %v14133_v55   ;;  %v14421_v55 = vperm.slane %v14414_v25, 4 }
 0x7b5   :  { %v10717_v0 = vpop.permute.xlu2 %3460 }
 0x7b6   :  { %14412 = vst [vmem:[#allocation284_spill] sm:$0xff] %v10717_v0  ;;  %v10719_v54 = vpop.permute.xlu1 %3426 }
 0x7b7   :  { %14413 = vst [vmem:[#allocation285_spill] sm:$0xff] %v10719_v54 }
 0x7b8   :  { %3721 = vperm.xlu0 %7486, %v14415_v48   ;;  %v14424_v48 = vperm.slane %v14414_v25, 6 }
 0x7ba   :  { %v10723_v20 = vpop.permute.xlu0 %3433  ;;  %3728 = vperm.xlu2 %7488, %v14417_v11  }
 0x7bb   :  { %14416 = vst [vmem:[#allocation286_spill] sm:$0xff] %v10723_v20 }
 0x7bc   :  { %3735 = vperm.xlu1 %7487, %v14418_v56   ;;  %v14427_v56 = vperm.slane %v14414_v25, 7 }
 0x7bd   :  { %v10729_v10 = vpop.permute.xlu2 %3481 }
 0x7be   :  { %14419 = vst [vmem:[#allocation287_spill] sm:$0xff] %v10729_v10  ;;  %v10731_v38 = vpop.permute.xlu1 %3446 }
 0x7bf   :  { %14420 = vst [vmem:[#allocation288_spill] sm:$0xff] %v10731_v38 }
 0x7c0   :  { %3742 = vperm.xlu0 %7486, %v14421_v55   ;;  %v14429_v55 = vperm.slane %v14156_v27, 1 }
 0x7c2   :  { %v10735_v39 = vpop.permute.xlu0 %3453  ;;  %3749 = vperm.xlu2 %7488, %v14423_v6  }
 0x7c3   :  { %14422 = vst [vmem:[#allocation289_spill] sm:$0xff] %v10735_v39 }
 0x7c4   :  { %3756 = vperm.xlu1 %7487, %v14424_v48   ;;  %v14432_v48 = vperm.slane %v14156_v27, 2 }
 0x7c5   :  { %v10741_v14 = vpop.permute.xlu2 %3501 }
 0x7c6   :  { %14425 = vst [vmem:[#allocation290_spill] sm:$0xff] %v10741_v14  ;;  %v10743_v11 = vpop.permute.xlu1 %3467 }
 0x7c7   :  { %14426 = vst [vmem:[#allocation291_spill] sm:$0xff] %v10743_v11 }
 0x7c8   :  { %3763 = vperm.xlu0 %7486, %v14427_v56   ;;  %v14435_v56 = vperm.slane %v14156_v27, 4 }
 0x7ca   :  { %v10747_v51 = vpop.permute.xlu0 %3474  ;;  %3769 = vperm.xlu2 %7488, %v14159_v15  }
 0x7cb   :  { %14428 = vst [vmem:[#allocation292_spill] sm:$0xff] %v10747_v51 }
 0x7cc   :  { %3776 = vperm.xlu1 %7487, %v14429_v55   ;;  %v14438_v55 = vperm.slane %v14156_v27, 5 }
 0x7cd   :  { %v10752_v49 = vpop.permute.xlu2 %3522 }
 0x7ce   :  { %14430 = vst [vmem:[#allocation293_spill] sm:$0xff] %v10752_v49  ;;  %v10754_v6 = vpop.permute.xlu1 %3488 }
 0x7cf   :  { %14431 = vst [vmem:[#allocation294_spill] sm:$0xff] %v10754_v6 }
 0x7d0   :  { %3783 = vperm.xlu0 %7486, %v14432_v48   ;;  %v14441_v48 = vperm.slane %v14156_v27, 7 }
 0x7d2   :  { %v10758_v53 = vpop.permute.xlu0 %3494  ;;  %3790 = vperm.xlu2 %7488, %v14434_v63  }
 0x7d3   :  { %14433 = vst [vmem:[#allocation295_spill] sm:$0xff] %v10758_v53 }
 0x7d4   :  { %3797 = vperm.xlu1 %7487, %v14435_v56  }
 0x7d5   :  { %v10764_v25 = vpop.permute.xlu2 %3543 }
 0x7d6   :  { %14436 = vst [vmem:[#allocation296_spill] sm:$0xff] %v10764_v25  ;;  %v10766_v15 = vpop.permute.xlu1 %3508 }
 0x7d7   :  { %14437 = vst [vmem:[#allocation297_spill] sm:$0xff] %v10766_v15 }
 0x7d8   :  { %3804 = vperm.xlu0 %7486, %v14438_v55   ;;  %v14446_v55 = vperm.slane %v14176_v16, 2 }
 0x7da   :  { %v10770_v7 = vpop.permute.xlu0 %3515  ;;  %3811 = vperm.xlu2 %7488, %v14440_v61  }
 0x7db   :  { %14439 = vst [vmem:[#allocation298_spill] sm:$0xff] %v10770_v7 }
 0x7dc   :  { %3818 = vperm.xlu1 %7487, %v14441_v48   ;;  %v14449_v48 = vperm.slane %v14176_v16, 3 }
 0x7dd   :  { %v10776_v43 = vpop.permute.xlu2 %3563 }
 0x7de   :  { %14442 = vst [vmem:[#allocation299_spill] sm:$0xff] %v10776_v43  ;;  %v10778_v63 = vpop.permute.xlu1 %3529 }
 0x7df   :  { %14443 = vst [vmem:[#allocation300_spill] sm:$0xff] %v10778_v63 }
 0x7e0   :  { %3824 = vperm.xlu0 %7486, %v14178_v13   ;;  %v14452_v13 = vperm.slane %v14176_v16, 5 }
 0x7e2   :  { %v10781_v56 = vpop.permute.xlu0 %3536  ;;  %3831 = vperm.xlu2 %7488, %v14445_v46  }
 0x7e3   :  { %14444 = vst [vmem:[#allocation301_spill] sm:$0xff] %v10781_v56 }
 0x7e4   :  { %3838 = vperm.xlu1 %7487, %v14446_v55   ;;  %v14455_v55 = vperm.slane %v14176_v16, 6 }
 0x7e5   :  { %v10787_v35 = vpop.permute.xlu2 %3584 }
 0x7e6   :  { %14447 = vst [vmem:[#allocation302_spill] sm:$0xff] %v10787_v35  ;;  %v10789_v61 = vpop.permute.xlu1 %3549 }
 0x7e7   :  { %14448 = vst [vmem:[#allocation303_spill] sm:$0xff] %v10789_v61 }
 0x7e8   :  { %3845 = vperm.xlu0 %7486, %v14449_v48  }
 0x7ea   :  { %v10793_v27 = vpop.permute.xlu0 %3556  ;;  %3852 = vperm.xlu2 %7488, %v14451_v5  }
 0x7eb   :  { %14450 = vst [vmem:[#allocation304_spill] sm:$0xff] %v10793_v27 }
 0x7ec   :  { %3859 = vperm.xlu1 %7487, %v14452_v13   ;;  %v14460_v13 = vperm.slane %v14195_v41, 1 }
 0x7ed   :  { %v10799_v2 = vpop.permute.xlu2 %3604 }
 0x7ee   :  { %14453 = vst [vmem:[#allocation305_spill] sm:$0xff] %v10799_v2  ;;  %v10801_v46 = vpop.permute.xlu1 %3570 }
 0x7ef   :  { %14454 = vst [vmem:[#allocation306_spill] sm:$0xff] %v10801_v46 }
 0x7f0   :  { %3866 = vperm.xlu0 %7486, %v14455_v55   ;;  %v14463_v55 = vperm.slane %v14195_v41, 3 }
 0x7f2   :  { %v10805_v57 = vpop.permute.xlu0 %3577  ;;  %3873 = vperm.xlu2 %7488, %v14457_v62  }
 0x7f3   :  { %14456 = vst [vmem:[#allocation307_spill] sm:$0xff] %v10805_v57 }
 0x7f4   :  { %3879 = vperm.xlu1 %7487, %v14194_v19   ;;  %v14466_v19 = vperm.slane %v14195_v41, 4 }
 0x7f5   :  { %v10810_v48 = vpop.permute.xlu2 %3625 }
 0x7f6   :  { %14458 = vst [vmem:[#allocation308_spill] sm:$0xff] %v10810_v48  ;;  %v10812_v5 = vpop.permute.xlu1 %3591 }
 0x7f7   :  { %14459 = vst [vmem:[#allocation309_spill] sm:$0xff] %v10812_v5 }
 0x7f8   :  { %3886 = vperm.xlu0 %7486, %v14460_v13   ;;  %v14469_v13 = vperm.slane %v14195_v41, 6 }
 0x7fa   :  { %v10816_v42 = vpop.permute.xlu0 %3598  ;;  %3893 = vperm.xlu2 %7488, %v14462_v47  }
 0x7fb   :  { %14461 = vst [vmem:[#allocation310_spill] sm:$0xff] %v10816_v42 }
 0x7fc   :  { %3900 = vperm.xlu1 %7487, %v14463_v55   ;;  %v14472_v55 = vperm.slane %v14195_v41, 7 }
 0x7fd   :  { %v10822_v9 = vpop.permute.xlu2 %3646 }
 0x7fe   :  { %14464 = vst [vmem:[#allocation311_spill] sm:$0xff] %v10822_v9  ;;  %v10824_v62 = vpop.permute.xlu1 %3611 }
 0x7ff   :  { %14465 = vst [vmem:[#allocation312_spill] sm:$0xff] %v10824_v62 }
 0x800   :  { %3907 = vperm.xlu0 %7486, %v14466_v19   ;;  %v14474_v19 = vperm.slane %v14212_v40, 1 }
 0x802   :  { %v10828_v16 = vpop.permute.xlu0 %3618  ;;  %3914 = vperm.xlu2 %7488, %v14468_v36  }
 0x803   :  { %14467 = vst [vmem:[#allocation313_spill] sm:$0xff] %v10828_v16 }
 0x804   :  { %3921 = vperm.xlu1 %7487, %v14469_v13   ;;  %v14477_v13 = vperm.slane %v14212_v40, 2 }
 0x805   :  { %v10834_v45 = vpop.permute.xlu2 %3666 }
 0x806   :  { %14470 = vst [vmem:[#allocation314_spill] sm:$0xff] %v10834_v45  ;;  %v10836_v47 = vpop.permute.xlu1 %3632 }
 0x807   :  { %14471 = vst [vmem:[#allocation315_spill] sm:$0xff] %v10836_v47  ;;  %v14479_v47 = vperm.slane %v14212_v40, 3 }
 0x808   :  { %3928 = vperm.xlu0 %7486, %v14472_v55   ;;  %v14480_v55 = vperm.slane %v14212_v40, 4 }
 0x80a   :  { %v10840_v23 = vpop.permute.xlu0 %3639  ;;  %3934 = vperm.xlu2 %7488, %v14215_v18  }
 0x80b   :  { %14473 = vst [vmem:[#allocation316_spill] sm:$0xff] %v10840_v23 }
 0x80c   :  { %3941 = vperm.xlu1 %7487, %v14474_v19   ;;  %v14483_v19 = vperm.slane %v14212_v40, 5 }
 0x80d   :  { %v10845_v9 = vpop.permute.xlu2 %3687 }
 0x80e   :  { %14475 = vst [vmem:[#allocation317_spill] sm:$0xff] %v10845_v9  ;;  %v10847_v36 = vpop.permute.xlu1 %3653 }
 0x80f   :  { %14476 = vst [vmem:[#allocation318_spill] sm:$0xff] %v10847_v36  ;;  %v14485_v36 = vperm.slane %v14212_v40, 6 }
 0x810   :  { %3948 = vperm.xlu0 %7486, %v14477_v13   ;;  %v14486_v13 = vperm.slane %v14212_v40, 7 }
 0x812   :  { %v10851_v45 = vpop.permute.xlu0 %3659  ;;  %3955 = vperm.xlu2 %7488, %v14479_v47  }
 0x813   :  { %14478 = vst [vmem:[#allocation319_spill] sm:$0xff] %v10851_v45 }
 0x814   :  { %3962 = vperm.xlu1 %7487, %v14480_v55  }
 0x815   :  { %v10857_v41 = vpop.permute.xlu2 %3708 }
 0x816   :  { %14481 = vst [vmem:[#allocation320_spill] sm:$0xff] %v10857_v41  ;;  %v10859_v18 = vpop.permute.xlu1 %3673 }
 0x817   :  { %14482 = vst [vmem:[#allocation321_spill] sm:$0xff] %v10859_v18  ;;  %v14490_v18 = vld [vmem:[#allocation4_spill] sm:$0xff] }
 0x818   :  { %3969 = vperm.xlu0 %7486, %v14483_v19   ;;  %v14491_v41 = vperm.slane %v14490_v18, 1  ;;  %v14492_v19 = vperm.slane %v14490_v18, 2 }
 0x81a   :  { %v10863_v9 = vpop.permute.xlu0 %3680  ;;  %3976 = vperm.xlu2 %7488, %v14485_v36  }
 0x81b   :  { %14484 = vst [vmem:[#allocation322_spill] sm:$0xff] %v10863_v9 }
 0x81c   :  { %3983 = vperm.xlu1 %7487, %v14486_v13   ;;  %v14495_v13 = vperm.slane %v14490_v18, 3 }
 0x81d   :  { %v10869_v23 = vpop.permute.xlu2 %3728 }
 0x81e   :  { %14487 = vst [vmem:[#allocation323_spill] sm:$0xff] %v10869_v23  ;;  %v10871_v47 = vpop.permute.xlu1 %3694  ;;  %v14497_v23 = vperm.slane %v14490_v18, 4 }
 0x81f   :  { %14488 = vst [vmem:[#allocation324_spill] sm:$0xff] %v10871_v47 }
 0x820   :  { %3989 = vperm.xlu0 %7486, %v14233_v58   ;;  %v14498_v58 = vperm.slane %v14490_v18, 5 }
 0x822   :  { %v10874_v55 = vpop.permute.xlu0 %3701  ;;  %3996 = vperm.xlu2 %7488, %v14491_v41  }
 0x823   :  { %14489 = vst [vmem:[#allocation325_spill] sm:$0xff] %v10874_v55 }
 0x824   :  { %4003 = vperm.xlu1 %7487, %v14492_v19   ;;  %v14501_v19 = vperm.slane %v14490_v18, 6 }
 0x825   :  { %v10880_v9 = vpop.permute.xlu2 %3749 }
 0x826   :  { %14493 = vst [vmem:[#allocation326_spill] sm:$0xff] %v10880_v9  ;;  %v10882_v36 = vpop.permute.xlu1 %3714 }
 0x827   :  { %14494 = vst [vmem:[#allocation327_spill] sm:$0xff] %v10882_v36  ;;  %v14503_v36 = vperm.slane %v14490_v18, 7 }
 0x828   :  { %4010 = vperm.xlu0 %7486, %v14495_v13  }
 0x82a   :  { %v10886_v40 = vpop.permute.xlu0 %3721  ;;  %4017 = vperm.xlu2 %7488, %v14497_v23  }
 0x82b   :  { %14496 = vst [vmem:[#allocation328_spill] sm:$0xff] %v10886_v40  ;;  %v14506_v40 = vld [vmem:[#allocation7_spill] sm:$0xff] }
 0x82c   :  { %4024 = vperm.xlu1 %7487, %v14498_v58   ;;  %v14507_v58 = vperm.slane %v14506_v40, 1 }
 0x82d   :  { %v10892_v47 = vpop.permute.xlu2 %3769 }
 0x82e   :  { %14499 = vst [vmem:[#allocation329_spill] sm:$0xff] %v10892_v47  ;;  %v10894_v41 = vpop.permute.xlu1 %3735 }
 0x82f   :  { %14500 = vst [vmem:[#allocation330_spill] sm:$0xff] %v10894_v41  ;;  %v14509_v41 = vperm.slane %v14506_v40, 2 }
 0x830   :  { %4031 = vperm.xlu0 %7486, %v14501_v19   ;;  %v14510_v19 = vperm.slane %v14506_v40, 3 }
 0x832   :  { %v10898_v9 = vpop.permute.xlu0 %3742  ;;  %4038 = vperm.xlu2 %7488, %v14503_v36  }
 0x833   :  { %14502 = vst [vmem:[#allocation331_spill] sm:$0xff] %v10898_v9 }
 0x834   :  { %4044 = vperm.xlu1 %7487, %v14250_v3   ;;  %v14513_v3 = vperm.slane %v14506_v40, 4 }
 0x835   :  { %v10903_v13 = vpop.permute.xlu2 %3790 }
 0x836   :  { %14504 = vst [vmem:[#allocation332_spill] sm:$0xff] %v10903_v13  ;;  %v10905_v23 = vpop.permute.xlu1 %3756 }
 0x837   :  { %14505 = vst [vmem:[#allocation333_spill] sm:$0xff] %v10905_v23  ;;  %v14515_v23 = vperm.slane %v14506_v40, 5 }
 0x838   :  { %4051 = vperm.xlu0 %7486, %v14507_v58   ;;  %v14516_v58 = vperm.slane %v14506_v40, 6 }
 0x83a   :  { %v10909_v47 = vpop.permute.xlu0 %3763  ;;  %4058 = vperm.xlu2 %7488, %v14509_v41  }
 0x83b   :  { %14508 = vst [vmem:[#allocation334_spill] sm:$0xff] %v10909_v47 }
 0x83c   :  { %4065 = vperm.xlu1 %7487, %v14510_v19   ;;  %v14519_v19 = vperm.slane %v14506_v40, 7 }
 0x83d   :  { %v10915_v9 = vpop.permute.xlu2 %3811 }
 0x83e   :  { %14511 = vst [vmem:[#allocation335_spill] sm:$0xff] %v10915_v9  ;;  %v10917_v36 = vpop.permute.xlu1 %3776 }
 0x83f   :  { %14512 = vst [vmem:[#allocation336_spill] sm:$0xff] %v10917_v36 }
 0x840   :  { %4072 = vperm.xlu0 %7486, %v14513_v3   ;;  %v14521_v3 = vld [vmem:[#allocation11_spill] sm:$0xff] }
 0x841   :  { %v14522_v36 = vperm.slane %v14521_v3, 1 }
 0x842   :  { %v10921_v18 = vpop.permute.xlu0 %3783  ;;  %4079 = vperm.xlu2 %7488, %v14515_v23  }
 0x843   :  { %14514 = vst [vmem:[#allocation337_spill] sm:$0xff] %v10921_v18  ;;  %v14546_v18 = vld [vmem:[#allocation121_spill] sm:$0xff] }
 0x844   :  { %4086 = vperm.xlu1 %7487, %v14516_v58   ;;  %v14525_v58 = vperm.slane %v14521_v3, 2 }
 0x845   :  { %v10927_v47 = vpop.permute.xlu2 %3831 }
 0x846   :  { %14517 = vst [vmem:[#allocation338_spill] sm:$0xff] %v10927_v47  ;;  %v10929_v41 = vpop.permute.xlu1 %3797 }
 0x847   :  { %14518 = vst [vmem:[#allocation339_spill] sm:$0xff] %v10929_v41  ;;  %v14527_v41 = vperm.slane %v14521_v3, 3 }
 0x848   :  { %4093 = vperm.xlu0 %7486, %v14519_v19   ;;  %v14528_v19 = vperm.slane %v14521_v3, 4 }
 0x84a   :  { %v10933_v9 = vpop.permute.xlu0 %3804  ;;  %4099 = vperm.xlu2 %7488, %v13994_v31  }
 0x84b   :  { %14520 = vst [vmem:[#allocation340_spill] sm:$0xff] %v10933_v9 }
 0x84c   :  { %4106 = vperm.xlu1 %7487, %v14522_v36   ;;  %v14531_v36 = vperm.slane %v14521_v3, 5 }
 0x84d   :  { %v10938_v13 = vpop.permute.xlu2 %3852 }
 0x84e   :  { %14523 = vst [vmem:[#allocation341_spill] sm:$0xff] %v10938_v13  ;;  %v10940_v23 = vpop.permute.xlu1 %3818 }
 0x84f   :  { %14524 = vst [vmem:[#allocation342_spill] sm:$0xff] %v10940_v23  ;;  %v14533_v23 = vperm.slane %v14521_v3, 6 }
 0x850   :  { %4113 = vperm.xlu0 %7486, %v14525_v58   ;;  %v14534_v58 = vperm.slane %v14521_v3, 7 }
 0x852   :  { %v10944_v47 = vpop.permute.xlu0 %3824  ;;  %4120 = vperm.xlu2 %7488, %v14527_v41  }
 0x853   :  { %14526 = vst [vmem:[#allocation343_spill] sm:$0xff] %v10944_v47 }
 0x854   :  { %4127 = vperm.xlu1 %7487, %v14528_v19  }
 0x855   :  { %v10950_v40 = vpop.permute.xlu2 %3873 }
 0x856   :  { %14529 = vst [vmem:[#allocation344_spill] sm:$0xff] %v10950_v40  ;;  %v10952_v31 = vpop.permute.xlu1 %3838 }
 0x857   :  { %14530 = vst [vmem:[#allocation345_spill] sm:$0xff] %v10952_v31  ;;  %v14538_v31 = vld [vmem:[#allocation17_spill] sm:$0xff] }
 0x858   :  { %4134 = vperm.xlu0 %7486, %v14531_v36   ;;  %v14539_v40 = vperm.slane %v14538_v31, 1  ;;  %v14540_v36 = vld [vmem:[#allocation123_spill] sm:$0xff]  ;;  %v14541_v47 = vperm.slane %v14538_v31, 2 }
 0x85a   :  { %v10956_v13 = vpop.permute.xlu0 %3845  ;;  %4141 = vperm.xlu2 %7488, %v14533_v23   ;;  %v14542_v23 = vld [vmem:[#allocation120_spill] sm:$0xff] }
 0x85b   :  { %14532 = vst [vmem:[#allocation346_spill] sm:$0xff] %v10956_v13  ;;  %v4334_v13 = vmul.f32 %v10665_v22, %v14540_v36  ;;  %v14548_v36 = vperm.slane %v14538_v31, 4  ;;  %v14550_v22 = vld [vmem:[#allocation125_spill] sm:$0xff] }
 0x85c   :  { %4148 = vperm.xlu1 %7487, %v14534_v58   ;;  %v4333_v58 = vmul.f32 %v10650_v60, %v14542_v23  ;;  %v4338_v60 = vmul.f32 %v10685_v28, %v14550_v22 }
 0x85d   :  { %v10962_v9 = vpop.permute.xlu2 %3893 }
 0x85e   :  { %14535 = vst [vmem:[#allocation347_spill] sm:$0xff] %v10962_v9  ;;  %v10964_v41 = vpop.permute.xlu1 %3859 }
 0x85f   :  { %14536 = vst [vmem:[#allocation348_spill] sm:$0xff] %v10964_v41  ;;  %v4462_v41 = vadd.f32 1.0, %v4334_v13 }
 0x860   :  { %4154 = vperm.xlu0 %7486, %v14035_v30   ;;  %v14545_v30 = vperm.slane %v14538_v31, 3 }
 0x862   :  { %v10967_v19 = vpop.permute.xlu0 %3866  ;;  %4161 = vperm.xlu2 %7488, %v14539_v40   ;;  %v4336_v40 = vmul.f32 %v10677_v29, %v14546_v18  ;;  %v14554_v18 = vperm.slane %v14538_v31, 5  ;;  %v14555_v29 = vld [vmem:[#allocation128_spill] sm:$0xff] }
 0x863   :  { %14537 = vst [vmem:[#allocation349_spill] sm:$0xff] %v10967_v19  ;;  %v4461_v19 = vadd.f32 1.0, %v4333_v58  ;;  %v14553_v58 = vld [vmem:[#allocation124_spill] sm:$0xff] }
 0x864   :  { %4168 = vperm.xlu1 %7487, %v14541_v47   ;;  %v14549_v47 = vld [vmem:[#allocation122_spill] sm:$0xff] }
 0x865   :  { %v10977_v3 = vpop.permute.xlu2 %3914  ;;  %v4335_v23 = vmul.f32 %v10673_v24, %v14549_v47  ;;  %vm4589_vm15 = vcmp.gt.f32.partialorder %v4461_v19, %v14555_v29  ;;  %v4464_v47 = vadd.f32 1.0, %v4336_v40  ;;  %v14561_v29 = vperm.slane %v14538_v31, 6  ;;  %v14563_v40 = vld [vmem:[#allocation66_spill] sm:$0xff] }
 0x866   :  { %14543 = vst [vmem:[#allocation123_spill] sm:$0xff] %v10977_v3  ;;  %v10979_v9 = vpop.permute.xlu1 %3879  ;;  %v14552_v3 = vld [vmem:[#allocation129_spill] sm:$0xff] }
 0x867   :  { %14544 = vst [vmem:[#allocation120_spill] sm:$0xff] %v10979_v9  ;;  %v14551_v9 = vld [vmem:[#allocation28_spill] sm:$0xff]  ;;  %vm4590_vm14 = vcmp.gt.f32.partialorder %v4462_v41, %v14552_v3  ;;  %v4463_v3 = vadd.f32 1.0, %v4335_v23  ;;  %v4466_v41 = vadd.f32 1.0, %v4338_v60  ;;  %v14565_v60 = vperm.slane %v14538_v31, 7  ;;  %v14566_v23 = vld [vmem:[#allocation55_spill] sm:$0xff] }
 0x868   :  { %4175 = vperm.xlu0 %7486, %v14545_v30   ;;  %v4337_v13 = vmul.f32 %v10659_v52, %v14551_v9  ;;  %v4339_v30 = vmul.f32 %v10688_v4, %v14553_v58  ;;  %v11008_v9 = vsel %vm4590_vm14, 1.0, %v13889_v21  ;;  %v11011_v58 = vsel %vm4589_vm15, 1.0, %v13889_v21  ;;  %v14573_v31 = vld [vmem:[#allocation134_spill] sm:$0xff] }
 0x869   :  { %14559 = vst [vmem:[#allocation28_spill] sm:$0xff] %v11008_v9  ;;  %v4345_v4 = vmul.f32 %v10712_v34, %v14563_v40  ;;  %vm4591_vm1 = vcmp.gt.f32.partialorder %v4463_v3, %v14566_v23  ;;  %v14571_v40 = vld [vmem:[#allocation62_spill] sm:$0xff] }
 0x86a   :  { %v10985_v55 = vpop.permute.xlu0 %3886  ;;  %4182 = vperm.xlu2 %7488, %v14548_v36   ;;  %v14556_v36 = vld [vmem:[#allocation43_spill] sm:$0xff]  ;;  %14560 = vst [vmem:[#allocation129_spill] sm:$0xff] %v11011_v58  ;;  %v4465_v28 = vadd.f32 1.0, %v4337_v13  ;;  %v14567_v13 = vld [vmem:[#allocation44_spill] sm:$0xff]  ;;  %v4343_v34 = vmul.f32 %v10683_v26, %v14571_v40 }
 0x86b   :  { %14547 = vst [vmem:[#allocation121_spill] sm:$0xff] %v10985_v55  ;;  %v4340_v55 = vmul.f32 %v10671_v37, %v14556_v36  ;;  %v14562_v36 = vld [vmem:[#allocation130_spill] sm:$0xff]  ;;  %v7490_v37 = vpack.i.bf16 %v11008_v9, %v11011_v58  ;;  %vm4594_vm2 = vcmp.gt.f32.partialorder %v4466_v41, %v14567_v13  ;;  %v14572_v9 = vld [vmem:[#allocation131_spill] sm:$0xff]  ;;  %v7917_v58 = vmov 0   ;;  %v14582_v40 = vld [vmem:[#allocation140_spill] sm:$0xff] }
 0x86c   :  { %4189 = vperm.xlu1 %7487, %v14554_v18   ;;  %v4467_v18 = vadd.f32 1.0, %v4339_v30  ;;  %vm4592_vm0 = vcmp.gt.f32.partialorder %v4464_v47, %v14562_v36  ;;  %v14568_v30 = vld [vmem:[#allocation61_spill] sm:$0xff] }
 0x86d   :  { %v11003_v24 = vpop.permute.xlu2 %3934  ;;  %v4468_v19 = vadd.f32 1.0, %v4340_v55  ;;  %v4346_v55 = vmul.f32 %v10694_v50, %v14568_v30  ;;  %v11031_v36 = vsel %vm4592_vm0, 1.0, %v13889_v21  ;;  %v14576_v30 = vld [vmem:[#allocation133_spill] sm:$0xff] }
 0x86e   :  { %14557 = vst [vmem:[#allocation122_spill] sm:$0xff] %v11003_v24  ;;  %v11005_v22 = vpop.permute.xlu1 %3900  ;;  %vm4595_vm3 = vcmp.gt.f32.partialorder %v4467_v18, %v14572_v9  ;;  %v14574_v24 = vld [vmem:[#allocation40_spill] sm:$0xff]  ;;  %v11047_v9 = vsel %vm4591_vm1, 1.0, %v13889_v21 }
 0x86f   :  { %14558 = vst [vmem:[#allocation125_spill] sm:$0xff] %v11005_v22  ;;  %vm4593_vm5 = vcmp.gt.f32.partialorder %v4465_v28, %v14574_v24  ;;  %v14575_v22 = vld [vmem:[#allocation132_spill] sm:$0xff]  ;;  %v7496_v28 = vpack.i.bf16 %v11031_v36, %v11047_v9 }
 0x870   :  { %4196 = vperm.xlu0 %7486, %v14561_v29   ;;  %v14569_v29 = vld [vmem:[#allocation16_spill] sm:$0xff]  ;;  %14570 = vst [vmem:[#allocation128_spill] sm:$0xff] %v11031_v36  ;;  %vm4596_vm6 = vcmp.gt.f32.partialorder %v4468_v19, %v14575_v22  ;;  %v4474_v22 = vadd.f32 1.0, %v4346_v55  ;;  %v11062_v18 = vsel %vm4593_vm5, 1.0, %v13889_v21  ;;  %v4471_v19 = vadd.f32 1.0, %v4343_v34  ;;  %v14586_v34 = vld [vmem:[#allocation138_spill] sm:$0xff] }
 0x871   :  { %v4342_v47 = vmul.f32 %v10700_v1, %v14569_v29  ;;  %v4341_v29 = vmul.f32 %v10696_v12, %v14576_v30  ;;  %v4473_v1 = vadd.f32 1.0, %v4345_v4  ;;  %14578 = vst [vmem:[#allocation130_spill] sm:$0xff] %v11047_v9  ;;  %v11059_v4 = vsel %vm4595_vm3, 1.0, %v13889_v21  ;;  %v14583_v30 = vld [vmem:[#allocation24_spill] sm:$0xff]  ;;  %v14585_v12 = vld [vmem:[#allocation142_spill] sm:$0xff]  ;;  %v14605_v36 = vld [vmem:[#allocation143_spill] sm:$0xff] }
 0x872   :  { %v11020_v52 = vpop.permute.xlu0 %3907  ;;  %4203 = vperm.xlu2 %7488, %v14565_v60   ;;  %v4344_v60 = vmul.f32 %v10708_v33, %v14573_v31  ;;  %v11052_v31 = vsel %vm4594_vm2, 1.0, %v13889_v21  ;;  %14581 = vst [vmem:[#allocation44_spill] sm:$0xff] %v11059_v4  ;;  %v11065_v3 = vsel %vm4596_vm6, 1.0, %v13889_v21  ;;  %v4351_v33 = vmul.f32 %v10735_v39, %v14583_v30  ;;  %v14590_v30 = vld [vmem:[#allocation63_spill] sm:$0xff] }
 0x873   :  { %14564 = vst [vmem:[#allocation124_spill] sm:$0xff] %v11020_v52  ;;  %v7502_v23 = vpack.i.bf16 %v11052_v31, %v11062_v18  ;;  %v4469_v13 = vadd.f32 1.0, %v4341_v29  ;;  %vm4601_vm7 = vcmp.gt.f32.partialorder %v4473_v1, %v14582_v40  ;;  %v7507_v55 = vpack.i.bf16 %v11065_v3, %v11059_v4  ;;  %v14588_v29 = vld [vmem:[#allocation69_spill] sm:$0xff]  ;;  %v14601_v39 = vld [vmem:[#allocation95_spill] sm:$0xff] }
 0x874   :  { %7489 = vset.pattern.permute.xlu1 %v7917_v58  ;;  %14579 = vst [vmem:[#allocation66_spill] sm:$0xff] %v11052_v31  ;;  %v4472_v41 = vadd.f32 1.0, %v4344_v60  ;;  %vm4602_vm8 = vcmp.gt.f32.partialorder %v4474_v22, %v14585_v12  ;;  %v14587_v60 = vld [vmem:[#allocation71_spill] sm:$0xff]  ;;  %v4348_v1 = vmul.f32 %v10723_v20, %v14588_v29  ;;  %v14589_v40 = vld [vmem:[#allocation141_spill] sm:$0xff]  ;;  %v11086_v9 = vsel %vm4601_vm7, 1.0, %v13889_v21 }
 0x875   :  { %v11042_v50 = vpop.permute.xlu2 %3955  ;;  %7491 = vperm.xlu1 %7489, %v7490_v37   ;;  %v4470_v37 = vadd.f32 1.0, %v4342_v47  ;;  %v4352_v31 = vmul.f32 %v10717_v0, %v14587_v60  ;;  %14591 = vst [vmem:[#allocation16_spill] sm:$0xff] %v11086_v9  ;;  %v14593_v22 = vld [vmem:[#allocation139_spill] sm:$0xff]  ;;  %v4479_v29 = vadd.f32 1.0, %v4351_v33  ;;  %v14602_v20 = vld [vmem:[#allocation93_spill] sm:$0xff] }
 0x876   :  { %14577 = vst [vmem:[#allocation43_spill] sm:$0xff] %v11042_v50  ;;  %v11054_v24 = vpop.permute.xlu1 %3921  ;;  %vm4600_vm10 = vcmp.gt.f32.partialorder %v4472_v41, %v14590_v30  ;;  %vm4599_vm11 = vcmp.gt.f32.partialorder %v4471_v19, %v14593_v22  ;;  %v4476_v22 = vadd.f32 1.0, %v4348_v1  ;;  %v4357_v4 = vmul.f32 %v10758_v53, %v14602_v20  ;;  %v14622_v53 = vld [vmem:[#allocation101_spill] sm:$0xff] }
 0x877   :  { %14580 = vst [vmem:[#allocation55_spill] sm:$0xff] %v11054_v24  ;;  %vm4598_vm9 = vcmp.gt.f32.partialorder %v4470_v37, %v14586_v34  ;;  %v14594_v37 = vld [vmem:[#allocation56_spill] sm:$0xff]  ;;  %v11110_v33 = vsel %vm4599_vm11, 1.0, %v13889_v21  ;;  %vm4607_vm13 = vcmp.gt.f32.partialorder %v4479_v29, %v14601_v39  ;;  %v14609_v29 = vld [vmem:[#allocation150_spill] sm:$0xff] }
 0x878   :  { %7495 = vset.pattern.permute.xlu0 %v7917_v58  ;;  %vm4597_vm12 = vcmp.gt.f32.partialorder %v4469_v13, %v14594_v37  ;;  %v14595_v34 = vld [vmem:[#allocation48_spill] sm:$0xff]  ;;  %v11100_v41 = vsel %vm4598_vm9, 1.0, %v13889_v21  ;;  %v4480_v13 = vadd.f32 1.0, %v4352_v31  ;;  %vm4604_vm15 = vcmp.gt.f32.partialorder %v4476_v22, %v14605_v36  ;;  %v14613_v36 = vld [vmem:[#allocation75_spill] sm:$0xff]  ;;  %v14614_v22 = vld [vmem:[#allocation74_spill] sm:$0xff] }
 0x879   :  { %7497 = vperm.xlu0 %7495, %v7496_v28   ;;  %v4349_v28 = vmul.f32 %v10706_v17, %v14589_v40  ;;  %v4347_v60 = vmul.f32 %v10719_v54, %v14595_v34  ;;  %v11097_v40 = vsel %vm4602_vm8, 1.0, %v13889_v21  ;;  %14597 = vst [vmem:[#allocation131_spill] sm:$0xff] %v11100_v41  ;;  %v14608_v39 = vld [vmem:[#allocation84_spill] sm:$0xff] }
 0x87a   :  { %v11074_v47 = vpop.permute.xlu0 %3928  ;;  %7501 = vset.pattern.permute.xlu2 %v7917_v58  ;;  %v14592_v58 = vld [vmem:[#allocation144_spill] sm:$0xff]  ;;  %v7522_v19 = vpack.i.bf16 %v11097_v40, %v11086_v9  ;;  %v14604_v9 = vld [vmem:[#allocation151_spill] sm:$0xff]  ;;  %v4355_v20 = vmul.f32 %v10729_v10, %v14608_v39 }
 0x87b   :  { %14584 = vst [vmem:[#allocation61_spill] sm:$0xff] %v11074_v47  ;;  %7503 = vperm.xlu2 %7501, %v7502_v23   ;;  %v4350_v12 = vmul.f32 %v10731_v38, %v14592_v58  ;;  %v11105_v58 = vsel %vm4600_vm10, 1.0, %v13889_v21  ;;  %v4477_v37 = vadd.f32 1.0, %v4349_v28  ;;  %v4475_v54 = vadd.f32 1.0, %v4347_v60  ;;  %v14606_v28 = vld [vmem:[#allocation90_spill] sm:$0xff] }
 0x87c   :  { %14599 = vst [vmem:[#allocation40_spill] sm:$0xff] %v11105_v58  ;;  %v7517_v31 = vpack.i.bf16 %v11105_v58, %v11110_v33  ;;  %vm4608_vm14 = vcmp.gt.f32.partialorder %v4480_v13, %v14604_v9  ;;  %v14611_v58 = vld [vmem:[#allocation80_spill] sm:$0xff] }
 0x87d   :  { %v11094_v23 = vpop.permute.xlu2 %3976  ;;  %7508 = vperm.xlu1 %7489, %v7507_v55   ;;  %v11113_v55 = vsel %vm4597_vm12, 1.0, %v13889_v21  ;;  %v4478_v34 = vadd.f32 1.0, %v4350_v12  ;;  %v4358_v12 = vmul.f32 %v10741_v14, %v14606_v28  ;;  %v4356_v9 = vmul.f32 %v10754_v6, %v14611_v58  ;;  %v14612_v13 = vld [vmem:[#allocation148_spill] sm:$0xff]  ;;  %v14626_v14 = vld [vmem:[#allocation99_spill] sm:$0xff] }
 0x87e   :  { %14596 = vst [vmem:[#allocation62_spill] sm:$0xff] %v11094_v23  ;;  %v11102_v30 = vpop.permute.xlu1 %3941  ;;  %v7512_v38 = vpack.i.bf16 %v11100_v41, %v11113_v55  ;;  %vm4605_vm1 = vcmp.gt.f32.partialorder %v4477_v37, %v14612_v13  ;;  %vm4603_vm2 = vcmp.gt.f32.partialorder %v4475_v54, %v14613_v36  ;;  %v4353_v28 = vmul.f32 %v10743_v11, %v14614_v22 }
 0x87f   :  { %14598 = vst [vmem:[#allocation134_spill] sm:$0xff] %v11102_v30  ;;  %vm4606_vm0 = vcmp.gt.f32.partialorder %v4478_v34, %v14609_v29  ;;  %v11145_v39 = vsel %vm4608_vm14, 1.0, %v13889_v21  ;;  %v11148_v34 = vsel %vm4604_vm15, 1.0, %v13889_v21  ;;  %v4486_v37 = vadd.f32 1.0, %v4358_v12 }
 0x880   :  { %14600 = vst [vmem:[#allocation132_spill] sm:$0xff] %v11113_v55  ;;  %v14607_v55 = vld [vmem:[#allocation85_spill] sm:$0xff]  ;;  %v11153_v58 = vsel %vm4606_vm0, 1.0, %v13889_v21  ;;  %v4483_v36 = vadd.f32 1.0, %v4355_v20  ;;  %v4484_v22 = vadd.f32 1.0, %v4356_v9  ;;  %v4481_v11 = vadd.f32 1.0, %v4353_v28 }
 0x881   :  { %7523 = vperm.xlu0 %7495, %v7522_v19   ;;  %v4354_v60 = vmul.f32 %v10747_v51, %v14607_v55  ;;  %v11134_v19 = vsel %vm4607_vm13, 1.0, %v13889_v21  ;;  %v4485_v55 = vadd.f32 1.0, %v4357_v4  ;;  %14616 = vst [vmem:[#allocation142_spill] sm:$0xff] %v11145_v39  ;;  %v11158_v4 = vsel %vm4605_vm1, 1.0, %v13889_v21  ;;  %v14623_v51 = vld [vmem:[#allocation154_spill] sm:$0xff]  ;;  %v14627_v20 = vld [vmem:[#allocation156_spill] sm:$0xff] }
 0x882   :  { %v11122_v1 = vpop.permute.xlu0 %3948  ;;  %14610 = vst [vmem:[#allocation140_spill] sm:$0xff] %v11134_v19  ;;  %v7537_v54 = vpack.i.bf16 %v11145_v39, %v11134_v19  ;;  %v4363_v41 = vmul.f32 %v10781_v56, %v14623_v51  ;;  %v7532_v12 = vpack.i.bf16 %v11153_v58, %v11158_v4  ;;  %v14625_v19 = vld [vmem:[#allocation108_spill] sm:$0xff]  ;;  %v4364_v9 = vmul.f32 %v10764_v25, %v14627_v20  ;;  %v14643_v56 = vld [vmem:[#allocation162_spill] sm:$0xff] }
 0x883   :  { %14603 = vst [vmem:[#allocation133_spill] sm:$0xff] %v11122_v1  ;;  %7513 = vperm.xlu2 %7501, %v7512_v38   ;;  %v4482_v13 = vadd.f32 1.0, %v4354_v60  ;;  %vm4613_vm3 = vcmp.gt.f32.partialorder %v4485_v55, %v14622_v53  ;;  %vm4614_vm5 = vcmp.gt.f32.partialorder %v4486_v37, %v14625_v19  ;;  %v14629_v53 = vld [vmem:[#allocation153_spill] sm:$0xff]  ;;  %v14630_v55 = vld [vmem:[#allocation86_spill] sm:$0xff]  ;;  %v14647_v25 = vld [vmem:[#allocation160_spill] sm:$0xff] }
 0x884   :  { %14617 = vst [vmem:[#allocation138_spill] sm:$0xff] %v11148_v34  ;;  %v4361_v51 = vmul.f32 %v10752_v49, %v14629_v53  ;;  %vm4612_vm7 = vcmp.gt.f32.partialorder %v4484_v22, %v14630_v55  ;;  %v14633_v37 = vld [vmem:[#allocation33_spill] sm:$0xff]  ;;  %v11193_v53 = vsel %vm4614_vm5, 1.0, %v13889_v21 }
 0x885   :  { %v11142_v38 = vpop.permute.xlu2 %3996  ;;  %7518 = vperm.xlu1 %7489, %v7517_v31   ;;  %14619 = vst [vmem:[#allocation69_spill] sm:$0xff] %v11153_v58  ;;  %v11161_v31 = vsel %vm4603_vm2, 1.0, %v13889_v21  ;;  %vm4610_vm6 = vcmp.gt.f32.partialorder %v4482_v13, %v14626_v14  ;;  %v14632_v58 = vld [vmem:[#allocation155_spill] sm:$0xff]  ;;  %vm4611_vm8 = vcmp.gt.f32.partialorder %v4483_v36, %v14633_v37  ;;  %v14635_v13 = vld [vmem:[#allocation94_spill] sm:$0xff]  ;;  %v4492_v36 = vadd.f32 1.0, %v4364_v9 }
 0x886   :  { %14615 = vst [vmem:[#allocation24_spill] sm:$0xff] %v11142_v38  ;;  %v11150_v29 = vpop.permute.xlu1 %3962  ;;  %v7527_v6 = vpack.i.bf16 %v11148_v34, %v11161_v31  ;;  %v4362_v19 = vmul.f32 %v10778_v63, %v14632_v58  ;;  %v14634_v14 = vld [vmem:[#allocation91_spill] sm:$0xff]  ;;  %v4359_v20 = vmul.f32 %v10766_v15, %v14635_v13  ;;  %v11196_v22 = vsel %vm4610_vm6, 1.0, %v13889_v21 }
 0x887   :  { %14618 = vst [vmem:[#allocation71_spill] sm:$0xff] %v11150_v29  ;;  %vm4609_vm9 = vcmp.gt.f32.partialorder %v4481_v11, %v14634_v14  ;;  %v11201_v58 = vsel %vm4612_vm7, 1.0, %v13889_v21  ;;  %v4489_v14 = vadd.f32 1.0, %v4361_v51  ;;  %v14648_v51 = vld [vmem:[#allocation109_spill] sm:$0xff] }
 0x888   :  { %14620 = vst [vmem:[#allocation141_spill] sm:$0xff] %v11158_v4  ;;  %v4490_v13 = vadd.f32 1.0, %v4362_v19  ;;  %v4487_v15 = vadd.f32 1.0, %v4359_v20  ;;  %v4370_v19 = vmul.f32 %v10787_v35, %v14648_v51  ;;  %v14735_v35 = vld [vmem:[#allocation331_spill] sm:$0xff] }
 0x889   :  { %14621 = vst [vmem:[#allocation63_spill] sm:$0xff] %v11161_v31  ;;  %7538 = vperm.xlu0 %7495, %v7537_v54   ;;  %v14628_v31 = vld [vmem:[#allocation97_spill] sm:$0xff]  ;;  %v11182_v54 = vsel %vm4613_vm3, 1.0, %v13889_v21 }
 0x88a   :  { %v11170_v60 = vpop.permute.xlu0 %3969  ;;  %v4360_v28 = vmul.f32 %v10770_v7, %v14628_v31  ;;  %14631 = vst [vmem:[#allocation139_spill] sm:$0xff] %v11182_v54  ;;  %v4491_v31 = vadd.f32 1.0, %v4363_v41  ;;  %v7552_v11 = vpack.i.bf16 %v11193_v53, %v11182_v54  ;;  %v11206_v41 = vsel %vm4611_vm8, 1.0, %v13889_v21  ;;  %v14644_v7 = vld [vmem:[#allocation111_spill] sm:$0xff]  ;;  %v14646_v54 = vld [vmem:[#allocation164_spill] sm:$0xff] }
 0x88b   :  { %14624 = vst [vmem:[#allocation144_spill] sm:$0xff] %v11170_v60  ;;  %7528 = vperm.xlu2 %7501, %v7527_v6   ;;  %v4369_v34 = vmul.f32 %v10805_v57, %v14644_v7  ;;  %v7547_v9 = vpack.i.bf16 %v11201_v58, %v11206_v41  ;;  %vm4620_vm11 = vcmp.gt.f32.partialorder %v4492_v36, %v14646_v54  ;;  %v14654_v36 = vld [vmem:[#allocation161_spill] sm:$0xff] }
 0x88c   :  { %14637 = vst [vmem:[#allocation48_spill] sm:$0xff] %v11193_v53  ;;  %v4488_v37 = vadd.f32 1.0, %v4360_v28  ;;  %vm4619_vm10 = vcmp.gt.f32.partialorder %v4491_v31, %v14643_v56  ;;  %v14650_v56 = vld [vmem:[#allocation104_spill] sm:$0xff]  ;;  %v14651_v31 = vld [vmem:[#allocation163_spill] sm:$0xff]  ;;  %vm4617_vm14 = vcmp.gt.f32.partialorder %v4489_v14, %v14654_v36  ;;  %v4498_v14 = vadd.f32 1.0, %v4370_v19  ;;  %v14664_v57 = vld [vmem:[#allocation169_spill] sm:$0xff] }
 0x88d   :  { %v11190_v6 = vpop.permute.xlu2 %4017  ;;  %7533 = vperm.xlu1 %7489, %v7532_v12   ;;  %14638 = vst [vmem:[#allocation95_spill] sm:$0xff] %v11196_v22  ;;  %v11209_v12 = vsel %vm4609_vm9, 1.0, %v13889_v21  ;;  %v4367_v7 = vmul.f32 %v10776_v43, %v14650_v56  ;;  %vm4618_vm13 = vcmp.gt.f32.partialorder %v4490_v13, %v14651_v31  ;;  %v11241_v56 = vsel %vm4620_vm11, 1.0, %v13889_v21  ;;  %v14787_v53 = vld [vmem:[#allocation343_spill] sm:$0xff] }
 0x88e   :  { %14636 = vst [vmem:[#allocation56_spill] sm:$0xff] %v11190_v6  ;;  %v11198_v55 = vpop.permute.xlu1 %3983  ;;  %v7542_v63 = vpack.i.bf16 %v11196_v22, %v11209_v12  ;;  %vm4616_vm12 = vcmp.gt.f32.partialorder %v4488_v37, %v14647_v25  ;;  %v14655_v25 = vld [vmem:[#allocation106_spill] sm:$0xff]  ;;  %v14656_v37 = vld [vmem:[#allocation165_spill] sm:$0xff]  ;;  %vm4626_vm1 = vcmp.gt.f32.partialorder %v4498_v14, %v10030_v32  ;;  %v14673_v14 = vld [vmem:[#allocation168_spill] sm:$0xff] }
 0x88f   :  { %14639 = vst [vmem:[#allocation93_spill] sm:$0xff] %v11198_v55  ;;  %vm4615_vm15 = vcmp.gt.f32.partialorder %v4487_v15, %v14655_v25  ;;  %v4365_v51 = vmul.f32 %v10789_v61, %v14656_v37  ;;  %v11244_v13 = vsel %vm4616_vm12, 1.0, %v13889_v21  ;;  %v4495_v25 = vadd.f32 1.0, %v4367_v7  ;;  %v14667_v7 = vld [vmem:[#allocation115_spill] sm:$0xff]  ;;  %v14695_v22 = vld [vmem:[#allocation318_spill] sm:$0xff] }
 0x890   :  { %14640 = vst [vmem:[#allocation151_spill] sm:$0xff] %v11201_v58  ;;  %v14653_v58 = vld [vmem:[#allocation166_spill] sm:$0xff] }
 0x891   :  { %14641 = vst [vmem:[#allocation143_spill] sm:$0xff] %v11206_v41  ;;  %7553 = vperm.xlu0 %7495, %v7552_v11   ;;  %v11230_v11 = vsel %vm4619_vm10, 1.0, %v13889_v21  ;;  %v4368_v54 = vmul.f32 %v10801_v46, %v14653_v58  ;;  %v11249_v58 = vsel %vm4618_vm13, 1.0, %v13889_v21  ;;  %v4493_v61 = vadd.f32 1.0, %v4365_v51 }
 0x892   :  { %14642 = vst [vmem:[#allocation90_spill] sm:$0xff] %v11209_v12  ;;  %v11218_v28 = vpop.permute.xlu0 %3989  ;;  %v14649_v12 = vld [vmem:[#allocation51_spill] sm:$0xff]  ;;  %v7567_v15 = vpack.i.bf16 %v11241_v56, %v11230_v11  ;;  %vm4623_vm5 = vcmp.gt.f32.partialorder %v4495_v25, %v14673_v14 }
 0x893   :  { %14645 = vst [vmem:[#allocation85_spill] sm:$0xff] %v11218_v28  ;;  %v4366_v20 = vmul.f32 %v10793_v27, %v14649_v12  ;;  %7543 = vperm.xlu2 %7501, %v7542_v63   ;;  %v4497_v12 = vadd.f32 1.0, %v4369_v34  ;;  %v11254_v34 = vsel %vm4617_vm14, 1.0, %v13889_v21  ;;  %v4496_v37 = vadd.f32 1.0, %v4368_v54 }
 0x894   :  { %14652 = vst [vmem:[#allocation84_spill] sm:$0xff] %v11230_v11  ;;  %v4375_v27 = vmul.f32 %v10828_v16, %v10041_v59  ;;  %v7562_v19 = vpack.i.bf16 %v11249_v58, %v11254_v34  ;;  %v14666_v11 = vld [vmem:[#allocation110_spill] sm:$0xff]  ;;  %v4376_v54 = vmul.f32 %v10810_v48, %v14667_v7  ;;  %v14683_v16 = vld [vmem:[#allocation177_spill] sm:$0xff] }
 0x895   :  { %v11238_v63 = vpop.permute.xlu2 %4038  ;;  %7548 = vperm.xlu1 %7489, %v7547_v9   ;;  %14658 = vst [vmem:[#allocation80_spill] sm:$0xff] %v11241_v56  ;;  %v4494_v36 = vadd.f32 1.0, %v4366_v20  ;;  %v11257_v9 = vsel %vm4615_vm15, 1.0, %v13889_v21  ;;  %vm4625_vm0 = vcmp.gt.f32.partialorder %v4497_v12, %v14664_v57  ;;  %v14669_v57 = vld [vmem:[#allocation172_spill] sm:$0xff]  ;;  %v14670_v12 = vld [vmem:[#allocation167_spill] sm:$0xff]  ;;  %v14709_v48 = vld [vmem:[#allocation325_spill] sm:$0xff] }
 0x896   :  { %14657 = vst [vmem:[#allocation150_spill] sm:$0xff] %v11238_v63  ;;  %v11246_v31 = vpop.permute.xlu1 %4003  ;;  %v7557_v46 = vpack.i.bf16 %v11244_v13, %v11257_v9  ;;  %v4373_v59 = vmul.f32 %v10799_v2, %v14669_v57  ;;  %vm4624_vm3 = vcmp.gt.f32.partialorder %v4496_v37, %v14670_v12  ;;  %v11289_v57 = vsel %vm4626_vm1, 1.0, %v13889_v21  ;;  %v14762_v56 = vld [vmem:[#allocation337_spill] sm:$0xff] }
 0x897   :  { %14659 = vst [vmem:[#allocation148_spill] sm:$0xff] %v11244_v13  ;;  %vm4622_vm2 = vcmp.gt.f32.partialorder %v4494_v36, %v14666_v11  ;;  %v14674_v11 = vld [vmem:[#allocation112_spill] sm:$0xff]  ;;  %v14675_v36 = vld [vmem:[#allocation107_spill] sm:$0xff]  ;;  %v4504_v25 = vadd.f32 1.0, %v4376_v54 }
 0x898   :  { %14660 = vst [vmem:[#allocation75_spill] sm:$0xff] %v11246_v31  ;;  %vm4621_vm6 = vcmp.gt.f32.partialorder %v4493_v61, %v14674_v11  ;;  %v4371_v7 = vmul.f32 %v10812_v5, %v14675_v36  ;;  %v11292_v37 = vsel %vm4622_vm2, 1.0, %v13889_v21  ;;  %v4501_v11 = vadd.f32 1.0, %v4373_v59  ;;  %v14686_v13 = vld [vmem:[#allocation171_spill] sm:$0xff]  ;;  %v14687_v59 = vld [vmem:[#allocation314_spill] sm:$0xff] }
 0x899   :  { %14661 = vst [vmem:[#allocation74_spill] sm:$0xff] %v11249_v58  ;;  %7568 = vperm.xlu0 %7495, %v7567_v15   ;;  %v11278_v15 = vsel %vm4625_vm0, 1.0, %v13889_v21  ;;  %v14672_v58 = vld [vmem:[#allocation173_spill] sm:$0xff] }
 0x89a   :  { %14662 = vst [vmem:[#allocation101_spill] sm:$0xff] %v11254_v34  ;;  %v11266_v20 = vpop.permute.xlu0 %4010  ;;  %v4374_v32 = vmul.f32 %v10824_v62, %v14672_v58  ;;  %v11297_v58 = vsel %vm4624_vm3, 1.0, %v13889_v21  ;;  %v7582_v61 = vpack.i.bf16 %v11289_v57, %v11278_v15  ;;  %v4499_v5 = vadd.f32 1.0, %v4371_v7  ;;  %v14689_v7 = vld [vmem:[#allocation316_spill] sm:$0xff] }
 0x89b   :  { %14663 = vst [vmem:[#allocation154_spill] sm:$0xff] %v11257_v9  ;;  %v14668_v9 = vld [vmem:[#allocation114_spill] sm:$0xff]  ;;  %7558 = vperm.xlu2 %7501, %v7557_v46  }
 0x89c   :  { %14665 = vst [vmem:[#allocation108_spill] sm:$0xff] %v11266_v20  ;;  %v4372_v51 = vmul.f32 %v10816_v42, %v14668_v9  ;;  %v4503_v9 = vadd.f32 1.0, %v4375_v27  ;;  %v11302_v27 = vsel %vm4623_vm5, 1.0, %v13889_v21  ;;  %v4502_v36 = vadd.f32 1.0, %v4374_v32 }
 0x89d   :  { %14671 = vst [vmem:[#allocation99_spill] sm:$0xff] %v11278_v15  ;;  %v11286_v46 = vpop.permute.xlu2 %4058  ;;  %7563 = vperm.xlu1 %7489, %v7562_v19   ;;  %v11305_v19 = vsel %vm4621_vm6, 1.0, %v13889_v21  ;;  %v4381_v42 = vmul.f32 %v10851_v45, %v10114_v8  ;;  %v7577_v54 = vpack.i.bf16 %v11297_v58, %v11302_v27  ;;  %v14685_v15 = vld [vmem:[#allocation176_spill] sm:$0xff]  ;;  %v4382_v32 = vmul.f32 %v14687_v59, %v10129_v44  ;;  %v14694_v45 = vld [vmem:[#allocation175_spill] sm:$0xff]  ;;  %v14698_v44 = vld [vmem:[#allocation113_spill] sm:$0xff] }
 0x89e   :  { %14676 = vst [vmem:[#allocation156_spill] sm:$0xff] %v11286_v46  ;;  %v11294_v12 = vpop.permute.xlu1 %4024  ;;  %v4500_v14 = vadd.f32 1.0, %v4372_v51  ;;  %v7572_v62 = vpack.i.bf16 %v11292_v37, %v11305_v19  ;;  %vm4631_vm7 = vcmp.gt.f32.partialorder %v4503_v9, %v14683_v16  ;;  %vm4632_vm8 = vcmp.gt.f32.partialorder %v4504_v25, %v14685_v15  ;;  %v14690_v16 = vld [vmem:[#allocation116_spill] sm:$0xff]  ;;  %v14691_v9 = vld [vmem:[#allocation311_spill] sm:$0xff]  ;;  %v14696_v25 = vld [vmem:[#allocation174_spill] sm:$0xff] }
 0x89f   :  { %14677 = vst [vmem:[#allocation97_spill] sm:$0xff] %v11289_v57  ;;  %v4379_v8 = vmul.f32 %v14691_v9, %v14690_v16  ;;  %v4380_v15 = vmul.f32 %v14695_v22, %v14694_v45  ;;  %vm4629_vm11 = vcmp.gt.f32.partialorder %v4501_v11, %v14696_v25  ;;  %v11337_v16 = vsel %vm4632_vm8, 1.0, %v13889_v21  ;;  %v14708_v9 = vld [vmem:[#allocation184_spill] sm:$0xff] }
 0x8a0   :  { %14678 = vst [vmem:[#allocation153_spill] sm:$0xff] %v11292_v37  ;;  %vm4628_vm9 = vcmp.gt.f32.partialorder %v4500_v14, %v14686_v13  ;;  %v14697_v13 = vld [vmem:[#allocation170_spill] sm:$0xff]  ;;  %v14699_v14 = vld [vmem:[#allocation315_spill] sm:$0xff]  ;;  %v4510_v11 = vadd.f32 1.0, %v4382_v32  ;;  %v4387_v2 = vmul.f32 %v14709_v48, %v14708_v9 }
 0x8a1   :  { %14679 = vst [vmem:[#allocation86_spill] sm:$0xff] %v11294_v12  ;;  %7583 = vperm.xlu0 %7495, %v7582_v61   ;;  %v14692_v61 = vld [vmem:[#allocation118_spill] sm:$0xff]  ;;  %vm4627_vm12 = vcmp.gt.f32.partialorder %v4499_v5, %v14697_v13  ;;  %v4377_v59 = vmul.f32 %v14699_v14, %v14698_v44  ;;  %v4507_v13 = vadd.f32 1.0, %v4379_v8  ;;  %v4508_v44 = vadd.f32 1.0, %v4380_v15  ;;  %v14714_v15 = vld [vmem:[#allocation320_spill] sm:$0xff]  ;;  %v14721_v48 = vld [vmem:[#allocation119_spill] sm:$0xff] }
 0x8a2   :  { %14680 = vst [vmem:[#allocation155_spill] sm:$0xff] %v11297_v58  ;;  %v11314_v51 = vpop.permute.xlu0 %4031  ;;  %vm4630_vm10 = vcmp.gt.f32.partialorder %v4502_v36, %v14692_v61  ;;  %v11326_v58 = vsel %vm4631_vm7, 1.0, %v13889_v21  ;;  %v11340_v36 = vsel %vm4628_vm9, 1.0, %v13889_v21  ;;  %v14713_v8 = vld [vmem:[#allocation186_spill] sm:$0xff] }
 0x8a3   :  { %14681 = vst [vmem:[#allocation33_spill] sm:$0xff] %v11302_v27  ;;  %7573 = vperm.xlu2 %7501, %v7572_v62   ;;  %v11345_v45 = vsel %vm4630_vm10, 1.0, %v13889_v21  ;;  %v7597_v5 = vpack.i.bf16 %v11337_v16, %v11326_v58  ;;  %v4505_v14 = vadd.f32 1.0, %v4377_v59  ;;  %v4388_v57 = vmul.f32 %v14714_v15, %v14713_v8  ;;  %v14716_v59 = vld [vmem:[#allocation322_spill] sm:$0xff]  ;;  %v14726_v8 = vld [vmem:[#allocation321_spill] sm:$0xff] }
 0x8a4   :  { %14682 = vst [vmem:[#allocation91_spill] sm:$0xff] %v11305_v19  ;;  %v14688_v19 = vld [vmem:[#allocation67_spill] sm:$0xff] }
 0x8a5   :  { %14684 = vst [vmem:[#allocation94_spill] sm:$0xff] %v11314_v51  ;;  %v4378_v37 = vmul.f32 %v14689_v7, %v14688_v19  ;;  %v4509_v19 = vadd.f32 1.0, %v4381_v42  ;;  %v11334_v62 = vpop.permute.xlu2 %4079  ;;  %7578 = vperm.xlu1 %7489, %v7577_v54   ;;  %v11350_v42 = vsel %vm4629_vm11, 1.0, %v13889_v21  ;;  %v11353_v54 = vsel %vm4627_vm12, 1.0, %v13889_v21  ;;  %v14707_v7 = vld [vmem:[#allocation185_spill] sm:$0xff] }
 0x8a6   :  { %14693 = vst [vmem:[#allocation162_spill] sm:$0xff] %v11326_v58  ;;  %v11342_v61 = vpop.permute.xlu1 %4044  ;;  %v7587_v22 = vpack.i.bf16 %v11340_v36, %v11353_v54  ;;  %v14711_v58 = vld [vmem:[#allocation187_spill] sm:$0xff] }
 0x8a7   :  { %14700 = vst [vmem:[#allocation111_spill] sm:$0xff] %v11334_v62  ;;  %v4506_v25 = vadd.f32 1.0, %v4378_v37  ;;  %vm4637_vm13 = vcmp.gt.f32.partialorder %v4509_v19, %v14707_v7  ;;  %v7592_v37 = vpack.i.bf16 %v11345_v45, %v11350_v42  ;;  %vm4638_vm14 = vcmp.gt.f32.partialorder %v4510_v11, %v14711_v58  ;;  %v14717_v7 = vld [vmem:[#allocation183_spill] sm:$0xff]  ;;  %v14718_v19 = vld [vmem:[#allocation317_spill] sm:$0xff] }
 0x8a8   :  { %14701 = vst [vmem:[#allocation164_spill] sm:$0xff] %v11337_v16  ;;  %v14712_v16 = vld [vmem:[#allocation180_spill] sm:$0xff]  ;;  %v4385_v9 = vmul.f32 %v14718_v19, %v14717_v7  ;;  %v14723_v11 = vld [vmem:[#allocation179_spill] sm:$0xff]  ;;  %v11385_v7 = vsel %vm4638_vm14, 1.0, %v13889_v21  ;;  %v14734_v19 = vld [vmem:[#allocation198_spill] sm:$0xff] }
 0x8a9   :  { %14702 = vst [vmem:[#allocation160_spill] sm:$0xff] %v11340_v36  ;;  %7598 = vperm.xlu0 %7495, %v7597_v5   ;;  %vm4634_vm15 = vcmp.gt.f32.partialorder %v4506_v25, %v14712_v16  ;;  %v14719_v5 = vld [vmem:[#allocation181_spill] sm:$0xff]  ;;  %vm4635_vm1 = vcmp.gt.f32.partialorder %v4507_v13, %v14723_v11  ;;  %v14724_v16 = vld [vmem:[#allocation178_spill] sm:$0xff]  ;;  %v4516_v13 = vadd.f32 1.0, %v4388_v57  ;;  %v4393_v27 = vmul.f32 %v14735_v35, %v14734_v19  ;;  %v14747_v35 = vld [vmem:[#allocation196_spill] sm:$0xff] }
 0x8aa   :  { %14703 = vst [vmem:[#allocation109_spill] sm:$0xff] %v11342_v61  ;;  %v11362_v32 = vpop.permute.xlu0 %4051  ;;  %vm4636_vm0 = vcmp.gt.f32.partialorder %v4508_v44, %v14719_v5  ;;  %vm4633_vm2 = vcmp.gt.f32.partialorder %v4505_v14, %v14724_v16  ;;  %v14725_v25 = vld [vmem:[#allocation182_spill] sm:$0xff]  ;;  %v11388_v44 = vsel %vm4634_vm15, 1.0, %v13889_v21  ;;  %v4513_v16 = vadd.f32 1.0, %v4385_v9  ;;  %v14739_v9 = vld [vmem:[#allocation197_spill] sm:$0xff] }
 0x8ab   :  { %14704 = vst [vmem:[#allocation51_spill] sm:$0xff] %v11345_v45  ;;  %7588 = vperm.xlu2 %7501, %v7587_v22   ;;  %v11374_v45 = vsel %vm4637_vm13, 1.0, %v13889_v21  ;;  %v4383_v15 = vmul.f32 %v14726_v8, %v14725_v25 }
 0x8ac   :  { %14705 = vst [vmem:[#allocation104_spill] sm:$0xff] %v11350_v42  ;;  %v14722_v42 = vld [vmem:[#allocation324_spill] sm:$0xff]  ;;  %v7612_v14 = vpack.i.bf16 %v11385_v7, %v11374_v45 }
 0x8ad   :  { %14706 = vst [vmem:[#allocation163_spill] sm:$0xff] %v11353_v54  ;;  %v14715_v54 = vld [vmem:[#allocation78_spill] sm:$0xff]  ;;  %v4386_v58 = vmul.f32 %v14722_v42, %v14721_v48  ;;  %v11382_v22 = vpop.permute.xlu2 %4099  ;;  %7593 = vperm.xlu1 %7489, %v7592_v37   ;;  %v11393_v48 = vsel %vm4636_vm0, 1.0, %v13889_v21  ;;  %v11401_v37 = vsel %vm4633_vm2, 1.0, %v13889_v21  ;;  %v4511_v8 = vadd.f32 1.0, %v4383_v15  ;;  %v14742_v15 = vld [vmem:[#allocation328_spill] sm:$0xff] }
 0x8ae   :  { %14710 = vst [vmem:[#allocation166_spill] sm:$0xff] %v11362_v32  ;;  %v4384_v36 = vmul.f32 %v14716_v59, %v14715_v54  ;;  %v4515_v54 = vadd.f32 1.0, %v4387_v2  ;;  %v11390_v5 = vpop.permute.xlu1 %4065  ;;  %v11398_v2 = vsel %vm4635_vm1, 1.0, %v13889_v21  ;;  %v7602_v42 = vpack.i.bf16 %v11388_v44, %v11401_v37  ;;  %v14733_v59 = vld [vmem:[#allocation191_spill] sm:$0xff] }
 0x8af   :  { %14720 = vst [vmem:[#allocation161_spill] sm:$0xff] %v11374_v45  ;;  %v4514_v25 = vadd.f32 1.0, %v4386_v58  ;;  %v7607_v57 = vpack.i.bf16 %v11393_v48, %v11398_v2  ;;  %v14737_v45 = vld [vmem:[#allocation193_spill] sm:$0xff]  ;;  %v14740_v58 = vld [vmem:[#allocation326_spill] sm:$0xff] }
 0x8b0   :  { %14727 = vst [vmem:[#allocation106_spill] sm:$0xff] %v11385_v7  ;;  %v4512_v11 = vadd.f32 1.0, %v4384_v36  ;;  %vm4643_vm3 = vcmp.gt.f32.partialorder %v4515_v54, %v14733_v59  ;;  %vm4644_vm5 = vcmp.gt.f32.partialorder %v4516_v13, %v14737_v45  ;;  %v14738_v7 = vld [vmem:[#allocation188_spill] sm:$0xff]  ;;  %v4394_v43 = vmul.f32 %v14740_v58, %v14739_v9  ;;  %v14743_v59 = vld [vmem:[#allocation81_spill] sm:$0xff]  ;;  %v14744_v54 = vld [vmem:[#allocation323_spill] sm:$0xff] }
 0x8b1   :  { %14728 = vst [vmem:[#allocation165_spill] sm:$0xff] %v11388_v44  ;;  %7613 = vperm.xlu0 %7495, %v7612_v14   ;;  %v4391_v19 = vmul.f32 %v14744_v54, %v14743_v59  ;;  %v14745_v14 = vld [vmem:[#allocation192_spill] sm:$0xff]  ;;  %v14749_v13 = vld [vmem:[#allocation190_spill] sm:$0xff]  ;;  %v14752_v9 = vld [vmem:[#allocation327_spill] sm:$0xff]  ;;  %v11433_v59 = vsel %vm4644_vm5, 1.0, %v13889_v21 }
 0x8b2   :  { %14729 = vst [vmem:[#allocation169_spill] sm:$0xff] %v11390_v5  ;;  %v11410_v36 = vpop.permute.xlu0 %4072  ;;  %vm4640_vm6 = vcmp.gt.f32.partialorder %v4512_v11, %v14738_v7  ;;  %vm4642_vm7 = vcmp.gt.f32.partialorder %v4514_v25, %v14745_v14  ;;  %vm4641_vm8 = vcmp.gt.f32.partialorder %v4513_v16, %v14749_v13  ;;  %v14750_v7 = vld [vmem:[#allocation189_spill] sm:$0xff]  ;;  %v14751_v11 = vld [vmem:[#allocation194_spill] sm:$0xff]  ;;  %v4522_v16 = vadd.f32 1.0, %v4394_v43 }
 0x8b3   :  { %14730 = vst [vmem:[#allocation110_spill] sm:$0xff] %v11393_v48  ;;  %7603 = vperm.xlu2 %7501, %v7602_v42   ;;  %v11422_v48 = vsel %vm4643_vm3, 1.0, %v13889_v21  ;;  %vm4639_vm9 = vcmp.gt.f32.partialorder %v4511_v8, %v14750_v7  ;;  %v4389_v58 = vmul.f32 %v14752_v9, %v14751_v11  ;;  %v11436_v25 = vsel %vm4640_vm6, 1.0, %v13889_v21  ;;  %v14761_v54 = vld [vmem:[#allocation210_spill] sm:$0xff] }
 0x8b4   :  { %14731 = vst [vmem:[#allocation115_spill] sm:$0xff] %v11398_v2  ;;  %v14748_v2 = vld [vmem:[#allocation330_spill] sm:$0xff]  ;;  %v7627_v8 = vpack.i.bf16 %v11433_v59, %v11422_v48  ;;  %v4519_v7 = vadd.f32 1.0, %v4391_v19  ;;  %v4399_v34 = vmul.f32 %v14762_v56, %v14761_v54  ;;  %v14766_v19 = vld [vmem:[#allocation96_spill] sm:$0xff]  ;;  %v14774_v56 = vld [vmem:[#allocation211_spill] sm:$0xff] }
 0x8b5   :  { %14732 = vst [vmem:[#allocation114_spill] sm:$0xff] %v11401_v37  ;;  %v14741_v37 = vld [vmem:[#allocation195_spill] sm:$0xff]  ;;  %v4392_v45 = vmul.f32 %v14748_v2, %v14747_v35  ;;  %v11430_v42 = vpop.permute.xlu2 %4120  ;;  %7608 = vperm.xlu1 %7489, %v7607_v57   ;;  %v11441_v35 = vsel %vm4642_vm7, 1.0, %v13889_v21  ;;  %v11449_v57 = vsel %vm4639_vm9, 1.0, %v13889_v21  ;;  %v4517_v9 = vadd.f32 1.0, %v4389_v58  ;;  %v14769_v58 = vld [vmem:[#allocation334_spill] sm:$0xff] }
 0x8b6   :  { %14736 = vst [vmem:[#allocation172_spill] sm:$0xff] %v11410_v36  ;;  %v4390_v44 = vmul.f32 %v14742_v15, %v14741_v37  ;;  %v4521_v37 = vadd.f32 1.0, %v4393_v27  ;;  %v11438_v14 = vpop.permute.xlu1 %4086  ;;  %v11446_v27 = vsel %vm4641_vm8, 1.0, %v13889_v21  ;;  %v7617_v2 = vpack.i.bf16 %v11436_v25, %v11449_v57  ;;  %v14760_v15 = vld [vmem:[#allocation205_spill] sm:$0xff] }
 0x8b7   :  { %14746 = vst [vmem:[#allocation167_spill] sm:$0xff] %v11422_v48  ;;  %v4520_v11 = vadd.f32 1.0, %v4392_v45  ;;  %v7622_v43 = vpack.i.bf16 %v11441_v35, %v11446_v27  ;;  %v14764_v48 = vld [vmem:[#allocation207_spill] sm:$0xff]  ;;  %v14767_v45 = vld [vmem:[#allocation332_spill] sm:$0xff] }
 0x8b8   :  { %14753 = vst [vmem:[#allocation173_spill] sm:$0xff] %v11430_v42  ;;  %v4518_v13 = vadd.f32 1.0, %v4390_v44  ;;  %vm4649_vm10 = vcmp.gt.f32.partialorder %v4521_v37, %v14760_v15  ;;  %vm4650_vm11 = vcmp.gt.f32.partialorder %v4522_v16, %v14764_v48  ;;  %v4400_v49 = vmul.f32 %v14767_v45, %v14766_v19  ;;  %v14770_v15 = vld [vmem:[#allocation209_spill] sm:$0xff]  ;;  %v14776_v16 = vld [vmem:[#allocation204_spill] sm:$0xff] }
 0x8b9   :  { %14754 = vst [vmem:[#allocation168_spill] sm:$0xff] %v11433_v59  ;;  %7628 = vperm.xlu0 %7495, %v7627_v8   ;;  %v14765_v59 = vld [vmem:[#allocation202_spill] sm:$0xff]  ;;  %v14771_v37 = vld [vmem:[#allocation329_spill] sm:$0xff]  ;;  %v14772_v8 = vld [vmem:[#allocation203_spill] sm:$0xff]  ;;  %vm4647_vm14 = vcmp.gt.f32.partialorder %v4519_v7, %v14776_v16 }
 0x8ba   :  { %14755 = vst [vmem:[#allocation112_spill] sm:$0xff] %v11436_v25  ;;  %v11458_v44 = vpop.permute.xlu0 %4093  ;;  %vm4646_vm12 = vcmp.gt.f32.partialorder %v4518_v13, %v14765_v59  ;;  %v4397_v54 = vmul.f32 %v14771_v37, %v14770_v15  ;;  %vm4648_vm13 = vcmp.gt.f32.partialorder %v4520_v11, %v14772_v8  ;;  %v14777_v59 = vld [vmem:[#allocation200_spill] sm:$0xff]  ;;  %v14778_v13 = vld [vmem:[#allocation199_spill] sm:$0xff]  ;;  %v14779_v19 = vld [vmem:[#allocation333_spill] sm:$0xff]  ;;  %v11481_v15 = vsel %vm4650_vm11, 1.0, %v13889_v21 }
 0x8bb   :  { %14756 = vst [vmem:[#allocation107_spill] sm:$0xff] %v11438_v14  ;;  %7618 = vperm.xlu2 %7501, %v7617_v2   ;;  %vm4645_vm15 = vcmp.gt.f32.partialorder %v4517_v9, %v14777_v59  ;;  %v4395_v45 = vmul.f32 %v14779_v19, %v14778_v13  ;;  %v11484_v11 = vsel %vm4646_vm12, 1.0, %v13889_v21  ;;  %v4528_v7 = vadd.f32 1.0, %v4400_v49  ;;  %v14786_v37 = vld [vmem:[#allocation224_spill] sm:$0xff] }
 0x8bc   :  { %14757 = vst [vmem:[#allocation177_spill] sm:$0xff] %v11441_v35  ;;  %v11470_v35 = vsel %vm4649_vm10, 1.0, %v13889_v21  ;;  %v4525_v59 = vadd.f32 1.0, %v4397_v54  ;;  %v4405_v41 = vmul.f32 %v14787_v53, %v14786_v37  ;;  %v14791_v54 = vld [vmem:[#allocation226_spill] sm:$0xff]  ;;  %v14799_v53 = vld [vmem:[#allocation216_spill] sm:$0xff] }
 0x8bd   :  { %14758 = vst [vmem:[#allocation176_spill] sm:$0xff] %v11446_v27  ;;  %v14775_v27 = vld [vmem:[#allocation336_spill] sm:$0xff]  ;;  %v11478_v2 = vpop.permute.xlu2 %4141  ;;  %7623 = vperm.xlu1 %7489, %v7622_v43   ;;  %v7642_v9 = vpack.i.bf16 %v11481_v15, %v11470_v35  ;;  %v11497_v43 = vsel %vm4645_vm15, 1.0, %v13889_v21  ;;  %v4523_v19 = vadd.f32 1.0, %v4395_v45 }
 0x8be   :  { %14759 = vst [vmem:[#allocation171_spill] sm:$0xff] %v11449_v57  ;;  %v14768_v57 = vld [vmem:[#allocation201_spill] sm:$0xff]  ;;  %v4398_v48 = vmul.f32 %v14775_v27, %v14774_v56  ;;  %v11486_v8 = vpop.permute.xlu1 %4106  ;;  %v11489_v56 = vsel %vm4648_vm13, 1.0, %v13889_v21  ;;  %v7632_v27 = vpack.i.bf16 %v11484_v11, %v11497_v43  ;;  %v14794_v45 = vld [vmem:[#allocation340_spill] sm:$0xff] }
 0x8bf   :  { %14763 = vst [vmem:[#allocation67_spill] sm:$0xff] %v11458_v44  ;;  %v4396_v25 = vmul.f32 %v14769_v58, %v14768_v57  ;;  %v4527_v57 = vadd.f32 1.0, %v4399_v34  ;;  %v11494_v34 = vsel %vm4647_vm14, 1.0, %v13889_v21  ;;  %v14785_v58 = vld [vmem:[#allocation219_spill] sm:$0xff] }
 0x8c0   :  { %14773 = vst [vmem:[#allocation116_spill] sm:$0xff] %v11470_v35  ;;  %v4526_v13 = vadd.f32 1.0, %v4398_v48  ;;  %v7637_v49 = vpack.i.bf16 %v11489_v56, %v11494_v34  ;;  %v14789_v35 = vld [vmem:[#allocation218_spill] sm:$0xff] }
 0x8c1   :  { %14780 = vst [vmem:[#allocation118_spill] sm:$0xff] %v11481_v15  ;;  %v4524_v16 = vadd.f32 1.0, %v4396_v25  ;;  %vm4655_vm0 = vcmp.gt.f32.partialorder %v4527_v57, %v14785_v58  ;;  %7643 = vperm.xlu0 %7495, %v7642_v9   ;;  %vm4656_vm1 = vcmp.gt.f32.partialorder %v4528_v7, %v14789_v35  ;;  %v14790_v15 = vld [vmem:[#allocation208_spill] sm:$0xff]  ;;  %v14792_v48 = vld [vmem:[#allocation338_spill] sm:$0xff]  ;;  %v14796_v57 = vld [vmem:[#allocation335_spill] sm:$0xff] }
 0x8c2   :  { %14781 = vst [vmem:[#allocation175_spill] sm:$0xff] %v11484_v11  ;;  %v11506_v25 = vpop.permute.xlu0 %4113  ;;  %v4406_v10 = vmul.f32 %v14792_v48, %v14791_v54  ;;  %v14795_v58 = vld [vmem:[#allocation214_spill] sm:$0xff]  ;;  %v14797_v9 = vld [vmem:[#allocation217_spill] sm:$0xff]  ;;  %v14801_v7 = vld [vmem:[#allocation215_spill] sm:$0xff] }
 0x8c3   :  { %14782 = vst [vmem:[#allocation174_spill] sm:$0xff] %v11489_v56  ;;  %vm4652_vm2 = vcmp.gt.f32.partialorder %v4524_v16, %v14790_v15  ;;  %7633 = vperm.xlu2 %7501, %v7632_v27   ;;  %v4403_v37 = vmul.f32 %v14796_v57, %v14795_v58  ;;  %vm4654_vm3 = vcmp.gt.f32.partialorder %v4526_v13, %v14797_v9  ;;  %v11518_v56 = vsel %vm4655_vm0, 1.0, %v13889_v21  ;;  %v14802_v15 = vld [vmem:[#allocation206_spill] sm:$0xff]  ;;  %v14803_v16 = vld [vmem:[#allocation213_spill] sm:$0xff]  ;;  %v14804_v54 = vld [vmem:[#allocation339_spill] sm:$0xff] }
 0x8c4   :  { %14783 = vst [vmem:[#allocation170_spill] sm:$0xff] %v11494_v34  ;;  %v14800_v34 = vld [vmem:[#allocation342_spill] sm:$0xff]  ;;  %vm4653_vm5 = vcmp.gt.f32.partialorder %v4525_v59, %v14801_v7  ;;  %vm4651_vm6 = vcmp.gt.f32.partialorder %v4523_v19, %v14802_v15  ;;  %v4401_v48 = vmul.f32 %v14804_v54, %v14803_v16  ;;  %v11529_v58 = vsel %vm4656_vm1, 1.0, %v13889_v21 }
 0x8c5   :  { %14784 = vst [vmem:[#allocation113_spill] sm:$0xff] %v11497_v43  ;;  %v14793_v43 = vld [vmem:[#allocation212_spill] sm:$0xff]  ;;  %v4404_v35 = vmul.f32 %v14800_v34, %v14799_v53  ;;  %v11526_v27 = vpop.permute.xlu2 %4161  ;;  %7638 = vperm.xlu1 %7489, %v7637_v49   ;;  %v11532_v13 = vsel %vm4652_vm2, 1.0, %v13889_v21  ;;  %v11537_v53 = vsel %vm4654_vm3, 1.0, %v13889_v21  ;;  %v7657_v19 = vpack.i.bf16 %v11529_v58, %v11518_v56  ;;  %v14813_v57 = vld [vmem:[#allocation18_spill] sm:$0xff] }
 0x8c6   :  { %14788 = vst [vmem:[#allocation185_spill] sm:$0xff] %v11506_v25  ;;  %v4402_v11 = vmul.f32 %v14794_v45, %v14793_v43  ;;  %v4533_v43 = vadd.f32 1.0, %v4405_v41  ;;  %v11534_v9 = vpop.permute.xlu1 %4127  ;;  %v4534_v59 = vadd.f32 1.0, %v4406_v10  ;;  %v11542_v41 = vsel %vm4653_vm5, 1.0, %v13889_v21  ;;  %v14812_v45 = vld [vmem:[#allocation228_spill] sm:$0xff] }
 0x8c7   :  { %14798 = vst [vmem:[#allocation184_spill] sm:$0xff] %v11518_v56  ;;  %v11545_v49 = vsel %vm4651_vm6, 1.0, %v13889_v21  ;;  %v4531_v15 = vadd.f32 1.0, %v4403_v37  ;;  %v4532_v16 = vadd.f32 1.0, %v4404_v35  ;;  %v4529_v54 = vadd.f32 1.0, %v4401_v48  ;;  %v14816_v56 = vld [vmem:[#allocation19_spill] sm:$0xff] }
 0x8c8   :  { %14805 = vst [vmem:[#allocation187_spill] sm:$0xff] %v11526_v27  ;;  %v4530_v7 = vadd.f32 1.0, %v4402_v11  ;;  %v7647_v34 = vpack.i.bf16 %v11532_v13, %v11545_v49  ;;  %vm4661_vm7 = vcmp.gt.f32.partialorder %v4533_v43, %v14812_v45  ;;  %v14814_v27 = vld [vmem:[#allocation349_spill] sm:$0xff]  ;;  %v7652_v10 = vpack.i.bf16 %v11537_v53, %v11542_v41  ;;  %v14819_v35 = vld [vmem:[#allocation344_spill] sm:$0xff]  ;;  %v14821_v48 = vld [vmem:[#allocation346_spill] sm:$0xff] }
 0x8c9   :  { %14806 = vst [vmem:[#allocation180_spill] sm:$0xff] %v11529_v58  ;;  %v4411_v39 = vmul.f32 %v14814_v27, %v14813_v57  ;;  %7658 = vperm.xlu0 %7495, %v7657_v19   ;;  %vm4662_vm8 = vcmp.gt.f32.partialorder %v4534_v59, %v14816_v56  ;;  %v14817_v58 = vld [vmem:[#allocation222_spill] sm:$0xff]  ;;  %v14818_v37 = vld [vmem:[#allocation13_spill] sm:$0xff]  ;;  %v14824_v19 = vld [vmem:[#allocation223_spill] sm:$0xff] }
 0x8ca   :  { %14807 = vst [vmem:[#allocation186_spill] sm:$0xff] %v11532_v13  ;;  %v11554_v11 = vpop.permute.xlu0 %4134  ;;  %vm4658_vm9 = vcmp.gt.f32.partialorder %v4530_v7, %v14817_v58  ;;  %v4412_v0 = vmul.f32 %v14819_v35, %v14818_v37  ;;  %v14822_v45 = vld [vmem:[#allocation117_spill] sm:$0xff]  ;;  %vm4660_vm10 = vcmp.gt.f32.partialorder %v4532_v16, %v14824_v19  ;;  %v14829_v58 = vld [vmem:[#allocation220_spill] sm:$0xff] }
 0x8cb   :  { %14808 = vst [vmem:[#allocation78_spill] sm:$0xff] %v11534_v9  ;;  %7648 = vperm.xlu2 %7501, %v7647_v34   ;;  %v14823_v43 = vld [vmem:[#allocation341_spill] sm:$0xff]  ;;  %vm4657_vm12 = vcmp.gt.f32.partialorder %v4529_v54, %v14829_v58  ;;  %v11580_v16 = vsel %vm4658_vm9, 1.0, %v13889_v21 }
 0x8cc   :  { %14809 = vst [vmem:[#allocation183_spill] sm:$0xff] %v11537_v53  ;;  %v4409_v57 = vmul.f32 %v14823_v43, %v14822_v45  ;;  %v11566_v53 = vsel %vm4661_vm7, 1.0, %v13889_v21  ;;  %v14826_v27 = vld [vmem:[#allocation5_spill] sm:$0xff]  ;;  %v11577_v45 = vsel %vm4662_vm8, 1.0, %v13889_v21 }
 0x8cd   :  { %14810 = vst [vmem:[#allocation181_spill] sm:$0xff] %v11542_v41  ;;  %v14827_v41 = vld [vmem:[#allocation348_spill] sm:$0xff]  ;;  %v14828_v59 = vld [vmem:[#allocation221_spill] sm:$0xff]  ;;  %v11574_v34 = vpop.permute.xlu2 %4182  ;;  %7653 = vperm.xlu1 %7489, %v7652_v10   ;;  %v7672_v54 = vpack.i.bf16 %v11577_v45, %v11566_v53  ;;  %v11593_v10 = vsel %vm4657_vm12, 1.0, %v13889_v21 }
 0x8ce   :  { %14811 = vst [vmem:[#allocation119_spill] sm:$0xff] %v11545_v49  ;;  %v14820_v49 = vld [vmem:[#allocation227_spill] sm:$0xff]  ;;  %v4410_v56 = vmul.f32 %v14827_v41, %v14826_v27  ;;  %vm4659_vm11 = vcmp.gt.f32.partialorder %v4531_v15, %v14828_v59  ;;  %v14830_v7 = vld [vmem:[#allocation225_spill] sm:$0xff]  ;;  %v11582_v19 = vpop.permute.xlu1 %4148  ;;  %v11585_v27 = vsel %vm4660_vm10, 1.0, %v13889_v21  ;;  %v4540_v15 = vadd.f32 1.0, %v4412_v0 }
 0x8cf   :  { %14815 = vst [vmem:[#allocation179_spill] sm:$0xff] %v11554_v11  ;;  %v4408_v13 = vmul.f32 %v14821_v48, %v14820_v49  ;;  %v14831_v37 = vld [vmem:[#allocation345_spill] sm:$0xff]  ;;  %v4539_v49 = vadd.f32 1.0, %v4411_v39  ;;  %v11590_v39 = vsel %vm4659_vm11, 1.0, %v13889_v21  ;;  %v4537_v58 = vadd.f32 1.0, %v4409_v57  ;;  %v14841_v57 = vld [vmem:[#allocation27_spill] sm:$0xff] }
 0x8d0   :  { %14825 = vst [vmem:[#allocation178_spill] sm:$0xff] %v11566_v53  ;;  %v4407_v35 = vmul.f32 %v14831_v37, %v14830_v7  ;;  %v4538_v7 = vadd.f32 1.0, %v4410_v56  ;;  %v7662_v41 = vpack.i.bf16 %v11580_v16, %v11593_v10  ;;  %v14837_v48 = vld [vmem:[#allocation25_spill] sm:$0xff]  ;;  %v7667_v0 = vpack.i.bf16 %v11585_v27, %v11590_v39  ;;  %v14839_v53 = vld [vmem:[#allocation31_spill] sm:$0xff] }
 0x8d1   :  { %14832 = vst [vmem:[#allocation182_spill] sm:$0xff] %v11577_v45  ;;  %v4536_v59 = vadd.f32 1.0, %v4408_v13  ;;  %vm4667_vm13 = vcmp.gt.f32.partialorder %v4539_v49, %v14837_v48  ;;  %v14838_v43 = vld [vmem:[#allocation41_spill] sm:$0xff]  ;;  %7673 = vperm.xlu0 %7495, %v7672_v54   ;;  %vm4668_vm14 = vcmp.gt.f32.partialorder %v4540_v15, %v14839_v53  ;;  %v14840_v45 = vld [vmem:[#allocation20_spill] sm:$0xff]  ;;  %v14842_v56 = vld [vmem:[#allocation123_spill] sm:$0xff] }
 0x8d2   :  { %14833 = vst [vmem:[#allocation191_spill] sm:$0xff] %v11580_v16  ;;  %v4535_v37 = vadd.f32 1.0, %v4407_v35  ;;  %v4417_v4 = vmul.f32 %v11020_v52, %v14838_v43  ;;  %v11602_v13 = vpop.permute.xlu0 %4154  ;;  %v4418_v17 = vmul.f32 %v14842_v56, %v14841_v57  ;;  %v14844_v35 = vld [vmem:[#allocation121_spill] sm:$0xff]  ;;  %v14845_v48 = vld [vmem:[#allocation26_spill] sm:$0xff]  ;;  %v14846_v49 = vld [vmem:[#allocation347_spill] sm:$0xff] }
 0x8d3   :  { %14834 = vst [vmem:[#allocation198_spill] sm:$0xff] %v11585_v27  ;;  %vm4664_vm15 = vcmp.gt.f32.partialorder %v4536_v59, %v14840_v45  ;;  %7663 = vperm.xlu2 %7501, %v7662_v41   ;;  %v4415_v43 = vmul.f32 %v14846_v49, %v14845_v48  ;;  %v14847_v54 = vld [vmem:[#allocation8_spill] sm:$0xff]  ;;  %v11614_v27 = vsel %vm4667_vm13, 1.0, %v13889_v21  ;;  %v14849_v52 = vld [vmem:[#allocation37_spill] sm:$0xff]  ;;  %v14851_v15 = vld [vmem:[#allocation23_spill] sm:$0xff]  ;;  %v11625_v48 = vsel %vm4668_vm14, 1.0, %v13889_v21 }
 0x8d4   :  { %14835 = vst [vmem:[#allocation193_spill] sm:$0xff] %v11590_v39  ;;  %vm4666_vm0 = vcmp.gt.f32.partialorder %v4538_v7, %v14847_v54  ;;  %v14850_v39 = vld [vmem:[#allocation125_spill] sm:$0xff]  ;;  %vm4665_vm1 = vcmp.gt.f32.partialorder %v4537_v58, %v14851_v15  ;;  %v14852_v45 = vld [vmem:[#allocation14_spill] sm:$0xff]  ;;  %v14854_v57 = vld [vmem:[#allocation120_spill] sm:$0xff]  ;;  %v11628_v7 = vsel %vm4664_vm15, 1.0, %v13889_v21  ;;  %v4546_v58 = vadd.f32 1.0, %v4418_v17 }
 0x8d5   :  { %14836 = vst [vmem:[#allocation188_spill] sm:$0xff] %v11593_v10  ;;  %v14843_v10 = vld [vmem:[#allocation35_spill] sm:$0xff]  ;;  %v4416_v53 = vmul.f32 %v14850_v39, %v14849_v52  ;;  %vm4663_vm2 = vcmp.gt.f32.partialorder %v4535_v37, %v14852_v45  ;;  %v14853_v59 = vld [vmem:[#allocation34_spill] sm:$0xff]  ;;  %v11622_v41 = vpop.permute.xlu2 %4203  ;;  %7668 = vperm.xlu1 %7489, %v7667_v0   ;;  %v11633_v52 = vsel %vm4666_vm0, 1.0, %v13889_v21  ;;  %v7687_v37 = vpack.i.bf16 %v11625_v48, %v11614_v27  ;;  %v14862_v49 = vld [vmem:[#allocation76_spill] sm:$0xff] }
 0x8d6   :  { %v4414_v16 = vmul.f32 %v14844_v35, %v14843_v10  ;;  %14848 = vst [vmem:[#allocation197_spill] sm:$0xff] %v11614_v27  ;;  %v4413_v56 = vmul.f32 %v14854_v57, %v14853_v59  ;;  %v4545_v10 = vadd.f32 1.0, %v4417_v4  ;;  %v11630_v54 = vpop.permute.xlu1 %4168  ;;  %v11638_v4 = vsel %vm4665_vm1, 1.0, %v13889_v21  ;;  %v14861_v35 = vld [vmem:[#allocation58_spill] sm:$0xff]  ;;  %v14864_v27 = vld [vmem:[#allocation73_spill] sm:$0xff] }
 0x8d7   :  { %14855 = vst [vmem:[#allocation195_spill] sm:$0xff] %v11622_v41  ;;  %v11641_v0 = vsel %vm4663_vm2, 1.0, %v13889_v21  ;;  %v4543_v45 = vadd.f32 1.0, %v4415_v43  ;;  %v4544_v59 = vadd.f32 1.0, %v4416_v53  ;;  %v4423_v41 = vmul.f32 %v11122_v1, %v14862_v49  ;;  %v14866_v43 = vld [vmem:[#allocation64_spill] sm:$0xff]  ;;  %v14872_v1 = vld [vmem:[#allocation77_spill] sm:$0xff] }
 0x8d8   :  { %14856 = vst [vmem:[#allocation81_spill] sm:$0xff] %v11625_v48  ;;  %v4542_v15 = vadd.f32 1.0, %v4414_v16  ;;  %v7677_v39 = vpack.i.bf16 %v11628_v7, %v11641_v0  ;;  %v4541_v57 = vadd.f32 1.0, %v4413_v56  ;;  %vm4673_vm3 = vcmp.gt.f32.partialorder %v4545_v10, %v14861_v35  ;;  %v14865_v48 = vld [vmem:[#allocation54_spill] sm:$0xff]  ;;  %v14868_v35 = vld [vmem:[#allocation59_spill] sm:$0xff] }
 0x8d9   :  { %14857 = vst [vmem:[#allocation192_spill] sm:$0xff] %v11628_v7  ;;  %7688 = vperm.xlu0 %7495, %v7687_v37   ;;  %v7682_v17 = vpack.i.bf16 %v11633_v52, %v11638_v4  ;;  %vm4674_vm5 = vcmp.gt.f32.partialorder %v4546_v58, %v14864_v27  ;;  %v4424_v53 = vmul.f32 %v11042_v50, %v14866_v43  ;;  %v14869_v10 = vld [vmem:[#allocation122_spill] sm:$0xff]  ;;  %v14873_v58 = vld [vmem:[#allocation57_spill] sm:$0xff] }
 0x8da   :  { %14858 = vst [vmem:[#allocation196_spill] sm:$0xff] %v11630_v54  ;;  %v11650_v16 = vpop.permute.xlu0 %4175  ;;  %vm4670_vm6 = vcmp.gt.f32.partialorder %v4542_v15, %v14865_v48  ;;  %v4421_v49 = vmul.f32 %v14869_v10, %v14868_v35  ;;  %v14870_v37 = vld [vmem:[#allocation42_spill] sm:$0xff]  ;;  %v4422_v27 = vmul.f32 %v11102_v30, %v14872_v1  ;;  %vm4671_vm8 = vcmp.gt.f32.partialorder %v4543_v45, %v14873_v58  ;;  %v14875_v15 = vld [vmem:[#allocation229_spill] sm:$0xff] }
 0x8db   :  { %14859 = vst [vmem:[#allocation190_spill] sm:$0xff] %v11633_v52  ;;  %7678 = vperm.xlu2 %7501, %v7677_v39   ;;  %vm4672_vm7 = vcmp.gt.f32.partialorder %v4544_v59, %v14870_v37  ;;  %v11662_v52 = vsel %vm4673_vm3, 1.0, %v13889_v21  ;;  %v14874_v48 = vld [vmem:[#allocation38_spill] sm:$0xff]  ;;  %v4419_v43 = vmul.f32 %v11054_v24, %v14875_v15  ;;  %v11673_v35 = vsel %vm4674_vm5, 1.0, %v13889_v21 }
 0x8dc   :  { %14860 = vst [vmem:[#allocation189_spill] sm:$0xff] %v11641_v0  ;;  %v14867_v0 = vld [vmem:[#allocation53_spill] sm:$0xff]  ;;  %vm4669_vm9 = vcmp.gt.f32.partialorder %v4541_v57, %v14874_v48  ;;  %v11676_v59 = vsel %vm4670_vm6, 1.0, %v13889_v21  ;;  %v11681_v1 = vsel %vm4672_vm7, 1.0, %v13889_v21  ;;  %v7702_v57 = vpack.i.bf16 %v11673_v35, %v11662_v52  ;;  %v14881_v7 = vld [vmem:[#allocation50_spill] sm:$0xff] }
 0x8dd   :  { %14863 = vst [vmem:[#allocation194_spill] sm:$0xff] %v11650_v16  ;;  %v4420_v56 = vmul.f32 %v11074_v47, %v14867_v0  ;;  %v4551_v0 = vadd.f32 1.0, %v4423_v41  ;;  %v11670_v39 = vpop.permute.xlu2 %7503  ;;  %7683 = vperm.xlu1 %7489, %v7682_v17   ;;  %v4552_v45 = vadd.f32 1.0, %v4424_v53  ;;  %v11686_v41 = vsel %vm4671_vm8, 1.0, %v13889_v21  ;;  %v14880_v47 = vld [vmem:[#allocation236_spill] sm:$0xff]  ;;  %v14883_v10 = vld [vmem:[#allocation230_spill] sm:$0xff] }
 0x8de   :  { %14871 = vst [vmem:[#allocation205_spill] sm:$0xff] %v11662_v52  ;;  %v11678_v37 = vpop.permute.xlu1 %4189  ;;  %v11689_v17 = vsel %vm4669_vm9, 1.0, %v13889_v21  ;;  %v4549_v48 = vadd.f32 1.0, %v4421_v49  ;;  %v4550_v15 = vadd.f32 1.0, %v4422_v27  ;;  %v4547_v24 = vadd.f32 1.0, %v4419_v43  ;;  %v14882_v52 = vld [vmem:[#allocation235_spill] sm:$0xff] }
 0x8df   :  { %14876 = vst [vmem:[#allocation210_spill] sm:$0xff] %v11676_v59  ;;  %v4548_v58 = vadd.f32 1.0, %v4420_v56  ;;  %v7692_v30 = vpack.i.bf16 %v11676_v59, %v11689_v17  ;;  %vm4679_vm10 = vcmp.gt.f32.partialorder %v4551_v0, %v14880_v47  ;;  %v4429_v50 = vmul.f32 %v11218_v28, %v14881_v7  ;;  %v14884_v49 = vld [vmem:[#allocation49_spill] sm:$0xff]  ;;  %v14886_v47 = vld [vmem:[#allocation234_spill] sm:$0xff]  ;;  %v14897_v28 = vld [vmem:[#allocation127_spill] sm:$0xff] }
 0x8e0   :  { %14877 = vst [vmem:[#allocation207_spill] sm:$0xff] %v11678_v37  ;;  %v7697_v53 = vpack.i.bf16 %v11681_v1, %v11686_v41  ;;  %vm4680_vm11 = vcmp.gt.f32.partialorder %v4552_v45, %v14882_v52  ;;  %v4430_v27 = vmul.f32 %v11142_v38, %v14884_v49  ;;  %vm4678_vm13 = vcmp.gt.f32.partialorder %v4550_v15, %v14886_v47  ;;  %v14888_v0 = vld [vmem:[#allocation233_spill] sm:$0xff]  ;;  %v14893_v15 = vld [vmem:[#allocation231_spill] sm:$0xff]  ;;  %v14899_v38 = vld [vmem:[#allocation240_spill] sm:$0xff] }
 0x8e1   :  { %14878 = vst [vmem:[#allocation202_spill] sm:$0xff] %v11681_v1  ;;  %7703 = vperm.xlu0 %7495, %v7702_v57   ;;  %vm4676_vm12 = vcmp.gt.f32.partialorder %v4548_v58, %v14883_v10  ;;  %v11708_v7 = vsel %vm4679_vm10, 1.0, %v13889_v21  ;;  %v4428_v57 = vmul.f32 %v11198_v55, %v14888_v0  ;;  %v14889_v1 = vld [vmem:[#allocation232_spill] sm:$0xff]  ;;  %v14890_v52 = vld [vmem:[#allocation45_spill] sm:$0xff]  ;;  %v14891_v10 = vld [vmem:[#allocation83_spill] sm:$0xff]  ;;  %v4557_v58 = vadd.f32 1.0, %v4429_v50 }
 0x8e2   :  { %14879 = vst [vmem:[#allocation96_spill] sm:$0xff] %v11689_v17  ;;  %v11698_v56 = vpop.permute.xlu0 %4196  ;;  %v14885_v17 = vld [vmem:[#allocation82_spill] sm:$0xff]  ;;  %vm4677_vm14 = vcmp.gt.f32.partialorder %v4549_v48, %v14889_v1  ;;  %vm4675_vm15 = vcmp.gt.f32.partialorder %v4547_v24, %v14890_v52  ;;  %v4425_v45 = vmul.f32 %v11150_v29, %v14891_v10  ;;  %v4427_v47 = vmul.f32 %v11094_v23, %v14893_v15  ;;  %v14896_v29 = vld [vmem:[#allocation241_spill] sm:$0xff]  ;;  %v14901_v23 = vld [vmem:[#allocation36_spill] sm:$0xff] }
 0x8e3   :  { %v4426_v43 = vmul.f32 %v11170_v60, %v14885_v17  ;;  %7693 = vperm.xlu2 %7501, %v7692_v30   ;;  %14887 = vst [vmem:[#allocation201_spill] sm:$0xff] %v11708_v7  ;;  %v11719_v30 = vsel %vm4680_vm11, 1.0, %v13889_v21  ;;  %v11722_v17 = vsel %vm4676_vm12, 1.0, %v13889_v21  ;;  %v11727_v1 = vsel %vm4678_vm13, 1.0, %v13889_v21 }
 0x8e4   :  { %14892 = vst [vmem:[#allocation209_spill] sm:$0xff] %v11722_v17  ;;  %v7717_v24 = vpack.i.bf16 %v11719_v30, %v11708_v7  ;;  %v4558_v48 = vadd.f32 1.0, %v4430_v27  ;;  %v11734_v0 = vsel %vm4677_vm14, 1.0, %v13889_v21  ;;  %v11737_v52 = vsel %vm4675_vm15, 1.0, %v13889_v21  ;;  %v14898_v7 = vld [vmem:[#allocation12_spill] sm:$0xff] }
 0x8e5   :  { %7698 = vperm.xlu1 %7489, %v7697_v53   ;;  %v11716_v49 = vpop.permute.xlu2 %7513  ;;  %14894 = vst [vmem:[#allocation203_spill] sm:$0xff] %v11727_v1  ;;  %v4554_v50 = vadd.f32 1.0, %v4426_v43  ;;  %v4556_v10 = vadd.f32 1.0, %v4428_v57  ;;  %v7707_v15 = vpack.i.bf16 %v11722_v17, %v11737_v52  ;;  %v4553_v55 = vadd.f32 1.0, %v4425_v45  ;;  %v14900_v57 = vld [vmem:[#allocation238_spill] sm:$0xff]  ;;  %v14918_v17 = vld [vmem:[#allocation72_spill] sm:$0xff] }
 0x8e6   :  { %14895 = vst [vmem:[#allocation211_spill] sm:$0xff] %v11737_v52  ;;  %vm4685_vm0 = vcmp.gt.f32.partialorder %v4557_v58, %v14896_v29  ;;  %v4435_v60 = vmul.f32 %v11314_v51, %v14897_v28  ;;  %v4555_v27 = vadd.f32 1.0, %v4427_v47  ;;  %v7712_v43 = vpack.i.bf16 %v11727_v1, %v11734_v0  ;;  %v14902_v52 = vld [vmem:[#allocation30_spill] sm:$0xff]  ;;  %v14913_v1 = vld [vmem:[#allocation135_spill] sm:$0xff] }
 0x8e7   :  { %v11731_v53 = vpop.permute.xlu1 %7491  ;;  %v4432_v59 = vmul.f32 %v11266_v20, %v14898_v7  ;;  %vm4686_vm1 = vcmp.gt.f32.partialorder %v4558_v48, %v14899_v38  ;;  %vm4682_vm2 = vcmp.gt.f32.partialorder %v4554_v50, %v14900_v57  ;;  %v4436_v45 = vmul.f32 %v11238_v63, %v14901_v23  ;;  %v14903_v28 = vld [vmem:[#allocation126_spill] sm:$0xff]  ;;  %v14906_v38 = vld [vmem:[#allocation32_spill] sm:$0xff]  ;;  %v14907_v50 = vld [vmem:[#allocation3_spill] sm:$0xff] }
 0x8e8   :  { %v4431_v29 = vmul.f32 %v11246_v31, %v14902_v52  ;;  %v4433_v47 = vmul.f32 %v11190_v6, %v14903_v28  ;;  %v11760_v7 = vsel %vm4685_vm0, 1.0, %v13889_v21  ;;  %v4434_v48 = vmul.f32 %v11294_v12, %v14906_v38  ;;  %v14908_v52 = vld [vmem:[#allocation237_spill] sm:$0xff]  ;;  %v14912_v31 = vld [vmem:[#allocation247_spill] sm:$0xff]  ;;  %v14915_v20 = vld [vmem:[#allocation246_spill] sm:$0xff] }
 0x8e9   :  { %7718 = vperm.xlu0 %7495, %v7717_v24   ;;  %v14904_v24 = vld [vmem:[#allocation239_spill] sm:$0xff]  ;;  %14905 = vst [vmem:[#allocation204_spill] sm:$0xff] %v11760_v7  ;;  %vm4681_vm5 = vcmp.gt.f32.partialorder %v4553_v55, %v14907_v50  ;;  %v4563_v23 = vadd.f32 1.0, %v4435_v60  ;;  %vm4683_vm6 = vcmp.gt.f32.partialorder %v4555_v27, %v14908_v52  ;;  %v11772_v28 = vsel %vm4682_vm2, 1.0, %v13889_v21 }
 0x8ea   :  { %vm4684_vm3 = vcmp.gt.f32.partialorder %v4556_v10, %v14904_v24  ;;  %14909 = vst [vmem:[#allocation200_spill] sm:$0xff] %v11772_v28  ;;  %v4560_v10 = vadd.f32 1.0, %v4432_v59  ;;  %v4564_v55 = vadd.f32 1.0, %v4436_v45  ;;  %v4559_v60 = vadd.f32 1.0, %v4431_v29  ;;  %v14914_v29 = vld [vmem:[#allocation244_spill] sm:$0xff] }
 0x8eb   :  { %v11754_v58 = vpop.permute.xlu0 %7497  ;;  %7708 = vperm.xlu2 %7501, %v7707_v15   ;;  %v11769_v15 = vsel %vm4686_vm1, 1.0, %v13889_v21  ;;  %v11775_v24 = vsel %vm4684_vm3, 1.0, %v13889_v21  ;;  %v11782_v50 = vsel %vm4681_vm5, 1.0, %v13889_v21  ;;  %v4561_v27 = vadd.f32 1.0, %v4433_v47  ;;  %v14916_v47 = vld [vmem:[#allocation242_spill] sm:$0xff] }
 0x8ec   :  { %14910 = vst [vmem:[#allocation199_spill] sm:$0xff] %v11775_v24  ;;  %v7732_v38 = vpack.i.bf16 %v11769_v15, %v11760_v7  ;;  %v4562_v52 = vadd.f32 1.0, %v4434_v48  ;;  %v11785_v12 = vsel %vm4683_vm6, 1.0, %v13889_v21  ;;  %v7722_v59 = vpack.i.bf16 %v11772_v28, %v11782_v50  ;;  %v14917_v48 = vld [vmem:[#allocation68_spill] sm:$0xff] }
 0x8ed   :  { %7713 = vperm.xlu1 %7489, %v7712_v43   ;;  %v11765_v57 = vpop.permute.xlu2 %7528  ;;  %14911 = vst [vmem:[#allocation219_spill] sm:$0xff] %v11782_v50  ;;  %vm4691_vm7 = vcmp.gt.f32.partialorder %v4563_v23, %v14912_v31  ;;  %v4441_v51 = vmul.f32 %v11410_v36, %v14913_v1  ;;  %v7727_v45 = vpack.i.bf16 %v11775_v24, %v11785_v12  ;;  %v14919_v1 = vld [vmem:[#allocation243_spill] sm:$0xff]  ;;  %v14920_v23 = vld [vmem:[#allocation245_spill] sm:$0xff]  ;;  %v14931_v28 = vld [vmem:[#allocation88_spill] sm:$0xff] }
 0x8ee   :  { %vm4688_vm8 = vcmp.gt.f32.partialorder %v4560_v10, %v14914_v29  ;;  %vm4692_vm9 = vcmp.gt.f32.partialorder %v4564_v55, %v14915_v20  ;;  %vm4687_vm10 = vcmp.gt.f32.partialorder %v4559_v60, %v14916_v47  ;;  %v4442_v7 = vmul.f32 %v11334_v62, %v14917_v48  ;;  %v14923_v10 = vld [vmem:[#allocation52_spill] sm:$0xff]  ;;  %v14924_v60 = vld [vmem:[#allocation21_spill] sm:$0xff] }
 0x8ef   :  { %v11779_v43 = vpop.permute.xlu1 %7508  ;;  %v4438_v50 = vmul.f32 %v11362_v32, %v14918_v17  ;;  %vm4689_vm11 = vcmp.gt.f32.partialorder %v4561_v27, %v14919_v1  ;;  %vm4690_vm12 = vcmp.gt.f32.partialorder %v4562_v52, %v14920_v23  ;;  %v11809_v20 = vsel %vm4688_vm8, 1.0, %v13889_v21  ;;  %v14927_v48 = vld [vmem:[#allocation65_spill] sm:$0xff]  ;;  %v14930_v32 = vld [vmem:[#allocation251_spill] sm:$0xff]  ;;  %v14934_v1 = vld [vmem:[#allocation92_spill] sm:$0xff] }
 0x8f0   :  { %14922 = vst [vmem:[#allocation218_spill] sm:$0xff] %v11809_v20  ;;  %v4437_v55 = vmul.f32 %v11342_v61, %v14923_v10  ;;  %v4440_v29 = vmul.f32 %v11390_v5, %v14924_v60  ;;  %v4569_v17 = vadd.f32 1.0, %v4441_v51  ;;  %v11821_v52 = vsel %vm4687_vm10, 1.0, %v13889_v21  ;;  %v14933_v27 = vld [vmem:[#allocation249_spill] sm:$0xff] }
 0x8f1   :  { %7733 = vperm.xlu0 %7495, %v7732_v38   ;;  %v11806_v38 = vsel %vm4691_vm7, 1.0, %v13889_v21  ;;  %14926 = vst [vmem:[#allocation226_spill] sm:$0xff] %v11821_v52  ;;  %v4439_v23 = vmul.f32 %v11286_v46, %v14927_v48  ;;  %v11826_v24 = vsel %vm4690_vm12, 1.0, %v13889_v21  ;;  %v4570_v60 = vadd.f32 1.0, %v4442_v7 }
 0x8f2   :  { %14921 = vst [vmem:[#allocation224_spill] sm:$0xff] %v11806_v38  ;;  %v4566_v51 = vadd.f32 1.0, %v4438_v50  ;;  %v11835_v5 = vsel %vm4689_vm11, 1.0, %v13889_v21  ;;  %v7737_v61 = vpack.i.bf16 %v11809_v20, %v11821_v52  ;;  %v4565_v36 = vadd.f32 1.0, %v4437_v55  ;;  %v14935_v52 = vld [vmem:[#allocation137_spill] sm:$0xff] }
 0x8f3   :  { %v11801_v31 = vpop.permute.xlu0 %7523  ;;  %7723 = vperm.xlu2 %7501, %v7722_v59   ;;  %v11818_v59 = vsel %vm4692_vm9, 1.0, %v13889_v21  ;;  %14928 = vst [vmem:[#allocation212_spill] sm:$0xff] %v11826_v24  ;;  %v4568_v48 = vadd.f32 1.0, %v4440_v29  ;;  %vm4697_vm13 = vcmp.gt.f32.partialorder %v4569_v17, %v14930_v32  ;;  %v4447_v62 = vmul.f32 %v11506_v25, %v14931_v28  ;;  %v14937_v28 = vld [vmem:[#allocation248_spill] sm:$0xff]  ;;  %v14938_v17 = vld [vmem:[#allocation10_spill] sm:$0xff] }
 0x8f4   :  { %14925 = vst [vmem:[#allocation208_spill] sm:$0xff] %v11818_v59  ;;  %v7747_v10 = vpack.i.bf16 %v11818_v59, %v11806_v38  ;;  %v4567_v7 = vadd.f32 1.0, %v4439_v23  ;;  %v7742_v50 = vpack.i.bf16 %v11826_v24, %v11835_v5  ;;  %v14932_v38 = vld [vmem:[#allocation252_spill] sm:$0xff]  ;;  %vm4694_vm15 = vcmp.gt.f32.partialorder %v4566_v51, %v14933_v27 }
 0x8f5   :  { %7728 = vperm.xlu1 %7489, %v7727_v45   ;;  %v11815_v47 = vpop.permute.xlu2 %7543  ;;  %14929 = vst [vmem:[#allocation214_spill] sm:$0xff] %v11835_v5  ;;  %vm4698_vm14 = vcmp.gt.f32.partialorder %v4570_v60, %v14932_v38  ;;  %v4448_v46 = vmul.f32 %v11430_v42, %v14934_v1  ;;  %v4444_v55 = vmul.f32 %v11458_v44, %v14935_v52  ;;  %v11853_v32 = vsel %vm4697_vm13, 1.0, %v13889_v21  ;;  %v14939_v23 = vld [vmem:[#allocation136_spill] sm:$0xff] }
 0x8f6   :  { %14936 = vst [vmem:[#allocation217_spill] sm:$0xff] %v11853_v32  ;;  %vm4693_vm0 = vcmp.gt.f32.partialorder %v4565_v36, %v14937_v28  ;;  %vm4696_vm1 = vcmp.gt.f32.partialorder %v4568_v48, %v14938_v17  ;;  %v4443_v38 = vmul.f32 %v11438_v14, %v14939_v23  ;;  %v11862_v51 = vsel %vm4698_vm14, 1.0, %v13889_v21  ;;  %v14945_v23 = vld [vmem:[#allocation257_spill] sm:$0xff] }
 0x8f7   :  { %v11830_v45 = vpop.permute.xlu1 %7518  ;;  %14940 = vst [vmem:[#allocation216_spill] sm:$0xff] %v11862_v51  ;;  %v11865_v52 = vsel %vm4694_vm15, 1.0, %v13889_v21  ;;  %v7762_v36 = vpack.i.bf16 %v11862_v51, %v11853_v32  ;;  %v4576_v27 = vadd.f32 1.0, %v4448_v46  ;;  %v4572_v48 = vadd.f32 1.0, %v4444_v55  ;;  %v14947_v55 = vld [vmem:[#allocation259_spill] sm:$0xff]  ;;  %v14949_v14 = vld [vmem:[#allocation145_spill] sm:$0xff] }
 0x8f8   :  { %14941 = vst [vmem:[#allocation215_spill] sm:$0xff] %v11865_v52  ;;  %v4571_v17 = vadd.f32 1.0, %v4443_v38  ;;  %v4450_v24 = vmul.f32 %v11554_v11, %v14949_v14  ;;  %vm5615_vm12 = vcmask 1041409   ;;  %vm5617_vm13 = vcmask 1042434  }
 0x8f9   :  { %7748 = vperm.xlu0 %7495, %v7747_v10   ;;  %v4575_v10 = vadd.f32 1.0, %v4447_v62  ;;  %v11873_v62 = vsel %vm4693_vm0, 1.0, %v13889_v21  ;;  %vm4704_vm5 = vcmp.gt.f32.partialorder %v4576_v27, %v14947_v55  ;;  %vm5619_vm14 = vcmask 1043459  }
 0x8fa   :  { %14943 = vst [vmem:[#allocation206_spill] sm:$0xff] %v11873_v62  ;;  %v7752_v28 = vpack.i.bf16 %v11865_v52, %v11873_v62  ;;  %v11901_v27 = vsel %vm4704_vm5, 1.0, %v13889_v21  ;;  %v14958_v62 = vld [vmem:[#allocation98_spill] sm:$0xff]  ;;  %v7500_v42 = vunpack.i.h.bf16 %v11754_v58  ;;  %vm5621_vm15 = vcmask 1044484  }
 0x8fb   :  { %v11850_v29 = vpop.permute.xlu0 %7538  ;;  %7738 = vperm.xlu2 %7501, %v7737_v61   ;;  %v14942_v61 = vld [vmem:[#allocation250_spill] sm:$0xff]  ;;  %vm4703_vm3 = vcmp.gt.f32.partialorder %v4575_v10, %v14945_v23  ;;  %v14951_v10 = vld [vmem:[#allocation253_spill] sm:$0xff]  ;;  %14953 = vst [vmem:[#allocation19_spill] sm:$0xff] %v11901_v27  ;;  %v4456_v11 = vmul.f32 %v11650_v16, %v14958_v62  ;;  %v7515_v62 = vunpack.i.l.bf16 %v11716_v49  ;;  %v14964_v16 = vld [vmem:[#allocation267_spill] sm:$0xff]  ;;  %vm5623_vm0 = vcmask 1045509  }
 0x8fc   :  { %vm4695_vm2 = vcmp.gt.f32.partialorder %v4567_v7, %v14942_v61  ;;  %v14948_v61 = vld [vmem:[#allocation254_spill] sm:$0xff]  ;;  %v11893_v38 = vsel %vm4703_vm3, 1.0, %v13889_v21  ;;  %vm4699_vm7 = vcmp.gt.f32.partialorder %v4571_v17, %v14951_v10  ;;  %v14956_v10 = vld [vmem:[#allocation260_spill] sm:$0xff] }
 0x8fd   :  { %7743 = vperm.xlu1 %7489, %v7742_v50   ;;  %v11859_v60 = vpop.permute.xlu2 %7558  ;;  %v11876_v50 = vsel %vm4696_vm1, 1.0, %v13889_v21  ;;  %v11882_v7 = vsel %vm4695_vm2, 1.0, %v13889_v21  ;;  %vm4700_vm6 = vcmp.gt.f32.partialorder %v4572_v48, %v14948_v61  ;;  %14950 = vst [vmem:[#allocation18_spill] sm:$0xff] %v11893_v38  ;;  %v7772_v14 = vpack.i.bf16 %v11901_v27, %v11893_v38 }
 0x8fe   :  { %14944 = vst [vmem:[#allocation213_spill] sm:$0xff] %v11876_v50  ;;  %v7757_v46 = vpack.i.bf16 %v11876_v50, %v11882_v7  ;;  %v11904_v48 = vsel %vm4700_vm6, 1.0, %v13889_v21  ;;  %v11911_v17 = vsel %vm4699_vm7, 1.0, %v13889_v21  ;;  %vm5625_vm1 = vcmask 1046534  }
 0x8ff   :  { %v11870_v1 = vpop.permute.xlu1 %7533  ;;  %14946 = vst [vmem:[#allocation228_spill] sm:$0xff] %v11882_v7  ;;  %vm5627_vm2 = vcmask 1047559  }
 0x900   :  { %14954 = vst [vmem:[#allocation222_spill] sm:$0xff] %v11904_v48 }
 0x901   :  { %7763 = vperm.xlu0 %7495, %v7762_v36   ;;  %v14952_v36 = vld [vmem:[#allocation149_spill] sm:$0xff]  ;;  %14955 = vst [vmem:[#allocation13_spill] sm:$0xff] %v11911_v17 }
 0x902   :  { %v4449_v23 = vmul.f32 %v11534_v9, %v14952_v36  ;;  %v14957_v36 = vld [vmem:[#allocation158_spill] sm:$0xff] }
 0x903   :  { %v11890_v25 = vpop.permute.xlu0 %7553  ;;  %7753 = vperm.xlu2 %7501, %v7752_v28   ;;  %v4578_v28 = vadd.f32 1.0, %v4450_v24  ;;  %v4455_v9 = vmul.f32 %v11630_v54, %v14957_v36  ;;  %v14959_v24 = vld [vmem:[#allocation258_spill] sm:$0xff]  ;;  %v14962_v36 = vlaneseq  ;;  %v14963_v54 = vld [vmem:[#allocation263_spill] sm:$0xff] }
 0x904   :  { %v4577_v61 = vadd.f32 1.0, %v4449_v23 }
 0x905   :  { %7758 = vperm.xlu1 %7489, %v7757_v46   ;;  %v11898_v50 = vpop.permute.xlu2 %7573  ;;  %v7767_v46 = vpack.i.bf16 %v11904_v48, %v11911_v17  ;;  %vm4706_vm8 = vcmp.gt.f32.partialorder %v4578_v28, %v14956_v10  ;;  %v4583_v23 = vadd.f32 1.0, %v4455_v9  ;;  %v7516_v10 = vunpack.i.h.bf16 %v11716_v49 }
 0x906   :  { %vm4705_vm9 = vcmp.gt.f32.partialorder %v4577_v61, %v14959_v24  ;;  %v11926_v32 = vsel %vm4706_vm8, 1.0, %v13889_v21  ;;  %v7520_v61 = vunpack.i.l.bf16 %v11830_v45  ;;  %v11939_v24 = vand.u32 127, %v14962_v36 }
 0x907   :  { %v11908_v55 = vpop.permute.xlu1 %7548  ;;  %14960 = vst [vmem:[#allocation227_spill] sm:$0xff] %v11926_v32  ;;  %v11931_v28 = vsel %vm4705_vm9, 1.0, %v13889_v21  ;;  %v7494_v9 = vunpack.i.h.bf16 %v11731_v53  ;;  %vm4711_vm10 = vcmp.gt.f32.partialorder %v4583_v23, %v14963_v54  ;;  %v7506_v48 = vunpack.i.h.bf16 %v11670_v39 }
 0x908   :  { %14961 = vst [vmem:[#allocation117_spill] sm:$0xff] %v11931_v28  ;;  %v7505_v49 = vunpack.i.l.bf16 %v11670_v39  ;;  %v5495_v36 = vperm.slane %v7515_v62, %v11939_v24  ;;  %v5497_v54 = vperm.slane %v7520_v61, %v11939_v24  ;;  %v7536_v62 = vunpack.i.h.bf16 %v11870_v1 }
 0x909   :  { %7773 = vperm.xlu0 %7495, %v7772_v14   ;;  %v4584_v14 = vadd.f32 1.0, %v4456_v11  ;;  %v7493_v11 = vunpack.i.l.bf16 %v11731_v53  ;;  %v5488_v39 = vperm.slane %v7494_v9, %v11939_v24  ;;  %v7576_v7 = vunpack.i.h.bf16 %v11898_v50 }
 0x90a   :  { %v11970_v20 = vperm.slane %v7505_v49, %v11939_v24  ;;  %v7575_v49 = vunpack.i.l.bf16 %v11898_v50  ;;  %v7531_v50 = vunpack.i.h.bf16 %v11765_v57 }
 0x90b   :  { %v11920_v38 = vpop.permute.xlu0 %7568  ;;  %7768 = vperm.xlu2 %7501, %v7767_v46   ;;  %v7777_v46 = vpack.i.bf16 %v11926_v32, %v11931_v28  ;;  %vm4712_vm11 = vcmp.gt.f32.partialorder %v4584_v14, %v14964_v16  ;;  %v5496_v28 = vperm.slane %v7516_v10, %v11939_v24  ;;  %v7521_v32 = vunpack.i.h.bf16 %v11830_v45 }
 0x90c   :  { %v11956_v16 = vsel %vm4711_vm10, 1.0, %v13889_v21  ;;  %v11959_v23 = vsel %vm4712_vm11, 1.0, %v13889_v21  ;;  %v5487_v14 = vperm.slane %v7493_v11, %v11939_v24  ;;  %v11964_v10 = vperm.slane %v7506_v48, %v11939_v24 }
 0x90d   :  { %v11923_v44 = vpop.permute.xlu2 %7588  ;;  %14965 = vst [vmem:[#allocation223_spill] sm:$0xff] %v11956_v16  ;;  %v7499_v45 = vunpack.i.l.bf16 %v11754_v58  ;;  %v5629_v27 = vsel %vm5615_vm12, %v5496_v28, %v5495_v36  ;;  %v5498_v9 = vperm.slane %v7521_v32, %v11939_v24  ;;  %v7782_v48 = vpack.i.bf16 %v11959_v23, %v11956_v16 }
 0x90e   :  { %14966 = vst [vmem:[#allocation5_spill] sm:$0xff] %v11959_v23  ;;  %v7525_v11 = vunpack.i.l.bf16 %v11801_v31  ;;  %v5630_v51 = vsel %vm5617_vm13, %v5497_v54, %v5629_v27  ;;  %v5504_v58 = vperm.slane %v7536_v62, %v11939_v24  ;;  %v5490_v27 = vperm.slane %v7500_v42, %v11939_v24 }
 0x90f   :  { %v11928_v17 = vpop.permute.xlu1 %7563  ;;  %v5489_v28 = vperm.slane %v7499_v45, %v11939_v24  ;;  %v7526_v54 = vunpack.i.h.bf16 %v11801_v31  ;;  %v7530_v45 = vunpack.i.l.bf16 %v11765_v57  ;;  %v5519_v42 = vperm.slane %v7575_v49, %v11939_v24 }
 0x910   :  { %v5499_v62 = vperm.slane %v7525_v11, %v11939_v24  ;;  %v7545_v49 = vunpack.i.l.bf16 %v11815_v47 }
 0x911   :  { %v5500_v11 = vperm.slane %v7526_v54, %v11939_v24 }
 0x913   :  { %v11946_v52 = vpop.permute.xlu0 %7583  ;;  %7778 = vperm.xlu2 %7501, %v7777_v46   ;;  %v7535_v46 = vunpack.i.l.bf16 %v11870_v1  ;;  %v5616_v1 = vsel %vm5615_vm12, %v5488_v39, %v5487_v14  ;;  %v5631_v39 = vsel %vm5619_vm14, %v5498_v9, %v5630_v51  ;;  %v7540_v14 = vunpack.i.l.bf16 %v11850_v29 }
 0x914   :  { %v5618_v31 = vsel %vm5617_vm13, %v5489_v28, %v5616_v1  ;;  %v5632_v57 = vsel %vm5621_vm15, %v5499_v62, %v5631_v39  ;;  %v7585_v54 = vunpack.i.l.bf16 %v11946_v52  ;;  %v7510_v62 = vunpack.i.l.bf16 %v11779_v43 }
 0x915   :  { %v11953_v53 = vpop.permute.xlu2 %7603  ;;  %v5503_v32 = vperm.slane %v7535_v46, %v11939_v24  ;;  %v7541_v46 = vunpack.i.h.bf16 %v11850_v29  ;;  %v5505_v29 = vperm.slane %v7540_v14, %v11939_v24 }
 0x917   :  { %v7579_v61 = vpop.permute.xlu1 %7578  ;;  %v5636_v51 = vsel %vm5615_vm12, %v5504_v58, %v5503_v32  ;;  %v5506_v1 = vperm.slane %v7541_v46, %v11939_v24  ;;  %v7550_v46 = vunpack.i.l.bf16 %v11908_v55 }
 0x918   :  { %v7580_v36 = vunpack.i.l.bf16 %v7579_v61  ;;  %v7581_v59 = vunpack.i.h.bf16 %v7579_v61  ;;  %v5501_v61 = vperm.slane %v7530_v45, %v11939_v24  ;;  %v5637_v28 = vsel %vm5617_vm13, %v5505_v29, %v5636_v51 }
 0x919   :  { %v5620_v45 = vsel %vm5619_vm14, %v5490_v27, %v5618_v31 }
 0x91a   :  { %v5521_v9 = vperm.slane %v7580_v36, %v11939_v24  ;;  %v5522_v32 = vperm.slane %v7581_v59, %v11939_v24  ;;  %v5633_v36 = vsel %vm5623_vm0, %v5500_v11, %v5632_v57  ;;  %v7551_v57 = vunpack.i.h.bf16 %v11908_v55 }
 0x91b   :  { %v11985_v16 = vpop.permute.xlu0 %7598  ;;  %7783 = vperm.xlu2 %7501, %v7782_v48   ;;  %v5520_v48 = vperm.slane %v7576_v7, %v11939_v24  ;;  %v5502_v7 = vperm.slane %v7531_v50, %v11939_v24  ;;  %v5634_v31 = vsel %vm5625_vm1, %v5501_v61, %v5633_v36  ;;  %v5523_v11 = vperm.slane %v7585_v54, %v11939_v24 }
 0x91c   :  { %v7600_v59 = vunpack.i.l.bf16 %v11985_v16  ;;  %v7555_v55 = vunpack.i.l.bf16 %v11890_v25  ;;  %v7605_v54 = vunpack.i.l.bf16 %v11953_v53 }
 0x91d   :  { %v11995_v23 = vpop.permute.xlu2 %7618  ;;  %v5650_v58 = vsel %vm5615_vm12, %v5520_v48, %v5519_v42  ;;  %v7546_v48 = vunpack.i.h.bf16 %v11815_v47  ;;  %v5507_v42 = vperm.slane %v7545_v49, %v11939_v24  ;;  %v7601_v47 = vunpack.i.h.bf16 %v11985_v16 }
 0x91f   :  { %v7594_v63 = vpop.permute.xlu1 %7593  ;;  %v5508_v61 = vperm.slane %v7546_v48, %v11939_v24 }
 0x920   :  { %v7596_v5 = vunpack.i.h.bf16 %v7594_v63  ;;  %v7595_v6 = vunpack.i.l.bf16 %v7594_v63  ;;  %v5651_v63 = vsel %vm5617_vm13, %v5521_v9, %v5650_v58  ;;  %v7586_v9 = vunpack.i.h.bf16 %v11946_v52 }
 0x921   :  { %v5652_v27 = vsel %vm5619_vm14, %v5522_v32, %v5651_v63  ;;  %v5509_v58 = vperm.slane %v7550_v46, %v11939_v24  ;;  %v5622_v52 = vsel %vm5621_vm15, %v11970_v20, %v5620_v45  ;;  %v7590_v32 = vunpack.i.l.bf16 %v11923_v44 }
 0x922   :  { %v5528_v39 = vperm.slane %v7596_v5, %v11939_v24  ;;  %v5527_v14 = vperm.slane %v7595_v6, %v11939_v24  ;;  %v5638_v5 = vsel %vm5619_vm14, %v5506_v1, %v5637_v28  ;;  %v7556_v6 = vunpack.i.h.bf16 %v11890_v25 }
 0x923   :  { %v12017_v50 = vpop.permute.xlu0 %7613  ;;  %v5529_v1 = vperm.slane %v7600_v59, %v11939_v24  ;;  %v5639_v28 = vsel %vm5621_vm15, %v5507_v42, %v5638_v5  ;;  %v5653_v16 = vsel %vm5621_vm15, %v5523_v11, %v5652_v27  ;;  %v5524_v36 = vperm.slane %v7586_v9, %v11939_v24 }
 0x924   :  { %v5657_v29 = vsel %vm5615_vm12, %v5528_v39, %v5527_v14  ;;  %v5635_v39 = vsel %vm5627_vm2, %v5502_v7, %v5634_v31  ;;  %v5512_v14 = vperm.slane %v7556_v6, %v11939_v24  ;;  %v5510_v20 = vperm.slane %v7551_v57, %v11939_v24 }
 0x925   :  { %v12025_v51 = vpop.permute.xlu2 %7633  ;;  %v5658_v63 = vsel %vm5617_vm13, %v5529_v1, %v5657_v29  ;;  %v5530_v45 = vperm.slane %v7601_v47, %v11939_v24  ;;  %v5640_v25 = vsel %vm5623_vm0, %v5508_v61, %v5639_v28  ;;  %v7591_v59 = vunpack.i.h.bf16 %v11923_v44 }
 0x926   :  { %v5641_v42 = vsel %vm5625_vm1, %v5509_v58, %v5640_v25  ;;  %v5654_v5 = vsel %vm5623_vm0, %v5524_v36, %v5653_v16  ;;  %v5511_v9 = vperm.slane %v7555_v55, %v11939_v24  ;;  %v5525_v7 = vperm.slane %v7590_v32, %v11939_v24 }
 0x927   :  { %v7609_v49 = vpop.permute.xlu1 %7608  ;;  %v7606_v6 = vunpack.i.h.bf16 %v11953_v53  ;;  %v5659_v31 = vsel %vm5619_vm14, %v5530_v45, %v5658_v63  ;;  %v7511_v57 = vunpack.i.h.bf16 %v11779_v43  ;;  %v5493_v11 = vperm.slane %v7510_v62, %v11939_v24 }
 0x928   :  { %v7610_v48 = vunpack.i.l.bf16 %v7609_v49  ;;  %v5531_v44 = vperm.slane %v7605_v54, %v11939_v24  ;;  %v5753_v47 = vsel %vm2428_vm4, %v5635_v39, 0.0  ;;  %v7611_v29 = vunpack.i.h.bf16 %v7609_v49 }
 0x929   :  { %v5642_v1 = vsel %vm5627_vm2, %v5510_v20, %v5641_v42  ;;  %v5655_v53 = vsel %vm5625_vm1, %v5525_v7, %v5654_v5  ;;  %v5624_v28 = vsel %vm5623_vm0, %v11964_v10, %v5622_v52  ;;  %v7560_v61 = vunpack.i.l.bf16 %v11859_v60 }
 0x92a   :  { %v5526_v43 = vperm.slane %v7591_v59, %v11939_v24  ;;  %v5533_v62 = vperm.slane %v7610_v48, %v11939_v24  ;;  %v5660_v55 = vsel %vm5621_vm15, %v5531_v44, %v5659_v31  ;;  %v7561_v49 = vunpack.i.h.bf16 %v11859_v60 }
 0x92b   :  { %v12052_v46 = vpop.permute.xlu0 %7628  ;;  %v5643_v32 = vsel %vm5615_vm12, %v5512_v14, %v5511_v9  ;;  %v7565_v16 = vunpack.i.l.bf16 %v11928_v17  ;;  %v5532_v36 = vperm.slane %v7606_v6, %v11939_v24  ;;  %v7616_v54 = vunpack.i.h.bf16 %v12017_v50 }
 0x92c   :  { %v7615_v10 = vunpack.i.l.bf16 %v12017_v50  ;;  %v5756_v52 = vsel %vm2428_vm4, %v5642_v1, 0.0  ;;  %v5656_v63 = vsel %vm5627_vm2, %v5526_v43, %v5655_v53  ;;  %v7636_v39 = vunpack.i.h.bf16 %v12025_v51 }
 0x92d   :  { %v12061_v27 = vpop.permute.xlu2 %7648  ;;  %v7635_v20 = vunpack.i.l.bf16 %v12025_v51  ;;  %v5534_v60 = vperm.slane %v7611_v29, %v11939_v24  ;;  %v5661_v14 = vsel %vm5623_vm0, %v5532_v36, %v5660_v55  ;;  %v5494_v25 = vperm.slane %v7511_v57, %v11939_v24 }
 0x92e   :  { %v5513_v59 = vperm.slane %v7560_v61, %v11939_v24  ;;  %v5662_v50 = vsel %vm5625_vm1, %v5533_v62, %v5661_v14  ;;  %v5514_v48 = vperm.slane %v7561_v49, %v11939_v24  ;;  %v7566_v42 = vunpack.i.h.bf16 %v11928_v17 }
 0x92f   :  { %v12068_v58 = vpop.permute.xlu1 %7623  ;;  %5754 = vadd.xlane.f32.xlu1 %v5753_v47  ;;  %v5626_v51 = vsel %vm5625_vm1, %v5493_v11, %v5624_v28  ;;  %v5515_v7 = vperm.slane %v7565_v16, %v11939_v24  ;;  %v5536_v6 = vperm.slane %v7616_v54, %v11939_v24  ;;  %v5762_v31 = vsel %vm2428_vm4, %v5656_v63, 0.0 }
 0x930   :  { %v5644_v9 = vsel %vm5617_vm13, %v5513_v59, %v5643_v32  ;;  %v5535_v57 = vperm.slane %v7615_v10, %v11939_v24  ;;  %v5544_v44 = vperm.slane %v7636_v39, %v11939_v24  ;;  %v5543_v47 = vperm.slane %v7635_v20, %v11939_v24 }
 0x931   :  { %v5663_v17 = vsel %vm5627_vm2, %v5534_v60, %v5662_v50  ;;  %v7620_v11 = vunpack.i.l.bf16 %v11995_v23  ;;  %v5628_v28 = vsel %vm5627_vm2, %v5494_v25, %v5626_v51  ;;  %v7570_v61 = vunpack.i.l.bf16 %v11920_v38 }
 0x932   :  { %v5516_v43 = vperm.slane %v7566_v42, %v11939_v24  ;;  %v5645_v55 = vsel %vm5619_vm14, %v5514_v48, %v5644_v9  ;;  %v5765_v16 = vsel %vm2428_vm4, %v5663_v17, 0.0  ;;  %v5664_v54 = vsel %vm5615_vm12, %v5536_v6, %v5535_v57 }
 0x933   :  { %v7644_v45 = vpop.permute.xlu0 %7643  ;;  %5757 = vadd.xlane.f32.xlu0 %v5756_v52  ;;  %v5646_v36 = vsel %vm5621_vm15, %v5515_v7, %v5645_v55  ;;  %v5671_v10 = vsel %vm5615_vm12, %v5544_v44, %v5543_v47  ;;  %v7650_v52 = vunpack.i.l.bf16 %v12061_v27  ;;  %v5537_v20 = vperm.slane %v7620_v11, %v11939_v24 }
 0x934   :  { %v7645_v62 = vunpack.i.l.bf16 %v7644_v45  ;;  %v7646_v63 = vunpack.i.h.bf16 %v7644_v45  ;;  %v7625_v60 = vunpack.i.l.bf16 %v12068_v58  ;;  %v5750_v25 = vsel %vm2428_vm4, %v5628_v28, 0.0 }
 0x935   :  { %v12095_v5 = vpop.permute.xlu2 %7663  ;;  %v7621_v59 = vunpack.i.h.bf16 %v11995_v23  ;;  %v7651_v50 = vunpack.i.h.bf16 %v12061_v27  ;;  %v7571_v45 = vunpack.i.h.bf16 %v11920_v38  ;;  %v5517_v9 = vperm.slane %v7570_v61, %v11939_v24 }
 0x936   :  { %v5547_v48 = vperm.slane %v7645_v62, %v11939_v24  ;;  %v5665_v7 = vsel %vm5617_vm13, %v5537_v20, %v5664_v54  ;;  %v5647_v6 = vsel %vm5623_vm0, %v5516_v43, %v5646_v36  ;;  %v5548_v23 = vperm.slane %v7646_v63, %v11939_v24 }
 0x937   :  { %v7639_v29 = vpop.permute.xlu1 %7638  ;;  %5763 = vadd.xlane.f32.xlu1 %v5762_v31  ;;  %v5549_v31 = vperm.slane %v7650_v52, %v11939_v24  ;;  %v7626_v47 = vunpack.i.h.bf16 %v12068_v58  ;;  %v5538_v11 = vperm.slane %v7621_v59, %v11939_v24  ;;  %v5648_v55 = vsel %vm5625_vm1, %v5517_v9, %v5647_v6 }
 0x938   :  { %v7641_v1 = vunpack.i.h.bf16 %v7639_v29  ;;  %v7640_v53 = vunpack.i.l.bf16 %v7639_v29  ;;  %v5539_v29 = vperm.slane %v7625_v60, %v11939_v24  ;;  %v7665_v58 = vunpack.i.l.bf16 %v12095_v5 }
 0x939   :  { %v5666_v36 = vsel %vm5619_vm14, %v5538_v11, %v5665_v7  ;;  %v5540_v54 = vperm.slane %v7626_v47, %v11939_v24  ;;  %v5518_v59 = vperm.slane %v7571_v45, %v11939_v24  ;;  %v7631_v6 = vunpack.i.h.bf16 %v12052_v46 }
 0x93a   :  { %v5546_v49 = vperm.slane %v7641_v1, %v11939_v24  ;;  %v5545_v32 = vperm.slane %v7640_v53, %v11939_v24  ;;  %v5550_v1 = vperm.slane %v7651_v50, %v11939_v24  ;;  %v5667_v63 = vsel %vm5621_vm15, %v5539_v29, %v5666_v36 }
 0x93b   :  { %v7659_v39 = vpop.permute.xlu0 %7658  ;;  %5766 = vadd.xlane.f32.xlu0 %v5765_v16  ;;  %v7630_v50 = vunpack.i.l.bf16 %v12052_v46  ;;  %v5555_v9 = vperm.slane %v7665_v58, %v11939_v24 }
 0x93c   :  { %v5672_v14 = vsel %vm5617_vm13, %v5545_v32, %v5671_v10  ;;  %v7660_v57 = vunpack.i.l.bf16 %v7659_v39  ;;  %v7661_v53 = vunpack.i.h.bf16 %v7659_v39 }
 0x93d   :  { %v5673_v42 = vsel %vm5619_vm14, %v5546_v49, %v5672_v14  ;;  %v12126_v51 = vpop.permute.xlu2 %7678  ;;  %v5541_v47 = vperm.slane %v7630_v50, %v11939_v24 }
 0x93e   :  { %v5674_v44 = vsel %vm5621_vm15, %v5547_v48, %v5673_v42  ;;  %v5553_v49 = vperm.slane %v7660_v57, %v11939_v24  ;;  %v5554_v39 = vperm.slane %v7661_v53, %v11939_v24  ;;  %v7666_v48 = vunpack.i.h.bf16 %v12095_v5 }
 0x93f   :  { %v7654_v27 = vpop.permute.xlu1 %7653  ;;  %v5675_v28 = vsel %vm5623_vm0, %v5548_v23, %v5674_v44  ;;  %v5649_v23 = vsel %vm5627_vm2, %v5518_v59, %v5648_v55  ;;  %v5668_v57 = vsel %vm5623_vm0, %v5540_v54, %v5667_v63 }
 0x940   :  { %v7656_v17 = vunpack.i.h.bf16 %v7654_v27  ;;  %v7655_v38 = vunpack.i.l.bf16 %v7654_v27  ;;  %v5676_v62 = vsel %vm5625_vm1, %v5549_v31, %v5675_v28  ;;  %v5556_v29 = vperm.slane %v7666_v48, %v11939_v24 }
 0x941   :  { %v5677_v16 = vsel %vm5627_vm2, %v5550_v1, %v5676_v62  ;;  %v5759_v1 = vsel %vm2428_vm4, %v5649_v23, 0.0  ;;  %v5669_v28 = vsel %vm5625_vm1, %v5541_v47, %v5668_v57 }
 0x942   :  { %v5552_v61 = vperm.slane %v7656_v17, %v11939_v24  ;;  %v5551_v43 = vperm.slane %v7655_v38, %v11939_v24  ;;  %v5771_v52 = vsel %vm2428_vm4, %v5677_v16, 0.0  ;;  %v7680_v17 = vunpack.i.l.bf16 %v12126_v51 }
 0x943   :  { %v7674_v32 = vpop.permute.xlu0 %7673  ;;  %5772 = vadd.xlane.f32.xlu1 %v5771_v52 }
 0x944   :  { %v5678_v10 = vsel %vm5615_vm12, %v5552_v61, %v5551_v43  ;;  %5751 = vadd.xlane.f32.xlu2 %v5750_v25  ;;  %v7676_v60 = vunpack.i.h.bf16 %v7674_v32  ;;  %v7675_v14 = vunpack.i.l.bf16 %v7674_v32  ;;  %v5542_v61 = vperm.slane %v7631_v6, %v11939_v24 }
 0x945   :  { %v5679_v20 = vsel %vm5617_vm13, %v5553_v49, %v5678_v10  ;;  %v7694_v42 = vpop.permute.xlu2 %7693  ;;  %v7681_v43 = vunpack.i.h.bf16 %v12126_v51  ;;  %v5561_v58 = vperm.slane %v7680_v17, %v11939_v24 }
 0x946   :  { %v5680_v25 = vsel %vm5619_vm14, %v5554_v39, %v5679_v20  ;;  %v5560_v27 = vperm.slane %v7676_v60, %v11939_v24  ;;  %v5559_v45 = vperm.slane %v7675_v14, %v11939_v24  ;;  %v5670_v16 = vsel %vm5627_vm2, %v5542_v61, %v5669_v28 }
 0x947   :  { %v7669_v7 = vpop.permute.xlu1 %7668  ;;  %v5681_v5 = vsel %vm5621_vm15, %v5555_v9, %v5680_v25  ;;  %v5562_v63 = vperm.slane %v7681_v43, %v11939_v24  ;;  %v5768_v14 = vsel %vm2428_vm4, %v5670_v16, 0.0  ;;  %v7696_v59 = vunpack.i.h.bf16 %v7694_v42 }
 0x948   :  { %v7671_v31 = vunpack.i.h.bf16 %v7669_v7  ;;  %v7670_v44 = vunpack.i.l.bf16 %v7669_v7  ;;  %v5682_v53 = vsel %vm5623_vm0, %v5556_v29, %v5681_v5  ;;  %v5685_v62 = vsel %vm5615_vm12, %v5560_v27, %v5559_v45 }
 0x949   :  { %v5686_v36 = vsel %vm5617_vm13, %v5561_v58, %v5685_v62  ;;  %v7695_v50 = vunpack.i.l.bf16 %v7694_v42  ;;  %v5568_v23 = vperm.slane %v7696_v59, %v11939_v24 }
 0x94a   :  { %v5558_v46 = vperm.slane %v7671_v31, %v11939_v24  ;;  %v5557_v38 = vperm.slane %v7670_v44, %v11939_v24  ;;  %v5687_v7 = vsel %vm5619_vm14, %v5562_v63, %v5686_v36 }
 0x94b   :  { %v7689_v11 = vpop.permute.xlu0 %7688  ;;  %v5567_v57 = vperm.slane %v7695_v50, %v11939_v24 }
 0x94c   :  { %5760 = vadd.xlane.f32.xlu2 %v5759_v1  ;;  %v5683_v55 = vsel %vm5625_vm1, %v5557_v38, %v5682_v53  ;;  %v7690_v39 = vunpack.i.l.bf16 %v7689_v11  ;;  %v7691_v48 = vunpack.i.h.bf16 %v7689_v11 }
 0x94d   :  { %v5684_v32 = vsel %vm5627_vm2, %v5558_v46, %v5683_v55  ;;  %v7709_v54 = vpop.permute.xlu2 %7708  ;;  %v5692_v11 = vsel %vm5615_vm12, %v5568_v23, %v5567_v57 }
 0x94e   :  { %v5774_v51 = vsel %vm2428_vm4, %v5684_v32, 0.0  ;;  %v5565_v6 = vperm.slane %v7690_v39, %v11939_v24  ;;  %v5566_v27 = vperm.slane %v7691_v48, %v11939_v24  ;;  %v7710_v61 = vunpack.i.l.bf16 %v7709_v54 }
 0x94f   :  { %v7684_v49 = vpop.permute.xlu1 %7683  ;;  %5775 = vadd.xlane.f32.xlu0 %v5774_v51  ;;  %v7711_v62 = vunpack.i.h.bf16 %v7709_v54 }
 0x950   :  { %v7686_v10 = vunpack.i.h.bf16 %v7684_v49  ;;  %v7685_v52 = vunpack.i.l.bf16 %v7684_v49 }
 0x951   :  { %v5574_v39 = vperm.slane %v7711_v62, %v11939_v24 }
 0x952   :  { %v5564_v20 = vperm.slane %v7686_v10, %v11939_v24  ;;  %v5563_v60 = vperm.slane %v7685_v52, %v11939_v24  ;;  %v5573_v10 = vperm.slane %v7710_v61, %v11939_v24 }
 0x953   :  { %v7704_v9 = vpop.permute.xlu0 %7703 }
 0x954   :  { %5769 = vadd.xlane.f32.xlu2 %v5768_v14  ;;  %v5688_v25 = vsel %vm5621_vm15, %v5563_v60, %v5687_v7  ;;  %v7705_v47 = vunpack.i.l.bf16 %v7704_v9  ;;  %v7706_v1 = vunpack.i.h.bf16 %v7704_v9 }
 0x955   :  { %v5689_v31 = vsel %vm5623_vm0, %v5564_v20, %v5688_v25  ;;  %v7724_v17 = vpop.permute.xlu2 %7723 }
 0x956   :  { %v5690_v42 = vsel %vm5625_vm1, %v5565_v6, %v5689_v31  ;;  %v5571_v55 = vperm.slane %v7705_v47, %v11939_v24  ;;  %v5572_v49 = vperm.slane %v7706_v1, %v11939_v24  ;;  %v7725_v59 = vunpack.i.l.bf16 %v7724_v17 }
 0x957   :  { %v7699_v45 = vpop.permute.xlu1 %7698  ;;  %v5691_v29 = vsel %vm5627_vm2, %v5566_v27, %v5690_v42 }
 0x958   :  { %v7701_v44 = vunpack.i.h.bf16 %v7699_v45  ;;  %v7700_v5 = vunpack.i.l.bf16 %v7699_v45  ;;  %v5777_v28 = vsel %vm2428_vm4, %v5691_v29, 0.0  ;;  %v7726_v45 = vunpack.i.h.bf16 %v7724_v17 }
 0x959   :  { %v5579_v42 = vperm.slane %v7725_v59, %v11939_v24 }
 0x95a   :  { %v5570_v46 = vperm.slane %v7701_v44, %v11939_v24  ;;  %v5569_v38 = vperm.slane %v7700_v5, %v11939_v24  ;;  %v5580_v1 = vperm.slane %v7726_v45, %v11939_v24 }
 0x95b   :  { %v7719_v53 = vpop.permute.xlu0 %7718 }
 0x95c   :  { %v5693_v43 = vsel %vm5617_vm13, %v5569_v38, %v5692_v11  ;;  %5778 = vadd.xlane.f32.xlu2 %v5777_v28  ;;  %v7720_v32 = vunpack.i.l.bf16 %v7719_v53  ;;  %v7721_v51 = vunpack.i.h.bf16 %v7719_v53 }
 0x95d   :  { %v5694_v58 = vsel %vm5619_vm14, %v5570_v46, %v5693_v43  ;;  %v7739_v7 = vpop.permute.xlu2 %7738 }
 0x95e   :  { %v5695_v36 = vsel %vm5621_vm15, %v5571_v55, %v5694_v58  ;;  %v5577_v50 = vperm.slane %v7720_v32, %v11939_v24  ;;  %v5578_v31 = vperm.slane %v7721_v51, %v11939_v24  ;;  %v7740_v53 = vunpack.i.l.bf16 %v7739_v7 }
 0x95f   :  { %v7714_v16 = vpop.permute.xlu1 %7713  ;;  %v5696_v20 = vsel %vm5623_vm0, %v5572_v49, %v5695_v36  ;;  %v7741_v62 = vunpack.i.h.bf16 %v7739_v7 }
 0x960   :  { %v7716_v52 = vunpack.i.h.bf16 %v7714_v16  ;;  %v7715_v63 = vunpack.i.l.bf16 %v7714_v16  ;;  %v5697_v14 = vsel %vm5625_vm1, %v5573_v10, %v5696_v20  ;;  %v5585_v49 = vperm.slane %v7740_v53, %v11939_v24 }
 0x961   :  { %v5698_v9 = vsel %vm5627_vm2, %v5574_v39, %v5697_v14  ;;  %v5586_v39 = vperm.slane %v7741_v62, %v11939_v24 }
 0x962   :  { %v5576_v54 = vperm.slane %v7716_v52, %v11939_v24  ;;  %v5575_v60 = vperm.slane %v7715_v63, %v11939_v24  ;;  %v5780_v6 = vsel %vm2428_vm4, %v5698_v9, 0.0 }
 0x963   :  { %v7734_v48 = vpop.permute.xlu0 %7733  ;;  %5781 = vadd.xlane.f32.xlu1 %v5780_v6 }
 0x964   :  { %v5699_v25 = vsel %vm5615_vm12, %v5576_v54, %v5575_v60  ;;  %v7736_v57 = vunpack.i.h.bf16 %v7734_v48  ;;  %v7735_v27 = vunpack.i.l.bf16 %v7734_v48 }
 0x965   :  { %v5700_v23 = vsel %vm5617_vm13, %v5577_v50, %v5699_v25  ;;  %v7754_v32 = vpop.permute.xlu2 %7753 }
 0x966   :  { %v5701_v5 = vsel %vm5619_vm14, %v5578_v31, %v5700_v23  ;;  %v5584_v29 = vperm.slane %v7736_v57, %v11939_v24  ;;  %v5583_v46 = vperm.slane %v7735_v27, %v11939_v24  ;;  %v7756_v14 = vunpack.i.h.bf16 %v7754_v32 }
 0x967   :  { %v7729_v44 = vpop.permute.xlu1 %7728  ;;  %v5702_v11 = vsel %vm5621_vm15, %v5579_v42, %v5701_v5  ;;  %v7755_v59 = vunpack.i.l.bf16 %v7754_v32 }
 0x968   :  { %v7731_v47 = vunpack.i.h.bf16 %v7729_v44  ;;  %v7730_v38 = vunpack.i.l.bf16 %v7729_v44  ;;  %v5703_v43 = vsel %vm5623_vm0, %v5580_v1, %v5702_v11  ;;  %v5706_v55 = vsel %vm5615_vm12, %v5584_v29, %v5583_v46 }
 0x969   :  { %v5707_v10 = vsel %vm5617_vm13, %v5585_v49, %v5706_v55  ;;  %v5592_v31 = vperm.slane %v7756_v14, %v11939_v24  ;;  %v5591_v23 = vperm.slane %v7755_v59, %v11939_v24  ;;  %v14969_v14 = vld [vmem:[#allocation256_spill] sm:$0xff] }
 0x96a   :  { %v5582_v28 = vperm.slane %v7731_v47, %v11939_v24  ;;  %v5581_v17 = vperm.slane %v7730_v38, %v11939_v24  ;;  %v5708_v48 = vsel %vm5619_vm14, %v5586_v39, %v5707_v10  ;;  %v14970_v59 = vld [vmem:[#allocation152_spill] sm:$0xff] }
 0x96b   :  { %v7749_v61 = vpop.permute.xlu0 %7748  ;;  %v5713_v53 = vsel %vm5615_vm12, %v5592_v31, %v5591_v23 }
 0x96c   :  { %v5704_v58 = vsel %vm5625_vm1, %v5581_v17, %v5703_v43  ;;  %v7750_v51 = vunpack.i.l.bf16 %v7749_v61  ;;  %v7751_v50 = vunpack.i.h.bf16 %v7749_v61 }
 0x96d   :  { %v5705_v36 = vsel %vm5627_vm2, %v5582_v28, %v5704_v58  ;;  %v7769_v42 = vpop.permute.xlu2 %7768 }
 0x96e   :  { %v5783_v20 = vsel %vm2428_vm4, %v5705_v36, 0.0  ;;  %v5589_v7 = vperm.slane %v7750_v51, %v11939_v24  ;;  %v5590_v57 = vperm.slane %v7751_v50, %v11939_v24  ;;  %v7770_v28 = vunpack.i.l.bf16 %v7769_v42  ;;  %v14968_v51 = vld [vmem:[#allocation87_spill] sm:$0xff] }
 0x96f   :  { %v7744_v16 = vpop.permute.xlu1 %7743  ;;  %5784 = vadd.xlane.f32.xlu0 %v5783_v20  ;;  %v7771_v17 = vunpack.i.h.bf16 %v7769_v42  ;;  %v4445_v20 = vmul.f32 %v11382_v22, %v14968_v51  ;;  %v4452_v50 = vmul.f32 %v11582_v19, %v14970_v59  ;;  %v14986_v51 = vld [vmem:[#allocation141_spill] sm:$0xff]  ;;  %v14991_v59 = vld [vmem:[#allocation143_spill] sm:$0xff] }
 0x970   :  { %v7746_v52 = vunpack.i.h.bf16 %v7744_v16  ;;  %v7745_v63 = vunpack.i.l.bf16 %v7744_v16  ;;  %v5597_v58 = vperm.slane %v7770_v28, %v11939_v24  ;;  %v14978_v28 = vld [vmem:[#allocation268_spill] sm:$0xff] }
 0x971   :  { %v5598_v32 = vperm.slane %v7771_v17, %v11939_v24 }
 0x972   :  { %v5588_v54 = vperm.slane %v7746_v52, %v11939_v24  ;;  %v5587_v60 = vperm.slane %v7745_v63, %v11939_v24  ;;  %v14967_v63 = vld [vmem:[#allocation146_spill] sm:$0xff] }
 0x973   :  { %v7764_v6 = vpop.permute.xlu0 %7763  ;;  %v4446_v39 = vmul.f32 %v11486_v8, %v14967_v63 }
 0x974   :  { %v5709_v9 = vsel %vm5621_vm15, %v5587_v60, %v5708_v48  ;;  %v7765_v47 = vunpack.i.l.bf16 %v7764_v6  ;;  %v7766_v46 = vunpack.i.h.bf16 %v7764_v6  ;;  %v4573_v60 = vadd.f32 1.0, %v4445_v20  ;;  %v14971_v48 = vld [vmem:[#allocation255_spill] sm:$0xff] }
 0x975   :  { %v5710_v25 = vsel %vm5623_vm0, %v5588_v54, %v5709_v9  ;;  %v4574_v54 = vadd.f32 1.0, %v4446_v39  ;;  %v14972_v9 = vld [vmem:[#allocation147_spill] sm:$0xff]  ;;  %v4580_v6 = vadd.f32 1.0, %v4452_v50  ;;  %v14985_v39 = vld [vmem:[#allocation281_spill] sm:$0xff] }
 0x976   :  { %v5711_v45 = vsel %vm5625_vm1, %v5589_v7, %v5710_v25  ;;  %v5595_v43 = vperm.slane %v7765_v47, %v11939_v24  ;;  %v5596_v55 = vperm.slane %v7766_v46, %v11939_v24  ;;  %vm4701_vm5 = vcmp.gt.f32.partialorder %v4573_v60, %v14971_v48  ;;  %v14988_v60 = vld [vmem:[#allocation142_spill] sm:$0xff]  ;;  %v14994_v48 = vld [vmem:[#allocation48_spill] sm:$0xff] }
 0x977   :  { %v7759_v27 = vpop.permute.xlu1 %7758  ;;  %v5712_v29 = vsel %vm5627_vm2, %v5590_v57, %v5711_v45  ;;  %vm4702_vm3 = vcmp.gt.f32.partialorder %v4574_v54, %v14969_v14  ;;  %v4451_v7 = vmul.f32 %v11478_v2, %v14972_v9  ;;  %v12272_v31 = vsel %vm4701_vm5, 1.0, %v13889_v21  ;;  %v14974_v45 = vld [vmem:[#allocation159_spill] sm:$0xff]  ;;  %v14987_v54 = vld [vmem:[#allocation284_spill] sm:$0xff] }
 0x978   :  { %v7761_v44 = vunpack.i.h.bf16 %v7759_v27  ;;  %v7760_v5 = vunpack.i.l.bf16 %v7759_v27  ;;  %v5786_v1 = vsel %vm2428_vm4, %v5712_v29, 0.0  ;;  %v12269_v25 = vsel %vm4702_vm3, 1.0, %v13889_v21  ;;  %v14973_v27 = vld [vmem:[#allocation261_spill] sm:$0xff] }
 0x979   :  { %5787 = vadd.xlane.f32.xlu2 %v5786_v1  ;;  %v4579_v23 = vadd.f32 1.0, %v4451_v7  ;;  %v7787_v57 = vpack.i.bf16 %v12269_v25, %v12272_v31  ;;  %vm4708_vm6 = vcmp.gt.f32.partialorder %v4580_v6, %v14973_v27  ;;  %v4458_v42 = vmul.f32 %v11678_v37, %v14974_v45  ;;  %v14996_v7 = vld [vmem:[#allocation293_spill] sm:$0xff]  ;;  %v14999_v27 = vld [vmem:[#allocation296_spill] sm:$0xff] }
 0x97a   :  { %v5594_v38 = vperm.slane %v7761_v44, %v11939_v24  ;;  %v5593_v11 = vperm.slane %v7760_v5, %v11939_v24  ;;  %v14975_v44 = vld [vmem:[#allocation262_spill] sm:$0xff]  ;;  %v14976_v5 = vld [vmem:[#allocation100_spill] sm:$0xff]  ;;  %v12283_v29 = vsel %vm4708_vm6, 1.0, %v13889_v21  ;;  %v5814_v20 = vmul.f32 %v14986_v51, %v14985_v39  ;;  %v14997_v6 = vld [vmem:[#allocation101_spill] sm:$0xff] }
 0x97b   :  { %vm4707_vm7 = vcmp.gt.f32.partialorder %v4579_v23, %v14975_v44  ;;  %v4457_v47 = vmul.f32 %v11574_v34, %v14976_v5  ;;  %v4586_v46 = vadd.f32 1.0, %v4458_v42  ;;  %v5826_v23 = vmul.f32 %v14997_v6, %v14996_v7  ;;  %v15000_v45 = vld [vmem:[#allocation80_spill] sm:$0xff]  ;;  %v15002_v5 = vld [vmem:[#allocation299_spill] sm:$0xff]  ;;  %v15006_v7 = vld [vmem:[#allocation305_spill] sm:$0xff] }
 0x97c   :  { %v5714_v61 = vsel %vm5617_vm13, %v5593_v11, %v5713_v53  ;;  %v14977_v53 = vld [vmem:[#allocation266_spill] sm:$0xff]  ;;  %v5829_v42 = vmul.f32 %v15000_v45, %v14999_v27  ;;  %v15007_v6 = vld [vmem:[#allocation104_spill] sm:$0xff] }
 0x97d   :  { %v5715_v62 = vsel %vm5619_vm14, %v5594_v38, %v5714_v61  ;;  %v12286_v38 = vsel %vm4707_vm7, 1.0, %v13889_v21  ;;  %v4585_v11 = vadd.f32 1.0, %v4457_v47  ;;  %vm4714_vm8 = vcmp.gt.f32.partialorder %v4586_v46, %v14977_v53  ;;  %v15003_v47 = vld [vmem:[#allocation33_spill] sm:$0xff]  ;;  %v15157_v37 = vld [vmem:[#allocation312_spill] sm:$0xff] }
 0x97e   :  { %v5716_v49 = vsel %vm5621_vm15, %v5595_v43, %v5715_v62  ;;  %v7792_v1 = vpack.i.bf16 %v12283_v29, %v12286_v38  ;;  %v12293_v17 = vsel %vm4714_vm8, 1.0, %v13889_v21  ;;  %v14980_v62 = vld [vmem:[#allocation269_spill] sm:$0xff]  ;;  %v5832_v46 = vmul.f32 %v15003_v47, %v15002_v5  ;;  %v15008_v47 = vld [vmem:[#allocation308_spill] sm:$0xff] }
 0x97f   :  { %v5717_v16 = vsel %vm5623_vm0, %v5596_v55, %v5716_v49  ;;  %vm4713_vm9 = vcmp.gt.f32.partialorder %v4585_v11, %v14978_v28  ;;  %14979 = vst [vmem:[#allocation221_spill] sm:$0xff] %v12293_v17  ;;  %v14981_v55 = vld [vmem:[#allocation129_spill] sm:$0xff]  ;;  %v14982_v49 = vld [vmem:[#allocation271_spill] sm:$0xff]  ;;  %v7774_v11 = vpop.permute.xlu0 %7773 }
 0x980   :  { %v5718_v36 = vsel %vm5625_vm1, %v5597_v58, %v5717_v16  ;;  %v12296_v61 = vsel %vm4713_vm9, 1.0, %v13889_v21  ;;  %v5798_v58 = vmul.f32 %v14981_v55, %v14980_v62  ;;  %v14983_v16 = vld [vmem:[#allocation274_spill] sm:$0xff]  ;;  %v7775_v53 = vunpack.i.l.bf16 %v7774_v11 }
 0x981   :  { %v5719_v10 = vsel %vm5627_vm2, %v5598_v32, %v5718_v36  ;;  %v7797_v43 = vpack.i.bf16 %v12293_v17, %v12296_v61  ;;  %v5802_v32 = vmul.f32 %v11062_v18, %v14982_v49  ;;  %v5805_v36 = vmul.f32 %v11065_v3, %v14983_v16  ;;  %v14990_v3 = vld [vmem:[#allocation287_spill] sm:$0xff]  ;;  %v15004_v16 = vld [vmem:[#allocation302_spill] sm:$0xff] }
 0x982   :  { %v5789_v52 = vsel %vm2428_vm4, %v5719_v10, 0.0  ;;  %v5808_v10 = vmul.f32 %v11110_v33, %v10683_v26  ;;  %v5817_v18 = vmul.f32 %v14988_v60, %v14987_v54  ;;  %v5820_v50 = vmul.f32 %v14991_v59, %v14990_v3  ;;  %v14993_v33 = vld [vmem:[#allocation290_spill] sm:$0xff] }
 0x983   :  { %5790 = vadd.xlane.f32.xlu1 %v5789_v52  ;;  %v14984_v52 = vld [vmem:[#allocation278_spill] sm:$0xff] }
 0x984   :  { %v5811_v63 = vmul.f32 %v11097_v40, %v14984_v52  ;;  %v5823_v40 = vmul.f32 %v14994_v48, %v14993_v33  ;;  %v5601_v52 = vperm.slane %v7775_v53, %v11939_v24 }
 0x99c   :  { %7788 = vperm.xlu1 %7489, %v7787_v57  }
 0x9a2   :  { %v12314_v14 = vpop.xlane.xlu1 %5754 }
 0x9a3   :  { %14989 = vst [vmem:[#allocation220_spill] sm:$0xff] %v12314_v14  ;;  %v15154_v14 = vld [vmem:[#allocation163_spill] sm:$0xff] }
 0x9a4   :  { %7793 = vperm.xlu1 %7489, %v7792_v1   ;;  %v7779_v1 = vpop.permute.xlu2 %7778 }
 0x9a5   :  { %v7781_v51 = vunpack.i.h.bf16 %v7779_v1 }
 0x9a7   :  { %v5604_v33 = vperm.slane %v7781_v51, %v11939_v24  ;;  %v15018_v51 = vld [vmem:[#allocation103_spill] sm:$0xff] }
 0x9aa   :  { %v12318_v26 = vpop.xlane.xlu1 %5763 }
 0x9ab   :  { %14992 = vst [vmem:[#allocation225_spill] sm:$0xff] %v12318_v26 }
 0x9ac   :  { %7798 = vperm.xlu1 %7489, %v7797_v43   ;;  %v7776_v43 = vunpack.i.h.bf16 %v7774_v11 }
 0x9b4   :  { %6055 = vperm.xlu1 %7489, %v5798_v58   ;;  %v7780_v58 = vunpack.i.l.bf16 %v7779_v1  ;;  %v15010_v1 = vld [vmem:[#allocation157_spill] sm:$0xff] }
 0x9b5   :  { %v4453_v53 = vmul.f32 %v11602_v13, %v15010_v1  ;;  %v15026_v1 = vld [vmem:[#allocation273_spill] sm:$0xff] }
 0x9b6   :  { %v12322_v9 = vpop.xlane.xlu1 %5772  ;;  %v5603_v54 = vperm.slane %v7780_v58, %v11939_v24 }
 0x9b7   :  { %14995 = vst [vmem:[#allocation25_spill] sm:$0xff] %v12322_v9 }
 0x9bc   :  { %6067 = vperm.xlu1 %7489, %v5802_v32  }
 0x9c4   :  { %6076 = vperm.xlu1 %7489, %v5805_v36   ;;  %v15005_v36 = vld [vmem:[#allocation97_spill] sm:$0xff] }
 0x9cc   :  { %6085 = vperm.xlu1 %7489, %v5808_v10   ;;  %v5835_v10 = vmul.f32 %v15005_v36, %v15004_v16  ;;  %v15014_v16 = vld [vmem:[#allocation115_spill] sm:$0xff] }
 0x9d4   :  { %6094 = vperm.xlu1 %7489, %v5811_v63   ;;  %v5602_v63 = vperm.slane %v7776_v43, %v11939_v24  ;;  %v15012_v43 = vld [vmem:[#allocation187_spill] sm:$0xff] }
 0x9d6   :  { %v12326_v57 = vpop.xlane.xlu1 %5781 }
 0x9d7   :  { %14998 = vst [vmem:[#allocation41_spill] sm:$0xff] %v12326_v57 }
 0x9dc   :  { %6103 = vperm.xlu1 %7489, %v5814_v20  }
 0x9e4   :  { %6112 = vperm.xlu1 %7489, %v5817_v18  }
 0x9ec   :  { %6121 = vperm.xlu1 %7489, %v5820_v50  }
 0x9f4   :  { %6130 = vperm.xlu1 %7489, %v5823_v40  }
 0x9f6   :  { %v12330_v44 = vpop.xlane.xlu1 %5790 }
 0x9f7   :  { %15001 = vst [vmem:[#allocation31_spill] sm:$0xff] %v12330_v44 }
 0x9fc   :  { %6139 = vperm.xlu1 %7489, %v5826_v23   ;;  %v5838_v23 = vmul.f32 %v15007_v6, %v15006_v7  ;;  %v15022_v7 = vld [vmem:[#allocation270_spill] sm:$0xff] }
 0xa04   :  { %6148 = vperm.xlu1 %7489, %v5829_v42  }
 0xa0c   :  { %6157 = vperm.xlu1 %7489, %v5832_v46   ;;  %v15009_v46 = vld [vmem:[#allocation164_spill] sm:$0xff] }
 0xa0d   :  { %v5841_v11 = vmul.f32 %v15009_v46, %v15008_v47  ;;  %v15025_v47 = vld [vmem:[#allocation176_spill] sm:$0xff] }
 0xa0e   :  { %v7789_v28 = vpop.permute.xlu1 %7788 }
 0xa0f   :  { %v7791_v62 = vunpack.i.h.bf16 %v7789_v28  ;;  %v7790_v55 = vunpack.i.l.bf16 %v7789_v28  ;;  %v15011_v28 = vld [vmem:[#allocation102_spill] sm:$0xff] }
 0xa11   :  { %v5600_v49 = vperm.slane %v7791_v62, %v11939_v24  ;;  %v5599_v32 = vperm.slane %v7790_v55, %v11939_v24  ;;  %v4454_v62 = vmul.f32 %v15012_v43, %v15011_v28  ;;  %v4581_v55 = vadd.f32 1.0, %v4453_v53  ;;  %v15027_v53 = vld [vmem:[#allocation28_spill] sm:$0xff] }
 0xa12   :  { %v5799_v28 = vmul.f32 %v15027_v53, %v15026_v1  ;;  %v15043_v1 = vld [vmem:[#allocation16_spill] sm:$0xff] }
 0xa13   :  { %v5720_v39 = vsel %vm5615_vm12, %v5600_v49, %v5599_v32  ;;  %v4582_v58 = vadd.f32 1.0, %v4454_v62  ;;  %v15013_v32 = vld [vmem:[#allocation311_spill] sm:$0xff]  ;;  %v15028_v62 = vld [vmem:[#allocation320_spill] sm:$0xff] }
 0xa14   :  { %v5721_v20 = vsel %vm5617_vm13, %v5601_v52, %v5720_v39  ;;  %6166 = vperm.xlu1 %7489, %v5835_v10   ;;  %v5844_v36 = vmul.f32 %v15014_v16, %v15013_v32  ;;  %v15015_v10 = vld [vmem:[#allocation264_spill] sm:$0xff]  ;;  %v15016_v52 = vld [vmem:[#allocation105_spill] sm:$0xff] }
 0xa15   :  { %v5722_v60 = vsel %vm5619_vm14, %v5602_v63, %v5721_v20  ;;  %vm4709_vm10 = vcmp.gt.f32.partialorder %v4581_v55, %v15015_v10  ;;  %v4459_v63 = vmul.f32 %v11698_v56, %v15016_v52  ;;  %v15017_v39 = vld [vmem:[#allocation265_spill] sm:$0xff]  ;;  %v15019_v20 = vld [vmem:[#allocation195_spill] sm:$0xff]  ;;  %v15029_v55 = vld [vmem:[#allocation168_spill] sm:$0xff] }
 0xa16   :  { %v7794_v18 = vpop.permute.xlu1 %7793  ;;  %v5723_v50 = vsel %vm5621_vm15, %v5603_v54, %v5722_v60  ;;  %vm4710_vm11 = vcmp.gt.f32.partialorder %v4582_v58, %v15017_v39  ;;  %v4460_v54 = vmul.f32 %v15019_v20, %v15018_v51  ;;  %v12371_v60 = vsel %vm4709_vm10, 1.0, %v13889_v21  ;;  %v15030_v32 = vld [vmem:[#allocation276_spill] sm:$0xff]  ;;  %v15032_v10 = vld [vmem:[#allocation323_spill] sm:$0xff]  ;;  %v15033_v52 = vld [vmem:[#allocation170_spill] sm:$0xff] }
 0xa17   :  { %v7796_v3 = vunpack.i.h.bf16 %v7794_v18  ;;  %v7795_v59 = vunpack.i.l.bf16 %v7794_v18  ;;  %v5724_v27 = vsel %vm5623_vm0, %v5604_v33, %v5723_v50  ;;  %v4587_v18 = vadd.f32 1.0, %v4459_v63  ;;  %v15020_v33 = vld [vmem:[#allocation314_spill] sm:$0xff]  ;;  %v15031_v16 = vld [vmem:[#allocation128_spill] sm:$0xff] }
 0xa18   :  { %v4588_v50 = vadd.f32 1.0, %v4460_v54  ;;  %v5853_v58 = vmul.f32 %v15029_v55, %v15028_v62  ;;  %v5856_v63 = vmul.f32 %v15033_v52, %v15032_v10  ;;  %v15034_v39 = vld [vmem:[#allocation46_spill] sm:$0xff]  ;;  %v15035_v51 = vld [vmem:[#allocation44_spill] sm:$0xff]  ;;  %v15048_v10 = vld [vmem:[#allocation335_spill] sm:$0xff]  ;;  %vm6998_vm10 = vcmp.lt.s32.totalorder %v11939_v24, 8 }
 0xa19   :  { %v5606_v48 = vperm.slane %v7796_v3, %v11939_v24  ;;  %v5605_v40 = vperm.slane %v7795_v59, %v11939_v24  ;;  %v12374_v3 = vsel %vm4710_vm11, 1.0, %v13889_v21  ;;  %vm4715_vm3 = vcmp.gt.f32.partialorder %v4587_v18, %v15022_v7  ;;  %v15045_v62 = vld [vmem:[#allocation180_spill] sm:$0xff]  ;;  %v15049_v52 = vld [vmem:[#allocation193_spill] sm:$0xff] }
 0xa1a   :  { %v7802_v59 = vpack.i.bf16 %v12374_v3, %v12371_v60  ;;  %v5804_v54 = vmul.f32 %v15035_v51, %v15034_v39  ;;  %v15050_v51 = vld [vmem:[#allocation289_spill] sm:$0xff] }
 0xa1b   :  { %v5725_v45 = vsel %vm5625_vm1, %v5605_v40, %v5724_v27  ;;  %v12385_v27 = vsel %vm4715_vm3, 1.0, %v13889_v21 }
 0xa1c   :  { %6175 = vperm.xlu1 %7489, %v5838_v23   ;;  %v5726_v42 = vsel %vm5627_vm2, %v5606_v48, %v5725_v45  ;;  %v15021_v48 = vld [vmem:[#allocation106_spill] sm:$0xff]  ;;  %v15023_v23 = vld [vmem:[#allocation272_spill] sm:$0xff] }
 0xa1d   :  { %v5792_v5 = vsel %vm2428_vm4, %v5726_v42, 0.0  ;;  %v5847_v40 = vmul.f32 %v15021_v48, %v15020_v33  ;;  %vm4716_vm5 = vcmp.gt.f32.partialorder %v4588_v50, %v15023_v23  ;;  %v15037_v50 = vld [vmem:[#allocation118_spill] sm:$0xff]  ;;  %v15038_v48 = vld [vmem:[#allocation280_spill] sm:$0xff]  ;;  %v15040_v23 = vld [vmem:[#allocation329_spill] sm:$0xff] }
 0xa1e   :  { %5793 = vadd.xlane.f32.xlu0 %v5792_v5  ;;  %v12360_v49 = vpop.permute.xlu1 %7798  ;;  %v12388_v45 = vsel %vm4716_vm5, 1.0, %v13889_v21  ;;  %v15024_v5 = vld [vmem:[#allocation317_spill] sm:$0xff] }
 0xa1f   :  { %v7807_v42 = vpack.i.bf16 %v12388_v45, %v12385_v27  ;;  %v5850_v46 = vmul.f32 %v15025_v47, %v15024_v5 }
 0xa24   :  { %6184 = vperm.xlu1 %7489, %v5841_v11  }
 0xa26   :  { %v12381_v6 = vpop.permute.xlu1 %6055 }
 0xa2c   :  { %6193 = vperm.xlu1 %7489, %v5844_v36   ;;  %v5801_v36 = vmul.f32 %v15031_v16, %v15030_v32  ;;  %v15046_v32 = vld [vmem:[#allocation286_spill] sm:$0xff] }
 0xa2d   :  { %v15047_v16 = vld [vmem:[#allocation138_spill] sm:$0xff] }
 0xa2e   :  { %v12394_v11 = vpop.permute.xlu1 %6067 }
 0xa32   :  { %7803 = vperm.xlu0 %7495, %v7802_v59   ;;  %v15036_v59 = vld [vmem:[#allocation326_spill] sm:$0xff] }
 0xa33   :  { %v5859_v33 = vmul.f32 %v15037_v50, %v15036_v59  ;;  %v15052_v50 = vld [vmem:[#allocation338_spill] sm:$0xff] }
 0xa34   :  { %6202 = vperm.xlu1 %7489, %v5847_v40   ;;  %v15039_v40 = vld [vmem:[#allocation131_spill] sm:$0xff] }
 0xa35   :  { %v5807_v7 = vmul.f32 %v15039_v40, %v15038_v48  ;;  %v15054_v40 = vld [vmem:[#allocation292_spill] sm:$0xff] }
 0xa36   :  { %v12400_v21 = vpop.permute.xlu1 %6076 }
 0xa3a   :  { %7808 = vperm.xlu0 %7495, %v7807_v42   ;;  %v15041_v42 = vld [vmem:[#allocation181_spill] sm:$0xff] }
 0xa3b   :  { %v5862_v5 = vmul.f32 %v15041_v42, %v15040_v23 }
 0xa3c   :  { %6211 = vperm.xlu1 %7489, %v5850_v46   ;;  %v15042_v46 = vld [vmem:[#allocation283_spill] sm:$0xff] }
 0xa3d   :  { %v5810_v53 = vmul.f32 %v15043_v1, %v15042_v46  ;;  %v12440_v1 = vpop.xlane.xlu0 %5757 }
 0xa3e   :  { %v12408_v18 = vpop.permute.xlu1 %6085  ;;  %7882 = vrcp.f32 %v12440_v1  ;;  %vm6793_vm7 = vweird.f32 %v12440_v1 }
 0xa42   :  { %6058 = vperm.xlu0 %7495, %v5799_v28   ;;  %v15044_v28 = vld [vmem:[#allocation332_spill] sm:$0xff] }
 0xa43   :  { %v5865_v55 = vmul.f32 %v15045_v62, %v15044_v28  ;;  %v15058_v28 = vld [vmem:[#allocation139_spill] sm:$0xff] }
 0xa44   :  { %6220 = vperm.xlu1 %7489, %v5853_v58  }
 0xa46   :  { %v12416_v47 = vpop.permute.xlu1 %6094 }
 0xa4a   :  { %6064 = vperm.xlu0 %7495, %v5801_v36   ;;  %v5813_v36 = vmul.f32 %v15047_v16, %v15046_v32  ;;  %v15060_v32 = vld [vmem:[#allocation81_spill] sm:$0xff] }
 0xa4c   :  { %6229 = vperm.xlu1 %7489, %v5856_v63   ;;  %v5868_v63 = vmul.f32 %v15049_v52, %v15048_v10  ;;  %v12448_v10 = vpop.xlane.xlu0 %5766  ;;  %v15062_v52 = vld [vmem:[#allocation298_spill] sm:$0xff] }
 0xa4d   :  { %15061 = vst [vmem:[#allocation20_spill] sm:$0xff] %v12448_v10  ;;  %v15171_v10 = vld [vmem:[#allocation171_spill] sm:$0xff] }
 0xa4e   :  { %v12422_v58 = vpop.permute.xlu1 %6103 }
 0xa52   :  { %6073 = vperm.xlu0 %7495, %v5804_v54   ;;  %v15051_v54 = vld [vmem:[#allocation140_spill] sm:$0xff] }
 0xa53   :  { %v5816_v59 = vmul.f32 %v15051_v54, %v15050_v51 }
 0xa54   :  { %6238 = vperm.xlu1 %7489, %v5859_v33   ;;  %v15053_v33 = vld [vmem:[#allocation182_spill] sm:$0xff] }
 0xa55   :  { %v5871_v48 = vmul.f32 %v15053_v33, %v15052_v50  ;;  %v15066_v33 = vld [vmem:[#allocation301_spill] sm:$0xff] }
 0xa56   :  { %v12428_v39 = vpop.permute.xlu1 %6112 }
 0xa5a   :  { %6082 = vperm.xlu0 %7495, %v5807_v7   ;;  %v15055_v7 = vld [vmem:[#allocation95_spill] sm:$0xff] }
 0xa5b   :  { %v5819_v23 = vmul.f32 %v15055_v7, %v15054_v40  ;;  %v15068_v7 = vld [vmem:[#allocation123_spill] sm:$0xff] }
 0xa5c   :  { %6247 = vperm.xlu1 %7489, %v5862_v5   ;;  %v15056_v5 = vld [vmem:[#allocation341_spill] sm:$0xff] }
 0xa5d   :  { %v5874_v46 = vmul.f32 %v11638_v4, %v15056_v5  ;;  %v15064_v4 = vld [vmem:[#allocation347_spill] sm:$0xff] }
 0xa5e   :  { %v12436_v42 = vpop.permute.xlu1 %6121  ;;  %v5880_v54 = vmul.f32 %v11686_v41, %v15064_v4  ;;  %v15071_v41 = vld [vmem:[#allocation153_spill] sm:$0xff]  ;;  %v15076_v4 = vld [vmem:[#allocation43_spill] sm:$0xff] }
 0xa62   :  { %6091 = vperm.xlu0 %7495, %v5810_v53   ;;  %v15057_v53 = vld [vmem:[#allocation295_spill] sm:$0xff] }
 0xa63   :  { %v5822_v62 = vmul.f32 %v15058_v28, %v15057_v53  ;;  %v15070_v53 = vld [vmem:[#allocation304_spill] sm:$0xff] }
 0xa64   :  { %6256 = vperm.xlu1 %7489, %v5865_v55   ;;  %v15059_v55 = vld [vmem:[#allocation344_spill] sm:$0xff]  ;;  %v5831_v28 = vmul.f32 %v15071_v41, %v15070_v53 }
 0xa65   :  { %v5877_v16 = vmul.f32 %v15060_v32, %v15059_v55 }
 0xa6a   :  { %6100 = vperm.xlu0 %7495, %v5813_v36   ;;  %v12446_v36 = vpop.permute.xlu1 %6130 }
 0xa6c   :  { %6265 = vperm.xlu1 %7489, %v5868_v63   ;;  %v15063_v63 = vld [vmem:[#allocation148_spill] sm:$0xff] }
 0xa6d   :  { %v5825_v51 = vmul.f32 %v15063_v63, %v15062_v52  ;;  %v15075_v52 = vld [vmem:[#allocation99_spill] sm:$0xff] }
 0xa72   :  { %6109 = vperm.xlu0 %7495, %v5816_v59   ;;  %v12454_v59 = vpop.xlane.xlu0 %5775  ;;  %v12456_v50 = vpop.permute.xlu1 %6139 }
 0xa73   :  { %15065 = vst [vmem:[#allocation27_spill] sm:$0xff] %v12454_v59 }
 0xa74   :  { %6274 = vperm.xlu1 %7489, %v5871_v48   ;;  %v15067_v48 = vld [vmem:[#allocation84_spill] sm:$0xff] }
 0xa75   :  { %v5828_v40 = vmul.f32 %v15067_v48, %v15066_v33 }
 0xa7a   :  { %6118 = vperm.xlu0 %7495, %v5819_v23   ;;  %v5883_v23 = vmul.f32 %v11673_v35, %v15068_v7  ;;  %v12462_v5 = vpop.xlane.xlu0 %5784  ;;  %v7784_v35 = vpop.permute.xlu2 %7783 }
 0xa7b   :  { %15069 = vst [vmem:[#allocation35_spill] sm:$0xff] %v12462_v5  ;;  %v7785_v33 = vunpack.i.l.bf16 %v7784_v35 }
 0xa7c   :  { %6283 = vperm.xlu1 %7489, %v5874_v46   ;;  %v12464_v46 = vpop.permute.xlu1 %6148 }
 0xa82   :  { %6127 = vperm.xlu0 %7495, %v5822_v62   ;;  %v15072_v62 = vld [vmem:[#allocation122_spill] sm:$0xff] }
 0xa83   :  { %v5886_v55 = vmul.f32 %v11734_v0, %v15072_v62  ;;  %v15078_v62 = vld [vmem:[#allocation160_spill] sm:$0xff] }
 0xa84   :  { %6292 = vperm.xlu1 %7489, %v5877_v16   ;;  %v15074_v16 = vld [vmem:[#allocation307_spill] sm:$0xff] }
 0xa85   :  { %v5834_v63 = vmul.f32 %v15075_v52, %v15074_v16  ;;  %v5609_v16 = vperm.slane %v7785_v33, %v11939_v24 }
 0xa8a   :  { %6136 = vperm.xlu0 %7495, %v5825_v51   ;;  %v12474_v51 = vpop.permute.xlu1 %6157 }
 0xa8c   :  { %6301 = vperm.xlu1 %7489, %v5880_v54   ;;  %v5889_v54 = vmul.f32 %v11719_v30, %v15076_v4  ;;  %v7801_v4 = vunpack.i.h.bf16 %v12360_v49 }
 0xa91   :  { %v12470_v32 = vpop.xlane.xlu0 %5793 }
 0xa92   :  { %6145 = vperm.xlu0 %7495, %v5828_v40   ;;  %15073 = vst [vmem:[#allocation26_spill] sm:$0xff] %v12470_v32  ;;  %v7786_v40 = vunpack.i.h.bf16 %v7784_v35 }
 0xa94   :  { %6310 = vperm.xlu1 %7489, %v5883_v23   ;;  %v7800_v23 = vunpack.i.l.bf16 %v12360_v49  ;;  %v5610_v30 = vperm.slane %v7786_v40, %v11939_v24 }
 0xa9a   :  { %6154 = vperm.xlu0 %7495, %v5831_v28   ;;  %v15077_v28 = vld [vmem:[#allocation310_spill] sm:$0xff] }
 0xa9c   :  { %6319 = vperm.xlu1 %7489, %v5886_v55   ;;  %v5837_v55 = vmul.f32 %v15078_v62, %v15077_v28  ;;  %v15080_v62 = vld [vmem:[#allocation313_spill] sm:$0xff] }
 0xaa2   :  { %6163 = vperm.xlu0 %7495, %v5834_v63   ;;  %v15079_v63 = vld [vmem:[#allocation62_spill] sm:$0xff] }
 0xaa3   :  { %v5892_v35 = vmul.f32 %v11785_v12, %v15079_v63 }
 0xaa4   :  { %6328 = vperm.xlu1 %7489, %v5889_v54   ;;  %v7804_v48 = vpop.permute.xlu0 %7803 }
 0xaa5   :  { %v7806_v7 = vunpack.i.h.bf16 %v7804_v48  ;;  %v7805_v0 = vunpack.i.l.bf16 %v7804_v48  ;;  %v5611_v48 = vperm.slane %v7800_v23, %v11939_v24 }
 0xaa7   :  { %v5608_v53 = vperm.slane %v7806_v7, %v11939_v24  ;;  %v5607_v41 = vperm.slane %v7805_v0, %v11939_v24  ;;  %v12491_v7 = vpop.permute.xlu1 %6166 }
 0xaa9   :  { %v5727_v52 = vsel %vm5615_vm12, %v5608_v53, %v5607_v41  ;;  %v5612_v41 = vperm.slane %v7801_v4, %v11939_v24 }
 0xaaa   :  { %v5728_v54 = vsel %vm5617_vm13, %v5609_v16, %v5727_v52  ;;  %6172 = vperm.xlu0 %7495, %v5837_v55   ;;  %v15081_v55 = vld [vmem:[#allocation162_spill] sm:$0xff] }
 0xaab   :  { %v5729_v0 = vsel %vm5619_vm14, %v5610_v30, %v5728_v54  ;;  %v5840_v16 = vmul.f32 %v15081_v55, %v15080_v62  ;;  %v15082_v30 = vld [vmem:[#allocation24_spill] sm:$0xff] }
 0xaac   :  { %6337 = vperm.xlu1 %7489, %v5892_v35   ;;  %v7809_v33 = vpop.permute.xlu0 %7808  ;;  %v5730_v53 = vsel %vm5621_vm15, %v5611_v48, %v5729_v0  ;;  %v5895_v63 = vmul.f32 %v11769_v15, %v15082_v30  ;;  %v6438_v48 = vperm.slane %v12381_v6, %v11939_v24  ;;  %v15084_v15 = vld [vmem:[#allocation165_spill] sm:$0xff]  ;;  %v15087_v6 = vld [vmem:[#allocation319_spill] sm:$0xff]  ;;  %v15090_v30 = vld [vmem:[#allocation208_spill] sm:$0xff] }
 0xaad   :  { %v7811_v28 = vunpack.i.h.bf16 %v7809_v33  ;;  %v7810_v40 = vunpack.i.l.bf16 %v7809_v33  ;;  %v5731_v23 = vsel %vm5623_vm0, %v5612_v41, %v5730_v53  ;;  %v15085_v41 = vld [vmem:[#allocation56_spill] sm:$0xff] }
 0xaaf   :  { %v5614_v12 = vperm.slane %v7811_v28, %v11939_v24  ;;  %v5613_v49 = vperm.slane %v7810_v40, %v11939_v24  ;;  %v12508_v0 = vpop.permute.xlu1 %6175  ;;  %v15083_v40 = vld [vmem:[#allocation316_spill] sm:$0xff] }
 0xab0   :  { %v5843_v53 = vmul.f32 %v15084_v15, %v15083_v40  ;;  %v15093_v40 = vld [vmem:[#allocation275_spill] sm:$0xff]  ;;  %v15094_v15 = vld [vmem:[#allocation130_spill] sm:$0xff] }
 0xab1   :  { %v5732_v52 = vsel %vm5625_vm1, %v5613_v49, %v5731_v23 }
 0xab2   :  { %6181 = vperm.xlu0 %7495, %v5840_v16   ;;  %v5733_v35 = vsel %vm5627_vm2, %v5614_v12, %v5732_v52  ;;  %v15086_v12 = vld [vmem:[#allocation214_spill] sm:$0xff]  ;;  %v15088_v16 = vld [vmem:[#allocation161_spill] sm:$0xff] }
 0xab3   :  { %v5795_v54 = vsel %vm2428_vm4, %v5733_v35, 0.0  ;;  %v5898_v49 = vmul.f32 %v15086_v12, %v15085_v41  ;;  %v5846_v23 = vmul.f32 %v15088_v16, %v15087_v6  ;;  %v15089_v52 = vld [vmem:[#allocation150_spill] sm:$0xff]  ;;  %v15095_v41 = vld [vmem:[#allocation156_spill] sm:$0xff]  ;;  %v15097_v16 = vld [vmem:[#allocation325_spill] sm:$0xff] }
 0xab4   :  { %6346 = vperm.xlu1 %7489, %v5895_v63   ;;  %v6059_v4 = vpop.permute.xlu0 %6058  ;;  %5796 = vadd.xlane.f32.xlu2 %v5795_v54  ;;  %v5901_v63 = vmul.f32 %v15090_v30, %v15089_v52  ;;  %v15091_v54 = vld [vmem:[#allocation322_spill] sm:$0xff]  ;;  %v15096_v12 = vld [vmem:[#allocation228_spill] sm:$0xff]  ;;  %v15099_v30 = vld [vmem:[#allocation277_spill] sm:$0xff] }
 0xab5   :  { %v6439_v33 = vperm.slane %v6059_v4, %v11939_v24  ;;  %v15092_v4 = vld [vmem:[#allocation112_spill] sm:$0xff] }
 0xab7   :  { %v12512_v28 = vsel %vm5615_vm12, %v6439_v33, %v6438_v48  ;;  %v12520_v55 = vpop.permute.xlu1 %6184  ;;  %v5849_v48 = vmul.f32 %v15092_v4, %v15091_v54  ;;  %v15101_v54 = vld [vmem:[#allocation111_spill] sm:$0xff]  ;;  %v15102_v4 = vld [vmem:[#allocation216_spill] sm:$0xff] }
 0xab8   :  { %v5907_v44 = vmul.f32 %v15102_v4, %v15101_v54  ;;  %v15110_v54 = vld [vmem:[#allocation40_spill] sm:$0xff] }
 0xaba   :  { %6190 = vperm.xlu0 %7495, %v5843_v53   ;;  %v5800_v53 = vmul.f32 %v15094_v15, %v15093_v40  ;;  %v15104_v15 = vld [vmem:[#allocation175_spill] sm:$0xff] }
 0xabc   :  { %6355 = vperm.xlu1 %7489, %v5898_v49   ;;  %v12518_v62 = vpop.permute.xlu0 %6064  ;;  %v5904_v49 = vmul.f32 %v15096_v12, %v15095_v41  ;;  %v15106_v12 = vld [vmem:[#allocation132_spill] sm:$0xff] }
 0xabf   :  { %v12530_v33 = vpop.permute.xlu1 %6193 }
 0xac2   :  { %6199 = vperm.xlu0 %7495, %v5846_v23   ;;  %v15098_v23 = vld [vmem:[#allocation167_spill] sm:$0xff] }
 0xac3   :  { %v5852_v52 = vmul.f32 %v15098_v23, %v15097_v16  ;;  %v5910_v16 = vmul.f32 %v12272_v31, %v11382_v22  ;;  %v15113_v31 = vld [vmem:[#allocation334_spill] sm:$0xff] }
 0xac4   :  { %6364 = vperm.xlu1 %7489, %v5901_v63   ;;  %v12526_v35 = vpop.permute.xlu0 %6073  ;;  %v15100_v63 = vld [vmem:[#allocation66_spill] sm:$0xff] }
 0xac5   :  { %v5803_v32 = vmul.f32 %v15100_v63, %v15099_v30  ;;  %v15108_v30 = vld [vmem:[#allocation116_spill] sm:$0xff] }
 0xac7   :  { %v12544_v5 = vpop.permute.xlu1 %6202 }
 0xaca   :  { %6208 = vperm.xlu0 %7495, %v5849_v48   ;;  %v15103_v48 = vld [vmem:[#allocation328_spill] sm:$0xff] }
 0xacb   :  { %v5855_v41 = vmul.f32 %v15104_v15, %v15103_v48  ;;  %v15111_v48 = vld [vmem:[#allocation173_spill] sm:$0xff]  ;;  %v15112_v15 = vld [vmem:[#allocation19_spill] sm:$0xff] }
 0xacc   :  { %6373 = vperm.xlu1 %7489, %v5904_v49   ;;  %v12536_v6 = vpop.permute.xlu0 %6082  ;;  %6061 = vperm.xlu2 %7501, %v5800_v53   ;;  %v15105_v53 = vld [vmem:[#allocation279_spill] sm:$0xff]  ;;  %v5913_v57 = vmul.f32 %v15112_v15, %v15111_v48  ;;  %v15120_v48 = vld [vmem:[#allocation69_spill] sm:$0xff] }
 0xacd   :  { %v5806_v49 = vmul.f32 %v15106_v12, %v15105_v53 }
 0xad2   :  { %6217 = vperm.xlu0 %7495, %v5852_v52   ;;  %v12556_v52 = vpop.permute.xlu1 %6211 }
 0xad4   :  { %6382 = vperm.xlu1 %7489, %v5907_v44   ;;  %v12546_v40 = vpop.permute.xlu0 %6091  ;;  %6070 = vperm.xlu2 %7501, %v5803_v32   ;;  %v15107_v44 = vld [vmem:[#allocation331_spill] sm:$0xff]  ;;  %v15109_v32 = vld [vmem:[#allocation282_spill] sm:$0xff] }
 0xad5   :  { %v5858_v63 = vmul.f32 %v15108_v30, %v15107_v44  ;;  %v5809_v4 = vmul.f32 %v15110_v54, %v15109_v32  ;;  %v5916_v44 = vmul.f32 %v12286_v38, %v11478_v2  ;;  %v6463_v2 = vperm.slane %v12446_v36, %v11939_v24 }
 0xada   :  { %6226 = vperm.xlu0 %7495, %v5855_v41   ;;  %v12566_v22 = vpop.permute.xlu1 %6220  ;;  %v15114_v41 = vld [vmem:[#allocation186_spill] sm:$0xff] }
 0xadb   :  { %v5861_v12 = vmul.f32 %v15114_v41, %v15113_v31  ;;  %v5919_v31 = vmul.f32 %v12374_v3, %v15012_v43  ;;  %v5922_v3 = vmul.f32 %v12296_v61, %v11574_v34 }
 0xadc   :  { %6391 = vperm.xlu1 %7489, %v5910_v16   ;;  %v12554_v23 = vpop.permute.xlu0 %6100  ;;  %6079 = vperm.xlu2 %7501, %v5806_v49   ;;  %v15115_v49 = vld [vmem:[#allocation285_spill] sm:$0xff]  ;;  %v15116_v16 = vld [vmem:[#allocation63_spill] sm:$0xff] }
 0xadd   :  { %v5812_v59 = vmul.f32 %v15116_v16, %v15115_v49  ;;  %v15122_v49 = vld [vmem:[#allocation191_spill] sm:$0xff] }
 0xae2   :  { %6235 = vperm.xlu0 %7495, %v5858_v63   ;;  %v15118_v63 = vld [vmem:[#allocation184_spill] sm:$0xff]  ;;  %v12578_v54 = vpop.permute.xlu1 %6229 }
 0xae4   :  { %6400 = vperm.xlu1 %7489, %v5913_v57   ;;  %v12564_v53 = vpop.permute.xlu0 %6109  ;;  %6088 = vperm.xlu2 %7501, %v5809_v4   ;;  %v15117_v57 = vld [vmem:[#allocation337_spill] sm:$0xff]  ;;  %v15119_v4 = vld [vmem:[#allocation288_spill] sm:$0xff] }
 0xae5   :  { %v5864_v32 = vmul.f32 %v15118_v63, %v15117_v57  ;;  %v5815_v15 = vmul.f32 %v15120_v48, %v15119_v4  ;;  %v15124_v57 = vld [vmem:[#allocation291_spill] sm:$0xff]  ;;  %v15125_v63 = vld [vmem:[#allocation90_spill] sm:$0xff] }
 0xae6   :  { %v5818_v43 = vmul.f32 %v15125_v63, %v15124_v57  ;;  %v15126_v4 = vld [vmem:[#allocation343_spill] sm:$0xff]  ;;  %v15127_v48 = vld [vmem:[#allocation178_spill] sm:$0xff]  ;;  %v15133_v63 = vld [vmem:[#allocation297_spill] sm:$0xff] }
 0xaea   :  { %6244 = vperm.xlu0 %7495, %v5861_v12   ;;  %v15121_v12 = vld [vmem:[#allocation340_spill] sm:$0xff] }
 0xaeb   :  { %v5867_v16 = vmul.f32 %v15122_v49, %v15121_v12  ;;  %v15131_v49 = vld [vmem:[#allocation346_spill] sm:$0xff] }
 0xaec   :  { %6409 = vperm.xlu1 %7489, %v5916_v44   ;;  %v12574_v30 = vpop.permute.xlu0 %6118  ;;  %6097 = vperm.xlu2 %7501, %v5812_v59   ;;  %v12592_v44 = vpop.xlane.xlu2 %5751 }
 0xaed   :  { %15123 = vst [vmem:[#allocation8_spill] sm:$0xff] %v12592_v44 }
 0xaf2   :  { %6253 = vperm.xlu0 %7495, %v5864_v32   ;;  %v12598_v32 = vpop.permute.xlu1 %6238 }
 0xaf4   :  { %6418 = vperm.xlu1 %7489, %v5919_v31   ;;  %v6128_v41 = vpop.permute.xlu0 %6127  ;;  %6106 = vperm.xlu2 %7501, %v5815_v15   ;;  %v5870_v15 = vmul.f32 %v15127_v48, %v15126_v4  ;;  %v15128_v31 = vld [vmem:[#allocation294_spill] sm:$0xff]  ;;  %v12608_v12 = vpop.xlane.xlu2 %5760  ;;  %v15136_v48 = vld [vmem:[#allocation349_spill] sm:$0xff] }
 0xaf5   :  { %v6462_v38 = vperm.slane %v6128_v41, %v11939_v24  ;;  %v15129_v41 = vld [vmem:[#allocation151_spill] sm:$0xff]  ;;  %15130 = vst [vmem:[#allocation37_spill] sm:$0xff] %v12608_v12 }
 0xaf7   :  { %v12588_v59 = vsel %vm5615_vm12, %v6463_v2, %v6462_v38  ;;  %v5821_v2 = vmul.f32 %v15129_v41, %v15128_v31  ;;  %v5925_v38 = vmul.f32 %v12388_v45, %v15019_v20  ;;  %v15138_v41 = vld [vmem:[#allocation300_spill] sm:$0xff] }
 0xafa   :  { %6262 = vperm.xlu0 %7495, %v5867_v16   ;;  %v12612_v61 = vpop.permute.xlu1 %6247  ;;  %v15132_v16 = vld [vmem:[#allocation192_spill] sm:$0xff] }
 0xafb   :  { %v5873_v57 = vmul.f32 %v15132_v16, %v15131_v49  ;;  %v15141_v16 = vld [vmem:[#allocation121_spill] sm:$0xff] }
 0xafc   :  { %6427 = vperm.xlu1 %7489, %v5922_v3   ;;  %v12600_v36 = vpop.permute.xlu0 %6136  ;;  %6115 = vperm.xlu2 %7501, %v5818_v43   ;;  %v15134_v43 = vld [vmem:[#allocation154_spill] sm:$0xff]  ;;  %v12620_v20 = vpop.xlane.xlu2 %5769 }
 0xafd   :  { %v5824_v3 = vmul.f32 %v15134_v43, %v15133_v63  ;;  %15135 = vst [vmem:[#allocation23_spill] sm:$0xff] %v12620_v20  ;;  %v15144_v20 = vld [vmem:[#allocation91_spill] sm:$0xff] }
 0xb02   :  { %6271 = vperm.xlu0 %7495, %v5870_v15   ;;  %v12622_v45 = vpop.permute.xlu1 %6256  ;;  %v15137_v15 = vld [vmem:[#allocation197_spill] sm:$0xff] }
 0xb03   :  { %v5876_v31 = vmul.f32 %v15137_v15, %v15136_v48  ;;  %v15146_v15 = vld [vmem:[#allocation124_spill] sm:$0xff] }
 0xb04   :  { %6436 = vperm.xlu1 %7489, %v5925_v38   ;;  %v12610_v34 = vpop.permute.xlu0 %6145  ;;  %6124 = vperm.xlu2 %7501, %v5821_v2   ;;  %v15139_v2 = vld [vmem:[#allocation74_spill] sm:$0xff]  ;;  %v12630_v49 = vpop.xlane.xlu2 %5778 }
 0xb05   :  { %v5827_v38 = vmul.f32 %v15139_v2, %v15138_v41  ;;  %15140 = vst [vmem:[#allocation14_spill] sm:$0xff] %v12630_v49  ;;  %v15148_v2 = vld [vmem:[#allocation306_spill] sm:$0xff] }
 0xb0a   :  { %6280 = vperm.xlu0 %7495, %v5873_v57   ;;  %v15142_v57 = vld [vmem:[#allocation210_spill] sm:$0xff]  ;;  %v12634_v43 = vpop.permute.xlu1 %6265 }
 0xb0b   :  { %v5879_v63 = vmul.f32 %v15142_v57, %v15141_v16 }
 0xb0c   :  { %v12618_v4 = vpop.permute.xlu0 %6154  ;;  %6133 = vperm.xlu2 %7501, %v5824_v3   ;;  %v15143_v3 = vld [vmem:[#allocation303_spill] sm:$0xff]  ;;  %v12640_v48 = vpop.xlane.xlu2 %5787 }
 0xb0d   :  { %v5830_v44 = vmul.f32 %v15144_v20, %v15143_v3  ;;  %15145 = vst [vmem:[#allocation34_spill] sm:$0xff] %v12640_v48  ;;  %v15151_v20 = vld [vmem:[#allocation61_spill] sm:$0xff] }
 0xb12   :  { %6289 = vperm.xlu0 %7495, %v5876_v31   ;;  %v15147_v31 = vld [vmem:[#allocation205_spill] sm:$0xff]  ;;  %v12646_v26 = vpop.permute.xlu1 %6274 }
 0xb13   :  { %v5882_v41 = vmul.f32 %v15147_v31, %v15146_v15 }
 0xb14   :  { %v12628_v12 = vpop.permute.xlu0 %6163  ;;  %6142 = vperm.xlu2 %7501, %v5827_v38   ;;  %v15149_v38 = vld [vmem:[#allocation155_spill] sm:$0xff] }
 0xb15   :  { %v5833_v49 = vmul.f32 %v15149_v38, %v15148_v2  ;;  %v15156_v2 = vld [vmem:[#allocation201_spill] sm:$0xff] }
 0xb1a   :  { %6298 = vperm.xlu0 %7495, %v5879_v63   ;;  %v15152_v63 = vld [vmem:[#allocation209_spill] sm:$0xff]  ;;  %v12658_v15 = vpop.permute.xlu1 %6283 }
 0xb1b   :  { %v5885_v3 = vmul.f32 %v15152_v63, %v15151_v20  ;;  %v15158_v20 = vld [vmem:[#allocation51_spill] sm:$0xff] }
 0xb1c   :  { %v12638_v9 = vpop.permute.xlu0 %6172  ;;  %6151 = vperm.xlu2 %7501, %v5830_v44   ;;  %v15153_v44 = vld [vmem:[#allocation309_spill] sm:$0xff]  ;;  %v5839_v63 = vmul.f32 %v15158_v20, %v15157_v37  ;;  %v15159_v20 = vld [vmem:[#allocation144_spill] sm:$0xff] }
 0xb1d   :  { %v5836_v48 = vmul.f32 %v15154_v14, %v15153_v44  ;;  %v6442_v14 = vperm.slane %v12394_v11, %v11939_v24 }
 0xb22   :  { %6307 = vperm.xlu0 %7495, %v5882_v41   ;;  %v15155_v41 = vld [vmem:[#allocation133_spill] sm:$0xff] }
 0xb23   :  { %v5888_v38 = vmul.f32 %v15156_v2, %v15155_v41  ;;  %v12676_v2 = vpop.permute.xlu1 %6292 }
 0xb24   :  { %v12648_v16 = vpop.permute.xlu0 %6181  ;;  %6160 = vperm.xlu2 %7501, %v5833_v49  }
 0xb27   :  { %v12650_v57 = vpop.xlane.xlu2 %5796 }
 0xb28   :  { %15150 = vst [vmem:[#allocation58_spill] sm:$0xff] %v12650_v57  ;;  %v6441_v57 = vperm.slane %v12518_v62, %v11939_v24 }
 0xb2a   :  { %6316 = vperm.xlu0 %7495, %v5885_v3  }
 0xb2c   :  { %v12656_v17 = vpop.permute.xlu0 %6190  ;;  %6169 = vperm.xlu2 %7501, %v5836_v48  }
 0xb2f   :  { %v6062_v31 = vpop.permute.xlu2 %6061 }
 0xb30   :  { %v6440_v49 = vperm.slane %v6062_v31, %v11939_v24  ;;  %v6487_v31 = vperm.slane %v12544_v5, %v11939_v24  ;;  %v6445_v5 = vperm.slane %v12400_v21, %v11939_v24 }
 0xb32   :  { %v6567_v48 = vsel %vm5617_vm13, %v6440_v49, %v12512_v28  ;;  %6325 = vperm.xlu0 %7495, %v5888_v38   ;;  %v15160_v28 = vld [vmem:[#allocation200_spill] sm:$0xff]  ;;  %v6444_v49 = vperm.slane %v12526_v35, %v11939_v24 }
 0xb33   :  { %v6568_v3 = vsel %vm5619_vm14, %v6441_v57, %v6567_v48  ;;  %v5891_v38 = vmul.f32 %v15160_v28, %v15159_v20  ;;  %v15164_v20 = vld [vmem:[#allocation85_spill] sm:$0xff]  ;;  %v15165_v35 = vld [vmem:[#allocation204_spill] sm:$0xff] }
 0xb34   :  { %v6200_v44 = vpop.permute.xlu0 %6199  ;;  %6178 = vperm.xlu2 %7501, %v5839_v63   ;;  %v6569_v41 = vsel %vm5621_vm15, %v6442_v14, %v6568_v3  ;;  %v15161_v63 = vld [vmem:[#allocation315_spill] sm:$0xff]  ;;  %v15162_v14 = vld [vmem:[#allocation114_spill] sm:$0xff]  ;;  %v5894_v28 = vmul.f32 %v15165_v35, %v15164_v20 }
 0xb35   :  { %v6486_v62 = vperm.slane %v6200_v44, %v11939_v24  ;;  %v5842_v48 = vmul.f32 %v15162_v14, %v15161_v63  ;;  %v6447_v63 = vperm.slane %v12536_v6, %v11939_v24  ;;  %v15168_v6 = vld [vmem:[#allocation108_spill] sm:$0xff]  ;;  %v15169_v20 = vld [vmem:[#allocation218_spill] sm:$0xff] }
 0xb37   :  { %v12679_v37 = vsel %vm5615_vm12, %v6487_v31, %v6486_v62  ;;  %v6071_v11 = vpop.permute.xlu2 %6070 }
 0xb38   :  { %v6443_v57 = vperm.slane %v6071_v11, %v11939_v24 }
 0xb3a   :  { %v6570_v3 = vsel %vm5623_vm0, %v6443_v57, %v6569_v41  ;;  %6334 = vperm.xlu0 %7495, %v5891_v38   ;;  %v6448_v41 = vperm.slane %v12408_v18, %v11939_v24  ;;  %v12704_v38 = vpop.permute.xlu1 %6301  ;;  %v15166_v57 = vld [vmem:[#allocation318_spill] sm:$0xff]  ;;  %v6450_v18 = vperm.slane %v12546_v40, %v11939_v24 }
 0xb3b   :  { %v6571_v44 = vsel %vm5625_vm1, %v6444_v49, %v6570_v3  ;;  %v15167_v49 = vld [vmem:[#allocation110_spill] sm:$0xff] }
 0xb3c   :  { %v12692_v31 = vpop.permute.xlu0 %6208  ;;  %6187 = vperm.xlu2 %7501, %v5842_v48   ;;  %v12695_v62 = vsel %vm5627_vm2, %v6445_v5, %v6571_v44  ;;  %v5845_v14 = vmul.f32 %v15167_v49, %v15166_v57  ;;  %v15172_v40 = vld [vmem:[#allocation94_spill] sm:$0xff] }
 0xb3d   :  { %15163 = vst [vmem:[#allocation76_spill] sm:$0xff] %v12695_v62  ;;  %v15170_v62 = vld [vmem:[#allocation321_spill] sm:$0xff] }
 0xb3e   :  { %v5848_v57 = vmul.f32 %v15171_v10, %v15170_v62  ;;  %v15174_v62 = vld [vmem:[#allocation324_spill] sm:$0xff] }
 0xb3f   :  { %v6080_v11 = vpop.permute.xlu2 %6079 }
 0xb40   :  { %v6446_v21 = vperm.slane %v6080_v11, %v11939_v24  ;;  %v5897_v11 = vmul.f32 %v15169_v20, %v15168_v6 }
 0xb42   :  { %v6573_v48 = vsel %vm5615_vm12, %v6447_v63, %v6446_v21  ;;  %6343 = vperm.xlu0 %7495, %v5894_v28   ;;  %v6451_v28 = vperm.slane %v12416_v47, %v11939_v24  ;;  %v12722_v21 = vpop.permute.xlu1 %6310  ;;  %v6453_v47 = vperm.slane %v12554_v23, %v11939_v24  ;;  %v6454_v23 = vperm.slane %v12422_v58, %v11939_v24 }
 0xb43   :  { %v6574_v5 = vsel %vm5617_vm13, %v6448_v41, %v6573_v48 }
 0xb44   :  { %v12710_v3 = vpop.permute.xlu0 %6217  ;;  %6196 = vperm.xlu2 %7501, %v5845_v14  }
 0xb47   :  { %v6089_v44 = vpop.permute.xlu2 %6088 }
 0xb48   :  { %v6449_v35 = vperm.slane %v6089_v44, %v11939_v24  ;;  %v15173_v44 = vld [vmem:[#allocation224_spill] sm:$0xff] }
 0xb49   :  { %v5900_v6 = vmul.f32 %v15173_v44, %v15172_v40  ;;  %v15178_v44 = vld [vmem:[#allocation327_spill] sm:$0xff] }
 0xb4a   :  { %v6575_v63 = vsel %vm5619_vm14, %v6449_v35, %v6574_v5  ;;  %6352 = vperm.xlu0 %7495, %v5897_v11   ;;  %v15175_v5 = vld [vmem:[#allocation177_spill] sm:$0xff] }
 0xb4b   :  { %v6576_v41 = vsel %vm5621_vm15, %v6450_v18, %v6575_v63  ;;  %v5851_v20 = vmul.f32 %v15175_v5, %v15174_v62  ;;  %v15176_v63 = vld [vmem:[#allocation166_spill] sm:$0xff] }
 0xb4c   :  { %v12725_v49 = vpop.permute.xlu0 %6226  ;;  %6205 = vperm.xlu2 %7501, %v5848_v57   ;;  %v6577_v14 = vsel %vm5623_vm0, %v6451_v28, %v6576_v41  ;;  %v12741_v57 = vpop.permute.xlu1 %6319  ;;  %v15177_v41 = vld [vmem:[#allocation215_spill] sm:$0xff] }
 0xb4f   :  { %v6098_v48 = vpop.permute.xlu2 %6097 }
 0xb50   :  { %v6452_v10 = vperm.slane %v6098_v48, %v11939_v24  ;;  %v5903_v48 = vmul.f32 %v15177_v41, %v15176_v63  ;;  %v15182_v63 = vld [vmem:[#allocation217_spill] sm:$0xff] }
 0xb52   :  { %6361 = vperm.xlu0 %7495, %v5900_v6   ;;  %v6578_v11 = vsel %vm5625_vm1, %v6452_v10, %v6577_v14  ;;  %v6456_v14 = vperm.slane %v12564_v53, %v11939_v24  ;;  %v15179_v6 = vld [vmem:[#allocation113_spill] sm:$0xff]  ;;  %v15181_v53 = vld [vmem:[#allocation172_spill] sm:$0xff] }
 0xb53   :  { %v12737_v35 = vsel %vm5627_vm2, %v6453_v47, %v6578_v11  ;;  %v5854_v10 = vmul.f32 %v15179_v6, %v15178_v44  ;;  %v6457_v47 = vperm.slane %v12428_v39, %v11939_v24  ;;  %v5906_v41 = vmul.f32 %v15182_v63, %v15181_v53  ;;  %v15186_v53 = vld [vmem:[#allocation222_spill] sm:$0xff] }
 0xb54   :  { %v12739_v18 = vpop.permute.xlu0 %6235  ;;  %6214 = vperm.xlu2 %7501, %v5851_v20   ;;  %v12759_v11 = vpop.permute.xlu1 %6328  ;;  %v6459_v39 = vperm.slane %v12574_v30, %v11939_v24 }
 0xb55   :  { %15180 = vst [vmem:[#allocation73_spill] sm:$0xff] %v12759_v11 }
 0xb57   :  { %v6107_v28 = vpop.permute.xlu2 %6106 }
 0xb58   :  { %v6455_v40 = vperm.slane %v6107_v28, %v11939_v24 }
 0xb5a   :  { %v6580_v62 = vsel %vm5615_vm12, %v6455_v40, %v6454_v23  ;;  %6370 = vperm.xlu0 %7495, %v5903_v48   ;;  %v15183_v23 = vld [vmem:[#allocation330_spill] sm:$0xff] }
 0xb5b   :  { %v6581_v5 = vsel %vm5617_vm13, %v6456_v14, %v6580_v62  ;;  %v15184_v48 = vld [vmem:[#allocation174_spill] sm:$0xff]  ;;  %v6460_v14 = vperm.slane %v12436_v42, %v11939_v24  ;;  %v15188_v42 = vld [vmem:[#allocation119_spill] sm:$0xff] }
 0xb5c   :  { %v12756_v20 = vpop.permute.xlu0 %6244  ;;  %6223 = vperm.xlu2 %7501, %v5854_v10   ;;  %v6582_v58 = vsel %vm5619_vm14, %v6457_v47, %v6581_v5  ;;  %v5857_v40 = vmul.f32 %v15184_v48, %v15183_v23  ;;  %v12778_v23 = vpop.permute.xlu1 %6337  ;;  %v15187_v48 = vld [vmem:[#allocation333_spill] sm:$0xff] }
 0xb5d   :  { %v5860_v11 = vmul.f32 %v15188_v42, %v15187_v48 }
 0xb5f   :  { %v6116_v28 = vpop.permute.xlu2 %6115 }
 0xb60   :  { %v6458_v44 = vperm.slane %v6116_v28, %v11939_v24  ;;  %v15185_v28 = vld [vmem:[#allocation67_spill] sm:$0xff] }
 0xb61   :  { %v5909_v30 = vmul.f32 %v15186_v53, %v15185_v28  ;;  %v15191_v28 = vld [vmem:[#allocation336_spill] sm:$0xff]  ;;  %v15192_v53 = vld [vmem:[#allocation183_spill] sm:$0xff] }
 0xb62   :  { %v6583_v6 = vsel %vm5621_vm15, %v6458_v44, %v6582_v58  ;;  %6379 = vperm.xlu0 %7495, %v5906_v41  }
 0xb63   :  { %v6584_v10 = vsel %vm5623_vm0, %v6459_v39, %v6583_v6 }
 0xb64   :  { %v12772_v47 = vpop.permute.xlu0 %6253  ;;  %6232 = vperm.xlu2 %7501, %v5857_v40   ;;  %v6585_v62 = vsel %vm5625_vm1, %v6460_v14, %v6584_v10  ;;  %v15189_v40 = vld [vmem:[#allocation185_spill] sm:$0xff]  ;;  %v15190_v14 = vld [vmem:[#allocation18_spill] sm:$0xff] }
 0xb65   :  { %v5912_v6 = vmul.f32 %v15190_v14, %v15189_v40  ;;  %v15193_v40 = vld [vmem:[#allocation179_spill] sm:$0xff] }
 0xb67   :  { %v6125_v5 = vpop.permute.xlu2 %6124 }
 0xb68   :  { %v6461_v63 = vperm.slane %v6125_v5, %v11939_v24  ;;  %v6465_v5 = vperm.slane %v12600_v36, %v11939_v24  ;;  %v6511_v36 = vperm.slane %v12646_v26, %v11939_v24  ;;  %v6469_v26 = vperm.slane %v12464_v46, %v11939_v24 }
 0xb69   :  { %v6471_v46 = vperm.slane %v12618_v4, %v11939_v24  ;;  %v15199_v4 = vld [vmem:[#allocation194_spill] sm:$0xff] }
 0xb6a   :  { %6388 = vperm.xlu0 %7495, %v5909_v30   ;;  %v6586_v58 = vsel %vm5627_vm2, %v6461_v63, %v6585_v62  ;;  %v5863_v30 = vmul.f32 %v15192_v53, %v15191_v28  ;;  %v6466_v62 = vperm.slane %v12456_v50, %v11939_v24  ;;  %v15196_v28 = vld [vmem:[#allocation188_spill] sm:$0xff] }
 0xb6b   :  { %v6700_v41 = vsel %vm2428_vm4, %v6586_v58, 0.0 }
 0xb6c   :  { %v12784_v44 = vpop.permute.xlu0 %6262  ;;  %6241 = vperm.xlu2 %7501, %v5860_v11   ;;  %6701 = vadd.xlane.f32.xlu1 %v6700_v41  ;;  %v12797_v11 = vpop.permute.xlu1 %6346 }
 0xb6f   :  { %v6134_v39 = vpop.permute.xlu2 %6133 }
 0xb70   :  { %v6464_v10 = vperm.slane %v6134_v39, %v11939_v24 }
 0xb72   :  { %v6588_v63 = vsel %vm5617_vm13, %v6464_v10, %v12588_v59  ;;  %6397 = vperm.xlu0 %7495, %v5912_v6   ;;  %v15194_v59 = vld [vmem:[#allocation227_spill] sm:$0xff]  ;;  %v6468_v10 = vperm.slane %v12610_v34, %v11939_v24 }
 0xb73   :  { %v6589_v48 = vsel %vm5619_vm14, %v6465_v5, %v6588_v63  ;;  %v5915_v14 = vmul.f32 %v15194_v59, %v15193_v40  ;;  %v15195_v5 = vld [vmem:[#allocation339_spill] sm:$0xff]  ;;  %v15198_v40 = vld [vmem:[#allocation198_spill] sm:$0xff] }
 0xb74   :  { %v6272_v42 = vpop.permute.xlu0 %6271  ;;  %6250 = vperm.xlu2 %7501, %v5863_v30   ;;  %v6590_v58 = vsel %vm5621_vm15, %v6466_v62, %v6589_v48  ;;  %v5866_v53 = vmul.f32 %v15196_v28, %v15195_v5  ;;  %v15200_v5 = vld [vmem:[#allocation5_spill] sm:$0xff] }
 0xb75   :  { %v6510_v41 = vperm.slane %v6272_v42, %v11939_v24  ;;  %v12823_v42 = vpop.permute.xlu1 %6355  ;;  %v5921_v28 = vmul.f32 %v15200_v5, %v15199_v4 }
 0xb77   :  { %v12805_v39 = vsel %vm5615_vm12, %v6511_v36, %v6510_v41  ;;  %v6143_v50 = vpop.permute.xlu2 %6142  ;;  %v5918_v36 = vmul.f32 %v12371_v60, %v11602_v13  ;;  %v6472_v41 = vperm.slane %v12474_v51, %v11939_v24  ;;  %v6474_v51 = vperm.slane %v12628_v12, %v11939_v24 }
 0xb78   :  { %v6467_v6 = vperm.slane %v6143_v50, %v11939_v24  ;;  %v15197_v50 = vld [vmem:[#allocation342_spill] sm:$0xff]  ;;  %v5924_v12 = vmul.f32 %v12385_v27, %v11698_v56  ;;  %v6478_v27 = vperm.slane %v12508_v0, %v11939_v24 }
 0xb79   :  { %v5869_v59 = vmul.f32 %v15198_v40, %v15197_v50 }
 0xb7a   :  { %v6591_v30 = vsel %vm5623_vm0, %v6467_v6, %v6590_v58  ;;  %6406 = vperm.xlu0 %7495, %v5915_v14  }
 0xb7b   :  { %v6592_v62 = vsel %vm5625_vm1, %v6468_v10, %v6591_v30  ;;  %v15202_v30 = vld [vmem:[#allocation189_spill] sm:$0xff] }
 0xb7c   :  { %v12818_v63 = vpop.permute.xlu0 %6280  ;;  %6259 = vperm.xlu2 %7501, %v5866_v53   ;;  %v12821_v48 = vsel %vm5627_vm2, %v6469_v26, %v6592_v62  ;;  %v15201_v26 = vld [vmem:[#allocation345_spill] sm:$0xff] }
 0xb7d   :  { %v12838_v13 = vpop.permute.xlu1 %6364  ;;  %v5872_v62 = vmul.f32 %v15202_v30, %v15201_v26  ;;  %v15206_v26 = vld [vmem:[#allocation96_spill] sm:$0xff] }
 0xb7f   :  { %v6152_v34 = vpop.permute.xlu2 %6151 }
 0xb80   :  { %v6470_v58 = vperm.slane %v6152_v34, %v11939_v24  ;;  %v6475_v34 = vperm.slane %v12491_v7, %v11939_v24 }
 0xb82   :  { %v6594_v14 = vsel %vm5615_vm12, %v6471_v46, %v6470_v58  ;;  %6415 = vperm.xlu0 %7495, %v5918_v36  }
 0xb83   :  { %v6595_v6 = vsel %vm5617_vm13, %v6472_v41, %v6594_v14  ;;  %v15203_v14 = vld [vmem:[#allocation348_spill] sm:$0xff] }
 0xb84   :  { %v12836_v10 = vpop.permute.xlu0 %6289  ;;  %6268 = vperm.xlu2 %7501, %v5869_v59   ;;  %v6477_v59 = vperm.slane %v12638_v9, %v11939_v24 }
 0xb85   :  { %v12859_v7 = vpop.permute.xlu1 %6373 }
 0xb87   :  { %v6161_v60 = vpop.permute.xlu2 %6160 }
 0xb88   :  { %v6473_v53 = vperm.slane %v6161_v60, %v11939_v24 }
 0xb8a   :  { %v6596_v36 = vsel %vm5619_vm14, %v6473_v53, %v6595_v6  ;;  %6424 = vperm.xlu0 %7495, %v5921_v28   ;;  %v15204_v6 = vld [vmem:[#allocation190_spill] sm:$0xff]  ;;  %v6480_v53 = vperm.slane %v12648_v16, %v11939_v24 }
 0xb8b   :  { %v6597_v46 = vsel %vm5621_vm15, %v6474_v51, %v6596_v36  ;;  %v5875_v60 = vmul.f32 %v15204_v6, %v15203_v14  ;;  %v15205_v51 = vld [vmem:[#allocation120_spill] sm:$0xff]  ;;  %v6484_v14 = vperm.slane %v12530_v33, %v11939_v24 }
 0xb8c   :  { %v12851_v58 = vpop.permute.xlu0 %6298  ;;  %6277 = vperm.xlu2 %7501, %v5872_v62   ;;  %v6598_v41 = vsel %vm5623_vm0, %v6475_v34, %v6597_v46  ;;  %v5878_v30 = vmul.f32 %v15206_v26, %v15205_v51  ;;  %v6481_v62 = vperm.slane %v12520_v55, %v11939_v24  ;;  %v15210_v51 = vld [vmem:[#allocation211_spill] sm:$0xff] }
 0xb8d   :  { %v12879_v36 = vpop.permute.xlu1 %6382 }
 0xb8f   :  { %v6170_v50 = vpop.permute.xlu2 %6169 }
 0xb90   :  { %v6476_v40 = vperm.slane %v6170_v50, %v11939_v24 }
 0xb92   :  { %6433 = vperm.xlu0 %7495, %v5924_v12   ;;  %v6599_v4 = vsel %vm5625_vm1, %v6476_v40, %v6598_v41  ;;  %v6483_v12 = vperm.slane %v12656_v17, %v11939_v24  ;;  %v15207_v40 = vld [vmem:[#allocation125_spill] sm:$0xff] }
 0xb93   :  { %v12865_v5 = vsel %vm5627_vm2, %v6477_v59, %v6599_v4  ;;  %v15208_v59 = vld [vmem:[#allocation202_spill] sm:$0xff] }
 0xb94   :  { %v12867_v28 = vpop.permute.xlu0 %6307  ;;  %6286 = vperm.xlu2 %7501, %v5875_v60   ;;  %v5881_v55 = vmul.f32 %v15208_v59, %v15207_v40  ;;  %v6490_v59 = vperm.slane %v12556_v52, %v11939_v24 }
 0xb97   :  { %v6179_v56 = vpop.permute.xlu2 %6178 }
 0xb98   :  { %v6479_v9 = vperm.slane %v6179_v56, %v11939_v24 }
 0xb9a   :  { %v6601_v34 = vsel %vm5615_vm12, %v6479_v9, %v6478_v27  ;;  %v12897_v27 = vpop.permute.xlu1 %6391 }
 0xb9b   :  { %v6602_v46 = vsel %vm5617_vm13, %v6480_v53, %v6601_v34  ;;  %v15209_v53 = vld [vmem:[#allocation55_spill] sm:$0xff] }
 0xb9c   :  { %v12882_v41 = vpop.permute.xlu0 %6316  ;;  %6295 = vperm.xlu2 %7501, %v5878_v30   ;;  %v6603_v0 = vsel %vm5619_vm14, %v6481_v62, %v6602_v46  ;;  %v5884_v26 = vmul.f32 %v15210_v51, %v15209_v53  ;;  %v15213_v51 = vld [vmem:[#allocation71_spill] sm:$0xff] }
 0xb9f   :  { %v6188_v50 = vpop.permute.xlu2 %6187 }
 0xba0   :  { %v6482_v16 = vperm.slane %v6188_v50, %v11939_v24  ;;  %v6489_v50 = vperm.slane %v12692_v31, %v11939_v24 }
 0xba2   :  { %v6604_v6 = vsel %vm5621_vm15, %v6482_v16, %v6603_v0  ;;  %v12906_v34 = vpop.permute.xlu1 %6400  ;;  %v15211_v16 = vld [vmem:[#allocation134_spill] sm:$0xff] }
 0xba3   :  { %v6605_v60 = vsel %vm5623_vm0, %v6483_v12, %v6604_v6  ;;  %v15212_v12 = vld [vmem:[#allocation203_spill] sm:$0xff] }
 0xba4   :  { %v12894_v4 = vpop.permute.xlu0 %6325  ;;  %6304 = vperm.xlu2 %7501, %v5881_v55   ;;  %v6606_v56 = vsel %vm5625_vm1, %v6484_v14, %v6605_v60  ;;  %v5887_v40 = vmul.f32 %v15212_v12, %v15211_v16  ;;  %v6495_v12 = vperm.slane %v12725_v49, %v11939_v24 }
 0xba7   :  { %v6197_v9 = vpop.permute.xlu2 %6196 }
 0xba8   :  { %v6485_v17 = vperm.slane %v6197_v9, %v11939_v24 }
 0xbaa   :  { %v6607_v30 = vsel %vm5627_vm2, %v6485_v17, %v6606_v56  ;;  %v6535_v56 = vperm.slane %v12797_v11, %v11939_v24  ;;  %v12928_v53 = vpop.permute.xlu1 %6409 }
 0xbab   :  { %v6709_v33 = vsel %vm2428_vm4, %v6607_v30, 0.0 }
 0xbac   :  { %v12904_v62 = vpop.permute.xlu0 %6334  ;;  %6313 = vperm.xlu2 %7501, %v5884_v26   ;;  %6710 = vadd.xlane.f32.xlu1 %v6709_v33  ;;  %v15214_v26 = vld [vmem:[#allocation219_spill] sm:$0xff]  ;;  %v6493_v33 = vperm.slane %v12566_v22, %v11939_v24 }
 0xbad   :  { %v5890_v30 = vmul.f32 %v15214_v26, %v15213_v51 }
 0xbaf   :  { %v6206_v46 = vpop.permute.xlu2 %6205 }
 0xbb0   :  { %v6488_v0 = vperm.slane %v6206_v46, %v11939_v24  ;;  %v6697_v46 = vsel %vm2428_vm4, %v12737_v35, 0.0  ;;  %v15216_v35 = vld [vmem:[#allocation199_spill] sm:$0xff] }
 0xbb2   :  { %v6609_v55 = vsel %vm5617_vm13, %v6488_v0, %v12679_v37  ;;  %v6492_v37 = vperm.slane %v12710_v3, %v11939_v24 }
 0xbb3   :  { %v6610_v14 = vsel %vm5619_vm14, %v6489_v50, %v6609_v55 }
 0xbb4   :  { %v6344_v6 = vpop.permute.xlu0 %6343  ;;  %6322 = vperm.xlu2 %7501, %v5887_v40   ;;  %v6611_v60 = vsel %vm5621_vm15, %v6490_v59, %v6610_v14  ;;  %v6496_v40 = vperm.slane %v12578_v54, %v11939_v24  ;;  %v15215_v59 = vld [vmem:[#allocation93_spill] sm:$0xff] }
 0xbb5   :  { %v6534_v31 = vperm.slane %v6344_v6, %v11939_v24  ;;  %v5893_v55 = vmul.f32 %v15216_v35, %v15215_v59  ;;  %v12951_v6 = vpop.permute.xlu1 %6418 }
 0xbb7   :  { %v12923_v9 = vsel %vm5615_vm12, %v6535_v56, %v6534_v31  ;;  %v6215_v17 = vpop.permute.xlu2 %6214 }
 0xbb8   :  { %v6491_v52 = vperm.slane %v6215_v17, %v11939_v24  ;;  %v6498_v17 = vperm.slane %v12739_v18, %v11939_v24 }
 0xbba   :  { %v6612_v11 = vsel %vm5623_vm0, %v6491_v52, %v6611_v60  ;;  %v6706_v60 = vsel %vm2428_vm4, %v12865_v5, 0.0  ;;  %v15217_v52 = vld [vmem:[#allocation75_spill] sm:$0xff]  ;;  %v6499_v5 = vperm.slane %v12598_v32, %v11939_v24  ;;  %v6501_v32 = vperm.slane %v12756_v20, %v11939_v24 }
 0xbbb   :  { %v6613_v0 = vsel %vm5625_vm1, %v6492_v37, %v6612_v11  ;;  %v15218_v37 = vld [vmem:[#allocation226_spill] sm:$0xff]  ;;  %v6502_v20 = vperm.slane %v12612_v61, %v11939_v24 }
 0xbbc   :  { %v12938_v50 = vpop.permute.xlu0 %6352  ;;  %6331 = vperm.xlu2 %7501, %v5890_v30   ;;  %6698 = vadd.xlane.f32.xlu0 %v6697_v46  ;;  %v12941_v3 = vsel %vm5627_vm2, %v6493_v33, %v6613_v0  ;;  %v5896_v51 = vmul.f32 %v15218_v37, %v15217_v52  ;;  %v7883_v30 = vpop.eup %7882  ;;  %v15221_v37 = vld [vmem:[#allocation109_spill] sm:$0xff] }
 0xbbd   :  { %v12971_v0 = vpop.permute.xlu1 %6427  ;;  %v6789_v18 = vmul.f32 %v7883_v30, %v12440_v1  ;;  %vm6794_vm6 = vweird.f32 %v7883_v30 }
 0xbbe   :  { %vm6795_vm8 = vmor %vm6793_vm7, %vm6794_vm6 }
 0xbbf   :  { %v6224_v16 = vpop.permute.xlu2 %6223  ;;  %v6790_v35 = vsub.f32 1.0, %v6789_v18 }
 0xbc0   :  { %v6494_v22 = vperm.slane %v6224_v16, %v11939_v24 }
 0xbc2   :  { %v6615_v14 = vsel %vm5615_vm12, %v6495_v12, %v6494_v22  ;;  %v15219_v22 = vld [vmem:[#allocation86_spill] sm:$0xff] }
 0xbc3   :  { %v6616_v56 = vsel %vm5617_vm13, %v6496_v40, %v6615_v14  ;;  %v15220_v40 = vld [vmem:[#allocation212_spill] sm:$0xff] }
 0xbc4   :  { %v12956_v31 = vpop.permute.xlu0 %6361  ;;  %6340 = vperm.xlu2 %7501, %v5893_v55   ;;  %6707 = vadd.xlane.f32.xlu0 %v6706_v60  ;;  %v5899_v59 = vmul.f32 %v15220_v40, %v15219_v22 }
 0xbc7   :  { %v6233_v49 = vpop.permute.xlu2 %6232 }
 0xbc8   :  { %v6497_v54 = vperm.slane %v6233_v49, %v11939_v24  ;;  %v6791_v49 = vmul.f32 %v7883_v30, %v6790_v35 }
 0xbca   :  { %v6617_v26 = vsel %vm5619_vm14, %v6497_v54, %v6616_v56  ;;  %v12984_v54 = vpop.permute.xlu1 %6436  ;;  %v6792_v18 = vadd.f32 %v7883_v30, %v6791_v49  ;;  %v15223_v49 = vld [vmem:[#allocation169_spill] sm:$0xff] }
 0xbcb   :  { %v6618_v33 = vsel %vm5621_vm15, %v6498_v17, %v6617_v26  ;;  %v6504_v26 = vperm.slane %v12772_v47, %v11939_v24 }
 0xbcc   :  { %v12968_v11 = vpop.permute.xlu0 %6370  ;;  %6349 = vperm.xlu2 %7501, %v5896_v51   ;;  %v6619_v46 = vsel %vm5623_vm0, %v6499_v5, %v6618_v33  ;;  %v15222_v51 = vld [vmem:[#allocation206_spill] sm:$0xff]  ;;  %v6505_v33 = vperm.slane %v12622_v45, %v11939_v24  ;;  %v6796_v22 = vsel %vm6795_vm8, %v7883_v30, %v6792_v18 }
 0xbcd   :  { %v5902_v5 = vmul.f32 %v15222_v51, %v15221_v37  ;;  %v15225_v51 = vld [vmem:[#allocation9_spill] sm:$0xff] }
 0xbcf   :  { %v6242_v16 = vpop.permute.xlu2 %6241 }
 0xbd0   :  { %v6500_v12 = vperm.slane %v6242_v16, %v11939_v24 }
 0xbd2   :  { %v6620_v55 = vsel %vm5625_vm1, %v6500_v12, %v6619_v46  ;;  %v6799_v12 = vand.u32 2147483648, %v12440_v1 }
 0xbd3   :  { %v6621_v14 = vsel %vm5627_vm2, %v6501_v32, %v6620_v55  ;;  %v6797_v32 = vand.u32 2147483647, %v12440_v1  ;;  %v6508_v1 = vperm.slane %v12634_v43, %v11939_v24 }
 0xbd4   :  { %v12981_v60 = vpop.permute.xlu0 %6379  ;;  %6358 = vperm.xlu2 %7501, %v5899_v59   ;;  %v6715_v56 = vsel %vm2428_vm4, %v6621_v14, 0.0  ;;  %v6800_v45 = vor.u32 1.1754944e-38, %v6799_v12  ;;  %v6507_v14 = vperm.slane %v12784_v44, %v11939_v24  ;;  %v15227_v12 = vld [vmem:[#allocation13_spill] sm:$0xff] }
 0xbd5   :  { %6716 = vadd.xlane.f32.xlu0 %v6715_v56  ;;  %vm6798_vm9 = vcmp.eq.f32.partialorder %v6797_v32, 8.507059e+37 }
 0xbd6   :  { %v6801_v56 = vsel %vm6798_vm9, %v6800_v45, %v6796_v22 }
 0xbd7   :  { %v6251_v17 = vpop.permute.xlu2 %6250 }
 0xbd8   :  { %v6503_v52 = vperm.slane %v6251_v17, %v11939_v24  ;;  %v15224_v17 = vld [vmem:[#allocation213_spill] sm:$0xff] }
 0xbda   :  { %v6622_v46 = vsel %vm5615_vm12, %v6503_v52, %v6502_v20  ;;  %v5905_v20 = vmul.f32 %v15224_v17, %v15223_v49 }
 0xbdb   :  { %v6623_v16 = vsel %vm5617_vm13, %v6504_v26, %v6622_v46 }
 0xbdc   :  { %v12998_v61 = vpop.permute.xlu0 %6388  ;;  %6367 = vperm.xlu2 %7501, %v5902_v5   ;;  %v6624_v47 = vsel %vm5619_vm14, %v6505_v33, %v6623_v16  ;;  %v15226_v16 = vld [vmem:[#allocation107_spill] sm:$0xff] }
 0xbdd   :  { %v5908_v32 = vmul.f32 %v15227_v12, %v15226_v16  ;;  %v15230_v12 = vld [vmem:[#allocation20_spill] sm:$0xff] }
 0xbde   :  { %7884 = vrcp.f32 %v15230_v12  ;;  %vm6838_vm3 = vweird.f32 %v15230_v12 }
 0xbdf   :  { %v6702_v40 = vpop.xlane.xlu1 %6701  ;;  %v6260_v59 = vpop.permute.xlu2 %6259 }
 0xbe0   :  { %v7421_v35 = vadd.f32 -1.0, %v6702_v40  ;;  %v6506_v55 = vperm.slane %v6260_v59, %v11939_v24 }
 0xbe2   :  { %v6802_v52 = vmul.f32 %v7421_v35, %v6801_v56  ;;  %v6625_v30 = vsel %vm5621_vm15, %v6506_v55, %v6624_v47  ;;  %v6513_v35 = vperm.slane %v12818_v63, %v11939_v24  ;;  %v5911_v55 = vmul.f32 %v12269_v25, %v11486_v8 }
 0xbe3   :  { %v6626_v37 = vsel %vm5623_vm0, %v6507_v14, %v6625_v30  ;;  %v6514_v14 = vperm.slane %v12658_v15, %v11939_v24  ;;  %v6516_v15 = vperm.slane %v12836_v10, %v11939_v24  ;;  %v15229_v30 = vld [vmem:[#allocation117_spill] sm:$0xff] }
 0xbe4   :  { %v7001_v5 = vsub.f32 %v15225_v51, %v6802_v52  ;;  %v13013_v26 = vpop.permute.xlu0 %6397  ;;  %6376 = vperm.xlu2 %7501, %v5905_v20   ;;  %v6627_v33 = vsel %vm5625_vm1, %v6508_v1, %v6626_v37  ;;  %v6559_v1 = vperm.slane %v12951_v6, %v11939_v24  ;;  %v6517_v51 = vperm.slane %v12676_v2, %v11939_v24 }
 0xbe5   :  { %v5917_v2 = vmul.f32 %v12283_v29, %v11582_v19  ;;  %v7885_v29 = vpop.eup %7884 }
 0xbe6   :  { %v7017_v44 = vmax.f32 %v7001_v5, 0.0  ;;  %vm6839_vm11 = vweird.f32 %v7885_v29 }
 0xbe7   :  { %v6269_v46 = vpop.permute.xlu2 %6268  ;;  %vm6840_vm5 = vmor %vm6838_vm3, %vm6839_vm11 }
 0xbe8   :  { %v7033_v18 = vsel %vm6998_vm10, %v7017_v44, 0.0  ;;  %v6509_v43 = vperm.slane %v6269_v46, %v11939_v24  ;;  %v6519_v46 = vperm.slane %v12851_v58, %v11939_v24  ;;  %v6522_v58 = vperm.slane %v12867_v28, %v11939_v24 }
 0xbe9   :  { %7049 = vst [vmem:[%s13409_s5 + $0x10] sm:$0xff] %v7033_v18  ;;  %v6520_v18 = vperm.slane %v12704_v38, %v11939_v24  ;;  %v6523_v38 = vperm.slane %v12722_v21, %v11939_v24  ;;  %v6525_v28 = vperm.slane %v12882_v41, %v11939_v24 }
 0xbea   :  { %v6628_v47 = vsel %vm5627_vm2, %v6509_v43, %v6627_v33 }
 0xbeb   :  { %v6718_v22 = vsel %vm2428_vm4, %v6628_v47, 0.0 }
 0xbec   :  { %v13027_v45 = vpop.permute.xlu0 %6406  ;;  %6385 = vperm.xlu2 %7501, %v5908_v32   ;;  %6719 = vadd.xlane.f32.xlu1 %v6718_v22  ;;  %v15231_v22 = vld [vmem:[#allocation196_spill] sm:$0xff] }
 0xbef   :  { %v6278_v40 = vpop.permute.xlu2 %6277 }
 0xbf0   :  { %v6512_v59 = vperm.slane %v6278_v40, %v11939_v24  ;;  %v15232_v40 = vld [vmem:[#allocation223_spill] sm:$0xff] }
 0xbf2   :  { %v6630_v56 = vsel %vm5617_vm13, %v6512_v59, %v12805_v39  ;;  %v15228_v39 = vld [vmem:[#allocation78_spill] sm:$0xff]  ;;  %v5920_v59 = vmul.f32 %v15232_v40, %v15231_v22 }
 0xbf3   :  { %v6631_v49 = vsel %vm5619_vm14, %v6513_v35, %v6630_v56  ;;  %v5914_v37 = vmul.f32 %v15229_v30, %v15228_v39 }
 0xbf4   :  { %v6416_v17 = vpop.permute.xlu0 %6415  ;;  %6394 = vperm.xlu2 %7501, %v5911_v55   ;;  %v6632_v20 = vsel %vm5621_vm15, %v6514_v14, %v6631_v49  ;;  %v6834_v14 = vmul.f32 %v7885_v29, %v15230_v12 }
 0xbf5   :  { %v6558_v63 = vperm.slane %v6416_v17, %v11939_v24  ;;  %v15233_v17 = vld [vmem:[#allocation207_spill] sm:$0xff] }
 0xbf6   :  { %v6835_v21 = vsub.f32 1.0, %v6834_v14 }
 0xbf7   :  { %v13044_v52 = vsel %vm5615_vm12, %v6559_v1, %v6558_v63  ;;  %v6287_v8 = vpop.permute.xlu2 %6286 }
 0xbf8   :  { %v6515_v25 = vperm.slane %v6287_v8, %v11939_v24  ;;  %v6836_v39 = vmul.f32 %v7885_v29, %v6835_v21 }
 0xbfa   :  { %v6633_v5 = vsel %vm5623_vm0, %v6515_v25, %v6632_v20  ;;  %v15234_v20 = vld [vmem:[#allocation221_spill] sm:$0xff] }
 0xbfb   :  { %v6634_v6 = vsel %vm5625_vm1, %v6516_v15, %v6633_v5  ;;  %v5923_v1 = vmul.f32 %v15234_v20, %v15233_v17  ;;  %v15235_v15 = vld [vmem:[#allocation220_spill] sm:$0xff]  ;;  %v15236_v5 = vld [vmem:[#allocation73_spill] sm:$0xff] }
 0xbfc   :  { %6403 = vperm.xlu2 %7501, %v5914_v37   ;;  %v13056_v33 = vsel %vm5627_vm2, %v6517_v51, %v6634_v6  ;;  %7886 = vrcp.f32 %v15235_v15  ;;  %v6526_v37 = vperm.slane %v12741_v57, %v11939_v24  ;;  %v6528_v51 = vperm.slane %v12894_v4, %v11939_v24  ;;  %v13102_v4 = vpop.permute.xlu0 %6424 }
 0xbfd   :  { %v6529_v6 = vperm.slane %v15236_v5, %v11939_v24  ;;  %v6842_v57 = vand.u32 2147483647, %v15230_v12  ;;  %vm6778_vm8 = vweird.f32 %v15235_v15  ;;  %v6782_v5 = vand.u32 2147483647, %v15235_v15 }
 0xbff   :  { %v6296_v44 = vpop.permute.xlu2 %6295  ;;  %vm6843_vm6 = vcmp.eq.f32.partialorder %v6842_v57, 8.507059e+37  ;;  %vm6783_vm11 = vcmp.eq.f32.partialorder %v6782_v5, 8.507059e+37 }
 0xc00   :  { %v6518_v10 = vperm.slane %v6296_v44, %v11939_v24 }
 0xc02   :  { %v6636_v43 = vsel %vm5615_vm12, %v6519_v46, %v6518_v10  ;;  %v6837_v46 = vadd.f32 %v7885_v29, %v6836_v39  ;;  %v7887_v10 = vpop.eup %7886 }
 0xc03   :  { %v6637_v16 = vsel %vm5617_vm13, %v6520_v18, %v6636_v43  ;;  %vm6779_vm7 = vweird.f32 %v7887_v10 }
 0xc04   :  { %6412 = vperm.xlu2 %7501, %v5917_v2   ;;  %v6844_v2 = vand.u32 2147483648, %v15230_v12  ;;  %v6531_v12 = vperm.slane %v12904_v62, %v11939_v24  ;;  %v13115_v62 = vpop.permute.xlu0 %6433  ;;  %vm6780_vm9 = vmor %vm6778_vm8, %vm6779_vm7 }
 0xc07   :  { %v6305_v32 = vpop.permute.xlu2 %6304 }
 0xc08   :  { %v6521_v47 = vperm.slane %v6305_v32, %v11939_v24  ;;  %v6774_v32 = vmul.f32 %v7887_v10, %v15235_v15 }
 0xc0a   :  { %v6638_v19 = vsel %vm5619_vm14, %v6521_v47, %v6637_v16  ;;  %v15237_v16 = vld [vmem:[#allocation225_spill] sm:$0xff]  ;;  %v6841_v47 = vsel %vm6840_vm5, %v7885_v29, %v6837_v46 }
 0xc0b   :  { %v6639_v35 = vsel %vm5621_vm15, %v6522_v58, %v6638_v19  ;;  %7888 = vrcp.f32 %v15237_v16  ;;  %v6845_v58 = vor.u32 1.1754944e-38, %v6844_v2  ;;  %vm6823_vm5 = vweird.f32 %v15237_v16 }
 0xc0c   :  { %6421 = vperm.xlu2 %7501, %v5920_v59   ;;  %v6640_v55 = vsel %vm5623_vm0, %v6523_v38, %v6639_v35  ;;  %v6775_v35 = vsub.f32 1.0, %v6774_v32 }
 0xc0d   :  { %v6846_v19 = vsel %vm6843_vm6, %v6845_v58, %v6841_v47  ;;  %v6537_v47 = vperm.slane %v12938_v50, %v11939_v24  ;;  %v6827_v50 = vand.u32 2147483647, %v15237_v16 }
 0xc0f   :  { %v6314_v56 = vpop.permute.xlu2 %6313  ;;  %vm6828_vm7 = vcmp.eq.f32.partialorder %v6827_v50, 8.507059e+37 }
 0xc10   :  { %v6524_v49 = vperm.slane %v6314_v56, %v11939_v24 }
 0xc12   :  { %v6641_v63 = vsel %vm5625_vm1, %v6524_v49, %v6640_v55  ;;  %v6532_v55 = vperm.slane %v12778_v23, %v11939_v24  ;;  %v7889_v49 = vpop.eup %7888 }
 0xc13   :  { %v6642_v8 = vsel %vm5627_vm2, %v6525_v28, %v6641_v63  ;;  %v15238_v28 = vld [vmem:[#allocation29_spill] sm:$0xff]  ;;  %v6776_v63 = vmul.f32 %v7887_v10, %v6775_v35  ;;  %vm6824_vm3 = vweird.f32 %v7889_v49 }
 0xc14   :  { %6430 = vperm.xlu2 %7501, %v5923_v1   ;;  %v6724_v25 = vsel %vm2428_vm4, %v6642_v8, 0.0  ;;  %v6819_v1 = vmul.f32 %v7889_v49, %v15237_v16  ;;  %vm6825_vm6 = vmor %vm6823_vm5, %vm6824_vm3 }
 0xc15   :  { %6725 = vadd.xlane.f32.xlu0 %v6724_v25 }
 0xc16   :  { %v6820_v39 = vsub.f32 1.0, %v6819_v1 }
 0xc17   :  { %v6323_v30 = vpop.permute.xlu2 %6322 }
 0xc18   :  { %v6527_v41 = vperm.slane %v6323_v30, %v11939_v24  ;;  %v6821_v46 = vmul.f32 %v7889_v49, %v6820_v39  ;;  %v15241_v39 = vld [vmem:[#allocation22_spill] sm:$0xff] }
 0xc1a   :  { %v6643_v44 = vsel %vm5615_vm12, %v6527_v41, %v6526_v37  ;;  %v6777_v37 = vadd.f32 %v7887_v10, %v6776_v63 }
 0xc1b   :  { %v6644_v18 = vsel %vm5617_vm13, %v6528_v51, %v6643_v44  ;;  %v6784_v51 = vand.u32 2147483648, %v15235_v15  ;;  %v6538_v15 = vperm.slane %v12823_v42, %v11939_v24 }
 0xc1c   :  { %v6645_v43 = vsel %vm5619_vm14, %v6529_v6, %v6644_v18  ;;  %v15239_v6 = vld [vmem:[#allocation25_spill] sm:$0xff]  ;;  %v6781_v44 = vsel %vm6780_vm9, %v7887_v10, %v6777_v37  ;;  %v15242_v37 = vld [vmem:[#allocation76_spill] sm:$0xff] }
 0xc1d   :  { %7890 = vrcp.f32 %v15239_v6  ;;  %v6785_v18 = vor.u32 1.1754944e-38, %v6784_v51  ;;  %vm6868_vm9 = vweird.f32 %v15239_v6 }
 0xc1f   :  { %v6711_v22 = vpop.xlane.xlu1 %6710  ;;  %v6332_v40 = vpop.permute.xlu2 %6331  ;;  %v6786_v58 = vsel %vm6783_vm11, %v6785_v18, %v6781_v44 }
 0xc20   :  { %v7424_v59 = vadd.f32 -1.0, %v6711_v22  ;;  %v6530_v38 = vperm.slane %v6332_v40, %v11939_v24  ;;  %v6822_v40 = vadd.f32 %v7889_v49, %v6821_v46 }
 0xc22   :  { %v6847_v14 = vmul.f32 %v7424_v59, %v6846_v19  ;;  %v6646_v56 = vsel %vm5621_vm15, %v6530_v38, %v6645_v43  ;;  %v6829_v38 = vand.u32 2147483648, %v15237_v16  ;;  %v15240_v19 = vld [vmem:[#allocation6_spill] sm:$0xff]  ;;  %v6540_v16 = vperm.slane %v12956_v31, %v11939_v24 }
 0xc23   :  { %v6647_v29 = vsel %vm5623_vm0, %v6531_v12, %v6646_v56  ;;  %v7891_v12 = vpop.eup %7890 }
 0xc24   :  { %v7004_v17 = vsub.f32 %v15238_v28, %v6847_v14  ;;  %v6648_v20 = vsel %vm5625_vm1, %v6532_v55, %v6647_v29  ;;  %v6826_v14 = vsel %vm6825_vm6, %v7889_v49, %v6822_v40  ;;  %v6864_v56 = vmul.f32 %v7891_v12, %v15239_v6 }
 0xc25   :  { %vm6869_vm8 = vweird.f32 %v7891_v12 }
 0xc26   :  { %v7020_v21 = vmax.f32 %v7004_v17, 0.0  ;;  %vm6870_vm11 = vmor %vm6868_vm9, %vm6869_vm8 }
 0xc27   :  { %v6341_v8 = vpop.permute.xlu2 %6340 }
 0xc28   :  { %v7036_v23 = vsel %vm6998_vm10, %v7020_v21, 0.0  ;;  %v6533_v25 = vperm.slane %v6341_v8, %v11939_v24  ;;  %v6541_v21 = vperm.slane %v12838_v13, %v11939_v24  ;;  %v6543_v13 = vperm.slane %v12968_v11, %v11939_v24 }
 0xc29   :  { %7052 = vst [vmem:[%s13409_s5 + $0x28] sm:$0xff] %v7036_v23  ;;  %v6865_v23 = vsub.f32 1.0, %v6864_v56  ;;  %v6703_v11 = vsel %vm2428_vm4, %v12821_v48, 0.0  ;;  %v15244_v56 = vld [vmem:[#allocation47_spill] sm:$0xff] }
 0xc2a   :  { %v6649_v30 = vsel %vm5627_vm2, %v6533_v25, %v6648_v20 }
 0xc2b   :  { %v6727_v41 = vsel %vm2428_vm4, %v6649_v30, 0.0  ;;  %v6866_v44 = vmul.f32 %v7891_v12, %v6865_v23 }
 0xc2c   :  { %6728 = vadd.xlane.f32.xlu1 %v6727_v41  ;;  %v6694_v41 = vsel %vm2428_vm4, %v15242_v37, 0.0 }
 0xc2f   :  { %v6699_v2 = vpop.xlane.xlu0 %6698  ;;  %v6350_v57 = vpop.permute.xlu2 %6349 }
 0xc30   :  { %v7420_v43 = vadd.f32 -1.0, %v6699_v2  ;;  %v6536_v32 = vperm.slane %v6350_v57, %v11939_v24  ;;  %v6544_v2 = vperm.slane %v12859_v7, %v11939_v24  ;;  %v6872_v7 = vand.u32 2147483647, %v15239_v6 }
 0xc32   :  { %v6787_v22 = vmul.f32 %v7420_v43, %v6786_v58  ;;  %v6651_v10 = vsel %vm5617_vm13, %v6536_v32, %v12923_v9  ;;  %v6830_v9 = vor.u32 1.1754944e-38, %v6829_v38  ;;  %v6867_v32 = vadd.f32 %v7891_v12, %v6866_v44  ;;  %v15243_v58 = vld [vmem:[#allocation27_spill] sm:$0xff] }
 0xc33   :  { %v6652_v59 = vsel %vm5619_vm14, %v6537_v47, %v6651_v10  ;;  %v6874_v47 = vand.u32 2147483648, %v15239_v6  ;;  %7892 = vrcp.f32 %v15243_v58  ;;  %v6546_v38 = vperm.slane %v12981_v60, %v11939_v24 }
 0xc34   :  { %v7000_v35 = vsub.f32 %v15240_v19, %v6787_v22  ;;  %v6653_v55 = vsel %vm5621_vm15, %v6538_v15, %v6652_v59  ;;  %v6831_v49 = vsel %vm6828_vm7, %v6830_v9, %v6826_v14  ;;  %v6871_v22 = vsel %vm6870_vm11, %v7891_v12, %v6867_v32 }
 0xc35   :  { %v6875_v40 = vor.u32 1.1754944e-38, %v6874_v47  ;;  %vm6873_vm3 = vcmp.eq.f32.partialorder %v6872_v7, 8.507059e+37  ;;  %v6547_v19 = vperm.slane %v12879_v36, %v11939_v24  ;;  %v6712_v12 = vsel %vm2428_vm4, %v12941_v3, 0.0  ;;  %v15245_v47 = vld [vmem:[#allocation60_spill] sm:$0xff] }
 0xc36   :  { %v7016_v42 = vmax.f32 %v7000_v35, 0.0  ;;  %vm6883_vm6 = vweird.f32 %v15243_v58 }
 0xc37   :  { %v6708_v29 = vpop.xlane.xlu0 %6707  ;;  %v6359_v28 = vpop.permute.xlu2 %6358  ;;  %v6876_v50 = vsel %vm6873_vm3, %v6875_v40, %v6871_v22 }
 0xc38   :  { %v7032_v17 = vsel %vm6998_vm10, %v7016_v42, 0.0  ;;  %v7423_v20 = vadd.f32 -1.0, %v6708_v29  ;;  %v6539_v1 = vperm.slane %v6359_v28, %v11939_v24 }
 0xc39   :  { %7048 = vst [vmem:[%s13409_s5 + $0x8] sm:$0xff] %v7032_v17  ;;  %v6549_v17 = vperm.slane %v12998_v61, %v11939_v24 }
 0xc3a   :  { %v6832_v63 = vmul.f32 %v7423_v20, %v6831_v49  ;;  %v6654_v8 = vsel %vm5623_vm0, %v6539_v1, %v6653_v55  ;;  %v7893_v55 = vpop.eup %7892  ;;  %v6721_v49 = vsel %vm2428_vm4, %v13056_v33, 0.0 }
 0xc3b   :  { %v6655_v25 = vsel %vm5625_vm1, %v6540_v16, %v6654_v8  ;;  %v6879_v60 = vmul.f32 %v7893_v55, %v15243_v58  ;;  %v6550_v8 = vperm.slane %v12897_v27, %v11939_v24  ;;  %vm6884_vm5 = vweird.f32 %v7893_v55 }
 0xc3c   :  { %v7003_v30 = vsub.f32 %v15241_v39, %v6832_v63  ;;  %v13159_v31 = vsel %vm5627_vm2, %v6541_v21, %v6655_v25  ;;  %v6552_v25 = vperm.slane %v13013_v26, %v11939_v24  ;;  %v6553_v39 = vperm.slane %v12906_v34, %v11939_v24  ;;  %vm6885_vm7 = vmor %vm6883_vm6, %vm6884_vm5 }
 0xc3d   :  { %6695 = vadd.xlane.f32.xlu2 %v6694_v41  ;;  %v6880_v1 = vsub.f32 1.0, %v6879_v60  ;;  %v6889_v41 = vand.u32 2147483648, %v15243_v58  ;;  %v6887_v27 = vand.u32 2147483647, %v15243_v58 }
 0xc3e   :  { %v7019_v51 = vmax.f32 %v7003_v30, 0.0 }
 0xc3f   :  { %v6368_v5 = vpop.permute.xlu2 %6367  ;;  %v6881_v61 = vmul.f32 %v7893_v55, %v6880_v1  ;;  %v15247_v1 = vld [vmem:[#allocation35_spill] sm:$0xff] }
 0xc40   :  { %v7035_v46 = vsel %vm6998_vm10, %v7019_v51, 0.0  ;;  %v6542_v18 = vperm.slane %v6368_v5, %v11939_v24  ;;  %v6730_v51 = vsel %vm2428_vm4, %v13159_v31, 0.0  ;;  %v6890_v5 = vor.u32 1.1754944e-38, %v6889_v41 }
 0xc41   :  { %7051 = vst [vmem:[%s13409_s5 + $0x20] sm:$0xff] %v7035_v46  ;;  %v6882_v33 = vadd.f32 %v7893_v55, %v6881_v61 }
 0xc42   :  { %v6657_v57 = vsel %vm5615_vm12, %v6543_v13, %v6542_v18 }
 0xc43   :  { %v6658_v43 = vsel %vm5617_vm13, %v6544_v2, %v6657_v57  ;;  %v6886_v34 = vsel %vm6885_vm7, %v7893_v55, %v6882_v33  ;;  %v6555_v2 = vperm.slane %v13027_v45, %v11939_v24  ;;  %v6556_v57 = vperm.slane %v12928_v53, %v11939_v24 }
 0xc45   :  { %6704 = vadd.xlane.f32.xlu2 %v6703_v11 }
 0xc47   :  { %v6377_v15 = vpop.permute.xlu2 %6376 }
 0xc48   :  { %v6545_v10 = vperm.slane %v6377_v15, %v11939_v24  ;;  %v6717_v59 = vpop.xlane.xlu0 %6716 }
 0xc49   :  { %v7426_v48 = vadd.f32 -1.0, %v6717_v59  ;;  %v15246_v59 = vld [vmem:[#allocation41_spill] sm:$0xff] }
 0xc4a   :  { %v6659_v35 = vsel %vm5619_vm14, %v6545_v10, %v6658_v43  ;;  %7894 = vrcp.f32 %v15246_v59 }
 0xc4b   :  { %v6660_v6 = vsel %vm5621_vm15, %v6546_v38, %v6659_v35  ;;  %v6877_v42 = vmul.f32 %v7426_v48, %v6876_v50  ;;  %v6562_v35 = vperm.slane %v12971_v0, %v11939_v24  ;;  %7896 = vrcp.f32 %v15247_v1 }
 0xc4c   :  { %v6661_v14 = vsel %vm5623_vm0, %v6547_v19, %v6660_v6  ;;  %v6561_v19 = vperm.slane %v13102_v4, %v11939_v24  ;;  %v6565_v4 = vperm.slane %v12984_v54, %v11939_v24  ;;  %v6917_v54 = vand.u32 2147483647, %v15246_v59 }
 0xc4d   :  { %v7006_v9 = vsub.f32 %v15244_v56, %v6877_v42  ;;  %6713 = vadd.xlane.f32.xlu2 %v6712_v12 }
 0xc4f   :  { %v7022_v29 = vmax.f32 %v7006_v9, 0.0  ;;  %v6386_v28 = vpop.permute.xlu2 %6385  ;;  %v6564_v9 = vperm.slane %v13115_v62, %v11939_v24 }
 0xc50   :  { %v6548_v36 = vperm.slane %v6386_v28, %v11939_v24  ;;  %v7895_v6 = vpop.eup %7894 }
 0xc51   :  { %v7038_v20 = vsel %vm6998_vm10, %v7022_v29, 0.0  ;;  %v6909_v12 = vmul.f32 %v7895_v6, %v15246_v59  ;;  %v7897_v61 = vpop.eup %7896 }
 0xc52   :  { %7054 = vst [vmem:[%s13409_s5 + $0x38] sm:$0xff] %v7038_v20  ;;  %v6662_v3 = vsel %vm5625_vm1, %v6548_v36, %v6661_v14  ;;  %v6919_v20 = vand.u32 2147483648, %v15246_v59 }
 0xc53   :  { %v6663_v16 = vsel %vm5627_vm2, %v6549_v17, %v6662_v3  ;;  %v6910_v60 = vsub.f32 1.0, %v6909_v12 }
 0xc54   :  { %v6733_v21 = vsel %vm2428_vm4, %v6663_v16, 0.0  ;;  %v6920_v3 = vor.u32 1.1754944e-38, %v6919_v20  ;;  %v15256_v20 = vld [vmem:[#allocation34_spill] sm:$0xff] }
 0xc55   :  { %6722 = vadd.xlane.f32.xlu2 %v6721_v49  ;;  %6734 = vadd.xlane.f32.xlu0 %v6733_v21  ;;  %v6911_v36 = vmul.f32 %v7895_v6, %v6910_v60 }
 0xc57   :  { %v6395_v63 = vpop.permute.xlu2 %6394  ;;  %v6912_v17 = vadd.f32 %v7895_v6, %v6911_v36 }
 0xc58   :  { %v6551_v23 = vperm.slane %v6395_v63, %v11939_v24 }
 0xc5a   :  { %v6664_v30 = vsel %vm5615_vm12, %v6551_v23, %v6550_v8  ;;  %vm6888_vm12 = vcmp.eq.f32.partialorder %v6887_v27, 8.507059e+37  ;;  %v15248_v8 = vld [vmem:[#allocation79_spill] sm:$0xff]  ;;  %v6934_v27 = vand.u32 2147483648, %v15247_v1 }
 0xc5b   :  { %v6665_v37 = vsel %vm5617_vm13, %v6552_v25, %v6664_v30  ;;  %v6891_v31 = vsel %vm6888_vm12, %v6890_v5, %v6886_v34  ;;  %v6924_v25 = vmul.f32 %v7897_v61, %v15247_v1  ;;  %v6932_v34 = vand.u32 2147483647, %v15247_v1  ;;  %v15250_v5 = vld [vmem:[#allocation37_spill] sm:$0xff] }
 0xc5c   :  { %v6666_v26 = vsel %vm5619_vm14, %v6553_v39, %v6665_v37  ;;  %v15249_v37 = vld [vmem:[#allocation8_spill] sm:$0xff]  ;;  %vm6808_vm7 = vweird.f32 %v15250_v5  ;;  %v6812_v36 = vand.u32 2147483647, %v15250_v5 }
 0xc5d   :  { %6731 = vadd.xlane.f32.xlu2 %v6730_v51  ;;  %v6925_v33 = vsub.f32 1.0, %v6924_v25  ;;  %7898 = vrcp.f32 %v15249_v37  ;;  %vm6933_vm8 = vcmp.eq.f32.partialorder %v6932_v34, 8.507059e+37  ;;  %vm6763_vm11 = vweird.f32 %v15249_v37 }
 0xc5e   :  { %7900 = vrcp.f32 %v15250_v5 }
 0xc5f   :  { %v6720_v44 = vpop.xlane.xlu1 %6719  ;;  %v6404_v13 = vpop.permute.xlu2 %6403  ;;  %v6926_v41 = vmul.f32 %v7897_v61, %v6925_v33 }
 0xc60   :  { %v7427_v46 = vadd.f32 -1.0, %v6720_v44  ;;  %v6554_v18 = vperm.slane %v6404_v13, %v11939_v24 }
 0xc61   :  { %v6927_v51 = vadd.f32 %v7897_v61, %v6926_v41 }
 0xc62   :  { %v6892_v43 = vmul.f32 %v7427_v46, %v6891_v31  ;;  %v6667_v32 = vsel %vm5621_vm15, %v6554_v18, %v6666_v26  ;;  %v6935_v46 = vor.u32 1.1754944e-38, %v6934_v27 }
 0xc63   :  { %v6668_v11 = vsel %vm5623_vm0, %v6555_v2, %v6667_v32  ;;  %v7899_v26 = vpop.eup %7898 }
 0xc64   :  { %v7007_v58 = vsub.f32 %v15245_v47, %v6892_v43  ;;  %v6669_v7 = vsel %vm5625_vm1, %v6556_v57, %v6668_v11  ;;  %v6759_v13 = vmul.f32 %v7899_v26, %v15249_v37  ;;  %v7901_v32 = vpop.eup %7900  ;;  %v15251_v11 = vld [vmem:[#allocation89_spill] sm:$0xff]  ;;  %vm6764_vm9 = vweird.f32 %v7899_v26 }
 0xc65   :  { %vm6765_vm3 = vmor %vm6763_vm11, %vm6764_vm9  ;;  %vm6809_vm6 = vweird.f32 %v7901_v32 }
 0xc66   :  { %v7023_v15 = vmax.f32 %v7007_v58, 0.0  ;;  %v6760_v43 = vsub.f32 1.0, %v6759_v13  ;;  %v15252_v58 = vld [vmem:[#allocation23_spill] sm:$0xff]  ;;  %vm6810_vm12 = vmor %vm6808_vm7, %vm6809_vm6 }
 0xc67   :  { %v6413_v22 = vpop.permute.xlu2 %6412  ;;  %7902 = vrcp.f32 %v15252_v58  ;;  %v6859_v33 = vand.u32 2147483648, %v15252_v58 }
 0xc68   :  { %v7039_v10 = vsel %vm6998_vm10, %v7023_v15, 0.0  ;;  %v6557_v45 = vperm.slane %v6413_v22, %v11939_v24  ;;  %v6804_v15 = vmul.f32 %v7901_v32, %v15250_v5  ;;  %v6761_v22 = vmul.f32 %v7899_v26, %v6760_v43 }
 0xc69   :  { %7055 = vst [vmem:[%s13409_s5 + $0x40] sm:$0xff] %v7039_v10  ;;  %v6860_v13 = vor.u32 1.1754944e-38, %v6859_v33 }
 0xc6a   :  { %v6670_v53 = vsel %vm5627_vm2, %v6557_v45, %v6669_v7  ;;  %v6805_v45 = vsub.f32 1.0, %v6804_v15  ;;  %v15258_v15 = vld [vmem:[#allocation26_spill] sm:$0xff] }
 0xc6b   :  { %v6736_v40 = vsel %vm2428_vm4, %v6670_v53, 0.0  ;;  %v6762_v53 = vadd.f32 %v7899_v26, %v6761_v22  ;;  %v15259_v22 = vld [vmem:[#allocation39_spill] sm:$0xff] }
 0xc6c   :  { %6737 = vadd.xlane.f32.xlu1 %v6736_v40 }
 0xc6d   :  { %v13281_v40 = vpop.eup %7902 }
 0xc6f   :  { %v6422_v38 = vpop.permute.xlu2 %6421 }
 0xc70   :  { %v6560_v48 = vperm.slane %v6422_v38, %v11939_v24  ;;  %v15253_v38 = vld [vmem:[#allocation14_spill] sm:$0xff] }
 0xc71   :  { %7904 = vrcp.f32 %v15253_v38 }
 0xc72   :  { %v6672_v50 = vsel %vm5617_vm13, %v6560_v48, %v13044_v52  ;;  %vm6914_vm13 = vweird.f32 %v7895_v6  ;;  %v6767_v48 = vand.u32 2147483647, %v15249_v37 }
 0xc73   :  { %v6673_v55 = vsel %vm5619_vm14, %v6561_v19, %v6672_v50  ;;  %vm6913_vm14 = vweird.f32 %v15246_v59  ;;  %v6769_v59 = vand.u32 2147483648, %v15249_v37  ;;  %v15254_v19 = vld [vmem:[#allocation31_spill] sm:$0xff]  ;;  %v6766_v50 = vsel %vm6765_vm3, %v7899_v26, %v6762_v53 }
 0xc74   :  { %v6674_v42 = vsel %vm5621_vm15, %v6562_v35, %v6673_v55  ;;  %vm6915_vm15 = vmor %vm6913_vm14, %vm6914_vm13  ;;  %7906 = vrcp.f32 %v15254_v19  ;;  %v6849_v35 = vmul.f32 %v13281_v40, %v15252_v58  ;;  %v6806_v55 = vmul.f32 %v7901_v32, %v6805_v45  ;;  %v15257_v37 = vld [vmem:[#allocation15_spill] sm:$0xff] }
 0xc75   :  { %v6916_v62 = vsel %vm6915_vm15, %v7895_v6, %v6912_v17  ;;  %v6770_v6 = vor.u32 1.1754944e-38, %v6769_v59  ;;  %vm6768_vm5 = vcmp.eq.f32.partialorder %v6767_v48, 8.507059e+37  ;;  %7908 = vrcp.f32 %v15256_v20 }
 0xc76   :  { %vm6813_vm13 = vcmp.eq.f32.partialorder %v6812_v36, 8.507059e+37  ;;  %vm6854_vm14 = vweird.f32 %v13281_v40  ;;  %vm6853_vm15 = vweird.f32 %v15252_v58  ;;  %7910 = vrcp.f32 %v15258_v15 }
 0xc77   :  { %v6431_v14 = vpop.permute.xlu2 %6430  ;;  %vm6958_vm9 = vweird.f32 %v15254_v19  ;;  %v6962_v45 = vand.u32 2147483647, %v15254_v19 }
 0xc78   :  { %v6563_v56 = vperm.slane %v6431_v14, %v11939_v24  ;;  %v6771_v14 = vsel %vm6768_vm5, %v6770_v6, %v6766_v50 }
 0xc79   :  { %vm6963_vm6 = vcmp.eq.f32.partialorder %v6962_v45, 8.507059e+37 }
 0xc7a   :  { %v6675_v0 = vsel %vm5623_vm0, %v6563_v56, %v6674_v42  ;;  %vm6918_vm0 = vcmp.eq.f32.partialorder %v6917_v54, 8.507059e+37  ;;  %v13290_v56 = vpop.eup %7904 }
 0xc7b   :  { %v6676_v52 = vsel %vm5625_vm1, %v6564_v9, %v6675_v0  ;;  %v6921_v21 = vsel %vm6918_vm0, %v6920_v3, %v6916_v62  ;;  %vm6928_vm1 = vweird.f32 %v15247_v1  ;;  %v6850_v9 = vsub.f32 1.0, %v6849_v35  ;;  %v13292_v60 = vpop.eup %7906  ;;  %vm6855_vm0 = vmor %vm6853_vm15, %vm6854_vm14 }
 0xc7c   :  { %v6677_v29 = vsel %vm5627_vm2, %v6565_v4, %v6676_v52  ;;  %v6807_v0 = vadd.f32 %v7901_v32, %v6806_v55  ;;  %v6814_v52 = vand.u32 2147483648, %v15250_v5  ;;  %v6894_v17 = vmul.f32 %v13290_v56, %v15253_v38 }
 0xc7d   :  { %v6739_v28 = vsel %vm2428_vm4, %v6677_v29, 0.0  ;;  %vm6929_vm4 = vweird.f32 %v7897_v61  ;;  %v15255_v29 = vld [vmem:[#allocation2_spill] sm:$0xff]  ;;  %v6954_v1 = vmul.f32 %v13292_v60, %v15254_v19  ;;  %v6851_v3 = vmul.f32 %v13281_v40, %v6850_v9 }
 0xc7e   :  { %6740 = vadd.xlane.f32.xlu2 %v6739_v28  ;;  %vm6930_vm2 = vmor %vm6928_vm1, %vm6929_vm4  ;;  %v6811_v62 = vsel %vm6810_vm12, %v7901_v32, %v6807_v0  ;;  %vm6899_vm1 = vweird.f32 %v13290_v56  ;;  %vm6943_vm12 = vweird.f32 %v15256_v20 }
 0xc7f   :  { %v6931_v44 = vsel %vm6930_vm2, %v7897_v61, %v6927_v51  ;;  %v6857_v51 = vand.u32 2147483647, %v15252_v58  ;;  %vm6959_vm2 = vweird.f32 %v13292_v60  ;;  %v6902_v58 = vand.u32 2147483647, %v15253_v38 }
 0xc80   :  { %v6936_v31 = vsel %vm6933_vm8, %v6935_v46, %v6931_v44  ;;  %vm6898_vm8 = vweird.f32 %v15253_v38  ;;  %vm13343_vm3 = vmor %vm6958_vm9, %vm6959_vm2 }
 0xc81   :  { %vm6858_vm4 = vcmp.eq.f32.partialorder %v6857_v51, 8.507059e+37  ;;  %vm13339_vm11 = vmor %vm6898_vm8, %vm6899_vm1  ;;  %vm6903_vm5 = vcmp.eq.f32.partialorder %v6902_v58, 8.507059e+37 }
 0xc88   :  { %v6726_v16 = vpop.xlane.xlu0 %6725 }
 0xc89   :  { %v7429_v49 = vadd.f32 -1.0, %v6726_v16  ;;  %v6815_v16 = vor.u32 1.1754944e-38, %v6814_v52 }
 0xc8b   :  { %v6922_v63 = vmul.f32 %v7429_v49, %v6921_v21 }
 0xc8d   :  { %v7009_v23 = vsub.f32 %v15248_v8, %v6922_v63  ;;  %v6895_v63 = vsub.f32 1.0, %v6894_v17  ;;  %v6816_v8 = vsel %vm6813_vm13, %v6815_v16, %v6811_v62  ;;  %v15265_v17 = vld [vmem:[#allocation70_spill] sm:$0xff] }
 0xc8f   :  { %v7025_v39 = vmax.f32 %v7009_v23, 0.0  ;;  %v6955_v23 = vsub.f32 1.0, %v6954_v1  ;;  %v6896_v27 = vmul.f32 %v13290_v56, %v6895_v63 }
 0xc91   :  { %v7041_v30 = vsel %vm6998_vm10, %v7025_v39, 0.0  ;;  %v6852_v39 = vadd.f32 %v13281_v40, %v6851_v3  ;;  %v6956_v44 = vmul.f32 %v13292_v60, %v6955_v23 }
 0xc92   :  { %7057 = vst [vmem:[%s13409_s5 + $0x50] sm:$0xff] %v7041_v30  ;;  %v13311_v30 = vpop.eup %7908 }
 0xc93   :  { %v6939_v26 = vmul.f32 %v13311_v30, %v15256_v20  ;;  %v6856_v5 = vsel %vm6855_vm0, %v13281_v40, %v6852_v39  ;;  %vm6944_vm7 = vweird.f32 %v13311_v30  ;;  %vm6973_vm0 = vweird.f32 %v15258_v15 }
 0xc94   :  { %vm6945_vm13 = vmor %vm6943_vm12, %vm6944_vm7 }
 0xc95   :  { %v6940_v43 = vsub.f32 1.0, %v6939_v26 }
 0xc97   :  { %v6941_v35 = vmul.f32 %v13311_v30, %v6940_v43 }
 0xc99   :  { %v6942_v52 = vadd.f32 %v13311_v30, %v6941_v35 }
 0xc9f   :  { %v6729_v18 = vpop.xlane.xlu1 %6728 }
 0xca0   :  { %v7430_v2 = vadd.f32 -1.0, %v6729_v18 }
 0xca2   :  { %v6937_v57 = vmul.f32 %v7430_v2, %v6936_v31  ;;  %v6861_v31 = vsel %vm6858_vm4, %v6860_v13, %v6856_v5  ;;  %v6977_v5 = vand.u32 2147483647, %v15258_v15 }
 0xca4   :  { %v7010_v47 = vsub.f32 %v15251_v11, %v6937_v57  ;;  %v6897_v57 = vadd.f32 %v13290_v56, %v6896_v27  ;;  %v6957_v11 = vadd.f32 %v13292_v60, %v6956_v44  ;;  %vm6978_vm1 = vcmp.eq.f32.partialorder %v6977_v5, 8.507059e+37 }
 0xca6   :  { %v7026_v7 = vmax.f32 %v7010_v47, 0.0  ;;  %v6964_v47 = vand.u32 2147483648, %v15254_v19  ;;  %v6901_v48 = vsel %vm13339_vm11, %v13290_v56, %v6897_v57  ;;  %v7911_v56 = vpop.eup %7910 }
 0xca7   :  { %v6969_v62 = vmul.f32 %v7911_v56, %v15258_v15  ;;  %vm6974_vm15 = vweird.f32 %v7911_v56 }
 0xca8   :  { %v7042_v10 = vsel %vm6998_vm10, %v7026_v7, 0.0  ;;  %v6904_v7 = vand.u32 2147483648, %v15253_v38  ;;  %v6961_v38 = vsel %vm13343_vm3, %v13292_v60, %v6957_v11  ;;  %v6965_v19 = vor.u32 1.1754944e-38, %v6964_v47  ;;  %vm6975_vm4 = vmor %vm6973_vm0, %vm6974_vm15  ;;  %v15268_v11 = vld [vmem:[#allocation11_spill] sm:$0xff] }
 0xca9   :  { %7058 = vst [vmem:[%s13409_s5 + $0x58] sm:$0xff] %v7042_v10 }
 0xcaa   :  { %v6905_v55 = vor.u32 1.1754944e-38, %v6904_v7  ;;  %v6966_v9 = vsel %vm6963_vm6, %v6965_v19, %v6961_v38  ;;  %v15269_v19 = vld [vmem:[#allocation17_spill] sm:$0xff] }
 0xcb0   :  { %v6696_v42 = vpop.xlane.xlu2 %6695 }
 0xcb1   :  { %v7419_v12 = vadd.f32 -1.0, %v6696_v42 }
 0xcb3   :  { %v6772_v4 = vmul.f32 %v7419_v12, %v6771_v14 }
 0xcb5   :  { %v6999_v28 = vsub.f32 %v15255_v29, %v6772_v4  ;;  %v6906_v4 = vsel %vm6903_vm5, %v6905_v55, %v6901_v48  ;;  %v6949_v29 = vand.u32 2147483648, %v15256_v20 }
 0xcb7   :  { %v7015_v54 = vmax.f32 %v6999_v28, 0.0  ;;  %v15264_v28 = vld [vmem:[#allocation7_spill] sm:$0xff] }
 0xcb8   :  { %v6705_v49 = vpop.xlane.xlu2 %6704 }
 0xcb9   :  { %v7031_v21 = vsel %vm6998_vm10, %v7015_v54, 0.0  ;;  %v7422_v61 = vadd.f32 -1.0, %v6705_v49  ;;  %v6947_v54 = vand.u32 2147483647, %v15256_v20  ;;  %v6946_v49 = vsel %vm6945_vm13, %v13311_v30, %v6942_v52  ;;  %v15266_v30 = vld [vmem:[#allocation4_spill] sm:$0xff] }
 0xcba   :  { %7047 = vst [vmem:[%s13409_s5] sm:$0xff] %v7031_v21  ;;  %v6950_v21 = vor.u32 1.1754944e-38, %v6949_v29 }
 0xcbb   :  { %v6817_v25 = vmul.f32 %v7422_v61, %v6816_v8  ;;  %vm6948_vm14 = vcmp.eq.f32.partialorder %v6947_v54, 8.507059e+37 }
 0xcbc   :  { %v6951_v20 = vsel %vm6948_vm14, %v6950_v21, %v6946_v49 }
 0xcbd   :  { %v7002_v41 = vsub.f32 %v15257_v37, %v6817_v25  ;;  %v6970_v25 = vsub.f32 1.0, %v6969_v62 }
 0xcbf   :  { %v7018_v34 = vmax.f32 %v7002_v41, 0.0  ;;  %v6971_v37 = vmul.f32 %v7911_v56, %v6970_v25  ;;  %v15267_v41 = vld [vmem:[#allocation58_spill] sm:$0xff] }
 0xcc0   :  { %v6714_v46 = vpop.xlane.xlu2 %6713  ;;  %7912 = vrcp.f32 %v15267_v41  ;;  %vm6988_vm8 = vweird.f32 %v15267_v41  ;;  %v6992_v45 = vand.u32 2147483647, %v15267_v41 }
 0xcc1   :  { %v7034_v18 = vsel %vm6998_vm10, %v7018_v34, 0.0  ;;  %v7425_v2 = vadd.f32 -1.0, %v6714_v46  ;;  %v6972_v26 = vadd.f32 %v7911_v56, %v6971_v37  ;;  %v6979_v34 = vand.u32 2147483648, %v15258_v15 }
 0xcc2   :  { %7050 = vst [vmem:[%s13409_s5 + $0x18] sm:$0xff] %v7034_v18  ;;  %vm6993_vm11 = vcmp.eq.f32.partialorder %v6992_v45, 8.507059e+37 }
 0xcc3   :  { %v6862_v32 = vmul.f32 %v7425_v2, %v6861_v31  ;;  %v6976_v13 = vsel %vm6975_vm4, %v7911_v56, %v6972_v26  ;;  %v6980_v46 = vor.u32 1.1754944e-38, %v6979_v34 }
 0xcc5   :  { %v7005_v10 = vsub.f32 %v15259_v22, %v6862_v32  ;;  %v6981_v57 = vsel %vm6978_vm1, %v6980_v46, %v6976_v13 }
 0xcc6   :  { %v7913_v44 = vpop.eup %7912 }
 0xcc7   :  { %v7021_v59 = vmax.f32 %v7005_v10, 0.0  ;;  %v6984_v2 = vmul.f32 %v7913_v44, %v15267_v41  ;;  %vm6989_vm2 = vweird.f32 %v7913_v44  ;;  %v6994_v10 = vand.u32 2147483648, %v15267_v41 }
 0xcc8   :  { %v6735_v50 = vpop.xlane.xlu0 %6734  ;;  %v6723_v6 = vpop.xlane.xlu2 %6722  ;;  %vm6990_vm9 = vmor %vm6988_vm8, %vm6989_vm2 }
 0xcc9   :  { %v7037_v42 = vsel %vm6998_vm10, %v7021_v59, 0.0  ;;  %v7432_v12 = vadd.f32 -1.0, %v6735_v50  ;;  %v7428_v14 = vadd.f32 -1.0, %v6723_v6  ;;  %v6985_v32 = vsub.f32 1.0, %v6984_v2 }
 0xcca   :  { %7053 = vst [vmem:[%s13409_s5 + $0x30] sm:$0xff] %v7037_v42  ;;  %v6995_v40 = vor.u32 1.1754944e-38, %v6994_v10 }
 0xccb   :  { %v6967_v0 = vmul.f32 %v7432_v12, %v6966_v9  ;;  %v6907_v60 = vmul.f32 %v7428_v14, %v6906_v4  ;;  %v6986_v7 = vmul.f32 %v7913_v44, %v6985_v32 }
 0xccd   :  { %v7012_v36 = vsub.f32 %v15264_v28, %v6967_v0  ;;  %v7008_v1 = vsub.f32 %v15265_v17, %v6907_v60  ;;  %v6987_v15 = vadd.f32 %v7913_v44, %v6986_v7 }
 0xccf   :  { %v7028_v3 = vmax.f32 %v7012_v36, 0.0  ;;  %v7024_v16 = vmax.f32 %v7008_v1, 0.0  ;;  %v6991_v53 = vsel %vm6990_vm9, %v7913_v44, %v6987_v15 }
 0xcd0   :  { %v6732_v61 = vpop.xlane.xlu2 %6731  ;;  %v6996_v48 = vsel %vm6993_vm11, %v6995_v40, %v6991_v53 }
 0xcd1   :  { %v7044_v63 = vsel %vm6998_vm10, %v7028_v3, 0.0  ;;  %v7040_v8 = vsel %vm6998_vm10, %v7024_v16, 0.0  ;;  %v7431_v23 = vadd.f32 -1.0, %v6732_v61 }
 0xcd2   :  { %7060 = vst [vmem:[%s13409_s5 + $0x68] sm:$0xff] %v7044_v63 }
 0xcd3   :  { %7056 = vst [vmem:[%s13409_s5 + $0x48] sm:$0xff] %v7040_v8  ;;  %v6952_v39 = vmul.f32 %v7431_v23, %v6951_v20 }
 0xcd5   :  { %v7011_v33 = vsub.f32 %v15266_v30, %v6952_v39 }
 0xcd7   :  { %v7027_v51 = vmax.f32 %v7011_v33, 0.0 }
 0xcd9   :  { %v7043_v27 = vsel %vm6998_vm10, %v7027_v51, 0.0 }
 0xcda   :  { %7059 = vst [vmem:[%s13409_s5 + $0x60] sm:$0xff] %v7043_v27 }
 0xcdf   :  { %v6738_v18 = vpop.xlane.xlu1 %6737 }
 0xce0   :  { %v7433_v31 = vadd.f32 -1.0, %v6738_v18 }
 0xce2   :  { %v6982_v43 = vmul.f32 %v7433_v31, %v6981_v57 }
 0xce4   :  { %v7013_v47 = vsub.f32 %v15268_v11, %v6982_v43 }
 0xce6   :  { %v7029_v58 = vmax.f32 %v7013_v47, 0.0 }
 0xce8   :  { %v7045_v22 = vsel %vm6998_vm10, %v7029_v58, 0.0 }
 0xce9   :  { %7061 = vst [vmem:[%s13409_s5 + $0x70] sm:$0xff] %v7045_v22 }
 0xcf1   :  { %v6741_v59 = vpop.xlane.xlu2 %6740 }
 0xcf2   :  { %v7434_v38 = vadd.f32 -1.0, %v6741_v59 }
 0xcf4   :  { %v6997_v35 = vmul.f32 %v7434_v38, %v6996_v48 }
 0xcf6   :  { %v7014_v50 = vsub.f32 %v15269_v19, %v6997_v35 }
 0xcf8   :  { %v7030_v55 = vmax.f32 %v7014_v50, 0.0 }
 0xcfa   :  { %v7046_v6 = vsel %vm6998_vm10, %v7030_v55, 0.0 }
 0xcfb   :  { %7062 = vst [vmem:[%s13409_s5 + $0x78] sm:$0xff] %v7046_v6 }

</bundles_post_ra>
